<compile_context>
chip_gen: v6e
topology: v6e:2x2x1
jax: 0.10.0
libtpu: 0.0.40
codegen_flags: <defaults>
</compile_context>

<pallas_src>
import functools
import math

import jax
import jax.numpy as jnp
from jax import lax
from jax.experimental import pallas as pl
from jax.experimental.pallas import tpu as pltpu

# ----------------------------- configuration -------------------------------
ENT_CLS_NUM = 9          # number of entity types (as in the torch script)
GP_INNER_DIM = 64        # GlobalPointer head size (as in the torch script)
VOCAB = 50
MAX_POS = 16
TYPE_VOCAB = 2
HIDDEN = 32
N_HEADS = 4
HEAD_DIM = HIDDEN // N_HEADS
FFN = 64
NEG_BIG = -1e12          # GlobalPointer mask fill value
PAD_NEG = -1e9           # padding value for CRF tables (exp underflows to 0)


# --------------------------- fused Pallas kernel ----------------------------
def _fused_kernel(x_ref, bias_ref, valid_ref, tags_ref, mask_ref,
                  ln_ref, wqkv_ref, bqkv_ref, wao_ref, bao_ref,
                  wff1_ref, bff1_ref, wff2_ref, bff2_ref,
                  wgp_ref, bgp_ref, cos_ref, sin_ref,
                  trans_ref, exptrans_ref, start_ref, end_ref,
                  out_ref,
                  *, b_tile, seq_len, n_heads, head_dim, ent, gp_dim, t_pad):
    L = seq_len
    H = n_heads * head_dim
    D = gp_dim
    BL = b_tile * L
    T = ent * L
    ED = ent * D
    f32 = jnp.float32

    def mm(a, b):
        return jnp.dot(a, b, preferred_element_type=f32)

    def mm_nt(a, b):   # a @ b.T without materializing the transpose
        return lax.dot_general(a, b, (((1,), (1,)), ((), ())),
                               preferred_element_type=f32)

    def layer_norm(v, g, b, eps=1e-12):
        mu = jnp.mean(v, axis=-1, keepdims=True)
        var = jnp.mean((v - mu) ** 2, axis=-1, keepdims=True)
        return (v - mu) * lax.rsqrt(var + eps) * g + b

    ln = ln_ref[...]                     # (8, H): packed LN gammas / betas
    x0 = x_ref[0]                        # (BL, H)  sequences stacked on sublanes
    bias = bias_ref[0]                   # (BL, BL) block-diag + key-pad additive mask

    # ------------------- encoder (1 BERT-style layer) -------------------
    x = layer_norm(x0, ln[0:1, :], ln[1:2, :])
    qkv = mm(x, wqkv_ref[...]) + bqkv_ref[...]            # (BL, 3H); Q pre-scaled
    wao = wao_ref[...]
    attn = jnp.zeros((BL, H), f32)
    for h in range(n_heads):                              # static unroll (4)
        lo = h * head_dim
        q_h = qkv[:, lo:lo + head_dim]
        k_h = qkv[:, H + lo:H + lo + head_dim]
        v_h = qkv[:, 2 * H + lo:2 * H + lo + head_dim]
        s = mm_nt(q_h, k_h) + bias                        # (BL, BL)
        p = jax.nn.softmax(s, axis=-1)
        attn = attn + mm(mm(p, v_h), wao[lo:lo + head_dim, :])
    attn = attn + bao_ref[...]
    x1 = layer_norm(x + attn, ln[2:3, :], ln[3:4, :])
    ffn = mm(jax.nn.gelu(mm(x1, wff1_ref[...]) + bff1_ref[...]),
             wff2_ref[...]) + bff2_ref[...]
    hidden = layer_norm(x1 + ffn, ln[4:5, :], ln[5:6, :])     # (BL, H)

    # --------------------- GlobalPointer head ---------------------------
    # One matmul produces [q | rot(q) | k | rot(k)] (rotation + D^-0.25 scale
    # folded into the weights host-side).
    proj = mm(hidden, wgp_ref[...]) + bgp_ref[...]        # (BL, 4*ENT*D)
    cos_t = cos_ref[...]                                  # (BL, D)
    sin_t = sin_ref[...]
    blocks = []
    for e in range(ent):                                  # static unroll (9)
        qw = proj[:, e * D:(e + 1) * D]
        qr = proj[:, ED + e * D:ED + (e + 1) * D]
        kw = proj[:, 2 * ED + e * D:2 * ED + (e + 1) * D]
        kr = proj[:, 3 * ED + e * D:3 * ED + (e + 1) * D]
        q_rope = (qw * cos_t + qr * sin_t).reshape(b_tile, L, D)
        k_rope = (kw * cos_t + kr * sin_t).reshape(b_tile, L, D)
        blocks.append(jnp.einsum('bqd,bkd->bqk', q_rope, k_rope,
                                 preferred_element_type=f32))   # (Bt, L, L)
    blocks.append(jnp.zeros((b_tile, L, t_pad - T), f32))        # lane padding
    em_raw = jnp.concatenate(blocks, axis=-1)             # (Bt, L, T_PAD): torch flat view
    em = jnp.where(valid_ref[0] > 0.5, em_raw, NEG_BIG)   # pad rows+cols & tril masked

    # ------------------------------- CRF --------------------------------
    tags = tags_ref[0]                                    # (Bt, L) int32
    m = mask_ref[0]                                       # (Bt, L) f32 (mask[:,0]==1)
    oh = (lax.broadcasted_iota(jnp.int32, (b_tile, L, t_pad), 2)
          == tags[:, :, None]).astype(f32)                # one-hot, 0 on padded tags
    trans = trans_ref[...]                                # (T_PAD, T_PAD)
    exp_trans = exptrans_ref[...]                         # exp(trans - c), pads -> 0
    start = start_ref[...]                                # (1, T_PAD)
    end = end_ref[...]

    # numerator (gold-path score), batched over the tile
    start_term = jnp.sum(start * oh[:, 0, :], axis=-1, keepdims=True)
    emit_term = jnp.sum(jnp.sum(em * oh, axis=-1) * m, axis=-1, keepdims=True)
    rows = mm(oh.reshape(BL, t_pad), trans).reshape(b_tile, L, t_pad)
    trans_term = jnp.sum(jnp.sum(rows[:, :-1, :] * oh[:, 1:, :], axis=-1) * m[:, 1:],
                         axis=-1, keepdims=True)
    m_next = jnp.concatenate([m[:, 1:], jnp.zeros((b_tile, 1), f32)], axis=1)
    last_w = m * (1.0 - m_next)                           # 1 at last valid position
    last_oh = jnp.sum(oh * last_w[:, :, None], axis=1)    # (Bt, T_PAD)
    end_term = jnp.sum(end * last_oh, axis=-1, keepdims=True)
    numer = start_term + emit_term + trans_term + end_term           # (Bt, 1)

    # denominator: scaled forward recursion (log-partition, minus c*(len-1),
    # undone host-side).  Each step: one (Bt,T)x(T,T) MXU matmul + T exp/log.
    alpha = start + em[:, 0, :]                           # (Bt, T_PAD)
    for t in range(1, L):                                 # static unroll (L-1)
        mx = jnp.max(alpha, axis=-1, keepdims=True)
        z = mm(jnp.exp(alpha - mx), exp_trans)
        nxt = jnp.log(jnp.maximum(z, 1e-30)) + mx + em[:, t, :]
        alpha = jnp.where(m[:, t:t + 1] > 0.5, nxt, alpha)
    af = alpha + end
    mxf = jnp.max(af, axis=-1, keepdims=True)
    log_z = jnp.log(jnp.sum(jnp.exp(af - mxf), axis=-1, keepdims=True)) + mxf
    llh = numer - log_z                                   # (Bt, 1), scaled llh

    # lane-dense output tile (host reads lane 0)
    out_ref[0] = jnp.broadcast_to(llh, (b_tile, out_ref.shape[2]))


# ------------------------------- JAX glue -----------------------------------
def init_params(key, seq_len):
    ks = jax.random.split(key, 16)
    nrm = lambda k, s: (0.02 * jax.random.normal(k, s)).astype(jnp.float32)
    uni = lambda k, s: jax.random.uniform(k, s, jnp.float32, -0.1, 0.1)
    num_tags = ENT_CLS_NUM * seq_len   # consequence of the torch `.view(B, L, -1)`
    p = dict(
        word_emb=nrm(ks[0], (VOCAB, HIDDEN)),
        pos_emb=nrm(ks[1], (MAX_POS, HIDDEN)),
        type_emb=nrm(ks[2], (TYPE_VOCAB, HIDDEN)),
        ln_emb_g=jnp.ones((HIDDEN,), jnp.float32),
        ln_emb_b=jnp.zeros((HIDDEN,), jnp.float32),
        w_qkv=nrm(ks[3], (HIDDEN, 3 * HIDDEN)), b_qkv=jnp.zeros((3 * HIDDEN,), jnp.float32),
        w_ao=nrm(ks[4], (HIDDEN, HIDDEN)), b_ao=jnp.zeros((HIDDEN,), jnp.float32),
        ln1_g=jnp.ones((HIDDEN,), jnp.float32), ln1_b=jnp.zeros((HIDDEN,), jnp.float32),
        w_ff1=nrm(ks[5], (HIDDEN, FFN)), b_ff1=jnp.zeros((FFN,), jnp.float32),
        w_ff2=nrm(ks[6], (FFN, HIDDEN)), b_ff2=jnp.zeros((HIDDEN,), jnp.float32),
        ln2_g=jnp.ones((HIDDEN,), jnp.float32), ln2_b=jnp.zeros((HIDDEN,), jnp.float32),
        w_gp=nrm(ks[7], (HIDDEN, ENT_CLS_NUM * GP_INNER_DIM * 2)),
        b_gp=jnp.zeros((ENT_CLS_NUM * GP_INNER_DIM * 2,), jnp.float32),
        crf_start=uni(ks[8], (num_tags,)),
        crf_end=uni(ks[9], (num_tags,)),
        crf_trans=uni(ks[10], (num_tags, num_tags)),
    )
    return p


def gp_model_with_crf_forward(params, input_ids, attention_mask, token_type_ids,
                              labels=None, b_tile=8):
    B, L = input_ids.shape
    D = GP_INNER_DIM
    T = ENT_CLS_NUM * L
    T_PAD = ((T + 127) // 128) * 128
    f32 = jnp.float32

    if labels is None:
        # TODO(synk): crf.decode (Viterbi) inference branch not implemented.
        raise NotImplementedError("decode path not implemented")

    # ----------------- batch tiling: pad B up to G * b_tile -----------------
    G = -(-B // b_tile)
    B_pad = G * b_tile
    pad_n = B_pad - B

    def pad_rows(x, fill):
        if pad_n == 0:
            return x
        return jnp.concatenate(
            [x, jnp.full((pad_n,) + x.shape[1:], fill, x.dtype)], axis=0)

    ids_p = pad_rows(input_ids, 0)
    tt_p = pad_rows(token_type_ids, 0)
    labels_p = pad_rows(labels.astype(jnp.int32), 0)
    if pad_n:
        dummy = jnp.zeros((pad_n, L), attention_mask.dtype).at[:, 0].set(1)
        amask_p = jnp.concatenate([attention_mask, dummy], axis=0)
    else:
        amask_p = attention_mask
    mf = amask_p.astype(f32)                                       # (B_pad, L)

    # embedding gathers stay in plain JAX (no clean Pallas win at this size)
    x_emb = (params["word_emb"][ids_p]
             + params["pos_emb"][:L][None, :, :]
             + params["type_emb"][tt_p]).astype(f32)               # (B_pad, L, H)
    x_emb_t = x_emb.reshape(G, b_tile * L, HIDDEN)

    # attention: block-diag (within-sequence) + key-padding additive bias
    mfg = mf.reshape(G, b_tile, L)
    eye = jnp.eye(b_tile, dtype=f32)
    key_ok = jnp.einsum('bc,gck->gbck', eye, mfg)                  # (G,Bt,Bt,L)
    key_ok = jnp.broadcast_to(key_ok[:, :, None, :, :],
                              (G, b_tile, L, b_tile, L))
    attn_bias = jnp.where(key_ok > 0.5, 0.0, -1e9).astype(f32)
    attn_bias = attn_bias.reshape(G, b_tile * L, b_tile * L)

    # GlobalPointer validity mask already in the (L, ENT*L) emissions layout
    li = jnp.arange(L)
    keep = (li[None, :] >= li[:, None]).astype(f32)                # span end >= start
    valid = mfg[:, :, :, None] * mfg[:, :, None, :] * keep[None, None]   # (G,Bt,L,L)
    valid_em = jnp.concatenate(
        [jnp.tile(valid, (1, 1, 1, ENT_CLS_NUM)),
         jnp.zeros((G, b_tile, L, T_PAD - T), f32)], axis=-1)      # (G,Bt,L,T_PAD)

    tags_t = labels_p.reshape(G, b_tile, L)
    mask_t = mfg

    # ----------------- host-side weight prep (folds / padding) --------------
    att_scale = 1.0 / math.sqrt(HEAD_DIM)
    qcols = jnp.concatenate([jnp.full((HIDDEN,), att_scale, f32),
                             jnp.ones((2 * HIDDEN,), f32)])
    w_qkv_s = params["w_qkv"] * qcols[None, :]
    b_qkv_s = (params["b_qkv"] * qcols).reshape(1, -1)

    ln_pack = jnp.zeros((8, HIDDEN), f32)
    ln_pack = ln_pack.at[0].set(params["ln_emb_g"]).at[1].set(params["ln_emb_b"])
    ln_pack = ln_pack.at[2].set(params["ln1_g"]).at[3].set(params["ln1_b"])
    ln_pack = ln_pack.at[4].set(params["ln2_g"]).at[5].set(params["ln2_b"])

    # GlobalPointer: fold D^-0.25 scale and the interleaved-RoPE pair rotation
    # (x -> x @ rot_m) into extra weight/bias columns: [q | rot(q) | k | rot(k)]
    gscale = D ** -0.25
    w_gp4 = params["w_gp"].reshape(HIDDEN, ENT_CLS_NUM, 2, D) * gscale
    b_gp4 = params["b_gp"].reshape(ENT_CLS_NUM, 2, D) * gscale
    di = jnp.arange(D)
    rot_m = (((di[None, :] == di[:, None] + 1) & (di[:, None] % 2 == 0)).astype(f32)
             - ((di[None, :] == di[:, None] - 1) & (di[:, None] % 2 == 1)).astype(f32))
    ED = ENT_CLS_NUM * D
    wq, wk = w_gp4[:, :, 0, :], w_gp4[:, :, 1, :]
    bq, bk = b_gp4[:, 0, :], b_gp4[:, 1, :]
    rot_w = lambda w: jnp.einsum('hed,df->hef', w, rot_m)
    rot_b = lambda b: jnp.einsum('ed,df->ef', b, rot_m)
    w_gp_all = jnp.concatenate(
        [wq.reshape(HIDDEN, ED), rot_w(wq).reshape(HIDDEN, ED),
         wk.reshape(HIDDEN, ED), rot_w(wk).reshape(HIDDEN, ED)], axis=1)
    b_gp_all = jnp.concatenate(
        [bq.reshape(ED), rot_b(bq).reshape(ED),
         bk.reshape(ED), rot_b(bk).reshape(ED)]).reshape(1, -1)

    pos = jnp.arange(L, dtype=f32)[:, None]
    half = jnp.arange(D // 2, dtype=f32)
    ang = pos * jnp.power(10000.0, -2.0 * half / D)                # (L, D/2)
    cos_t = jnp.tile(jnp.repeat(jnp.cos(ang), 2, axis=-1), (b_tile, 1))   # (Bt*L, D)
    sin_t = jnp.tile(jnp.repeat(jnp.sin(ang), 2, axis=-1), (b_tile, 1))

    # CRF tables, tag dim padded 72 -> 128 (lane-dense); exp(trans - c) for the
    # scaled forward recursion (re-centered with c = max(trans); the missing
    # c*(len-1) is added back after the kernel).
    trans_pad = jnp.full((T_PAD, T_PAD), PAD_NEG, f32).at[:T, :T].set(params["crf_trans"])
    c = jnp.max(params["crf_trans"])
    exp_trans = jnp.exp(trans_pad - c)                   # padded entries underflow to 0
    start_pad = jnp.full((1, T_PAD), PAD_NEG, f32).at[0, :T].set(params["crf_start"])
    end_pad = jnp.full((1, T_PAD), PAD_NEG, f32).at[0, :T].set(params["crf_end"])

    shared_inputs = [
        ln_pack, w_qkv_s, b_qkv_s,
        params["w_ao"], params["b_ao"].reshape(1, -1),
        params["w_ff1"], params["b_ff1"].reshape(1, -1),
        params["w_ff2"], params["b_ff2"].reshape(1, -1),
        w_gp_all, b_gp_all, cos_t, sin_t,
        trans_pad, exp_trans, start_pad, end_pad,
    ]

    def shared_spec(a):
        nd = a.ndim
        return pl.BlockSpec(a.shape, lambda g, _nd=nd: (0,) * _nd)

    in_specs = [
        pl.BlockSpec((1, b_tile * L, HIDDEN), lambda g: (g, 0, 0)),      # x_emb
        pl.BlockSpec((1, b_tile * L, b_tile * L), lambda g: (g, 0, 0)),  # attn bias
        pl.BlockSpec((1, b_tile, L, T_PAD), lambda g: (g, 0, 0, 0)),     # gp valid
        pl.BlockSpec((1, b_tile, L), lambda g: (g, 0, 0)),               # tags
        pl.BlockSpec((1, b_tile, L), lambda g: (g, 0, 0)),               # mask
    ] + [shared_spec(a) for a in shared_inputs]

    kernel = functools.partial(
        _fused_kernel, b_tile=b_tile, seq_len=L, n_heads=N_HEADS,
        head_dim=HEAD_DIM, ent=ENT_CLS_NUM, gp_dim=D, t_pad=T_PAD)

    out = pl.pallas_call(
        kernel,
        out_shape=jax.ShapeDtypeStruct((G, b_tile, 128), f32),
        grid=(G,),
        in_specs=in_specs,
        out_specs=pl.BlockSpec((1, b_tile, 128), lambda g: (g, 0, 0)),
        compiler_params=pltpu.CompilerParams(
            dimension_semantics=("parallel",)),            # v7x megacore sharding
    )(x_emb_t, attn_bias, valid_em, tags_t, mask_t, *shared_inputs)

    # undo the exp(trans - c) centering, drop dummy rows, torchcrf 'mean'
    llh_scaled = out[:, :, 0].reshape(B_pad)[:B]
    lengths = jnp.sum(attention_mask.astype(f32), axis=-1)
    llh = llh_scaled - c * (lengths - 1.0)
    return -jnp.mean(llh)


# --------------------------------- demo -------------------------------------
if __name__ == "__main__":
    B, L = 2, 8
    key = jax.random.PRNGKey(0)
    pkey, k1, k2 = jax.random.split(key, 3)
    params = init_params(pkey, L)

    input_ids = jax.random.randint(k1, (B, L), 0, VOCAB, dtype=jnp.int32)
    lengths = jnp.array([L, 5], dtype=jnp.int32)
    attention_mask = (jnp.arange(L)[None, :] < lengths[:, None]).astype(jnp.int32)
    token_type_ids = jnp.zeros((B, L), dtype=jnp.int32)
    labels = jax.random.randint(k2, (B, L), 0, ENT_CLS_NUM * L, dtype=jnp.int32)

    # torchcrf requires the first timestep to be unmasked for every sequence
    assert bool(jnp.all(attention_mask[:, 0] == 1))

    fwd = jax.jit(gp_model_with_crf_forward)
    loss = fwd(params, input_ids, attention_mask, token_type_ids, labels)
    loss = jax.block_until_ready(loss)
    assert bool(jnp.isfinite(loss)), f"non-finite loss: {loss}"
    print("KERNEL_OK")
</pallas_src>

<mosaic_0001>
module attributes {stable_mosaic.version = 11 : i64} {
  func.func @_fused_kernel(%arg0: i32, %arg1: memref<1x64x32xf32, #tpu.memory_space<vmem>>, %arg2: memref<1x64x64xf32, #tpu.memory_space<vmem>>, %arg3: memref<1x8x8x128xf32, #tpu.memory_space<vmem>>, %arg4: memref<1x8x8xi32, #tpu.memory_space<vmem>>, %arg5: memref<1x8x8xf32, #tpu.memory_space<vmem>>, %arg6: memref<8x32xf32, #tpu.memory_space<vmem>>, %arg7: memref<32x96xf32, #tpu.memory_space<vmem>>, %arg8: memref<1x96xf32, #tpu.memory_space<vmem>>, %arg9: memref<32x32xf32, #tpu.memory_space<vmem>>, %arg10: memref<1x32xf32, #tpu.memory_space<vmem>>, %arg11: memref<32x64xf32, #tpu.memory_space<vmem>>, %arg12: memref<1x64xf32, #tpu.memory_space<vmem>>, %arg13: memref<64x32xf32, #tpu.memory_space<vmem>>, %arg14: memref<1x32xf32, #tpu.memory_space<vmem>>, %arg15: memref<32x2304xf32, #tpu.memory_space<vmem>>, %arg16: memref<1x2304xf32, #tpu.memory_space<vmem>>, %arg17: memref<64x64xf32, #tpu.memory_space<vmem>>, %arg18: memref<64x64xf32, #tpu.memory_space<vmem>>, %arg19: memref<128x128xf32, #tpu.memory_space<vmem>>, %arg20: memref<128x128xf32, #tpu.memory_space<vmem>>, %arg21: memref<1x128xf32, #tpu.memory_space<vmem>>, %arg22: memref<1x128xf32, #tpu.memory_space<vmem>>, %arg23: memref<1x8x128xf32, #tpu.memory_space<vmem>>) attributes {dimension_semantics = [#tpu.dimension_semantics<parallel>], iteration_bounds = array<i64: 1>, scalar_prefetch = 0 : i64, scratch_operands = 0 : i64, tpu.core_type = #tpu.core_type<tc>, window_params = [{transform_indices = @transform_0, window_bounds = array<i64: 1, 64, 32>}, {transform_indices = @transform_1, window_bounds = array<i64: 1, 64, 64>}, {transform_indices = @transform_2, window_bounds = array<i64: 1, 8, 8, 128>}, {transform_indices = @transform_3, window_bounds = array<i64: 1, 8, 8>}, {transform_indices = @transform_4, window_bounds = array<i64: 1, 8, 8>}, {pipeline_mode = #tpu.pipeline_mode<synchronous>, transform_indices = @transform_5, window_bounds = array<i64: 8, 32>}, {pipeline_mode = #tpu.pipeline_mode<synchronous>, transform_indices = @transform_6, window_bounds = array<i64: 32, 96>}, {pipeline_mode = #tpu.pipeline_mode<synchronous>, transform_indices = @transform_7, window_bounds = array<i64: 1, 96>}, {pipeline_mode = #tpu.pipeline_mode<synchronous>, transform_indices = @transform_8, window_bounds = array<i64: 32, 32>}, {pipeline_mode = #tpu.pipeline_mode<synchronous>, transform_indices = @transform_9, window_bounds = array<i64: 1, 32>}, {pipeline_mode = #tpu.pipeline_mode<synchronous>, transform_indices = @transform_10, window_bounds = array<i64: 32, 64>}, {pipeline_mode = #tpu.pipeline_mode<synchronous>, transform_indices = @transform_11, window_bounds = array<i64: 1, 64>}, {pipeline_mode = #tpu.pipeline_mode<synchronous>, transform_indices = @transform_12, window_bounds = array<i64: 64, 32>}, {pipeline_mode = #tpu.pipeline_mode<synchronous>, transform_indices = @transform_13, window_bounds = array<i64: 1, 32>}, {pipeline_mode = #tpu.pipeline_mode<synchronous>, transform_indices = @transform_14, window_bounds = array<i64: 32, 2304>}, {pipeline_mode = #tpu.pipeline_mode<synchronous>, transform_indices = @transform_15, window_bounds = array<i64: 1, 2304>}, {pipeline_mode = #tpu.pipeline_mode<synchronous>, transform_indices = @transform_16, window_bounds = array<i64: 64, 64>}, {pipeline_mode = #tpu.pipeline_mode<synchronous>, transform_indices = @transform_17, window_bounds = array<i64: 64, 64>}, {pipeline_mode = #tpu.pipeline_mode<synchronous>, transform_indices = @transform_18, window_bounds = array<i64: 128, 128>}, {pipeline_mode = #tpu.pipeline_mode<synchronous>, transform_indices = @transform_19, window_bounds = array<i64: 128, 128>}, {pipeline_mode = #tpu.pipeline_mode<synchronous>, transform_indices = @transform_20, window_bounds = array<i64: 1, 128>}, {pipeline_mode = #tpu.pipeline_mode<synchronous>, transform_indices = @transform_21, window_bounds = array<i64: 1, 128>}, {transform_indices = @transform_22, window_bounds = array<i64: 1, 8, 128>}]} {
    %c0 = arith.constant 0 : index
    %c0_0 = arith.constant 0 : index
    %0 = vector.load %arg6[%c0, %c0_0] : memref<8x32xf32, #tpu.memory_space<vmem>>, vector<8x32xf32>
    %c0_1 = arith.constant 0 : index
    %c0_2 = arith.constant 0 : index
    %c0_3 = arith.constant 0 : index
    %1 = vector.load %arg1[%c0_1, %c0_2, %c0_3] : memref<1x64x32xf32, #tpu.memory_space<vmem>>, vector<1x64x32xf32>
    %2 = vector.shape_cast %1 : vector<1x64x32xf32> to vector<64x32xf32>
    %c0_4 = arith.constant 0 : index
    %c0_5 = arith.constant 0 : index
    %c0_6 = arith.constant 0 : index
    %3 = vector.load %arg2[%c0_4, %c0_5, %c0_6] : memref<1x64x64xf32, #tpu.memory_space<vmem>>, vector<1x64x64xf32>
    %4 = vector.shape_cast %3 : vector<1x64x64xf32> to vector<64x64xf32>
    %5 = vector.extract_strided_slice %0 {offsets = [0, 0], sizes = [1, 32], strides = [1, 1]} : vector<8x32xf32> to vector<1x32xf32>
    %6 = vector.extract_strided_slice %0 {offsets = [1, 0], sizes = [1, 32], strides = [1, 1]} : vector<8x32xf32> to vector<1x32xf32>
    %cst = arith.constant dense<0.000000e+00> : vector<64xf32>
    %7 = vector.multi_reduction <add>, %2, %cst [1] : vector<64x32xf32> to vector<64xf32>
    %8 = vector.shape_cast %7 : vector<64xf32> to vector<64x1xf32>
    %cst_7 = arith.constant 3.200000e+01 : f32
    %9 = vector.broadcast %cst_7 : f32 to vector<64x1xf32>
    %10 = arith.divf %8, %9 : vector<64x1xf32>
    %11 = vector.broadcast %10 : vector<64x1xf32> to vector<64x32xf32>
    %12 = arith.subf %2, %11 : vector<64x32xf32>
    %13 = arith.mulf %12, %12 : vector<64x32xf32>
    %cst_8 = arith.constant dense<0.000000e+00> : vector<64xf32>
    %14 = vector.multi_reduction <add>, %13, %cst_8 [1] : vector<64x32xf32> to vector<64xf32>
    %15 = vector.shape_cast %14 : vector<64xf32> to vector<64x1xf32>
    %cst_9 = arith.constant 3.200000e+01 : f32
    %16 = vector.broadcast %cst_9 : f32 to vector<64x1xf32>
    %17 = arith.divf %15, %16 : vector<64x1xf32>
    %18 = vector.broadcast %10 : vector<64x1xf32> to vector<64x32xf32>
    %19 = arith.subf %2, %18 : vector<64x32xf32>
    %cst_10 = arith.constant 9.99999996E-13 : f32
    %20 = vector.broadcast %cst_10 : f32 to vector<64x1xf32>
    %21 = arith.addf %17, %20 : vector<64x1xf32>
    %22 = math.rsqrt %21 : vector<64x1xf32>
    %23 = vector.broadcast %22 : vector<64x1xf32> to vector<64x32xf32>
    %24 = arith.mulf %19, %23 : vector<64x32xf32>
    %25 = vector.broadcast %5 : vector<1x32xf32> to vector<64x32xf32>
    %26 = arith.mulf %24, %25 : vector<64x32xf32>
    %27 = vector.broadcast %6 : vector<1x32xf32> to vector<64x32xf32>
    %28 = arith.addf %26, %27 : vector<64x32xf32>
    %c0_11 = arith.constant 0 : index
    %c0_12 = arith.constant 0 : index
    %29 = vector.load %arg7[%c0_11, %c0_12] : memref<32x96xf32, #tpu.memory_space<vmem>>, vector<32x96xf32>
    %cst_13 = arith.constant dense<0.000000e+00> : vector<64x96xf32>
    %30 = tpu.matmul %28, %29, %cst_13 {dimension_numbers = #tpu.dot_dimension_numbers<[1], [0], [0], [1], [0, 0, 1, 1], [], []>} : vector<64x32xf32>, vector<32x96xf32>, vector<64x96xf32> -> vector<64x96xf32>
    %c0_14 = arith.constant 0 : index
    %c0_15 = arith.constant 0 : index
    %31 = vector.load %arg8[%c0_14, %c0_15] : memref<1x96xf32, #tpu.memory_space<vmem>>, vector<1x96xf32>
    %32 = vector.broadcast %31 : vector<1x96xf32> to vector<64x96xf32>
    %33 = arith.addf %30, %32 : vector<64x96xf32>
    %c0_16 = arith.constant 0 : index
    %c0_17 = arith.constant 0 : index
    %34 = vector.load %arg9[%c0_16, %c0_17] : memref<32x32xf32, #tpu.memory_space<vmem>>, vector<32x32xf32>
    %cst_18 = arith.constant 0.000000e+00 : f32
    %35 = vector.broadcast %cst_18 : f32 to vector<64x32xf32>
    %36 = vector.extract_strided_slice %33 {offsets = [0, 0], sizes = [64, 8], strides = [1, 1]} : vector<64x96xf32> to vector<64x8xf32>
    %37 = vector.extract_strided_slice %33 {offsets = [0, 32], sizes = [64, 8], strides = [1, 1]} : vector<64x96xf32> to vector<64x8xf32>
    %38 = vector.extract_strided_slice %33 {offsets = [0, 64], sizes = [64, 8], strides = [1, 1]} : vector<64x96xf32> to vector<64x8xf32>
    %cst_19 = arith.constant dense<0.000000e+00> : vector<64x64xf32>
    %39 = tpu.matmul %36, %37, %cst_19 {dimension_numbers = #tpu.dot_dimension_numbers<[1], [1], [0], [0], [0, 0, 1, 0], [], []>} : vector<64x8xf32>, vector<64x8xf32>, vector<64x64xf32> -> vector<64x64xf32>
    %40 = arith.addf %39, %4 : vector<64x64xf32>
    %cst_20 = arith.constant dense<0xFF800000> : vector<64xf32>
    %41 = vector.multi_reduction <maximumf>, %40, %cst_20 [1] : vector<64x64xf32> to vector<64xf32>
    %cst_21 = arith.constant 0xFF800000 : f32
    %42 = vector.broadcast %cst_21 : f32 to vector<64xf32>
    %43 = arith.maximumf %42, %41 : vector<64xf32>
    %44 = vector.shape_cast %43 : vector<64xf32> to vector<64x1xf32>
    %45 = vector.broadcast %44 : vector<64x1xf32> to vector<64x64xf32>
    %46 = arith.subf %40, %45 : vector<64x64xf32>
    %47 = math.exp %46 : vector<64x64xf32>
    %cst_22 = arith.constant dense<0.000000e+00> : vector<64xf32>
    %48 = vector.multi_reduction <add>, %47, %cst_22 [1] : vector<64x64xf32> to vector<64xf32>
    %49 = vector.shape_cast %48 : vector<64xf32> to vector<64x1xf32>
    %50 = vector.broadcast %49 : vector<64x1xf32> to vector<64x64xf32>
    %51 = arith.divf %47, %50 : vector<64x64xf32>
    %cst_23 = arith.constant dense<0.000000e+00> : vector<64x8xf32>
    %52 = tpu.matmul %51, %38, %cst_23 {dimension_numbers = #tpu.dot_dimension_numbers<[1], [0], [0], [1], [0, 0, 1, 1], [], []>} : vector<64x64xf32>, vector<64x8xf32>, vector<64x8xf32> -> vector<64x8xf32>
    %53 = vector.extract_strided_slice %34 {offsets = [0, 0], sizes = [8, 32], strides = [1, 1]} : vector<32x32xf32> to vector<8x32xf32>
    %cst_24 = arith.constant dense<0.000000e+00> : vector<64x32xf32>
    %54 = tpu.matmul %52, %53, %cst_24 {dimension_numbers = #tpu.dot_dimension_numbers<[1], [0], [0], [1], [0, 0, 1, 1], [], []>} : vector<64x8xf32>, vector<8x32xf32>, vector<64x32xf32> -> vector<64x32xf32>
    %55 = arith.addf %35, %54 : vector<64x32xf32>
    %56 = vector.extract_strided_slice %33 {offsets = [0, 8], sizes = [64, 8], strides = [1, 1]} : vector<64x96xf32> to vector<64x8xf32>
    %57 = vector.extract_strided_slice %33 {offsets = [0, 40], sizes = [64, 8], strides = [1, 1]} : vector<64x96xf32> to vector<64x8xf32>
    %58 = vector.extract_strided_slice %33 {offsets = [0, 72], sizes = [64, 8], strides = [1, 1]} : vector<64x96xf32> to vector<64x8xf32>
    %cst_25 = arith.constant dense<0.000000e+00> : vector<64x64xf32>
    %59 = tpu.matmul %56, %57, %cst_25 {dimension_numbers = #tpu.dot_dimension_numbers<[1], [1], [0], [0], [0, 0, 1, 0], [], []>} : vector<64x8xf32>, vector<64x8xf32>, vector<64x64xf32> -> vector<64x64xf32>
    %60 = arith.addf %59, %4 : vector<64x64xf32>
    %cst_26 = arith.constant dense<0xFF800000> : vector<64xf32>
    %61 = vector.multi_reduction <maximumf>, %60, %cst_26 [1] : vector<64x64xf32> to vector<64xf32>
    %cst_27 = arith.constant 0xFF800000 : f32
    %62 = vector.broadcast %cst_27 : f32 to vector<64xf32>
    %63 = arith.maximumf %62, %61 : vector<64xf32>
    %64 = vector.shape_cast %63 : vector<64xf32> to vector<64x1xf32>
    %65 = vector.broadcast %64 : vector<64x1xf32> to vector<64x64xf32>
    %66 = arith.subf %60, %65 : vector<64x64xf32>
    %67 = math.exp %66 : vector<64x64xf32>
    %cst_28 = arith.constant dense<0.000000e+00> : vector<64xf32>
    %68 = vector.multi_reduction <add>, %67, %cst_28 [1] : vector<64x64xf32> to vector<64xf32>
    %69 = vector.shape_cast %68 : vector<64xf32> to vector<64x1xf32>
    %70 = vector.broadcast %69 : vector<64x1xf32> to vector<64x64xf32>
    %71 = arith.divf %67, %70 : vector<64x64xf32>
    %cst_29 = arith.constant dense<0.000000e+00> : vector<64x8xf32>
    %72 = tpu.matmul %71, %58, %cst_29 {dimension_numbers = #tpu.dot_dimension_numbers<[1], [0], [0], [1], [0, 0, 1, 1], [], []>} : vector<64x64xf32>, vector<64x8xf32>, vector<64x8xf32> -> vector<64x8xf32>
    %73 = vector.extract_strided_slice %34 {offsets = [8, 0], sizes = [8, 32], strides = [1, 1]} : vector<32x32xf32> to vector<8x32xf32>
    %cst_30 = arith.constant dense<0.000000e+00> : vector<64x32xf32>
    %74 = tpu.matmul %72, %73, %cst_30 {dimension_numbers = #tpu.dot_dimension_numbers<[1], [0], [0], [1], [0, 0, 1, 1], [], []>} : vector<64x8xf32>, vector<8x32xf32>, vector<64x32xf32> -> vector<64x32xf32>
    %75 = arith.addf %55, %74 : vector<64x32xf32>
    %76 = vector.extract_strided_slice %33 {offsets = [0, 16], sizes = [64, 8], strides = [1, 1]} : vector<64x96xf32> to vector<64x8xf32>
    %77 = vector.extract_strided_slice %33 {offsets = [0, 48], sizes = [64, 8], strides = [1, 1]} : vector<64x96xf32> to vector<64x8xf32>
    %78 = vector.extract_strided_slice %33 {offsets = [0, 80], sizes = [64, 8], strides = [1, 1]} : vector<64x96xf32> to vector<64x8xf32>
    %cst_31 = arith.constant dense<0.000000e+00> : vector<64x64xf32>
    %79 = tpu.matmul %76, %77, %cst_31 {dimension_numbers = #tpu.dot_dimension_numbers<[1], [1], [0], [0], [0, 0, 1, 0], [], []>} : vector<64x8xf32>, vector<64x8xf32>, vector<64x64xf32> -> vector<64x64xf32>
    %80 = arith.addf %79, %4 : vector<64x64xf32>
    %cst_32 = arith.constant dense<0xFF800000> : vector<64xf32>
    %81 = vector.multi_reduction <maximumf>, %80, %cst_32 [1] : vector<64x64xf32> to vector<64xf32>
    %cst_33 = arith.constant 0xFF800000 : f32
    %82 = vector.broadcast %cst_33 : f32 to vector<64xf32>
    %83 = arith.maximumf %82, %81 : vector<64xf32>
    %84 = vector.shape_cast %83 : vector<64xf32> to vector<64x1xf32>
    %85 = vector.broadcast %84 : vector<64x1xf32> to vector<64x64xf32>
    %86 = arith.subf %80, %85 : vector<64x64xf32>
    %87 = math.exp %86 : vector<64x64xf32>
    %cst_34 = arith.constant dense<0.000000e+00> : vector<64xf32>
    %88 = vector.multi_reduction <add>, %87, %cst_34 [1] : vector<64x64xf32> to vector<64xf32>
    %89 = vector.shape_cast %88 : vector<64xf32> to vector<64x1xf32>
    %90 = vector.broadcast %89 : vector<64x1xf32> to vector<64x64xf32>
    %91 = arith.divf %87, %90 : vector<64x64xf32>
    %cst_35 = arith.constant dense<0.000000e+00> : vector<64x8xf32>
    %92 = tpu.matmul %91, %78, %cst_35 {dimension_numbers = #tpu.dot_dimension_numbers<[1], [0], [0], [1], [0, 0, 1, 1], [], []>} : vector<64x64xf32>, vector<64x8xf32>, vector<64x8xf32> -> vector<64x8xf32>
    %93 = vector.extract_strided_slice %34 {offsets = [16, 0], sizes = [8, 32], strides = [1, 1]} : vector<32x32xf32> to vector<8x32xf32>
    %cst_36 = arith.constant dense<0.000000e+00> : vector<64x32xf32>
    %94 = tpu.matmul %92, %93, %cst_36 {dimension_numbers = #tpu.dot_dimension_numbers<[1], [0], [0], [1], [0, 0, 1, 1], [], []>} : vector<64x8xf32>, vector<8x32xf32>, vector<64x32xf32> -> vector<64x32xf32>
    %95 = arith.addf %75, %94 : vector<64x32xf32>
    %96 = vector.extract_strided_slice %33 {offsets = [0, 24], sizes = [64, 8], strides = [1, 1]} : vector<64x96xf32> to vector<64x8xf32>
    %97 = vector.extract_strided_slice %33 {offsets = [0, 56], sizes = [64, 8], strides = [1, 1]} : vector<64x96xf32> to vector<64x8xf32>
    %98 = vector.extract_strided_slice %33 {offsets = [0, 88], sizes = [64, 8], strides = [1, 1]} : vector<64x96xf32> to vector<64x8xf32>
    %cst_37 = arith.constant dense<0.000000e+00> : vector<64x64xf32>
    %99 = tpu.matmul %96, %97, %cst_37 {dimension_numbers = #tpu.dot_dimension_numbers<[1], [1], [0], [0], [0, 0, 1, 0], [], []>} : vector<64x8xf32>, vector<64x8xf32>, vector<64x64xf32> -> vector<64x64xf32>
    %100 = arith.addf %99, %4 : vector<64x64xf32>
    %cst_38 = arith.constant dense<0xFF800000> : vector<64xf32>
    %101 = vector.multi_reduction <maximumf>, %100, %cst_38 [1] : vector<64x64xf32> to vector<64xf32>
    %cst_39 = arith.constant 0xFF800000 : f32
    %102 = vector.broadcast %cst_39 : f32 to vector<64xf32>
    %103 = arith.maximumf %102, %101 : vector<64xf32>
    %104 = vector.shape_cast %103 : vector<64xf32> to vector<64x1xf32>
    %105 = vector.broadcast %104 : vector<64x1xf32> to vector<64x64xf32>
    %106 = arith.subf %100, %105 : vector<64x64xf32>
    %107 = math.exp %106 : vector<64x64xf32>
    %cst_40 = arith.constant dense<0.000000e+00> : vector<64xf32>
    %108 = vector.multi_reduction <add>, %107, %cst_40 [1] : vector<64x64xf32> to vector<64xf32>
    %109 = vector.shape_cast %108 : vector<64xf32> to vector<64x1xf32>
    %110 = vector.broadcast %109 : vector<64x1xf32> to vector<64x64xf32>
    %111 = arith.divf %107, %110 : vector<64x64xf32>
    %cst_41 = arith.constant dense<0.000000e+00> : vector<64x8xf32>
    %112 = tpu.matmul %111, %98, %cst_41 {dimension_numbers = #tpu.dot_dimension_numbers<[1], [0], [0], [1], [0, 0, 1, 1], [], []>} : vector<64x64xf32>, vector<64x8xf32>, vector<64x8xf32> -> vector<64x8xf32>
    %113 = vector.extract_strided_slice %34 {offsets = [24, 0], sizes = [8, 32], strides = [1, 1]} : vector<32x32xf32> to vector<8x32xf32>
    %cst_42 = arith.constant dense<0.000000e+00> : vector<64x32xf32>
    %114 = tpu.matmul %112, %113, %cst_42 {dimension_numbers = #tpu.dot_dimension_numbers<[1], [0], [0], [1], [0, 0, 1, 1], [], []>} : vector<64x8xf32>, vector<8x32xf32>, vector<64x32xf32> -> vector<64x32xf32>
    %115 = arith.addf %95, %114 : vector<64x32xf32>
    %c0_43 = arith.constant 0 : index
    %c0_44 = arith.constant 0 : index
    %116 = vector.load %arg10[%c0_43, %c0_44] : memref<1x32xf32, #tpu.memory_space<vmem>>, vector<1x32xf32>
    %117 = vector.broadcast %116 : vector<1x32xf32> to vector<64x32xf32>
    %118 = arith.addf %115, %117 : vector<64x32xf32>
    %119 = arith.addf %28, %118 : vector<64x32xf32>
    %120 = vector.extract_strided_slice %0 {offsets = [2, 0], sizes = [1, 32], strides = [1, 1]} : vector<8x32xf32> to vector<1x32xf32>
    %121 = vector.extract_strided_slice %0 {offsets = [3, 0], sizes = [1, 32], strides = [1, 1]} : vector<8x32xf32> to vector<1x32xf32>
    %cst_45 = arith.constant dense<0.000000e+00> : vector<64xf32>
    %122 = vector.multi_reduction <add>, %119, %cst_45 [1] : vector<64x32xf32> to vector<64xf32>
    %123 = vector.shape_cast %122 : vector<64xf32> to vector<64x1xf32>
    %cst_46 = arith.constant 3.200000e+01 : f32
    %124 = vector.broadcast %cst_46 : f32 to vector<64x1xf32>
    %125 = arith.divf %123, %124 : vector<64x1xf32>
    %126 = vector.broadcast %125 : vector<64x1xf32> to vector<64x32xf32>
    %127 = arith.subf %119, %126 : vector<64x32xf32>
    %128 = arith.mulf %127, %127 : vector<64x32xf32>
    %cst_47 = arith.constant dense<0.000000e+00> : vector<64xf32>
    %129 = vector.multi_reduction <add>, %128, %cst_47 [1] : vector<64x32xf32> to vector<64xf32>
    %130 = vector.shape_cast %129 : vector<64xf32> to vector<64x1xf32>
    %cst_48 = arith.constant 3.200000e+01 : f32
    %131 = vector.broadcast %cst_48 : f32 to vector<64x1xf32>
    %132 = arith.divf %130, %131 : vector<64x1xf32>
    %133 = vector.broadcast %125 : vector<64x1xf32> to vector<64x32xf32>
    %134 = arith.subf %119, %133 : vector<64x32xf32>
    %cst_49 = arith.constant 9.99999996E-13 : f32
    %135 = vector.broadcast %cst_49 : f32 to vector<64x1xf32>
    %136 = arith.addf %132, %135 : vector<64x1xf32>
    %137 = math.rsqrt %136 : vector<64x1xf32>
    %138 = vector.broadcast %137 : vector<64x1xf32> to vector<64x32xf32>
    %139 = arith.mulf %134, %138 : vector<64x32xf32>
    %140 = vector.broadcast %120 : vector<1x32xf32> to vector<64x32xf32>
    %141 = arith.mulf %139, %140 : vector<64x32xf32>
    %142 = vector.broadcast %121 : vector<1x32xf32> to vector<64x32xf32>
    %143 = arith.addf %141, %142 : vector<64x32xf32>
    %c0_50 = arith.constant 0 : index
    %c0_51 = arith.constant 0 : index
    %144 = vector.load %arg11[%c0_50, %c0_51] : memref<32x64xf32, #tpu.memory_space<vmem>>, vector<32x64xf32>
    %cst_52 = arith.constant dense<0.000000e+00> : vector<64x64xf32>
    %145 = tpu.matmul %143, %144, %cst_52 {dimension_numbers = #tpu.dot_dimension_numbers<[1], [0], [0], [1], [0, 0, 1, 1], [], []>} : vector<64x32xf32>, vector<32x64xf32>, vector<64x64xf32> -> vector<64x64xf32>
    %c0_53 = arith.constant 0 : index
    %c0_54 = arith.constant 0 : index
    %146 = vector.load %arg12[%c0_53, %c0_54] : memref<1x64xf32, #tpu.memory_space<vmem>>, vector<1x64xf32>
    %147 = vector.broadcast %146 : vector<1x64xf32> to vector<64x64xf32>
    %148 = arith.addf %145, %147 : vector<64x64xf32>
    %149 = arith.mulf %148, %148 : vector<64x64xf32>
    %150 = arith.mulf %148, %149 : vector<64x64xf32>
    %cst_55 = arith.constant 4.471500e-02 : f32
    %151 = vector.broadcast %cst_55 : f32 to vector<64x64xf32>
    %152 = arith.mulf %151, %150 : vector<64x64xf32>
    %153 = arith.addf %148, %152 : vector<64x64xf32>
    %cst_56 = arith.constant 0.797884583 : f32
    %154 = vector.broadcast %cst_56 : f32 to vector<64x64xf32>
    %155 = arith.mulf %154, %153 : vector<64x64xf32>
    %156 = math.tanh %155 : vector<64x64xf32>
    %cst_57 = arith.constant 1.000000e+00 : f32
    %157 = vector.broadcast %cst_57 : f32 to vector<64x64xf32>
    %158 = arith.addf %157, %156 : vector<64x64xf32>
    %cst_58 = arith.constant 5.000000e-01 : f32
    %159 = vector.broadcast %cst_58 : f32 to vector<64x64xf32>
    %160 = arith.mulf %159, %158 : vector<64x64xf32>
    %161 = arith.mulf %148, %160 : vector<64x64xf32>
    %c0_59 = arith.constant 0 : index
    %c0_60 = arith.constant 0 : index
    %162 = vector.load %arg13[%c0_59, %c0_60] : memref<64x32xf32, #tpu.memory_space<vmem>>, vector<64x32xf32>
    %cst_61 = arith.constant dense<0.000000e+00> : vector<64x32xf32>
    %163 = tpu.matmul %161, %162, %cst_61 {dimension_numbers = #tpu.dot_dimension_numbers<[1], [0], [0], [1], [0, 0, 1, 1], [], []>} : vector<64x64xf32>, vector<64x32xf32>, vector<64x32xf32> -> vector<64x32xf32>
    %c0_62 = arith.constant 0 : index
    %c0_63 = arith.constant 0 : index
    %164 = vector.load %arg14[%c0_62, %c0_63] : memref<1x32xf32, #tpu.memory_space<vmem>>, vector<1x32xf32>
    %165 = vector.broadcast %164 : vector<1x32xf32> to vector<64x32xf32>
    %166 = arith.addf %163, %165 : vector<64x32xf32>
    %167 = arith.addf %143, %166 : vector<64x32xf32>
    %168 = vector.extract_strided_slice %0 {offsets = [4, 0], sizes = [1, 32], strides = [1, 1]} : vector<8x32xf32> to vector<1x32xf32>
    %169 = vector.extract_strided_slice %0 {offsets = [5, 0], sizes = [1, 32], strides = [1, 1]} : vector<8x32xf32> to vector<1x32xf32>
    %cst_64 = arith.constant dense<0.000000e+00> : vector<64xf32>
    %170 = vector.multi_reduction <add>, %167, %cst_64 [1] : vector<64x32xf32> to vector<64xf32>
    %171 = vector.shape_cast %170 : vector<64xf32> to vector<64x1xf32>
    %cst_65 = arith.constant 3.200000e+01 : f32
    %172 = vector.broadcast %cst_65 : f32 to vector<64x1xf32>
    %173 = arith.divf %171, %172 : vector<64x1xf32>
    %174 = vector.broadcast %173 : vector<64x1xf32> to vector<64x32xf32>
    %175 = arith.subf %167, %174 : vector<64x32xf32>
    %176 = arith.mulf %175, %175 : vector<64x32xf32>
    %cst_66 = arith.constant dense<0.000000e+00> : vector<64xf32>
    %177 = vector.multi_reduction <add>, %176, %cst_66 [1] : vector<64x32xf32> to vector<64xf32>
    %178 = vector.shape_cast %177 : vector<64xf32> to vector<64x1xf32>
    %cst_67 = arith.constant 3.200000e+01 : f32
    %179 = vector.broadcast %cst_67 : f32 to vector<64x1xf32>
    %180 = arith.divf %178, %179 : vector<64x1xf32>
    %181 = vector.broadcast %173 : vector<64x1xf32> to vector<64x32xf32>
    %182 = arith.subf %167, %181 : vector<64x32xf32>
    %cst_68 = arith.constant 9.99999996E-13 : f32
    %183 = vector.broadcast %cst_68 : f32 to vector<64x1xf32>
    %184 = arith.addf %180, %183 : vector<64x1xf32>
    %185 = math.rsqrt %184 : vector<64x1xf32>
    %186 = vector.broadcast %185 : vector<64x1xf32> to vector<64x32xf32>
    %187 = arith.mulf %182, %186 : vector<64x32xf32>
    %188 = vector.broadcast %168 : vector<1x32xf32> to vector<64x32xf32>
    %189 = arith.mulf %187, %188 : vector<64x32xf32>
    %190 = vector.broadcast %169 : vector<1x32xf32> to vector<64x32xf32>
    %191 = arith.addf %189, %190 : vector<64x32xf32>
    %c0_69 = arith.constant 0 : index
    %c0_70 = arith.constant 0 : index
    %192 = vector.load %arg15[%c0_69, %c0_70] : memref<32x2304xf32, #tpu.memory_space<vmem>>, vector<32x2304xf32>
    %cst_71 = arith.constant dense<0.000000e+00> : vector<64x2304xf32>
    %193 = tpu.matmul %191, %192, %cst_71 {dimension_numbers = #tpu.dot_dimension_numbers<[1], [0], [0], [1], [0, 0, 1, 1], [], []>} : vector<64x32xf32>, vector<32x2304xf32>, vector<64x2304xf32> -> vector<64x2304xf32>
    %c0_72 = arith.constant 0 : index
    %c0_73 = arith.constant 0 : index
    %194 = vector.load %arg16[%c0_72, %c0_73] : memref<1x2304xf32, #tpu.memory_space<vmem>>, vector<1x2304xf32>
    %195 = vector.broadcast %194 : vector<1x2304xf32> to vector<64x2304xf32>
    %196 = arith.addf %193, %195 : vector<64x2304xf32>
    %c0_74 = arith.constant 0 : index
    %c0_75 = arith.constant 0 : index
    %197 = vector.load %arg17[%c0_74, %c0_75] : memref<64x64xf32, #tpu.memory_space<vmem>>, vector<64x64xf32>
    %c0_76 = arith.constant 0 : index
    %c0_77 = arith.constant 0 : index
    %198 = vector.load %arg18[%c0_76, %c0_77] : memref<64x64xf32, #tpu.memory_space<vmem>>, vector<64x64xf32>
    %199 = vector.extract_strided_slice %196 {offsets = [0, 0], sizes = [64, 64], strides = [1, 1]} : vector<64x2304xf32> to vector<64x64xf32>
    %200 = vector.extract_strided_slice %196 {offsets = [0, 576], sizes = [64, 64], strides = [1, 1]} : vector<64x2304xf32> to vector<64x64xf32>
    %201 = vector.extract_strided_slice %196 {offsets = [0, 1152], sizes = [64, 64], strides = [1, 1]} : vector<64x2304xf32> to vector<64x64xf32>
    %202 = vector.extract_strided_slice %196 {offsets = [0, 1728], sizes = [64, 64], strides = [1, 1]} : vector<64x2304xf32> to vector<64x64xf32>
    %203 = arith.mulf %199, %197 : vector<64x64xf32>
    %204 = arith.mulf %200, %198 : vector<64x64xf32>
    %205 = arith.addf %203, %204 : vector<64x64xf32>
    %206 = vector.shape_cast %205 : vector<64x64xf32> to vector<8x8x64xf32>
    %207 = arith.mulf %201, %197 : vector<64x64xf32>
    %208 = arith.mulf %202, %198 : vector<64x64xf32>
    %209 = arith.addf %207, %208 : vector<64x64xf32>
    %210 = vector.shape_cast %209 : vector<64x64xf32> to vector<8x8x64xf32>
    "tpu.trace_start"() <{level = 10 : i32, message = "bqd,bkd->bqk"}> : () -> ()
    %cst_78 = arith.constant dense<0.000000e+00> : vector<8x8x8xf32>
    %211 = tpu.matmul %206, %210, %cst_78 {dimension_numbers = #tpu.dot_dimension_numbers<[2], [2], [1], [1], [0, 0, 0, 1, 1, 1], [0], [0]>} : vector<8x8x64xf32>, vector<8x8x64xf32>, vector<8x8x8xf32> -> vector<8x8x8xf32>
    "tpu.trace_stop"() : () -> ()
    %212 = vector.extract_strided_slice %196 {offsets = [0, 64], sizes = [64, 64], strides = [1, 1]} : vector<64x2304xf32> to vector<64x64xf32>
    %213 = vector.extract_strided_slice %196 {offsets = [0, 640], sizes = [64, 64], strides = [1, 1]} : vector<64x2304xf32> to vector<64x64xf32>
    %214 = vector.extract_strided_slice %196 {offsets = [0, 1216], sizes = [64, 64], strides = [1, 1]} : vector<64x2304xf32> to vector<64x64xf32>
    %215 = vector.extract_strided_slice %196 {offsets = [0, 1792], sizes = [64, 64], strides = [1, 1]} : vector<64x2304xf32> to vector<64x64xf32>
    %216 = arith.mulf %212, %197 : vector<64x64xf32>
    %217 = arith.mulf %213, %198 : vector<64x64xf32>
    %218 = arith.addf %216, %217 : vector<64x64xf32>
    %219 = vector.shape_cast %218 : vector<64x64xf32> to vector<8x8x64xf32>
    %220 = arith.mulf %214, %197 : vector<64x64xf32>
    %221 = arith.mulf %215, %198 : vector<64x64xf32>
    %222 = arith.addf %220, %221 : vector<64x64xf32>
    %223 = vector.shape_cast %222 : vector<64x64xf32> to vector<8x8x64xf32>
    "tpu.trace_start"() <{level = 10 : i32, message = "bqd,bkd->bqk"}> : () -> ()
    %cst_79 = arith.constant dense<0.000000e+00> : vector<8x8x8xf32>
    %224 = tpu.matmul %219, %223, %cst_79 {dimension_numbers = #tpu.dot_dimension_numbers<[2], [2], [1], [1], [0, 0, 0, 1, 1, 1], [0], [0]>} : vector<8x8x64xf32>, vector<8x8x64xf32>, vector<8x8x8xf32> -> vector<8x8x8xf32>
    "tpu.trace_stop"() : () -> ()
    %225 = vector.extract_strided_slice %196 {offsets = [0, 128], sizes = [64, 64], strides = [1, 1]} : vector<64x2304xf32> to vector<64x64xf32>
    %226 = vector.extract_strided_slice %196 {offsets = [0, 704], sizes = [64, 64], strides = [1, 1]} : vector<64x2304xf32> to vector<64x64xf32>
    %227 = vector.extract_strided_slice %196 {offsets = [0, 1280], sizes = [64, 64], strides = [1, 1]} : vector<64x2304xf32> to vector<64x64xf32>
    %228 = vector.extract_strided_slice %196 {offsets = [0, 1856], sizes = [64, 64], strides = [1, 1]} : vector<64x2304xf32> to vector<64x64xf32>
    %229 = arith.mulf %225, %197 : vector<64x64xf32>
    %230 = arith.mulf %226, %198 : vector<64x64xf32>
    %231 = arith.addf %229, %230 : vector<64x64xf32>
    %232 = vector.shape_cast %231 : vector<64x64xf32> to vector<8x8x64xf32>
    %233 = arith.mulf %227, %197 : vector<64x64xf32>
    %234 = arith.mulf %228, %198 : vector<64x64xf32>
    %235 = arith.addf %233, %234 : vector<64x64xf32>
    %236 = vector.shape_cast %235 : vector<64x64xf32> to vector<8x8x64xf32>
    "tpu.trace_start"() <{level = 10 : i32, message = "bqd,bkd->bqk"}> : () -> ()
    %cst_80 = arith.constant dense<0.000000e+00> : vector<8x8x8xf32>
    %237 = tpu.matmul %232, %236, %cst_80 {dimension_numbers = #tpu.dot_dimension_numbers<[2], [2], [1], [1], [0, 0, 0, 1, 1, 1], [0], [0]>} : vector<8x8x64xf32>, vector<8x8x64xf32>, vector<8x8x8xf32> -> vector<8x8x8xf32>
    "tpu.trace_stop"() : () -> ()
    %238 = vector.extract_strided_slice %196 {offsets = [0, 192], sizes = [64, 64], strides = [1, 1]} : vector<64x2304xf32> to vector<64x64xf32>
    %239 = vector.extract_strided_slice %196 {offsets = [0, 768], sizes = [64, 64], strides = [1, 1]} : vector<64x2304xf32> to vector<64x64xf32>
    %240 = vector.extract_strided_slice %196 {offsets = [0, 1344], sizes = [64, 64], strides = [1, 1]} : vector<64x2304xf32> to vector<64x64xf32>
    %241 = vector.extract_strided_slice %196 {offsets = [0, 1920], sizes = [64, 64], strides = [1, 1]} : vector<64x2304xf32> to vector<64x64xf32>
    %242 = arith.mulf %238, %197 : vector<64x64xf32>
    %243 = arith.mulf %239, %198 : vector<64x64xf32>
    %244 = arith.addf %242, %243 : vector<64x64xf32>
    %245 = vector.shape_cast %244 : vector<64x64xf32> to vector<8x8x64xf32>
    %246 = arith.mulf %240, %197 : vector<64x64xf32>
    %247 = arith.mulf %241, %198 : vector<64x64xf32>
    %248 = arith.addf %246, %247 : vector<64x64xf32>
    %249 = vector.shape_cast %248 : vector<64x64xf32> to vector<8x8x64xf32>
    "tpu.trace_start"() <{level = 10 : i32, message = "bqd,bkd->bqk"}> : () -> ()
    %cst_81 = arith.constant dense<0.000000e+00> : vector<8x8x8xf32>
    %250 = tpu.matmul %245, %249, %cst_81 {dimension_numbers = #tpu.dot_dimension_numbers<[2], [2], [1], [1], [0, 0, 0, 1, 1, 1], [0], [0]>} : vector<8x8x64xf32>, vector<8x8x64xf32>, vector<8x8x8xf32> -> vector<8x8x8xf32>
    "tpu.trace_stop"() : () -> ()
    %251 = vector.extract_strided_slice %196 {offsets = [0, 256], sizes = [64, 64], strides = [1, 1]} : vector<64x2304xf32> to vector<64x64xf32>
    %252 = vector.extract_strided_slice %196 {offsets = [0, 832], sizes = [64, 64], strides = [1, 1]} : vector<64x2304xf32> to vector<64x64xf32>
    %253 = vector.extract_strided_slice %196 {offsets = [0, 1408], sizes = [64, 64], strides = [1, 1]} : vector<64x2304xf32> to vector<64x64xf32>
    %254 = vector.extract_strided_slice %196 {offsets = [0, 1984], sizes = [64, 64], strides = [1, 1]} : vector<64x2304xf32> to vector<64x64xf32>
    %255 = arith.mulf %251, %197 : vector<64x64xf32>
    %256 = arith.mulf %252, %198 : vector<64x64xf32>
    %257 = arith.addf %255, %256 : vector<64x64xf32>
    %258 = vector.shape_cast %257 : vector<64x64xf32> to vector<8x8x64xf32>
    %259 = arith.mulf %253, %197 : vector<64x64xf32>
    %260 = arith.mulf %254, %198 : vector<64x64xf32>
    %261 = arith.addf %259, %260 : vector<64x64xf32>
    %262 = vector.shape_cast %261 : vector<64x64xf32> to vector<8x8x64xf32>
    "tpu.trace_start"() <{level = 10 : i32, message = "bqd,bkd->bqk"}> : () -> ()
    %cst_82 = arith.constant dense<0.000000e+00> : vector<8x8x8xf32>
    %263 = tpu.matmul %258, %262, %cst_82 {dimension_numbers = #tpu.dot_dimension_numbers<[2], [2], [1], [1], [0, 0, 0, 1, 1, 1], [0], [0]>} : vector<8x8x64xf32>, vector<8x8x64xf32>, vector<8x8x8xf32> -> vector<8x8x8xf32>
    "tpu.trace_stop"() : () -> ()
    %264 = vector.extract_strided_slice %196 {offsets = [0, 320], sizes = [64, 64], strides = [1, 1]} : vector<64x2304xf32> to vector<64x64xf32>
    %265 = vector.extract_strided_slice %196 {offsets = [0, 896], sizes = [64, 64], strides = [1, 1]} : vector<64x2304xf32> to vector<64x64xf32>
    %266 = vector.extract_strided_slice %196 {offsets = [0, 1472], sizes = [64, 64], strides = [1, 1]} : vector<64x2304xf32> to vector<64x64xf32>
    %267 = vector.extract_strided_slice %196 {offsets = [0, 2048], sizes = [64, 64], strides = [1, 1]} : vector<64x2304xf32> to vector<64x64xf32>
    %268 = arith.mulf %264, %197 : vector<64x64xf32>
    %269 = arith.mulf %265, %198 : vector<64x64xf32>
    %270 = arith.addf %268, %269 : vector<64x64xf32>
    %271 = vector.shape_cast %270 : vector<64x64xf32> to vector<8x8x64xf32>
    %272 = arith.mulf %266, %197 : vector<64x64xf32>
    %273 = arith.mulf %267, %198 : vector<64x64xf32>
    %274 = arith.addf %272, %273 : vector<64x64xf32>
    %275 = vector.shape_cast %274 : vector<64x64xf32> to vector<8x8x64xf32>
    "tpu.trace_start"() <{level = 10 : i32, message = "bqd,bkd->bqk"}> : () -> ()
    %cst_83 = arith.constant dense<0.000000e+00> : vector<8x8x8xf32>
    %276 = tpu.matmul %271, %275, %cst_83 {dimension_numbers = #tpu.dot_dimension_numbers<[2], [2], [1], [1], [0, 0, 0, 1, 1, 1], [0], [0]>} : vector<8x8x64xf32>, vector<8x8x64xf32>, vector<8x8x8xf32> -> vector<8x8x8xf32>
    "tpu.trace_stop"() : () -> ()
    %277 = vector.extract_strided_slice %196 {offsets = [0, 384], sizes = [64, 64], strides = [1, 1]} : vector<64x2304xf32> to vector<64x64xf32>
    %278 = vector.extract_strided_slice %196 {offsets = [0, 960], sizes = [64, 64], strides = [1, 1]} : vector<64x2304xf32> to vector<64x64xf32>
    %279 = vector.extract_strided_slice %196 {offsets = [0, 1536], sizes = [64, 64], strides = [1, 1]} : vector<64x2304xf32> to vector<64x64xf32>
    %280 = vector.extract_strided_slice %196 {offsets = [0, 2112], sizes = [64, 64], strides = [1, 1]} : vector<64x2304xf32> to vector<64x64xf32>
    %281 = arith.mulf %277, %197 : vector<64x64xf32>
    %282 = arith.mulf %278, %198 : vector<64x64xf32>
    %283 = arith.addf %281, %282 : vector<64x64xf32>
    %284 = vector.shape_cast %283 : vector<64x64xf32> to vector<8x8x64xf32>
    %285 = arith.mulf %279, %197 : vector<64x64xf32>
    %286 = arith.mulf %280, %198 : vector<64x64xf32>
    %287 = arith.addf %285, %286 : vector<64x64xf32>
    %288 = vector.shape_cast %287 : vector<64x64xf32> to vector<8x8x64xf32>
    "tpu.trace_start"() <{level = 10 : i32, message = "bqd,bkd->bqk"}> : () -> ()
    %cst_84 = arith.constant dense<0.000000e+00> : vector<8x8x8xf32>
    %289 = tpu.matmul %284, %288, %cst_84 {dimension_numbers = #tpu.dot_dimension_numbers<[2], [2], [1], [1], [0, 0, 0, 1, 1, 1], [0], [0]>} : vector<8x8x64xf32>, vector<8x8x64xf32>, vector<8x8x8xf32> -> vector<8x8x8xf32>
    "tpu.trace_stop"() : () -> ()
    %290 = vector.extract_strided_slice %196 {offsets = [0, 448], sizes = [64, 64], strides = [1, 1]} : vector<64x2304xf32> to vector<64x64xf32>
    %291 = vector.extract_strided_slice %196 {offsets = [0, 1024], sizes = [64, 64], strides = [1, 1]} : vector<64x2304xf32> to vector<64x64xf32>
    %292 = vector.extract_strided_slice %196 {offsets = [0, 1600], sizes = [64, 64], strides = [1, 1]} : vector<64x2304xf32> to vector<64x64xf32>
    %293 = vector.extract_strided_slice %196 {offsets = [0, 2176], sizes = [64, 64], strides = [1, 1]} : vector<64x2304xf32> to vector<64x64xf32>
    %294 = arith.mulf %290, %197 : vector<64x64xf32>
    %295 = arith.mulf %291, %198 : vector<64x64xf32>
    %296 = arith.addf %294, %295 : vector<64x64xf32>
    %297 = vector.shape_cast %296 : vector<64x64xf32> to vector<8x8x64xf32>
    %298 = arith.mulf %292, %197 : vector<64x64xf32>
    %299 = arith.mulf %293, %198 : vector<64x64xf32>
    %300 = arith.addf %298, %299 : vector<64x64xf32>
    %301 = vector.shape_cast %300 : vector<64x64xf32> to vector<8x8x64xf32>
    "tpu.trace_start"() <{level = 10 : i32, message = "bqd,bkd->bqk"}> : () -> ()
    %cst_85 = arith.constant dense<0.000000e+00> : vector<8x8x8xf32>
    %302 = tpu.matmul %297, %301, %cst_85 {dimension_numbers = #tpu.dot_dimension_numbers<[2], [2], [1], [1], [0, 0, 0, 1, 1, 1], [0], [0]>} : vector<8x8x64xf32>, vector<8x8x64xf32>, vector<8x8x8xf32> -> vector<8x8x8xf32>
    "tpu.trace_stop"() : () -> ()
    %303 = vector.extract_strided_slice %196 {offsets = [0, 512], sizes = [64, 64], strides = [1, 1]} : vector<64x2304xf32> to vector<64x64xf32>
    %304 = vector.extract_strided_slice %196 {offsets = [0, 1088], sizes = [64, 64], strides = [1, 1]} : vector<64x2304xf32> to vector<64x64xf32>
    %305 = vector.extract_strided_slice %196 {offsets = [0, 1664], sizes = [64, 64], strides = [1, 1]} : vector<64x2304xf32> to vector<64x64xf32>
    %306 = vector.extract_strided_slice %196 {offsets = [0, 2240], sizes = [64, 64], strides = [1, 1]} : vector<64x2304xf32> to vector<64x64xf32>
    %307 = arith.mulf %303, %197 : vector<64x64xf32>
    %308 = arith.mulf %304, %198 : vector<64x64xf32>
    %309 = arith.addf %307, %308 : vector<64x64xf32>
    %310 = vector.shape_cast %309 : vector<64x64xf32> to vector<8x8x64xf32>
    %311 = arith.mulf %305, %197 : vector<64x64xf32>
    %312 = arith.mulf %306, %198 : vector<64x64xf32>
    %313 = arith.addf %311, %312 : vector<64x64xf32>
    %314 = vector.shape_cast %313 : vector<64x64xf32> to vector<8x8x64xf32>
    "tpu.trace_start"() <{level = 10 : i32, message = "bqd,bkd->bqk"}> : () -> ()
    %cst_86 = arith.constant dense<0.000000e+00> : vector<8x8x8xf32>
    %315 = tpu.matmul %310, %314, %cst_86 {dimension_numbers = #tpu.dot_dimension_numbers<[2], [2], [1], [1], [0, 0, 0, 1, 1, 1], [0], [0]>} : vector<8x8x64xf32>, vector<8x8x64xf32>, vector<8x8x8xf32> -> vector<8x8x8xf32>
    %cst_87 = arith.constant 0.000000e+00 : f32
    "tpu.trace_stop"() : () -> ()
    %316 = vector.broadcast %cst_87 : f32 to vector<8x8x56xf32>
    %317 = tpu.concatenate %211, %224, %237, %250, %263, %276, %289, %302, %315, %316 in 2 : vector<8x8x8xf32>, vector<8x8x8xf32>, vector<8x8x8xf32>, vector<8x8x8xf32>, vector<8x8x8xf32>, vector<8x8x8xf32>, vector<8x8x8xf32>, vector<8x8x8xf32>, vector<8x8x8xf32>, vector<8x8x56xf32> -> vector<8x8x128xf32>
    %c0_88 = arith.constant 0 : index
    %c0_89 = arith.constant 0 : index
    %c0_90 = arith.constant 0 : index
    %c0_91 = arith.constant 0 : index
    %318 = vector.load %arg3[%c0_88, %c0_89, %c0_90, %c0_91] : memref<1x8x8x128xf32, #tpu.memory_space<vmem>>, vector<1x8x8x128xf32>
    %319 = vector.shape_cast %318 : vector<1x8x8x128xf32> to vector<8x8x128xf32>
    %cst_92 = arith.constant 5.000000e-01 : f32
    %320 = vector.broadcast %cst_92 : f32 to vector<8x8x128xf32>
    %321 = arith.cmpf ogt, %319, %320 : vector<8x8x128xf32>
    %cst_93 = arith.constant -9.99999995E+11 : f32
    %322 = vector.broadcast %cst_93 : f32 to vector<8x8x128xf32>
    %323 = arith.select %321, %317, %322 : vector<8x8x128xi1>, vector<8x8x128xf32>
    %c0_94 = arith.constant 0 : index
    %c0_95 = arith.constant 0 : index
    %c0_96 = arith.constant 0 : index
    %324 = vector.load %arg4[%c0_94, %c0_95, %c0_96] : memref<1x8x8xi32, #tpu.memory_space<vmem>>, vector<1x8x8xi32>
    %325 = vector.shape_cast %324 : vector<1x8x8xi32> to vector<8x8xi32>
    %c0_97 = arith.constant 0 : index
    %c0_98 = arith.constant 0 : index
    %c0_99 = arith.constant 0 : index
    %326 = vector.load %arg5[%c0_97, %c0_98, %c0_99] : memref<1x8x8xf32, #tpu.memory_space<vmem>>, vector<1x8x8xf32>
    %327 = vector.shape_cast %326 : vector<1x8x8xf32> to vector<8x8xf32>
    %328 = tpu.iota {dimensions = array<i32: 2>} : vector<8x8x128xi32>
    %329 = vector.shape_cast %325 : vector<8x8xi32> to vector<8x8x1xi32>
    %330 = vector.broadcast %329 : vector<8x8x1xi32> to vector<8x8x128xi32>
    %331 = arith.cmpi eq, %328, %330 : vector<8x8x128xi32>
    %332 = arith.extui %331 : vector<8x8x128xi1> to vector<8x8x128xi32>
    %333 = arith.sitofp %332 : vector<8x8x128xi32> to vector<8x8x128xf32>
    %c0_100 = arith.constant 0 : index
    %c0_101 = arith.constant 0 : index
    %334 = vector.load %arg19[%c0_100, %c0_101] : memref<128x128xf32, #tpu.memory_space<vmem>>, vector<128x128xf32>
    %c0_102 = arith.constant 0 : index
    %c0_103 = arith.constant 0 : index
    %335 = vector.load %arg20[%c0_102, %c0_103] : memref<128x128xf32, #tpu.memory_space<vmem>>, vector<128x128xf32>
    %c0_104 = arith.constant 0 : index
    %c0_105 = arith.constant 0 : index
    %336 = vector.load %arg21[%c0_104, %c0_105] : memref<1x128xf32, #tpu.memory_space<vmem>>, vector<1x128xf32>
    %c0_106 = arith.constant 0 : index
    %c0_107 = arith.constant 0 : index
    %337 = vector.load %arg22[%c0_106, %c0_107] : memref<1x128xf32, #tpu.memory_space<vmem>>, vector<1x128xf32>
    %338 = vector.extract_strided_slice %333 {offsets = [0, 0, 0], sizes = [8, 1, 128], strides = [1, 1, 1]} : vector<8x8x128xf32> to vector<8x1x128xf32>
    %339 = vector.shape_cast %338 : vector<8x1x128xf32> to vector<8x128xf32>
    %340 = vector.broadcast %336 : vector<1x128xf32> to vector<8x128xf32>
    %341 = arith.mulf %340, %339 : vector<8x128xf32>
    %cst_108 = arith.constant dense<0.000000e+00> : vector<8xf32>
    %342 = vector.multi_reduction <add>, %341, %cst_108 [1] : vector<8x128xf32> to vector<8xf32>
    %343 = vector.shape_cast %342 : vector<8xf32> to vector<8x1xf32>
    %344 = arith.mulf %323, %333 : vector<8x8x128xf32>
    %cst_109 = arith.constant dense<0.000000e+00> : vector<8x8xf32>
    %345 = vector.multi_reduction <add>, %344, %cst_109 [2] : vector<8x8x128xf32> to vector<8x8xf32>
    %346 = arith.mulf %345, %327 : vector<8x8xf32>
    %cst_110 = arith.constant dense<0.000000e+00> : vector<8xf32>
    %347 = vector.multi_reduction <add>, %346, %cst_110 [1] : vector<8x8xf32> to vector<8xf32>
    %348 = vector.shape_cast %347 : vector<8xf32> to vector<8x1xf32>
    %349 = vector.shape_cast %333 : vector<8x8x128xf32> to vector<64x128xf32>
    %cst_111 = arith.constant dense<0.000000e+00> : vector<64x128xf32>
    %350 = tpu.matmul %349, %334, %cst_111 {dimension_numbers = #tpu.dot_dimension_numbers<[1], [0], [0], [1], [0, 0, 1, 1], [], []>} : vector<64x128xf32>, vector<128x128xf32>, vector<64x128xf32> -> vector<64x128xf32>
    %351 = vector.shape_cast %350 : vector<64x128xf32> to vector<8x8x128xf32>
    %352 = vector.extract_strided_slice %351 {offsets = [0, 0, 0], sizes = [8, 7, 128], strides = [1, 1, 1]} : vector<8x8x128xf32> to vector<8x7x128xf32>
    %353 = vector.extract_strided_slice %333 {offsets = [0, 1, 0], sizes = [8, 7, 128], strides = [1, 1, 1]} : vector<8x8x128xf32> to vector<8x7x128xf32>
    %354 = arith.mulf %352, %353 : vector<8x7x128xf32>
    %cst_112 = arith.constant dense<0.000000e+00> : vector<8x7xf32>
    %355 = vector.multi_reduction <add>, %354, %cst_112 [2] : vector<8x7x128xf32> to vector<8x7xf32>
    %356 = vector.extract_strided_slice %327 {offsets = [0, 1], sizes = [8, 7], strides = [1, 1]} : vector<8x8xf32> to vector<8x7xf32>
    %357 = arith.mulf %355, %356 : vector<8x7xf32>
    %cst_113 = arith.constant dense<0.000000e+00> : vector<8xf32>
    %358 = vector.multi_reduction <add>, %357, %cst_113 [1] : vector<8x7xf32> to vector<8xf32>
    %359 = vector.shape_cast %358 : vector<8xf32> to vector<8x1xf32>
    %360 = vector.extract_strided_slice %327 {offsets = [0, 1], sizes = [8, 7], strides = [1, 1]} : vector<8x8xf32> to vector<8x7xf32>
    %cst_114 = arith.constant 0.000000e+00 : f32
    %361 = vector.broadcast %cst_114 : f32 to vector<8x1xf32>
    %362 = tpu.concatenate %360, %361 in 1 : vector<8x7xf32>, vector<8x1xf32> -> vector<8x8xf32>
    %cst_115 = arith.constant 1.000000e+00 : f32
    %363 = vector.broadcast %cst_115 : f32 to vector<8x8xf32>
    %364 = arith.subf %363, %362 : vector<8x8xf32>
    %365 = arith.mulf %327, %364 : vector<8x8xf32>
    %366 = vector.shape_cast %365 : vector<8x8xf32> to vector<8x8x1xf32>
    %367 = vector.broadcast %366 : vector<8x8x1xf32> to vector<8x8x128xf32>
    %368 = arith.mulf %333, %367 : vector<8x8x128xf32>
    %cst_116 = arith.constant dense<0.000000e+00> : vector<8x128xf32>
    %369 = vector.multi_reduction <add>, %368, %cst_116 [1] : vector<8x8x128xf32> to vector<8x128xf32>
    %370 = vector.broadcast %337 : vector<1x128xf32> to vector<8x128xf32>
    %371 = arith.mulf %370, %369 : vector<8x128xf32>
    %cst_117 = arith.constant dense<0.000000e+00> : vector<8xf32>
    %372 = vector.multi_reduction <add>, %371, %cst_117 [1] : vector<8x128xf32> to vector<8xf32>
    %373 = vector.shape_cast %372 : vector<8xf32> to vector<8x1xf32>
    %374 = arith.addf %343, %348 : vector<8x1xf32>
    %375 = arith.addf %374, %359 : vector<8x1xf32>
    %376 = arith.addf %375, %373 : vector<8x1xf32>
    %377 = vector.extract_strided_slice %323 {offsets = [0, 0, 0], sizes = [8, 1, 128], strides = [1, 1, 1]} : vector<8x8x128xf32> to vector<8x1x128xf32>
    %378 = vector.shape_cast %377 : vector<8x1x128xf32> to vector<8x128xf32>
    %379 = vector.broadcast %336 : vector<1x128xf32> to vector<8x128xf32>
    %380 = arith.addf %379, %378 : vector<8x128xf32>
    %cst_118 = arith.constant dense<0xFF800000> : vector<8xf32>
    %381 = vector.multi_reduction <maximumf>, %380, %cst_118 [1] : vector<8x128xf32> to vector<8xf32>
    %382 = vector.shape_cast %381 : vector<8xf32> to vector<8x1xf32>
    %383 = vector.broadcast %382 : vector<8x1xf32> to vector<8x128xf32>
    %384 = arith.subf %380, %383 : vector<8x128xf32>
    %385 = math.exp %384 : vector<8x128xf32>
    %cst_119 = arith.constant dense<0.000000e+00> : vector<8x128xf32>
    %386 = tpu.matmul %385, %335, %cst_119 {dimension_numbers = #tpu.dot_dimension_numbers<[1], [0], [0], [1], [0, 0, 1, 1], [], []>} : vector<8x128xf32>, vector<128x128xf32>, vector<8x128xf32> -> vector<8x128xf32>
    %cst_120 = arith.constant 1.000000e-30 : f32
    %387 = vector.broadcast %cst_120 : f32 to vector<8x128xf32>
    %388 = arith.maximumf %386, %387 : vector<8x128xf32>
    %389 = math.log %388 : vector<8x128xf32>
    %390 = vector.broadcast %382 : vector<8x1xf32> to vector<8x128xf32>
    %391 = arith.addf %389, %390 : vector<8x128xf32>
    %392 = vector.extract_strided_slice %323 {offsets = [0, 1, 0], sizes = [8, 1, 128], strides = [1, 1, 1]} : vector<8x8x128xf32> to vector<8x1x128xf32>
    %393 = vector.shape_cast %392 : vector<8x1x128xf32> to vector<8x128xf32>
    %394 = arith.addf %391, %393 : vector<8x128xf32>
    %395 = vector.extract_strided_slice %327 {offsets = [0, 1], sizes = [8, 1], strides = [1, 1]} : vector<8x8xf32> to vector<8x1xf32>
    %cst_121 = arith.constant 5.000000e-01 : f32
    %396 = vector.broadcast %cst_121 : f32 to vector<8x1xf32>
    %397 = arith.cmpf ogt, %395, %396 : vector<8x1xf32>
    %398 = vector.shape_cast %397 : vector<8x1xi1> to vector<8x1xi1>
    %399 = vector.broadcast %398 : vector<8x1xi1> to vector<8x128xi1>
    %400 = arith.select %399, %394, %380 : vector<8x128xi1>, vector<8x128xf32>
    %cst_122 = arith.constant dense<0xFF800000> : vector<8xf32>
    %401 = vector.multi_reduction <maximumf>, %400, %cst_122 [1] : vector<8x128xf32> to vector<8xf32>
    %402 = vector.shape_cast %401 : vector<8xf32> to vector<8x1xf32>
    %403 = vector.broadcast %402 : vector<8x1xf32> to vector<8x128xf32>
    %404 = arith.subf %400, %403 : vector<8x128xf32>
    %405 = math.exp %404 : vector<8x128xf32>
    %cst_123 = arith.constant dense<0.000000e+00> : vector<8x128xf32>
    %406 = tpu.matmul %405, %335, %cst_123 {dimension_numbers = #tpu.dot_dimension_numbers<[1], [0], [0], [1], [0, 0, 1, 1], [], []>} : vector<8x128xf32>, vector<128x128xf32>, vector<8x128xf32> -> vector<8x128xf32>
    %cst_124 = arith.constant 1.000000e-30 : f32
    %407 = vector.broadcast %cst_124 : f32 to vector<8x128xf32>
    %408 = arith.maximumf %406, %407 : vector<8x128xf32>
    %409 = math.log %408 : vector<8x128xf32>
    %410 = vector.broadcast %402 : vector<8x1xf32> to vector<8x128xf32>
    %411 = arith.addf %409, %410 : vector<8x128xf32>
    %412 = vector.extract_strided_slice %323 {offsets = [0, 2, 0], sizes = [8, 1, 128], strides = [1, 1, 1]} : vector<8x8x128xf32> to vector<8x1x128xf32>
    %413 = vector.shape_cast %412 : vector<8x1x128xf32> to vector<8x128xf32>
    %414 = arith.addf %411, %413 : vector<8x128xf32>
    %415 = vector.extract_strided_slice %327 {offsets = [0, 2], sizes = [8, 1], strides = [1, 1]} : vector<8x8xf32> to vector<8x1xf32>
    %cst_125 = arith.constant 5.000000e-01 : f32
    %416 = vector.broadcast %cst_125 : f32 to vector<8x1xf32>
    %417 = arith.cmpf ogt, %415, %416 : vector<8x1xf32>
    %418 = vector.shape_cast %417 : vector<8x1xi1> to vector<8x1xi1>
    %419 = vector.broadcast %418 : vector<8x1xi1> to vector<8x128xi1>
    %420 = arith.select %419, %414, %400 : vector<8x128xi1>, vector<8x128xf32>
    %cst_126 = arith.constant dense<0xFF800000> : vector<8xf32>
    %421 = vector.multi_reduction <maximumf>, %420, %cst_126 [1] : vector<8x128xf32> to vector<8xf32>
    %422 = vector.shape_cast %421 : vector<8xf32> to vector<8x1xf32>
    %423 = vector.broadcast %422 : vector<8x1xf32> to vector<8x128xf32>
    %424 = arith.subf %420, %423 : vector<8x128xf32>
    %425 = math.exp %424 : vector<8x128xf32>
    %cst_127 = arith.constant dense<0.000000e+00> : vector<8x128xf32>
    %426 = tpu.matmul %425, %335, %cst_127 {dimension_numbers = #tpu.dot_dimension_numbers<[1], [0], [0], [1], [0, 0, 1, 1], [], []>} : vector<8x128xf32>, vector<128x128xf32>, vector<8x128xf32> -> vector<8x128xf32>
    %cst_128 = arith.constant 1.000000e-30 : f32
    %427 = vector.broadcast %cst_128 : f32 to vector<8x128xf32>
    %428 = arith.maximumf %426, %427 : vector<8x128xf32>
    %429 = math.log %428 : vector<8x128xf32>
    %430 = vector.broadcast %422 : vector<8x1xf32> to vector<8x128xf32>
    %431 = arith.addf %429, %430 : vector<8x128xf32>
    %432 = vector.extract_strided_slice %323 {offsets = [0, 3, 0], sizes = [8, 1, 128], strides = [1, 1, 1]} : vector<8x8x128xf32> to vector<8x1x128xf32>
    %433 = vector.shape_cast %432 : vector<8x1x128xf32> to vector<8x128xf32>
    %434 = arith.addf %431, %433 : vector<8x128xf32>
    %435 = vector.extract_strided_slice %327 {offsets = [0, 3], sizes = [8, 1], strides = [1, 1]} : vector<8x8xf32> to vector<8x1xf32>
    %cst_129 = arith.constant 5.000000e-01 : f32
    %436 = vector.broadcast %cst_129 : f32 to vector<8x1xf32>
    %437 = arith.cmpf ogt, %435, %436 : vector<8x1xf32>
    %438 = vector.shape_cast %437 : vector<8x1xi1> to vector<8x1xi1>
    %439 = vector.broadcast %438 : vector<8x1xi1> to vector<8x128xi1>
    %440 = arith.select %439, %434, %420 : vector<8x128xi1>, vector<8x128xf32>
    %cst_130 = arith.constant dense<0xFF800000> : vector<8xf32>
    %441 = vector.multi_reduction <maximumf>, %440, %cst_130 [1] : vector<8x128xf32> to vector<8xf32>
    %442 = vector.shape_cast %441 : vector<8xf32> to vector<8x1xf32>
    %443 = vector.broadcast %442 : vector<8x1xf32> to vector<8x128xf32>
    %444 = arith.subf %440, %443 : vector<8x128xf32>
    %445 = math.exp %444 : vector<8x128xf32>
    %cst_131 = arith.constant dense<0.000000e+00> : vector<8x128xf32>
    %446 = tpu.matmul %445, %335, %cst_131 {dimension_numbers = #tpu.dot_dimension_numbers<[1], [0], [0], [1], [0, 0, 1, 1], [], []>} : vector<8x128xf32>, vector<128x128xf32>, vector<8x128xf32> -> vector<8x128xf32>
    %cst_132 = arith.constant 1.000000e-30 : f32
    %447 = vector.broadcast %cst_132 : f32 to vector<8x128xf32>
    %448 = arith.maximumf %446, %447 : vector<8x128xf32>
    %449 = math.log %448 : vector<8x128xf32>
    %450 = vector.broadcast %442 : vector<8x1xf32> to vector<8x128xf32>
    %451 = arith.addf %449, %450 : vector<8x128xf32>
    %452 = vector.extract_strided_slice %323 {offsets = [0, 4, 0], sizes = [8, 1, 128], strides = [1, 1, 1]} : vector<8x8x128xf32> to vector<8x1x128xf32>
    %453 = vector.shape_cast %452 : vector<8x1x128xf32> to vector<8x128xf32>
    %454 = arith.addf %451, %453 : vector<8x128xf32>
    %455 = vector.extract_strided_slice %327 {offsets = [0, 4], sizes = [8, 1], strides = [1, 1]} : vector<8x8xf32> to vector<8x1xf32>
    %cst_133 = arith.constant 5.000000e-01 : f32
    %456 = vector.broadcast %cst_133 : f32 to vector<8x1xf32>
    %457 = arith.cmpf ogt, %455, %456 : vector<8x1xf32>
    %458 = vector.shape_cast %457 : vector<8x1xi1> to vector<8x1xi1>
    %459 = vector.broadcast %458 : vector<8x1xi1> to vector<8x128xi1>
    %460 = arith.select %459, %454, %440 : vector<8x128xi1>, vector<8x128xf32>
    %cst_134 = arith.constant dense<0xFF800000> : vector<8xf32>
    %461 = vector.multi_reduction <maximumf>, %460, %cst_134 [1] : vector<8x128xf32> to vector<8xf32>
    %462 = vector.shape_cast %461 : vector<8xf32> to vector<8x1xf32>
    %463 = vector.broadcast %462 : vector<8x1xf32> to vector<8x128xf32>
    %464 = arith.subf %460, %463 : vector<8x128xf32>
    %465 = math.exp %464 : vector<8x128xf32>
    %cst_135 = arith.constant dense<0.000000e+00> : vector<8x128xf32>
    %466 = tpu.matmul %465, %335, %cst_135 {dimension_numbers = #tpu.dot_dimension_numbers<[1], [0], [0], [1], [0, 0, 1, 1], [], []>} : vector<8x128xf32>, vector<128x128xf32>, vector<8x128xf32> -> vector<8x128xf32>
    %cst_136 = arith.constant 1.000000e-30 : f32
    %467 = vector.broadcast %cst_136 : f32 to vector<8x128xf32>
    %468 = arith.maximumf %466, %467 : vector<8x128xf32>
    %469 = math.log %468 : vector<8x128xf32>
    %470 = vector.broadcast %462 : vector<8x1xf32> to vector<8x128xf32>
    %471 = arith.addf %469, %470 : vector<8x128xf32>
    %472 = vector.extract_strided_slice %323 {offsets = [0, 5, 0], sizes = [8, 1, 128], strides = [1, 1, 1]} : vector<8x8x128xf32> to vector<8x1x128xf32>
    %473 = vector.shape_cast %472 : vector<8x1x128xf32> to vector<8x128xf32>
    %474 = arith.addf %471, %473 : vector<8x128xf32>
    %475 = vector.extract_strided_slice %327 {offsets = [0, 5], sizes = [8, 1], strides = [1, 1]} : vector<8x8xf32> to vector<8x1xf32>
    %cst_137 = arith.constant 5.000000e-01 : f32
    %476 = vector.broadcast %cst_137 : f32 to vector<8x1xf32>
    %477 = arith.cmpf ogt, %475, %476 : vector<8x1xf32>
    %478 = vector.shape_cast %477 : vector<8x1xi1> to vector<8x1xi1>
    %479 = vector.broadcast %478 : vector<8x1xi1> to vector<8x128xi1>
    %480 = arith.select %479, %474, %460 : vector<8x128xi1>, vector<8x128xf32>
    %cst_138 = arith.constant dense<0xFF800000> : vector<8xf32>
    %481 = vector.multi_reduction <maximumf>, %480, %cst_138 [1] : vector<8x128xf32> to vector<8xf32>
    %482 = vector.shape_cast %481 : vector<8xf32> to vector<8x1xf32>
    %483 = vector.broadcast %482 : vector<8x1xf32> to vector<8x128xf32>
    %484 = arith.subf %480, %483 : vector<8x128xf32>
    %485 = math.exp %484 : vector<8x128xf32>
    %cst_139 = arith.constant dense<0.000000e+00> : vector<8x128xf32>
    %486 = tpu.matmul %485, %335, %cst_139 {dimension_numbers = #tpu.dot_dimension_numbers<[1], [0], [0], [1], [0, 0, 1, 1], [], []>} : vector<8x128xf32>, vector<128x128xf32>, vector<8x128xf32> -> vector<8x128xf32>
    %cst_140 = arith.constant 1.000000e-30 : f32
    %487 = vector.broadcast %cst_140 : f32 to vector<8x128xf32>
    %488 = arith.maximumf %486, %487 : vector<8x128xf32>
    %489 = math.log %488 : vector<8x128xf32>
    %490 = vector.broadcast %482 : vector<8x1xf32> to vector<8x128xf32>
    %491 = arith.addf %489, %490 : vector<8x128xf32>
    %492 = vector.extract_strided_slice %323 {offsets = [0, 6, 0], sizes = [8, 1, 128], strides = [1, 1, 1]} : vector<8x8x128xf32> to vector<8x1x128xf32>
    %493 = vector.shape_cast %492 : vector<8x1x128xf32> to vector<8x128xf32>
    %494 = arith.addf %491, %493 : vector<8x128xf32>
    %495 = vector.extract_strided_slice %327 {offsets = [0, 6], sizes = [8, 1], strides = [1, 1]} : vector<8x8xf32> to vector<8x1xf32>
    %cst_141 = arith.constant 5.000000e-01 : f32
    %496 = vector.broadcast %cst_141 : f32 to vector<8x1xf32>
    %497 = arith.cmpf ogt, %495, %496 : vector<8x1xf32>
    %498 = vector.shape_cast %497 : vector<8x1xi1> to vector<8x1xi1>
    %499 = vector.broadcast %498 : vector<8x1xi1> to vector<8x128xi1>
    %500 = arith.select %499, %494, %480 : vector<8x128xi1>, vector<8x128xf32>
    %cst_142 = arith.constant dense<0xFF800000> : vector<8xf32>
    %501 = vector.multi_reduction <maximumf>, %500, %cst_142 [1] : vector<8x128xf32> to vector<8xf32>
    %502 = vector.shape_cast %501 : vector<8xf32> to vector<8x1xf32>
    %503 = vector.broadcast %502 : vector<8x1xf32> to vector<8x128xf32>
    %504 = arith.subf %500, %503 : vector<8x128xf32>
    %505 = math.exp %504 : vector<8x128xf32>
    %cst_143 = arith.constant dense<0.000000e+00> : vector<8x128xf32>
    %506 = tpu.matmul %505, %335, %cst_143 {dimension_numbers = #tpu.dot_dimension_numbers<[1], [0], [0], [1], [0, 0, 1, 1], [], []>} : vector<8x128xf32>, vector<128x128xf32>, vector<8x128xf32> -> vector<8x128xf32>
    %cst_144 = arith.constant 1.000000e-30 : f32
    %507 = vector.broadcast %cst_144 : f32 to vector<8x128xf32>
    %508 = arith.maximumf %506, %507 : vector<8x128xf32>
    %509 = math.log %508 : vector<8x128xf32>
    %510 = vector.broadcast %502 : vector<8x1xf32> to vector<8x128xf32>
    %511 = arith.addf %509, %510 : vector<8x128xf32>
    %512 = vector.extract_strided_slice %323 {offsets = [0, 7, 0], sizes = [8, 1, 128], strides = [1, 1, 1]} : vector<8x8x128xf32> to vector<8x1x128xf32>
    %513 = vector.shape_cast %512 : vector<8x1x128xf32> to vector<8x128xf32>
    %514 = arith.addf %511, %513 : vector<8x128xf32>
    %515 = vector.extract_strided_slice %327 {offsets = [0, 7], sizes = [8, 1], strides = [1, 1]} : vector<8x8xf32> to vector<8x1xf32>
    %cst_145 = arith.constant 5.000000e-01 : f32
    %516 = vector.broadcast %cst_145 : f32 to vector<8x1xf32>
    %517 = arith.cmpf ogt, %515, %516 : vector<8x1xf32>
    %518 = vector.shape_cast %517 : vector<8x1xi1> to vector<8x1xi1>
    %519 = vector.broadcast %518 : vector<8x1xi1> to vector<8x128xi1>
    %520 = arith.select %519, %514, %500 : vector<8x128xi1>, vector<8x128xf32>
    %521 = vector.broadcast %337 : vector<1x128xf32> to vector<8x128xf32>
    %522 = arith.addf %520, %521 : vector<8x128xf32>
    %cst_146 = arith.constant dense<0xFF800000> : vector<8xf32>
    %523 = vector.multi_reduction <maximumf>, %522, %cst_146 [1] : vector<8x128xf32> to vector<8xf32>
    %524 = vector.shape_cast %523 : vector<8xf32> to vector<8x1xf32>
    %525 = vector.broadcast %524 : vector<8x1xf32> to vector<8x128xf32>
    %526 = arith.subf %522, %525 : vector<8x128xf32>
    %527 = math.exp %526 : vector<8x128xf32>
    %cst_147 = arith.constant dense<0.000000e+00> : vector<8xf32>
    %528 = vector.multi_reduction <add>, %527, %cst_147 [1] : vector<8x128xf32> to vector<8xf32>
    %529 = vector.shape_cast %528 : vector<8xf32> to vector<8x1xf32>
    %530 = math.log %529 : vector<8x1xf32>
    %531 = arith.addf %530, %524 : vector<8x1xf32>
    %532 = arith.subf %376, %531 : vector<8x1xf32>
    %533 = vector.shape_cast %532 : vector<8x1xf32> to vector<8x1xf32>
    %534 = vector.broadcast %533 : vector<8x1xf32> to vector<8x128xf32>
    %c0_148 = arith.constant 0 : index
    %c0_149 = arith.constant 0 : index
    %c0_150 = arith.constant 0 : index
    %535 = vector.load %arg23[%c0_148, %c0_149, %c0_150] : memref<1x8x128xf32, #tpu.memory_space<vmem>>, vector<1x8x128xf32>
    %536 = vector.shape_cast %535 : vector<1x8x128xf32> to vector<8x128xf32>
    %537 = vector.shape_cast %534 : vector<8x128xf32> to vector<1x8x128xf32>
    tpu.vector_store %arg23[%c0_148, %c0_149, %c0_150], %537 {strides = array<i32>} : memref<1x8x128xf32, #tpu.memory_space<vmem>>, vector<1x8x128xf32>,
    return
  }
  func.func @transform_0(%arg0: i32) -> (i32, i32, i32) {
    %c0_i32 = arith.constant 0 : i32
    %c0_i32_0 = arith.constant 0 : i32
    %c0_i32_1 = arith.constant 0 : i32
    return %arg0, %c0_i32, %c0_i32_0 : i32, i32, i32
  }
  func.func @transform_1(%arg0: i32) -> (i32, i32, i32) {
    %c0_i32 = arith.constant 0 : i32
    %c0_i32_0 = arith.constant 0 : i32
    %c0_i32_1 = arith.constant 0 : i32
    return %arg0, %c0_i32, %c0_i32_0 : i32, i32, i32
  }
  func.func @transform_2(%arg0: i32) -> (i32, i32, i32, i32) {
    %c0_i32 = arith.constant 0 : i32
    %c0_i32_0 = arith.constant 0 : i32
    %c0_i32_1 = arith.constant 0 : i32
    %c0_i32_2 = arith.constant 0 : i32
    return %arg0, %c0_i32, %c0_i32_0, %c0_i32_1 : i32, i32, i32, i32
  }
  func.func @transform_3(%arg0: i32) -> (i32, i32, i32) {
    %c0_i32 = arith.constant 0 : i32
    %c0_i32_0 = arith.constant 0 : i32
    %c0_i32_1 = arith.constant 0 : i32
    return %arg0, %c0_i32, %c0_i32_0 : i32, i32, i32
  }
  func.func @transform_4(%arg0: i32) -> (i32, i32, i32) {
    %c0_i32 = arith.constant 0 : i32
    %c0_i32_0 = arith.constant 0 : i32
    %c0_i32_1 = arith.constant 0 : i32
    return %arg0, %c0_i32, %c0_i32_0 : i32, i32, i32
  }
  func.func @transform_5(%arg0: i32) -> (i32, i32) {
    %c0_i32 = arith.constant 0 : i32
    %c0_i32_0 = arith.constant 0 : i32
    %c0_i32_1 = arith.constant 0 : i32
    return %c0_i32, %c0_i32_0 : i32, i32
  }
  func.func @transform_6(%arg0: i32) -> (i32, i32) {
    %c0_i32 = arith.constant 0 : i32
    %c0_i32_0 = arith.constant 0 : i32
    %c0_i32_1 = arith.constant 0 : i32
    return %c0_i32, %c0_i32_0 : i32, i32
  }
  func.func @transform_7(%arg0: i32) -> (i32, i32) {
    %c0_i32 = arith.constant 0 : i32
    %c0_i32_0 = arith.constant 0 : i32
    %c0_i32_1 = arith.constant 0 : i32
    return %c0_i32, %c0_i32_0 : i32, i32
  }
  func.func @transform_8(%arg0: i32) -> (i32, i32) {
    %c0_i32 = arith.constant 0 : i32
    %c0_i32_0 = arith.constant 0 : i32
    %c0_i32_1 = arith.constant 0 : i32
    return %c0_i32, %c0_i32_0 : i32, i32
  }
  func.func @transform_9(%arg0: i32) -> (i32, i32) {
    %c0_i32 = arith.constant 0 : i32
    %c0_i32_0 = arith.constant 0 : i32
    %c0_i32_1 = arith.constant 0 : i32
    return %c0_i32, %c0_i32_0 : i32, i32
  }
  func.func @transform_10(%arg0: i32) -> (i32, i32) {
    %c0_i32 = arith.constant 0 : i32
    %c0_i32_0 = arith.constant 0 : i32
    %c0_i32_1 = arith.constant 0 : i32
    return %c0_i32, %c0_i32_0 : i32, i32
  }
  func.func @transform_11(%arg0: i32) -> (i32, i32) {
    %c0_i32 = arith.constant 0 : i32
    %c0_i32_0 = arith.constant 0 : i32
    %c0_i32_1 = arith.constant 0 : i32
    return %c0_i32, %c0_i32_0 : i32, i32
  }
  func.func @transform_12(%arg0: i32) -> (i32, i32) {
    %c0_i32 = arith.constant 0 : i32
    %c0_i32_0 = arith.constant 0 : i32
    %c0_i32_1 = arith.constant 0 : i32
    return %c0_i32, %c0_i32_0 : i32, i32
  }
  func.func @transform_13(%arg0: i32) -> (i32, i32) {
    %c0_i32 = arith.constant 0 : i32
    %c0_i32_0 = arith.constant 0 : i32
    %c0_i32_1 = arith.constant 0 : i32
    return %c0_i32, %c0_i32_0 : i32, i32
  }
  func.func @transform_14(%arg0: i32) -> (i32, i32) {
    %c0_i32 = arith.constant 0 : i32
    %c0_i32_0 = arith.constant 0 : i32
    %c0_i32_1 = arith.constant 0 : i32
    return %c0_i32, %c0_i32_0 : i32, i32
  }
  func.func @transform_15(%arg0: i32) -> (i32, i32) {
    %c0_i32 = arith.constant 0 : i32
    %c0_i32_0 = arith.constant 0 : i32
    %c0_i32_1 = arith.constant 0 : i32
    return %c0_i32, %c0_i32_0 : i32, i32
  }
  func.func @transform_16(%arg0: i32) -> (i32, i32) {
    %c0_i32 = arith.constant 0 : i32
    %c0_i32_0 = arith.constant 0 : i32
    %c0_i32_1 = arith.constant 0 : i32
    return %c0_i32, %c0_i32_0 : i32, i32
  }
  func.func @transform_17(%arg0: i32) -> (i32, i32) {
    %c0_i32 = arith.constant 0 : i32
    %c0_i32_0 = arith.constant 0 : i32
    %c0_i32_1 = arith.constant 0 : i32
    return %c0_i32, %c0_i32_0 : i32, i32
  }
  func.func @transform_18(%arg0: i32) -> (i32, i32) {
    %c0_i32 = arith.constant 0 : i32
    %c0_i32_0 = arith.constant 0 : i32
    %c0_i32_1 = arith.constant 0 : i32
    return %c0_i32, %c0_i32_0 : i32, i32
  }
  func.func @transform_19(%arg0: i32) -> (i32, i32) {
    %c0_i32 = arith.constant 0 : i32
    %c0_i32_0 = arith.constant 0 : i32
    %c0_i32_1 = arith.constant 0 : i32
    return %c0_i32, %c0_i32_0 : i32, i32
  }
  func.func @transform_20(%arg0: i32) -> (i32, i32) {
    %c0_i32 = arith.constant 0 : i32
    %c0_i32_0 = arith.constant 0 : i32
    %c0_i32_1 = arith.constant 0 : i32
    return %c0_i32, %c0_i32_0 : i32, i32
  }
  func.func @transform_21(%arg0: i32) -> (i32, i32) {
    %c0_i32 = arith.constant 0 : i32
    %c0_i32_0 = arith.constant 0 : i32
    %c0_i32_1 = arith.constant 0 : i32
    return %c0_i32, %c0_i32_0 : i32, i32
  }
  func.func @transform_22(%arg0: i32) -> (i32, i32, i32) {
    %c0_i32 = arith.constant 0 : i32
    %c0_i32_0 = arith.constant 0 : i32
    %c0_i32_1 = arith.constant 0 : i32
    return %arg0, %c0_i32, %c0_i32_0 : i32, i32, i32
  }
}

</mosaic_0001>

<bundles_post_ra>
// kernel: gp_model_with_crf_forward.1
= control target key start
LH: loop header
LB: loop body
LE: loop exit
PB: predicated region body
PF: predicated region fallthrough
CT: control target
= control target key end

     0   :  { %vm88_vm0 = vcmask 261120   ;;  %vm20807_vm1 = vcmask 64512   ;;  %s15104_s30 = smov 64   ;;  %vm524_vm2 = vcmask 523264   ;;  %s15106_s25 = smov 120   ;;  %vm20808_vm3 = vmmov 0   ;;  %s20627_s0 = inlined_call_operand.vmem [shape: f32[1,64,32], index: 0, kind: input, shape index: {}]   ;;  %s20628_s6 = inlined_call_operand.vmem [shape: f32[32,96], index: 6, kind: input, shape index: {}]   ;;  %s20629_s5 = inlined_call_operand.vmem [shape: f32[8,32], index: 5, kind: input, shape index: {}]   ;;  %s20630_s7 = inlined_call_operand.vmem [shape: f32[1,96], index: 7, kind: input, shape index: {}]   ;;  %s20631_s1 = inlined_call_operand.vmem [shape: f32[1,64,64], index: 1, kind: input, shape index: {}]   ;;  %s20632_s8 = inlined_call_operand.vmem [shape: f32[32,32], index: 8, kind: input, shape index: {}]   ;;  %s20633_s9 = inlined_call_operand.vmem [shape: f32[1,32], index: 9, kind: input, shape index: {}]   ;;  %s20634_s10 = inlined_call_operand.vmem [shape: f32[32,64], index: 10, kind: input, shape index: {}]   ;;  %s20635_s12 = inlined_call_operand.vmem [shape: f32[64,32], index: 12, kind: input, shape index: {}]   ;;  %s20636_s11 = inlined_call_operand.vmem [shape: f32[1,64], index: 11, kind: input, shape index: {}]   ;;  %s20637_s13 = inlined_call_operand.vmem [shape: f32[1,32], index: 13, kind: input, shape index: {}]   ;;  %s20638_s14 = inlined_call_operand.vmem [shape: f32[32,2304], index: 14, kind: input, shape index: {}]   ;;  %s20639_s17 = inlined_call_operand.vmem [shape: f32[64,64], index: 17, kind: input, shape index: {}]   ;;  %s20640_s16 = inlined_call_operand.vmem [shape: f32[64,64], index: 16, kind: input, shape index: {}]   ;;  %s20641_s15 = inlined_call_operand.vmem [shape: f32[1,2304], index: 15, kind: input, shape index: {}]   ;;  %s20642_s4 = inlined_call_operand.vmem [shape: f32[1,8,8], index: 4, kind: input, shape index: {}]   ;;  %s20643_s3 = inlined_call_operand.vmem [shape: s32[1,8,8], index: 3, kind: input, shape index: {}]   ;;  %s20644_s19 = inlined_call_operand.vmem [shape: f32[128,128], index: 19, kind: input, shape index: {}]   ;;  %s20645_s2 = inlined_call_operand.vmem [shape: f32[1,8,8,128], index: 2, kind: input, shape index: {}]   ;;  %s20646_s20 = inlined_call_operand.vmem [shape: f32[1,128], index: 20, kind: input, shape index: {}]   ;;  %s20647_s18 = inlined_call_operand.vmem [shape: f32[128,128], index: 18, kind: input, shape index: {}]   ;;  %s20648_s21 = inlined_call_operand.vmem [shape: f32[1,128], index: 21, kind: input, shape index: {}]   ;;  %s20649_s22 = inlined_call_operand.vmem [shape: f32[1,8,128], index: 22, kind: output, shape index: {}]  }
   0x1   :  { %20813 = sst [smem:[#allocation155_spill]] %s20627_s0  ;;  %s15107_s26 = smov 56   ;;  %vm11332_vm5 = vcmask 130048   ;;  %vm11341_vm6 = vcmask 195584   ;;  %vm11358_vm7 = vcmask 326656   ;;  %vm11367_vm8 = vcmask 392192  }
   0x2   :  { %20814 = sst [smem:[#allocation156_spill]] %s20628_s6  ;;  %s15110_s0 = smov 72   ;;  %vm11376_vm9 = vcmask 457728   ;;  %vm11393_vm10 = vcmask 588800  }
   0x3   :  { %20815 = sst [smem:[#allocation157_spill]] %s20629_s5  ;;  %s15111_s23 = smov 104  }
   0x4   :  { %20816 = sst [smem:[#allocation158_spill]] %s20630_s7 }
   0x5   :  { %20817 = sst [smem:[#allocation159_spill]] %s20631_s1 }
   0x6   :  { %20818 = sst [smem:[#allocation160_spill]] %s20632_s8 }
   0x7   :  { %20819 = sst [smem:[#allocation161_spill]] %s20633_s9  ;;  %s15112_s9 = smov 48  }
   0x8   :  { %s20820_s29 = sld [smem:[#allocation155_spill]] }
   0x9   :  { %s20821_s1 = sld [smem:[#allocation156_spill]] }
   0xa   :  { %s20824_s5 = sld [smem:[#allocation157_spill]] }
   0xb   :  { %s20826_s28 = sld [smem:[#allocation158_spill]] }
   0xc   :  { %s20827_s6 = sld [smem:[#allocation159_spill]] }
   0xd   :  { %s20828_s7 = sld [smem:[#allocation160_spill]] }
   0xe   :  { %v72_v0 = vld [vmem:[%s20820_s29] sm:$0xff]  ;;  %v74_v1 = vld [vmem:[%s20820_s29 + $0x10] sm:$0xff]  ;;  %v73_v2 = vld [vmem:[%s20820_s29 + $0x8] sm:$0xff]  ;;  %s20829_s27 = sld [smem:[#allocation161_spill]] }
   0xf   :  { %v89_v3 = vsel %vm88_vm0, %v72_v0, 0.0  ;;  %v95_v4 = vsel %vm88_vm0, %v74_v1, 0.0  ;;  %v75_v5 = vld [vmem:[%s20820_s29 + $0x18] sm:$0xff]  ;;  %v92_v6 = vsel %vm88_vm0, %v73_v2, 0.0  ;;  %v76_v8 = vld [vmem:[%s20820_s29 + $0x20] sm:$0xff]  ;;  %v77_v9 = vld [vmem:[%s20820_s29 + $0x28] sm:$0xff] }
  0x10   :  { %90 = vadd.xlane.f32.xlu0 %v89_v3  ;;  %96 = vadd.xlane.f32.xlu1 %v95_v4  ;;  %v98_v7 = vsel %vm88_vm0, %v75_v5, 0.0  ;;  %v101_v10 = vsel %vm88_vm0, %v76_v8, 0.0  ;;  %v104_v11 = vsel %vm88_vm0, %v77_v9, 0.0  ;;  %v78_v12 = vld [vmem:[%s20820_s29 + $0x30] sm:$0xff]  ;;  %v79_v13 = vld [vmem:[%s20820_s29 + $0x38] sm:$0xff]  ;;  %v219_v58 = vld [vmem:[%s20821_s1 + $0x8] sm:$0xff]  ;;  %v20655_v3 = vlaneseq }
  0x11   :  { %v107_v14 = vsel %vm88_vm0, %v78_v12, 0.0  ;;  %v110_v15 = vsel %vm88_vm0, %v79_v13, 0.0  ;;  %v221_v56 = vld [vmem:[%s20821_s1 + $0x18] sm:$0xff]  ;;  %v220_v57 = vld [vmem:[%s20821_s1 + $0x10] sm:$0xff]  ;;  %v218_v59 = vld [vmem:[%s20821_s1] sm:$0xff]  ;;  %s15103_s29 = smov 96  }
  0x12   :  { %13802 = vmatprep.subr.mxu0 %v221_v56  ;;  %s15105_s1 = smov 88  }
  0x13   :  { %13803 = vmatpush3.msra.mxu0 %v221_v56 }
  0x14   :  { %93 = vadd.xlane.f32.xlu0 %v92_v6  ;;  %99 = vadd.xlane.f32.xlu1 %v98_v7 }
  0x15   :  { %13804 = vmatprep.subr.mxu0 %v220_v57 }
  0x16   :  { %13805 = vmatpush3.msra.mxu0 %v220_v57 }
  0x17   :  { %13806 = vmatprep.subr.mxu0 %v219_v58 }
  0x18   :  { %102 = vadd.xlane.f32.xlu0 %v101_v10  ;;  %105 = vadd.xlane.f32.xlu1 %v104_v11  ;;  %v15330_v10 = vshrl.u32 %v20655_v3, 7 }
  0x19   :  { %13807 = vmatpush3.msra.mxu0 %v219_v58 }
  0x1a   :  { %13808 = vmatprep.subr.mxu0 %v218_v59  ;;  %20822 = vst [vmem:[#allocation2_spill] sm:$0xff] %v15330_v10 }
  0x1b   :  { %13809 = vmatpush3.msra.mxu0 %v218_v59 }
  0x1c   :  { %108 = vadd.xlane.f32.xlu0 %v107_v14  ;;  %111 = vadd.xlane.f32.xlu1 %v110_v15 }
  0x99   :  { %v91_v16 = vpop.xlane.xlu0 %90  ;;  %v97_v17 = vpop.xlane.xlu1 %96 }
  0x9a   :  { %v114_v18 = vmul.f32 0.03125, %v91_v16  ;;  %v116_v19 = vmul.f32 0.03125, %v97_v17  ;;  %v15333_v17 = vsub.s32 0, %v15330_v10 }
  0x9c   :  { %v15277_v20 = vsub.f32 %v72_v0, %v114_v18  ;;  %v15279_v21 = vsub.f32 %v74_v1, %v116_v19  ;;  %20823 = vst [vmem:[#allocation3_spill] sm:$0xff] %v15333_v17  ;;  %v71_v18 = vld [vmem:[%s20824_s5] sm:$0xff] }
  0x9d   :  { %v94_v22 = vpop.xlane.xlu0 %93  ;;  %v100_v23 = vpop.xlane.xlu1 %99 }
  0x9e   :  { %v115_v24 = vmul.f32 0.03125, %v94_v22  ;;  %v117_v25 = vmul.f32 0.03125, %v100_v23  ;;  %v130_v26 = vmul.f32 %v15277_v20, %v15277_v20  ;;  %v132_v27 = vmul.f32 %v15279_v21, %v15279_v21 }
  0x9f   :  { %v15339_v23 = vsub.s32 1, %v15330_v10 }
  0xa0   :  { %v15285_v28 = vsub.f32 %v73_v2, %v115_v24  ;;  %v15287_v29 = vsub.f32 %v75_v5, %v117_v25  ;;  %v138_v30 = vsel %vm88_vm0, %v130_v26, 0.0  ;;  %v144_v33 = vsel %vm88_vm0, %v132_v27, 0.0 }
  0xa1   :  { %139 = vadd.xlane.f32.xlu0 %v138_v30  ;;  %v103_v31 = vpop.xlane.xlu0 %102  ;;  %v106_v32 = vpop.xlane.xlu1 %105  ;;  %20825 = vst [vmem:[#allocation4_spill] sm:$0xff] %v15339_v23  ;;  %v197_v26 = vrot.slane %v71_v18, %v15333_v17 }
  0xa2   :  { %v118_v34 = vmul.f32 0.03125, %v103_v31  ;;  %v119_v35 = vmul.f32 0.03125, %v106_v32  ;;  %v131_v36 = vmul.f32 %v15285_v28, %v15285_v28  ;;  %v133_v37 = vmul.f32 %v15287_v29, %v15287_v29 }
  0xa3   :  { %v209_v32 = vrot.slane %v71_v18, %v15339_v23 }
  0xa4   :  { %v15295_v38 = vsub.f32 %v76_v8, %v118_v34  ;;  %v15297_v39 = vsub.f32 %v77_v9, %v119_v35  ;;  %v141_v40 = vsel %vm88_vm0, %v131_v36, 0.0  ;;  %v147_v43 = vsel %vm88_vm0, %v133_v37, 0.0 }
  0xa5   :  { %145 = vadd.xlane.f32.xlu0 %v144_v33  ;;  %142 = vadd.xlane.f32.xlu1 %v141_v40  ;;  %v109_v41 = vpop.xlane.xlu0 %108  ;;  %v112_v42 = vpop.xlane.xlu1 %111 }
  0xa6   :  { %v120_v44 = vmul.f32 0.03125, %v109_v41  ;;  %v121_v45 = vmul.f32 0.03125, %v112_v42  ;;  %v134_v46 = vmul.f32 %v15295_v38, %v15295_v38  ;;  %v135_v47 = vmul.f32 %v15297_v39, %v15297_v39 }
  0xa8   :  { %v15305_v48 = vsub.f32 %v78_v12, %v120_v44  ;;  %v15307_v49 = vsub.f32 %v79_v13, %v121_v45  ;;  %v150_v50 = vsel %vm88_vm0, %v134_v46, 0.0  ;;  %v153_v51 = vsel %vm88_vm0, %v135_v47, 0.0 }
  0xa9   :  { %148 = vadd.xlane.f32.xlu1 %v147_v43  ;;  %151 = vadd.xlane.f32.xlu0 %v150_v50 }
  0xaa   :  { %v136_v52 = vmul.f32 %v15305_v48, %v15305_v48  ;;  %v137_v53 = vmul.f32 %v15307_v49, %v15307_v49 }
  0xac   :  { %v156_v54 = vsel %vm88_vm0, %v136_v52, 0.0  ;;  %v159_v55 = vsel %vm88_vm0, %v137_v53, 0.0 }
  0xad   :  { %154 = vadd.xlane.f32.xlu1 %v153_v51  ;;  %157 = vadd.xlane.f32.xlu0 %v156_v54 }
  0xb1   :  { %160 = vadd.xlane.f32.xlu1 %v159_v55 }
 0x12a   :  { %v140_v60 = vpop.xlane.xlu0 %139 }
 0x12b   :  { %v162_v61 = vmul.f32 0.03125, %v140_v60 }
 0x12d   :  { %v170_v62 = vadd.f32 1e-12, %v162_v61  ;;  %v12921_v61 = vld [vmem:[%s20826_s28] ss:$0 sm:$0xff]  ;;  %s15108_s28 = smov 80  }
 0x12e   :  { %v143_v63 = vpop.xlane.xlu1 %142  ;;  %v146_v0 = vpop.xlane.xlu0 %145 }
 0x12f   :  { %14836 = vrsqrt.f32 %v170_v62  ;;  %v163_v1 = vmul.f32 0.03125, %v143_v63  ;;  %v164_v2 = vmul.f32 0.03125, %v146_v0 }
 0x131   :  { %v171_v4 = vadd.f32 1e-12, %v163_v1  ;;  %v172_v5 = vadd.f32 1e-12, %v164_v2 }
 0x132   :  { %v149_v6 = vpop.xlane.xlu1 %148  ;;  %v152_v7 = vpop.xlane.xlu0 %151 }
 0x133   :  { %14838 = vrsqrt.f32 %v171_v4  ;;  %v165_v8 = vmul.f32 0.03125, %v149_v6  ;;  %v166_v9 = vmul.f32 0.03125, %v152_v7 }
 0x134   :  { %14840 = vrsqrt.f32 %v172_v5 }
 0x135   :  { %v173_v11 = vadd.f32 1e-12, %v165_v8  ;;  %v174_v12 = vadd.f32 1e-12, %v166_v9 }
 0x136   :  { %v155_v13 = vpop.xlane.xlu1 %154  ;;  %v158_v14 = vpop.xlane.xlu0 %157 }
 0x137   :  { %14842 = vrsqrt.f32 %v173_v11  ;;  %v167_v15 = vmul.f32 0.03125, %v155_v13  ;;  %v168_v16 = vmul.f32 0.03125, %v158_v14 }
 0x138   :  { %14844 = vrsqrt.f32 %v174_v12 }
 0x139   :  { %v175_v19 = vadd.f32 1e-12, %v167_v15  ;;  %v176_v22 = vadd.f32 1e-12, %v168_v16 }
 0x13a   :  { %v161_v24 = vpop.xlane.xlu1 %160 }
 0x13b   :  { %14846 = vrsqrt.f32 %v175_v19  ;;  %v169_v25 = vmul.f32 0.03125, %v161_v24 }
 0x13c   :  { %v14837_v27 = vpop.eup %14836  ;;  %14848 = vrsqrt.f32 %v176_v22 }
 0x13d   :  { %v177_v30 = vadd.f32 1e-12, %v169_v25  ;;  %v186_v31 = vmul.f32 %v14837_v27, %v15277_v20 }
 0x13f   :  { %14850 = vrsqrt.f32 %v177_v30  ;;  %v198_v33 = vmul.f32 %v197_v26, %v186_v31 }
 0x140   :  { %v14839_v34 = vpop.eup %14838 }
 0x141   :  { %v14841_v35 = vpop.eup %14840  ;;  %v15344_v36 = vadd.f32 %v209_v32, %v198_v33  ;;  %v187_v37 = vmul.f32 %v14839_v34, %v15285_v28 }
 0x142   :  { %v188_v40 = vmul.f32 %v14841_v35, %v15279_v21 }
 0x143   :  { %13810 = vmatprep.mubr.msk.f32.mxu0 %vm88_vm0, %v15344_v36  ;;  %v199_v41 = vmul.f32 %v197_v26, %v187_v37 }
 0x144   :  { %v14843_v42 = vpop.eup %14842  ;;  %v200_v43 = vmul.f32 %v197_v26, %v188_v40  ;;  %v15469_v40 = vld [vmem:[%s20827_s6 + $0x8] sm:$0xff] }
 0x145   :  { %v14845_v44 = vpop.eup %14844  ;;  %v15350_v20 = vadd.f32 %v209_v32, %v199_v41  ;;  %v189_v45 = vmul.f32 %v14843_v42, %v15287_v29  ;;  %v15474_v42 = vld [vmem:[%s20827_s6] sm:$0xff] }
 0x146   :  { %v15353_v46 = vadd.f32 %v209_v32, %v200_v43  ;;  %v190_v47 = vmul.f32 %v14845_v44, %v15295_v38 }
 0x147   :  { %13811 = vmatmul.mubr.msk.f32.vlgmr.msra.gmra.mxu0 %vm88_vm0, %v15350_v20  ;;  %v201_v28 = vmul.f32 %v197_v26, %v189_v45  ;;  %v15480_v45 = vld [vmem:[%s20827_s6 + $0x18] sm:$0xff] }
 0x148   :  { %v14847_v21 = vpop.eup %14846  ;;  %13813 = vmatprep.mubr.msk.f32.mxu0 %vm88_vm0, %v15353_v46  ;;  %v202_v50 = vmul.f32 %v197_v26, %v190_v47 }
 0x149   :  { %v14849_v51 = vpop.eup %14848  ;;  %v15360_v52 = vadd.f32 %v209_v32, %v201_v28  ;;  %v191_v53 = vmul.f32 %v14847_v21, %v15297_v39 }
 0x14a   :  { %v15363_v54 = vadd.f32 %v209_v32, %v202_v50  ;;  %v192_v29 = vmul.f32 %v14849_v51, %v15305_v48 }
 0x14b   :  { %13814 = vmatmul.mubr.msk.f32.gmra.mxu0 %vm88_vm0, %v15360_v52  ;;  %v203_v38 = vmul.f32 %v197_v26, %v191_v53 }
 0x14c   :  { %v14851_v55 = vpop.eup %14850  ;;  %13816 = vmatprep.mubr.msk.f32.mxu0 %vm88_vm0, %v15363_v54  ;;  %v204_v56 = vmul.f32 %v197_v26, %v192_v29  ;;  %v15489_v29 = vld [vmem:[%s20827_s6 + $0x10] sm:$0xff] }
 0x14d   :  { %v15370_v57 = vadd.f32 %v209_v32, %v203_v38  ;;  %v193_v58 = vmul.f32 %v14851_v55, %v15307_v49  ;;  %v15494_v38 = vld [vmem:[%s20827_s6 + $0x28] sm:$0xff] }
 0x14e   :  { %v15373_v59 = vadd.f32 %v209_v32, %v204_v56 }
 0x14f   :  { %13817 = vmatmul.mubr.msk.f32.gmra.mxu0 %vm88_vm0, %v15370_v57  ;;  %v205_v39 = vmul.f32 %v197_v26, %v193_v58 }
 0x150   :  { %13819 = vmatprep.mubr.msk.f32.mxu0 %vm88_vm0, %v15373_v59 }
 0x151   :  { %v15379_v48 = vadd.f32 %v209_v32, %v205_v39 }
 0x153   :  { %13820 = vmatmul.mubr.msk.f32.gmra.mxu0 %vm88_vm0, %v15379_v48 }
 0x207   :  { %v13812_v60 = vpop.f32.mrf.mxu0 }
 0x208   :  { %v15401_v11 = vadd.f32 %v13812_v60, %v12921_v61 }
 0x209   :  { %v319_v49 = vpop.f32.mrf.mxu0 }
 0x20a   :  { %v15386_v62 = vadd.f32 %v12921_v61, %v319_v49  ;;  %v15507_v49 = vld [vmem:[%s20827_s6 + $0x38] sm:$0xff] }
 0x20b   :  { %v13815_v63 = vpop.f32.mrf.mxu0 }
 0x20c   :  { %13838 = vmatprep.mubr.msk.f32.mxu1 %vm20807_vm1, %v15386_v62  ;;  %v15395_v8 = vadd.f32 %v13815_v63, %v12921_v61 }
 0x20d   :  { %v329_v0 = vpop.f32.mrf.mxu0 }
 0x20e   :  { %v15408_v13 = vadd.f32 %v12921_v61, %v329_v0 }
 0x20f   :  { %v13818_v1 = vpop.f32.mrf.mxu0 }
 0x210   :  { %v15398_v9 = vadd.f32 %v13818_v1, %v12921_v61 }
 0x211   :  { %v339_v2 = vpop.f32.mrf.mxu0 }
 0x212   :  { %v15404_v12 = vadd.f32 %v12921_v61, %v339_v2 }
 0x213   :  { %v13821_v4 = vpop.f32.mrf.mxu0 }
 0x214   :  { %v15390_v5 = vadd.f32 %v13821_v4, %v12921_v61 }
 0x215   :  { %v349_v6 = vpop.f32.mrf.mxu0 }
 0x216   :  { %v15392_v7 = vadd.f32 %v12921_v61, %v349_v6  ;;  %384 = vrot.lane.b32.xlu0 %v15390_v5, %s15103_s29  ;;  %v15502_v61 = vld [vmem:[%s20827_s6 + $0x20] sm:$0xff] }
 0x218   :  { %382 = vrot.lane.b32.xlu1 %v15392_v7, %s15103_s29 }
 0x21a   :  { %376 = vrot.lane.b32.xlu0 %v15395_v8, %s15103_s29 }
 0x21c   :  { %380 = vrot.lane.b32.xlu1 %v15398_v9, %s15103_s29 }
 0x21e   :  { %372 = vrot.lane.b32.xlu0 %v15401_v11, %s15103_s29 }
 0x220   :  { %378 = vrot.lane.b32.xlu1 %v15404_v12, %s15103_s29 }
 0x222   :  { %627 = vrot.lane.b32.xlu0 %v15390_v5, %s15104_s30 }
 0x224   :  { %374 = vrot.lane.b32.xlu1 %v15408_v13, %s15103_s29 }
 0x226   :  { %619 = vrot.lane.b32.xlu0 %v15395_v8, %s15104_s30 }
 0x228   :  { %370 = vrot.lane.b32.xlu1 %v15386_v62, %s15103_s29  ;;  %s15109_s29 = smov 112  }
 0x22a   :  { %615 = vrot.lane.b32.xlu0 %v15401_v11, %s15104_s30 }
 0x22c   :  { %623 = vrot.lane.b32.xlu1 %v15398_v9, %s15104_s30 }
 0x22e   :  { %796 = vrot.lane.b32.xlu0 %v15390_v5, %s15105_s1 }
 0x230   :  { %621 = vrot.lane.b32.xlu1 %v15404_v12, %s15104_s30 }
 0x234   :  { %617 = vrot.lane.b32.xlu1 %v15408_v13, %s15104_s30 }
 0x238   :  { %613 = vrot.lane.b32.xlu1 %v15386_v62, %s15104_s30 }
 0x23c   :  { %625 = vrot.lane.b32.xlu1 %v15392_v7, %s15104_s30 }
 0x240   :  { %794 = vrot.lane.b32.xlu1 %v15392_v7, %s15105_s1 }
 0x288   :  { %v385_v14 = vpop.permute.xlu0 %384 }
 0x289   :  { %13822 = vmatprep.subr.msk.mxu1 %vm20807_vm1, %v385_v14 }
 0x28a   :  { %13823 = vmatpush3.xpose.msk.msra.mxu1 %vm20807_vm1, %v385_v14  ;;  %v383_v15 = vpop.permute.xlu1 %382  ;;  %v15516_v14 = vld [vmem:[%s20827_s6 + $0x30] sm:$0xff] }
 0x28b   :  { %13824 = vmatprep.subr.msk.mxu1 %vm20807_vm1, %v383_v15 }
 0x28c   :  { %v377_v16 = vpop.permute.xlu0 %376 }
 0x28e   :  { %13825 = vmatpush3.xpose.msk.msra.mxu1 %vm20807_vm1, %v383_v15  ;;  %v381_v18 = vpop.permute.xlu1 %380 }
 0x28f   :  { %13826 = vmatprep.subr.msk.mxu1 %vm20807_vm1, %v381_v18 }
 0x290   :  { %v373_v19 = vpop.permute.xlu0 %372 }
 0x292   :  { %13827 = vmatpush3.xpose.msk.msra.mxu1 %vm20807_vm1, %v381_v18  ;;  %v379_v22 = vpop.permute.xlu1 %378 }
 0x293   :  { %13828 = vmatprep.subr.msk.mxu1 %vm20807_vm1, %v379_v22 }
 0x294   :  { %v628_v24 = vpop.permute.xlu0 %627 }
 0x295   :  { %13850 = vmatprep.subr.mxu0 %v628_v24 }
 0x296   :  { %13829 = vmatpush3.xpose.msk.msra.mxu1 %vm20807_vm1, %v379_v22  ;;  %13851 = vmatpush3.msra.mxu0 %v628_v24  ;;  %v375_v25 = vpop.permute.xlu1 %374 }
 0x297   :  { %13830 = vmatprep.subr.msk.mxu1 %vm20807_vm1, %v377_v16 }
 0x298   :  { %v620_v34 = vpop.permute.xlu0 %619 }
 0x29a   :  { %13831 = vmatpush3.xpose.msk.msra.mxu1 %vm20807_vm1, %v377_v16  ;;  %v371_v26 = vpop.permute.xlu1 %370 }
 0x29b   :  { %13832 = vmatprep.subr.msk.mxu1 %vm20807_vm1, %v375_v25 }
 0x29c   :  { %v616_v35 = vpop.permute.xlu0 %615 }
 0x29e   :  { %13833 = vmatpush3.xpose.msk.msra.mxu1 %vm20807_vm1, %v375_v25  ;;  %v624_v27 = vpop.permute.xlu1 %623 }
 0x29f   :  { %13834 = vmatprep.subr.msk.mxu1 %vm20807_vm1, %v373_v19 }
 0x2a0   :  { %v15462_v37 = vpop.permute.xlu0 %796 }
 0x2a2   :  { %13835 = vmatpush3.xpose.msk.msra.mxu1 %vm20807_vm1, %v373_v19  ;;  %v622_v30 = vpop.permute.xlu1 %621 }
 0x2a3   :  { %13836 = vmatprep.subr.msk.mxu1 %vm20807_vm1, %v371_v26 }
 0x2a6   :  { %13837 = vmatpush3.xpose.msk.msra.mxu1 %vm20807_vm1, %v371_v26  ;;  %v618_v31 = vpop.permute.xlu1 %617 }
 0x2a9   :  { %13839 = vmatmul.mubr.msk.f32.vlgmr.msra.gmra.mxu1 %vm20807_vm1, %v15401_v11 }
 0x2aa   :  { %13841 = vmatprep.mubr.msk.f32.mxu1 %vm20807_vm1, %v15408_v13  ;;  %v614_v32 = vpop.permute.xlu1 %613 }
 0x2ad   :  { %13842 = vmatmul.mubr.msk.f32.gmra.mxu1 %vm20807_vm1, %v15395_v8 }
 0x2ae   :  { %13844 = vmatprep.mubr.msk.f32.mxu1 %vm20807_vm1, %v15404_v12  ;;  %v626_v33 = vpop.permute.xlu1 %625 }
 0x2af   :  { %13852 = vmatprep.subr.mxu0 %v626_v33 }
 0x2b0   :  { %13853 = vmatpush3.msra.mxu0 %v626_v33 }
 0x2b1   :  { %13845 = vmatmul.mubr.msk.f32.gmra.mxu1 %vm20807_vm1, %v15398_v9  ;;  %13854 = vmatprep.subr.mxu0 %v624_v27 }
 0x2b2   :  { %13847 = vmatprep.mubr.msk.f32.mxu1 %vm20807_vm1, %v15392_v7  ;;  %13855 = vmatpush3.msra.mxu0 %v624_v27  ;;  %v15526_v22 = vpop.permute.xlu1 %794 }
 0x2b3   :  { %13856 = vmatprep.subr.mxu0 %v622_v30 }
 0x2b4   :  { %13857 = vmatpush3.msra.mxu0 %v622_v30 }
 0x2b5   :  { %13848 = vmatmul.mubr.msk.f32.gmra.mxu1 %vm20807_vm1, %v15390_v5  ;;  %13858 = vmatprep.subr.mxu0 %v620_v34 }
 0x2b6   :  { %13859 = vmatpush3.msra.mxu0 %v620_v34 }
 0x2b7   :  { %13860 = vmatprep.subr.mxu0 %v618_v31 }
 0x2b8   :  { %13861 = vmatpush3.msra.mxu0 %v618_v31 }
 0x2b9   :  { %13862 = vmatprep.subr.mxu0 %v616_v35 }
 0x2ba   :  { %13863 = vmatpush3.msra.mxu0 %v616_v35 }
 0x2bb   :  { %13864 = vmatprep.subr.mxu0 %v614_v32 }
 0x2bc   :  { %13865 = vmatpush3.msra.mxu0 %v614_v32 }
 0x2bd   :  { %13878 = vmatprep.subr.msk.mxu0 %vm20807_vm1, %v15462_v37 }
 0x369   :  { %v13840_v41 = vpop.f32.mrf.mxu1 }
 0x36a   :  { %v491_v43 = vadd.f32 %v13840_v41, %v15469_v40 }
 0x36b   :  { %v485_v44 = vpop.f32.mrf.mxu1 }
 0x36c   :  { %v486_v47 = vadd.f32 %v485_v44, %v15474_v42  ;;  %v528_v28 = vsel %vm524_vm2, %v491_v43, -inf }
 0x36d   :  { %529 = vmax.xlane.f32.xlu1 %v528_v28  ;;  %v13843_v21 = vpop.f32.mrf.mxu1 }
 0x36e   :  { %v501_v50 = vadd.f32 %v13843_v21, %v15480_v45  ;;  %v525_v51 = vsel %vm524_vm2, %v486_v47, -inf }
 0x36f   :  { %v495_v53 = vpop.f32.mrf.mxu1  ;;  %526 = vmax.xlane.f32.xlu0 %v525_v51 }
 0x370   :  { %v496_v56 = vadd.f32 %v495_v53, %v15489_v29  ;;  %v534_v39 = vsel %vm524_vm2, %v501_v50, -inf }
 0x371   :  { %v13846_v55 = vpop.f32.mrf.mxu1 }
 0x372   :  { %v511_v58 = vadd.f32 %v13846_v55, %v15494_v38  ;;  %v531_v4 = vsel %vm524_vm2, %v496_v56, -inf }
 0x373   :  { %v505_v60 = vpop.f32.mrf.mxu1  ;;  %535 = vmax.xlane.f32.xlu0 %v534_v39 }
 0x374   :  { %v540_v63 = vsel %vm524_vm2, %v511_v58, -inf  ;;  %v506_v1 = vadd.f32 %v505_v60, %v15502_v61 }
 0x375   :  { %541 = vmax.xlane.f32.xlu1 %v540_v63  ;;  %v13849_v0 = vpop.f32.mrf.mxu1 }
 0x376   :  { %v521_v2 = vadd.f32 %v13849_v0, %v15507_v49  ;;  %v537_v18 = vsel %vm524_vm2, %v506_v1, -inf }
 0x377   :  { %v515_v6 = vpop.f32.mrf.mxu1  ;;  %532 = vmax.xlane.f32.xlu0 %v531_v4 }
 0x378   :  { %v546_v15 = vsel %vm524_vm2, %v521_v2, -inf  ;;  %v516_v16 = vadd.f32 %v515_v6, %v15516_v14 }
 0x379   :  { %547 = vmax.xlane.f32.xlu1 %v546_v15 }
 0x37a   :  { %v543_v19 = vsel %vm524_vm2, %v516_v16, -inf }
 0x37b   :  { %538 = vmax.xlane.f32.xlu0 %v537_v18 }
 0x37f   :  { %544 = vmax.xlane.f32.xlu0 %v543_v19 }
 0x38a   :  { %790 = vrot.lane.b32.xlu1 %v15404_v12, %s15105_s1 }
 0x395   :  { %792 = vrot.lane.b32.xlu0 %v15398_v9, %s15105_s1 }
 0x3f6   :  { %v530_v24 = vpop.xlane.xlu1 %529 }
 0x3f7   :  { %v550_v25 = vsub.f32 %v491_v43, %v530_v24 }
 0x3f8   :  { %v527_v26 = vpop.xlane.xlu0 %526 }
 0x3f9   :  { %v559_v27 = vmul.f32 1.442695, %v550_v25  ;;  %v549_v30 = vsub.f32 %v486_v47, %v527_v26 }
 0x3fb   :  { %14852 = vpow2.f32 %v559_v27  ;;  %v557_v31 = vmul.f32 1.442695, %v549_v30 }
 0x3fc   :  { %v536_v41 = vpop.xlane.xlu0 %535 }
 0x3fd   :  { %14854 = vpow2.f32 %v557_v31  ;;  %v552_v47 = vsub.f32 %v501_v50, %v536_v41 }
 0x3fe   :  { %v542_v44 = vpop.xlane.xlu1 %541 }
 0x3ff   :  { %v563_v51 = vmul.f32 1.442695, %v552_v47  ;;  %v554_v53 = vsub.f32 %v511_v58, %v542_v44 }
 0x400   :  { %v533_v43 = vpop.xlane.xlu0 %532 }
 0x401   :  { %v551_v21 = vsub.f32 %v496_v56, %v533_v43  ;;  %14856 = vpow2.f32 %v563_v51  ;;  %v567_v0 = vmul.f32 1.442695, %v554_v53 }
 0x402   :  { %v548_v55 = vpop.xlane.xlu1 %547 }
 0x403   :  { %v561_v39 = vmul.f32 1.442695, %v551_v21  ;;  %v556_v4 = vsub.f32 %v521_v2, %v548_v55 }
 0x404   :  { %v539_v28 = vpop.xlane.xlu0 %538 }
 0x405   :  { %v553_v60 = vsub.f32 %v506_v1, %v539_v28  ;;  %14858 = vpow2.f32 %v561_v39  ;;  %v571_v18 = vmul.f32 1.442695, %v556_v4 }
 0x406   :  { %14860 = vpow2.f32 %v567_v0 }
 0x407   :  { %v565_v6 = vmul.f32 1.442695, %v553_v60 }
 0x408   :  { %v15528_v32 = vpop.eup %14852  ;;  %v545_v63 = vpop.xlane.xlu0 %544 }
 0x409   :  { %v576_v33 = vsel %vm524_vm2, %v15528_v32, 0.0  ;;  %v555_v15 = vsub.f32 %v516_v16, %v545_v63  ;;  %14862 = vpow2.f32 %v565_v6 }
 0x40a   :  { %v15532_v34 = vpop.eup %14854  ;;  %577 = vadd.xlane.f32.xlu1 %v576_v33  ;;  %14864 = vpow2.f32 %v571_v18  ;;  %v791_v33 = vpop.permute.xlu1 %790 }
 0x40b   :  { %v573_v35 = vsel %vm524_vm2, %v15532_v34, 0.0  ;;  %v569_v19 = vmul.f32 1.442695, %v555_v15 }
 0x40c   :  { %574 = vadd.xlane.f32.xlu0 %v573_v35  ;;  %v793_v35 = vpop.permute.xlu0 %792 }
 0x40d   :  { %14866 = vpow2.f32 %v569_v19 }
 0x40e   :  { %v15540_v50 = vpop.eup %14856 }
 0x40f   :  { %v582_v58 = vsel %vm524_vm2, %v15540_v50, 0.0 }
 0x412   :  { %v15542_v56 = vpop.eup %14858 }
 0x413   :  { %v15546_v1 = vpop.eup %14860  ;;  %v579_v2 = vsel %vm524_vm2, %v15542_v56, 0.0 }
 0x414   :  { %v588_v24 = vsel %vm524_vm2, %v15546_v1, 0.0 }
 0x416   :  { %v15550_v16 = vpop.eup %14862 }
 0x417   :  { %v15554_v25 = vpop.eup %14864  ;;  %v585_v26 = vsel %vm524_vm2, %v15550_v16, 0.0 }
 0x418   :  { %v594_v30 = vsel %vm524_vm2, %v15554_v25, 0.0 }
 0x41a   :  { %v15558_v27 = vpop.eup %14866 }
 0x41b   :  { %786 = vrot.lane.b32.xlu1 %v15408_v13, %s15105_s1  ;;  %v591_v31 = vsel %vm524_vm2, %v15558_v27, 0.0 }
 0x422   :  { %788 = vrot.lane.b32.xlu0 %v15395_v8, %s15105_s1 }
 0x43f   :  { %583 = vadd.xlane.f32.xlu1 %v582_v58 }
 0x441   :  { %580 = vadd.xlane.f32.xlu0 %v579_v2 }
 0x443   :  { %589 = vadd.xlane.f32.xlu1 %v588_v24 }
 0x445   :  { %586 = vadd.xlane.f32.xlu0 %v585_v26 }
 0x447   :  { %595 = vadd.xlane.f32.xlu1 %v594_v30 }
 0x449   :  { %592 = vadd.xlane.f32.xlu0 %v591_v31 }
 0x458   :  { %782 = vrot.lane.b32.xlu1 %v15386_v62, %s15105_s1 }
 0x45c   :  { %768 = vrot.lane.b32.xlu1 %v15401_v11, %s15106_s25 }
 0x45f   :  { %784 = vrot.lane.b32.xlu0 %v15401_v11, %s15105_s1 }
 0x460   :  { %772 = vrot.lane.b32.xlu1 %v15395_v8, %s15106_s25 }
 0x463   :  { %766 = vrot.lane.b32.xlu0 %v15386_v62, %s15106_s25 }
 0x464   :  { %776 = vrot.lane.b32.xlu1 %v15398_v9, %s15106_s25 }
 0x467   :  { %770 = vrot.lane.b32.xlu0 %v15408_v13, %s15106_s25 }
 0x468   :  { %780 = vrot.lane.b32.xlu1 %v15390_v5, %s15106_s25 }
 0x46b   :  { %774 = vrot.lane.b32.xlu0 %v15404_v12, %s15106_s25 }
 0x46c   :  { %1035 = vrot.lane.b32.xlu1 %v15392_v7, %s15107_s26 }
 0x46f   :  { %778 = vrot.lane.b32.xlu0 %v15392_v7, %s15106_s25 }
 0x473   :  { %1037 = vrot.lane.b32.xlu0 %v15390_v5, %s15107_s26 }
 0x493   :  { %v578_v41 = vpop.xlane.xlu1 %577 }
 0x494   :  { %14868 = vrcp.f32 %v578_v41 }
 0x495   :  { %v575_v43 = vpop.xlane.xlu0 %574 }
 0x496   :  { %14870 = vrcp.f32 %v575_v43 }
 0x4a1   :  { %v14869_v44 = vpop.eup %14868 }
 0x4a2   :  { %v600_v21 = vmul.f32 %v14869_v44, %v15528_v32  ;;  %v789_v32 = vpop.permute.xlu0 %788  ;;  %v358_v44 = vld [vmem:[%s20828_s7] sm:$0xff] }
 0x4a3   :  { %v14871_v47 = vpop.eup %14870 }
 0x4a4   :  { %v598_v28 = vmul.f32 %v14871_v47, %v15532_v34  ;;  %v787_v34 = vpop.permute.xlu1 %786 }
 0x4a6   :  { %13866 = vmatprep.mubr.msk.f32.mxu0 %vm524_vm2, %v598_v28 }
 0x4a7   :  { %13867 = vmatmul.mubr.msk.f32.vlgmr.msra.gmra.mxu0 %vm524_vm2, %v600_v21 }
 0x4a8   :  { %13879 = vmatpush3.xpose.msk.msra.mxu0 %vm20807_vm1, %v15462_v37 }
 0x4a9   :  { %13880 = vmatprep.subr.msk.mxu0 %vm20807_vm1, %v15526_v22 }
 0x4ac   :  { %13881 = vmatpush3.xpose.msk.msra.mxu0 %vm20807_vm1, %v15526_v22 }
 0x4ad   :  { %13882 = vmatprep.subr.msk.mxu0 %vm20807_vm1, %v793_v35 }
 0x4b0   :  { %13883 = vmatpush3.xpose.msk.msra.mxu0 %vm20807_vm1, %v793_v35 }
 0x4b1   :  { %13884 = vmatprep.subr.msk.mxu0 %vm20807_vm1, %v791_v33 }
 0x4b4   :  { %13885 = vmatpush3.xpose.msk.msra.mxu0 %vm20807_vm1, %v791_v33 }
 0x4b5   :  { %13886 = vmatprep.subr.msk.mxu0 %vm20807_vm1, %v789_v32 }
 0x4b8   :  { %13887 = vmatpush3.xpose.msk.msra.mxu0 %vm20807_vm1, %v789_v32 }
 0x4b9   :  { %13888 = vmatprep.subr.msk.mxu0 %vm20807_vm1, %v787_v34 }
 0x4bc   :  { %13889 = vmatpush3.xpose.msk.msra.mxu0 %vm20807_vm1, %v787_v34 }
 0x4c8   :  { %v584_v37 = vpop.xlane.xlu1 %583 }
 0x4c9   :  { %14872 = vrcp.f32 %v584_v37 }
 0x4ca   :  { %v581_v22 = vpop.xlane.xlu0 %580 }
 0x4cb   :  { %14874 = vrcp.f32 %v581_v22 }
 0x4cc   :  { %v590_v51 = vpop.xlane.xlu1 %589 }
 0x4cd   :  { %14876 = vrcp.f32 %v590_v51 }
 0x4ce   :  { %v587_v53 = vpop.xlane.xlu0 %586 }
 0x4cf   :  { %14878 = vrcp.f32 %v587_v53 }
 0x4d0   :  { %v596_v55 = vpop.xlane.xlu1 %595 }
 0x4d1   :  { %14880 = vrcp.f32 %v596_v55 }
 0x4d2   :  { %v593_v39 = vpop.xlane.xlu0 %592 }
 0x4d3   :  { %14882 = vrcp.f32 %v593_v39 }
 0x4d4   :  { %v783_v60 = vpop.permute.xlu1 %782 }
 0x4d6   :  { %v785_v63 = vpop.permute.xlu0 %784  ;;  %v14873_v0 = vpop.eup %14872 }
 0x4d7   :  { %13890 = vmatprep.subr.msk.mxu0 %vm20807_vm1, %v785_v63  ;;  %v604_v19 = vmul.f32 %v14873_v0, %v15540_v50 }
 0x4d8   :  { %v14875_v4 = vpop.eup %14874  ;;  %13891 = vmatpush3.xpose.msk.msra.mxu0 %vm20807_vm1, %v785_v63  ;;  %v769_v6 = vpop.permute.xlu1 %768 }
 0x4d9   :  { %13892 = vmatprep.subr.msk.mxu0 %vm20807_vm1, %v783_v60  ;;  %v602_v15 = vmul.f32 %v14875_v4, %v15542_v56 }
 0x4da   :  { %v767_v18 = vpop.permute.xlu0 %766  ;;  %v14877_v58 = vpop.eup %14876 }
 0x4db   :  { %13869 = vmatprep.mubr.msk.f32.mxu0 %vm524_vm2, %v602_v15  ;;  %v608_v31 = vmul.f32 %v14877_v58, %v15546_v1 }
 0x4dc   :  { %v14879_v2 = vpop.eup %14878  ;;  %13870 = vmatmul.mubr.msk.f32.gmra.mxu0 %vm524_vm2, %v604_v19  ;;  %v773_v24 = vpop.permute.xlu1 %772 }
 0x4dd   :  { %13893 = vmatpush3.xpose.msk.msra.mxu0 %vm20807_vm1, %v783_v60  ;;  %v606_v26 = vmul.f32 %v14879_v2, %v15550_v16 }
 0x4de   :  { %v771_v30 = vpop.permute.xlu0 %770  ;;  %v14881_v33 = vpop.eup %14880  ;;  %13948 = vmatprep.subr.mxu0 %v358_v44 }
 0x4df   :  { %13872 = vmatprep.mubr.msk.f32.mxu0 %vm524_vm2, %v606_v26  ;;  %v612_v43 = vmul.f32 %v14881_v33, %v15554_v25 }
 0x4e0   :  { %v14883_v56 = vpop.eup %14882  ;;  %13873 = vmatmul.mubr.msk.f32.gmra.mxu0 %vm524_vm2, %v608_v31  ;;  %v777_v50 = vpop.permute.xlu1 %776 }
 0x4e1   :  { %v610_v35 = vmul.f32 %v14883_v56, %v15558_v27 }
 0x4e2   :  { %v775_v41 = vpop.permute.xlu0 %774 }
 0x4e3   :  { %13875 = vmatprep.mubr.msk.f32.mxu0 %vm524_vm2, %v610_v35 }
 0x4e4   :  { %13876 = vmatmul.mubr.msk.f32.gmra.mxu0 %vm524_vm2, %v612_v43  ;;  %v781_v16 = vpop.permute.xlu1 %780 }
 0x4e5   :  { %13894 = vmatprep.mubr.msk.f32.mxu0 %vm20807_vm1, %v767_v18 }
 0x4e6   :  { %v779_v1 = vpop.permute.xlu0 %778 }
 0x4e8   :  { %13895 = vmatmul.mubr.msk.f32.vlgmr.msra.gmra.mxu0 %vm20807_vm1, %v769_v6  ;;  %v1036_v25 = vpop.permute.xlu1 %1035 }
 0x4e9   :  { %13897 = vmatprep.mubr.msk.f32.mxu0 %vm20807_vm1, %v771_v30  ;;  %13949 = vmatpush3.msra.mxu0 %v358_v44 }
 0x4ea   :  { %v1038_v27 = vpop.permute.xlu0 %1037 }
 0x4eb   :  { %13906 = vmatprep.subr.mxu1 %v1038_v27 }
 0x4ec   :  { %13898 = vmatmul.mubr.msk.f32.gmra.mxu0 %vm20807_vm1, %v773_v24  ;;  %13907 = vmatpush3.msra.mxu1 %v1038_v27 }
 0x4ed   :  { %13900 = vmatprep.mubr.msk.f32.mxu0 %vm20807_vm1, %v775_v41  ;;  %13908 = vmatprep.subr.mxu1 %v1036_v25 }
 0x4ee   :  { %13909 = vmatpush3.msra.mxu1 %v1036_v25 }
 0x4f0   :  { %13901 = vmatmul.mubr.msk.f32.gmra.mxu0 %vm20807_vm1, %v777_v50 }
 0x4f1   :  { %13903 = vmatprep.mubr.msk.f32.mxu0 %vm20807_vm1, %v779_v1 }
 0x4f4   :  { %13904 = vmatmul.mubr.msk.f32.gmra.mxu0 %vm20807_vm1, %v781_v16 }
 0x567   :  { %v13868_v47 = vpop.f32.mrf.mxu0 }
 0x569   :  { %v727_v28 = vpop.f32.mrf.mxu0 }
 0x56a   :  { %13950 = vmatprep.mubr.msk.f32.mxu0 %vm20807_vm1, %v727_v28 }
 0x56b   :  { %13951 = vmatmul.mubr.msk.f32.vlgmr.msra.gmra.mxu0 %vm20807_vm1, %v13868_v47 }
 0x59c   :  { %v13871_v21 = vpop.f32.mrf.mxu0 }
 0x59e   :  { %v737_v32 = vpop.f32.mrf.mxu0 }
 0x59f   :  { %13953 = vmatprep.mubr.msk.f32.mxu0 %vm20807_vm1, %v737_v32 }
 0x5a0   :  { %v13874_v34 = vpop.f32.mrf.mxu0  ;;  %13954 = vmatmul.mubr.msk.f32.gmra.mxu0 %vm20807_vm1, %v13871_v21 }
 0x5a2   :  { %v747_v37 = vpop.f32.mrf.mxu0 }
 0x5a3   :  { %13956 = vmatprep.mubr.msk.f32.mxu0 %vm20807_vm1, %v747_v37 }
 0x5a4   :  { %v13877_v22 = vpop.f32.mrf.mxu0  ;;  %13957 = vmatmul.mubr.msk.f32.gmra.mxu0 %vm20807_vm1, %v13874_v34 }
 0x5a6   :  { %v757_v51 = vpop.f32.mrf.mxu0 }
 0x5a7   :  { %13959 = vmatprep.mubr.msk.f32.mxu0 %vm20807_vm1, %v757_v51 }
 0x5a8   :  { %v13896_v53 = vpop.f32.mrf.mxu0  ;;  %13960 = vmatmul.mubr.msk.f32.gmra.mxu0 %vm20807_vm1, %v13877_v22 }
 0x5a9   :  { %v902_v55 = vadd.f32 %v13896_v53, %v15469_v40 }
 0x5aa   :  { %v896_v39 = vpop.f32.mrf.mxu0 }
 0x5ab   :  { %v897_v60 = vadd.f32 %v896_v39, %v15474_v42  ;;  %v938_v63 = vsel %vm524_vm2, %v902_v55, -inf }
 0x5ac   :  { %939 = vmax.xlane.f32.xlu1 %v938_v63  ;;  %v13899_v0 = vpop.f32.mrf.mxu0 }
 0x5ad   :  { %v912_v4 = vadd.f32 %v13899_v0, %v15480_v45  ;;  %v935_v6 = vsel %vm524_vm2, %v897_v60, -inf }
 0x5ae   :  { %936 = vmax.xlane.f32.xlu0 %v935_v6  ;;  %v906_v15 = vpop.f32.mrf.mxu0 }
 0x5af   :  { %v907_v19 = vadd.f32 %v906_v15, %v15489_v29  ;;  %v944_v40 = vsel %vm524_vm2, %v912_v4, -inf }
 0x5b0   :  { %v13902_v18 = vpop.f32.mrf.mxu0 }
 0x5b1   :  { %v15640_v58 = vadd.f32 %v13902_v18, %v15494_v38  ;;  %v941_v30 = vsel %vm524_vm2, %v907_v19, -inf }
 0x5b2   :  { %945 = vmax.xlane.f32.xlu0 %v944_v40  ;;  %v916_v42 = vpop.f32.mrf.mxu0 }
 0x5b3   :  { %v950_v2 = vsel %vm524_vm2, %v15640_v58, -inf  ;;  %v917_v45 = vadd.f32 %v916_v42, %v15502_v61 }
 0x5b4   :  { %951 = vmax.xlane.f32.xlu1 %v950_v2  ;;  %v13905_v24 = vpop.f32.mrf.mxu0 }
 0x5b5   :  { %v932_v26 = vadd.f32 %v13905_v24, %v15507_v49  ;;  %v947_v31 = vsel %vm524_vm2, %v917_v45, -inf }
 0x5b6   :  { %942 = vmax.xlane.f32.xlu0 %v941_v30  ;;  %v926_v61 = vpop.f32.mrf.mxu0 }
 0x5b7   :  { %v956_v29 = vsel %vm524_vm2, %v932_v26, -inf  ;;  %v927_v33 = vadd.f32 %v926_v61, %v15516_v14 }
 0x5b8   :  { %957 = vmax.xlane.f32.xlu1 %v956_v29 }
 0x5b9   :  { %v953_v56 = vsel %vm524_vm2, %v927_v33, -inf }
 0x5ba   :  { %948 = vmax.xlane.f32.xlu0 %v947_v31 }
 0x5c9   :  { %1033 = vrot.lane.b32.xlu1 %v15398_v9, %s15107_s26 }
 0x5d0   :  { %1031 = vrot.lane.b32.xlu0 %v15404_v12, %s15107_s26 }
 0x5d4   :  { %1029 = vrot.lane.b32.xlu0 %v15395_v8, %s15107_s26 }
 0x5f3   :  { %954 = vmax.xlane.f32.xlu0 %v953_v56 }
 0x635   :  { %v940_v50 = vpop.xlane.xlu1 %939 }
 0x636   :  { %v960_v35 = vsub.f32 %v902_v55, %v940_v50 }
 0x637   :  { %v937_v41 = vpop.xlane.xlu0 %936 }
 0x638   :  { %v969_v43 = vmul.f32 1.442695, %v960_v35  ;;  %v959_v16 = vsub.f32 %v897_v60, %v937_v41 }
 0x63a   :  { %14884 = vpow2.f32 %v969_v43  ;;  %v967_v1 = vmul.f32 1.442695, %v959_v16 }
 0x63b   :  { %v946_v44 = vpop.xlane.xlu0 %945 }
 0x63c   :  { %14886 = vpow2.f32 %v967_v1  ;;  %v962_v27 = vsub.f32 %v912_v4, %v946_v44 }
 0x63d   :  { %v952_v25 = vpop.xlane.xlu1 %951 }
 0x63e   :  { %v973_v47 = vmul.f32 1.442695, %v962_v27  ;;  %v964_v15 = vsub.f32 %v15640_v58, %v952_v25 }
 0x63f   :  { %v943_v28 = vpop.xlane.xlu0 %942 }
 0x640   :  { %14888 = vpow2.f32 %v973_v47  ;;  %v961_v0 = vsub.f32 %v907_v19, %v943_v28  ;;  %v977_v40 = vmul.f32 1.442695, %v964_v15 }
 0x641   :  { %v958_v21 = vpop.xlane.xlu1 %957 }
 0x642   :  { %v971_v4 = vmul.f32 1.442695, %v961_v0  ;;  %v966_v42 = vsub.f32 %v932_v26, %v958_v21 }
 0x643   :  { %v949_v32 = vpop.xlane.xlu0 %948 }
 0x644   :  { %v963_v6 = vsub.f32 %v917_v45, %v949_v32  ;;  %14890 = vpow2.f32 %v971_v4  ;;  %v981_v2 = vmul.f32 1.442695, %v966_v42 }
 0x645   :  { %v1034_v34 = vpop.permute.xlu1 %1033 }
 0x646   :  { %13910 = vmatprep.subr.mxu1 %v1034_v34  ;;  %v975_v18 = vmul.f32 1.442695, %v963_v6 }
 0x647   :  { %v15658_v37 = vpop.eup %14884  ;;  %v1032_v22 = vpop.permute.xlu0 %1031  ;;  %13911 = vmatpush3.msra.mxu1 %v1034_v34 }
 0x648   :  { %13912 = vmatprep.subr.mxu1 %v1032_v22  ;;  %v986_v51 = vsel %vm524_vm2, %v15658_v37, 0.0  ;;  %14892 = vpow2.f32 %v975_v18 }
 0x649   :  { %v15662_v53 = vpop.eup %14886  ;;  %987 = vadd.xlane.f32.xlu1 %v986_v51  ;;  %13913 = vmatpush3.msra.mxu1 %v1032_v22  ;;  %14894 = vpow2.f32 %v977_v40 }
 0x64a   :  { %v983_v55 = vsel %vm524_vm2, %v15662_v53, 0.0  ;;  %14896 = vpow2.f32 %v981_v2 }
 0x64b   :  { %v1030_v39 = vpop.permute.xlu0 %1029  ;;  %984 = vadd.xlane.f32.xlu0 %v983_v55 }
 0x64c   :  { %13914 = vmatprep.subr.mxu1 %v1030_v39 }
 0x64d   :  { %v15666_v60 = vpop.eup %14888  ;;  %13915 = vmatpush3.msra.mxu1 %v1030_v39 }
 0x64e   :  { %v992_v63 = vsel %vm524_vm2, %v15666_v60, 0.0 }
 0x64f   :  { %993 = vadd.xlane.f32.xlu0 %v992_v63 }
 0x651   :  { %v15675_v24 = vpop.eup %14890 }
 0x652   :  { %v989_v19 = vsel %vm524_vm2, %v15675_v24, 0.0 }
 0x655   :  { %v15679_v31 = vpop.eup %14892 }
 0x656   :  { %v995_v58 = vsel %vm524_vm2, %v15679_v31, 0.0  ;;  %v15683_v26 = vpop.eup %14894 }
 0x657   :  { %v998_v61 = vsel %vm524_vm2, %v15683_v26, 0.0  ;;  %v15687_v56 = vpop.eup %14896 }
 0x65a   :  { %1027 = vrot.lane.b32.xlu1 %v15408_v13, %s15107_s26 }
 0x665   :  { %1025 = vrot.lane.b32.xlu0 %v15401_v11, %s15107_s26 }
 0x67c   :  { %v955_v30 = vpop.xlane.xlu0 %954 }
 0x67d   :  { %v965_v29 = vsub.f32 %v927_v33, %v955_v30  ;;  %v1004_v33 = vsel %vm524_vm2, %v15687_v56, 0.0 }
 0x67e   :  { %990 = vadd.xlane.f32.xlu1 %v989_v19 }
 0x67f   :  { %v979_v45 = vmul.f32 1.442695, %v965_v29 }
 0x681   :  { %14898 = vpow2.f32 %v979_v45 }
 0x682   :  { %996 = vadd.xlane.f32.xlu1 %v995_v58 }
 0x686   :  { %999 = vadd.xlane.f32.xlu1 %v998_v61 }
 0x68a   :  { %1005 = vadd.xlane.f32.xlu1 %v1004_v33 }
 0x68e   :  { %v15691_v50 = vpop.eup %14898 }
 0x68f   :  { %v1001_v35 = vsel %vm524_vm2, %v15691_v50, 0.0 }
 0x690   :  { %1002 = vadd.xlane.f32.xlu0 %v1001_v35 }
 0x69b   :  { %1464 = vrot.lane.b32.xlu1 %v15390_v5, %s15108_s28 }
 0x69f   :  { %1462 = vrot.lane.b32.xlu1 %v15392_v7, %s15108_s28 }
 0x6a3   :  { %1458 = vrot.lane.b32.xlu1 %v15404_v12, %s15108_s28 }
 0x6a6   :  { %1023 = vrot.lane.b32.xlu0 %v15386_v62, %s15107_s26 }
 0x6a7   :  { %1454 = vrot.lane.b32.xlu1 %v15408_v13, %s15108_s28 }
 0x6aa   :  { %1460 = vrot.lane.b32.xlu0 %v15398_v9, %s15108_s28 }
 0x6ab   :  { %1450 = vrot.lane.b32.xlu1 %v15386_v62, %s15108_s28 }
 0x6ae   :  { %1456 = vrot.lane.b32.xlu0 %v15395_v8, %s15108_s28 }
 0x6af   :  { %1436 = vrot.lane.b32.xlu1 %v15401_v11, %s15109_s29 }
 0x6b2   :  { %1452 = vrot.lane.b32.xlu0 %v15401_v11, %s15108_s28 }
 0x6b3   :  { %1440 = vrot.lane.b32.xlu1 %v15395_v8, %s15109_s29 }
 0x6b6   :  { %1434 = vrot.lane.b32.xlu0 %v15386_v62, %s15109_s29 }
 0x6b7   :  { %1444 = vrot.lane.b32.xlu1 %v15398_v9, %s15109_s29 }
 0x6ba   :  { %1438 = vrot.lane.b32.xlu0 %v15408_v13, %s15109_s29 }
 0x6bb   :  { %1448 = vrot.lane.b32.xlu1 %v15390_v5, %s15109_s29 }
 0x6be   :  { %1442 = vrot.lane.b32.xlu0 %v15404_v12, %s15109_s29 }
 0x6bf   :  { %2009 = vrot.lane.b32.xlu1 %v15392_v7, %s15110_s0 }
 0x6c2   :  { %1446 = vrot.lane.b32.xlu0 %v15392_v7, %s15109_s29 }
 0x6c3   :  { %2005 = vrot.lane.b32.xlu1 %v15404_v12, %s15110_s0 }
 0x6c6   :  { %2011 = vrot.lane.b32.xlu0 %v15390_v5, %s15110_s0 }
 0x6c7   :  { %2001 = vrot.lane.b32.xlu1 %v15408_v13, %s15110_s0 }
 0x6ca   :  { %2007 = vrot.lane.b32.xlu0 %v15398_v9, %s15110_s0 }
 0x6cb   :  { %1997 = vrot.lane.b32.xlu1 %v15386_v62, %s15110_s0 }
 0x6ce   :  { %2003 = vrot.lane.b32.xlu0 %v15395_v8, %s15110_s0 }
 0x6cf   :  { %1983 = vrot.lane.b32.xlu1 %v15401_v11, %s15111_s23 }
 0x6d2   :  { %1999 = vrot.lane.b32.xlu0 %v15401_v11, %s15110_s0  ;;  %v988_v41 = vpop.xlane.xlu1 %987 }
 0x6d3   :  { %1987 = vrot.lane.b32.xlu1 %v15395_v8, %s15111_s23 }
 0x6d4   :  { %v985_v43 = vpop.xlane.xlu0 %984 }
 0x6d5   :  { %14900 = vrcp.f32 %v985_v43 }
 0x6d6   :  { %1981 = vrot.lane.b32.xlu0 %v15386_v62, %s15111_s23  ;;  %v1028_v16 = vpop.permute.xlu1 %1027  ;;  %14902 = vrcp.f32 %v988_v41 }
 0x6d7   :  { %1991 = vrot.lane.b32.xlu1 %v15398_v9, %s15111_s23  ;;  %13916 = vmatprep.subr.mxu1 %v1028_v16 }
 0x6d8   :  { %v994_v1 = vpop.xlane.xlu0 %993  ;;  %13917 = vmatpush3.msra.mxu1 %v1028_v16 }
 0x6da   :  { %1985 = vrot.lane.b32.xlu0 %v15408_v13, %s15111_s23 }
 0x6db   :  { %1995 = vrot.lane.b32.xlu1 %v15390_v5, %s15111_s23 }
 0x6dc   :  { %v1026_v44 = vpop.permute.xlu0 %1025 }
 0x6dd   :  { %13918 = vmatprep.subr.mxu1 %v1026_v44 }
 0x6de   :  { %1989 = vrot.lane.b32.xlu0 %v15404_v12, %s15111_s23  ;;  %13919 = vmatpush3.msra.mxu1 %v1026_v44 }
 0x6e2   :  { %v14901_v27 = vpop.eup %14900  ;;  %1993 = vrot.lane.b32.xlu0 %v15392_v7, %s15111_s23  ;;  %s15113_s23 = smov 40  }
 0x6e3   :  { %v1008_v25 = vmul.f32 %v14901_v27, %v15662_v53  ;;  %v14903_v22 = vpop.eup %14902  ;;  %v359_v53 = vld [vmem:[%s20828_s7 + $0x8] sm:$0xff] }
 0x6e4   :  { %v1010_v39 = vmul.f32 %v14903_v22, %v15658_v37 }
 0x6e5   :  { %13922 = vmatprep.mubr.msk.f32.mxu1 %vm524_vm2, %v1008_v25 }
 0x707   :  { %v991_v47 = vpop.xlane.xlu1 %990 }
 0x708   :  { %14904 = vrcp.f32 %v991_v47 }
 0x709   :  { %14906 = vrcp.f32 %v994_v1 }
 0x70b   :  { %v997_v28 = vpop.xlane.xlu1 %996 }
 0x70c   :  { %14908 = vrcp.f32 %v997_v28 }
 0x70f   :  { %v1000_v21 = vpop.xlane.xlu1 %999 }
 0x710   :  { %14910 = vrcp.f32 %v1000_v21 }
 0x713   :  { %v1006_v32 = vpop.xlane.xlu1 %1005 }
 0x714   :  { %14912 = vrcp.f32 %v1006_v32 }
 0x715   :  { %v14905_v51 = vpop.eup %14904 }
 0x716   :  { %v14907_v63 = vpop.eup %14906  ;;  %v1012_v0 = vmul.f32 %v14905_v51, %v15675_v24 }
 0x717   :  { %v1465_v6 = vpop.permute.xlu1 %1464  ;;  %v1014_v15 = vmul.f32 %v14907_v63, %v15666_v60 }
 0x719   :  { %v1003_v34 = vpop.xlane.xlu0 %1002  ;;  %v14909_v4 = vpop.eup %14908 }
 0x71a   :  { %14914 = vrcp.f32 %v1003_v34  ;;  %v1016_v37 = vmul.f32 %v14909_v4, %v15679_v31 }
 0x71b   :  { %v1463_v19 = vpop.permute.xlu1 %1462 }
 0x71d   :  { %v1024_v55 = vpop.permute.xlu0 %1023  ;;  %v14911_v18 = vpop.eup %14910 }
 0x71e   :  { %13920 = vmatprep.subr.mxu1 %v1024_v55  ;;  %v1018_v42 = vmul.f32 %v14911_v18, %v15683_v26 }
 0x71f   :  { %13921 = vmatpush3.msra.mxu1 %v1024_v55  ;;  %v1459_v45 = vpop.permute.xlu1 %1458 }
 0x720   :  { %13923 = vmatmul.mubr.msk.f32.vlgmr.msra.gmra.mxu1 %vm524_vm2, %v1010_v39  ;;  %13934 = vmatprep.subr.mxu1 %v359_v53 }
 0x721   :  { %13925 = vmatprep.mubr.msk.f32.mxu1 %vm524_vm2, %v1012_v0  ;;  %13935 = vmatpush3.msra.mxu1 %v359_v53  ;;  %v14913_v40 = vpop.eup %14912  ;;  %v1461_v60 = vpop.permute.xlu0 %1460 }
 0x722   :  { %13962 = vmatprep.subr.msk.mxu1 %vm20807_vm1, %v1465_v6  ;;  %v1022_v30 = vmul.f32 %v14913_v40, %v15687_v56 }
 0x723   :  { %v1455_v33 = vpop.permute.xlu1 %1454 }
 0x724   :  { %13926 = vmatmul.mubr.msk.f32.gmra.mxu1 %vm524_vm2, %v1014_v15 }
 0x725   :  { %13928 = vmatprep.mubr.msk.f32.mxu1 %vm524_vm2, %v1016_v37  ;;  %v1457_v29 = vpop.permute.xlu0 %1456 }
 0x727   :  { %v14915_v2 = vpop.eup %14914  ;;  %v1451_v41 = vpop.permute.xlu1 %1450 }
 0x728   :  { %13929 = vmatmul.mubr.msk.f32.gmra.mxu1 %vm524_vm2, %v1018_v42  ;;  %v1020_v24 = vmul.f32 %v14915_v2, %v15691_v50 }
 0x729   :  { %v1453_v31 = vpop.permute.xlu0 %1452 }
 0x72a   :  { %13931 = vmatprep.mubr.msk.f32.mxu1 %vm524_vm2, %v1020_v24 }
 0x72b   :  { %v1437_v27 = vpop.permute.xlu1 %1436 }
 0x72c   :  { %13932 = vmatmul.mubr.msk.f32.gmra.mxu1 %vm524_vm2, %v1022_v30 }
 0x72d   :  { %v1435_v58 = vpop.permute.xlu0 %1434 }
 0x72f   :  { %v1441_v28 = vpop.permute.xlu1 %1440 }
 0x731   :  { %v1439_v50 = vpop.permute.xlu0 %1438 }
 0x733   :  { %v1445_v32 = vpop.permute.xlu1 %1444 }
 0x735   :  { %v1443_v1 = vpop.permute.xlu0 %1442 }
 0x737   :  { %v1449_v22 = vpop.permute.xlu1 %1448 }
 0x739   :  { %v1447_v47 = vpop.permute.xlu0 %1446 }
 0x73b   :  { %v2010_v55 = vpop.permute.xlu1 %2009 }
 0x73d   :  { %v2012_v21 = vpop.permute.xlu0 %2011 }
 0x73f   :  { %v2006_v39 = vpop.permute.xlu1 %2005 }
 0x741   :  { %v2008_v34 = vpop.permute.xlu0 %2007 }
 0x743   :  { %v2002_v0 = vpop.permute.xlu1 %2001 }
 0x745   :  { %v2004_v51 = vpop.permute.xlu0 %2003 }
 0x747   :  { %v1998_v4 = vpop.permute.xlu1 %1997 }
 0x749   :  { %v2000_v53 = vpop.permute.xlu0 %1999 }
 0x74d   :  { %v1982_v63 = vpop.permute.xlu0 %1981 }
 0x751   :  { %v1986_v15 = vpop.permute.xlu0 %1985 }
 0x755   :  { %v1990_v37 = vpop.permute.xlu0 %1989 }
 0x759   :  { %v1994_v42 = vpop.permute.xlu0 %1993 }
 0x7e0   :  { %v13924_v61 = vpop.f32.mrf.mxu1 }
 0x7e2   :  { %v1137_v26 = vpop.f32.mrf.mxu1 }
 0x7e3   :  { %13936 = vmatprep.mubr.msk.f32.mxu1 %vm20807_vm1, %v1137_v26 }
 0x7e4   :  { %v13927_v35 = vpop.f32.mrf.mxu1  ;;  %13937 = vmatmul.mubr.msk.f32.vlgmr.msra.gmra.mxu1 %vm20807_vm1, %v13924_v61 }
 0x7e5   :  { %13963 = vmatpush3.xpose.msk.msra.mxu1 %vm20807_vm1, %v1465_v6  ;;  %v1984_v6 = vpop.permute.xlu1 %1983 }
 0x7e6   :  { %13964 = vmatprep.subr.msk.mxu1 %vm20807_vm1, %v1463_v19  ;;  %v1147_v56 = vpop.f32.mrf.mxu1 }
 0x7e7   :  { %13939 = vmatprep.mubr.msk.f32.mxu1 %vm20807_vm1, %v1147_v56 }
 0x7e8   :  { %v13930_v43 = vpop.f32.mrf.mxu1  ;;  %13940 = vmatmul.mubr.msk.f32.gmra.mxu1 %vm20807_vm1, %v13927_v35 }
 0x7e9   :  { %13965 = vmatpush3.xpose.msk.msra.mxu1 %vm20807_vm1, %v1463_v19  ;;  %v1988_v18 = vpop.permute.xlu1 %1987 }
 0x7ea   :  { %13966 = vmatprep.subr.msk.mxu1 %vm20807_vm1, %v1461_v60  ;;  %v1157_v16 = vpop.f32.mrf.mxu1 }
 0x7eb   :  { %13942 = vmatprep.mubr.msk.f32.mxu1 %vm20807_vm1, %v1157_v16  ;;  %v15836_v16 = vld [vmem:[%s20827_s6 + $0x18] sm:$0xff] }
 0x7ec   :  { %v13933_v44 = vpop.f32.mrf.mxu1  ;;  %13943 = vmatmul.mubr.msk.f32.gmra.mxu1 %vm20807_vm1, %v13930_v43 }
 0x7ed   :  { %13967 = vmatpush3.xpose.msk.msra.mxu1 %vm20807_vm1, %v1461_v60  ;;  %v1992_v40 = vpop.permute.xlu1 %1991 }
 0x7ee   :  { %13968 = vmatprep.subr.msk.mxu1 %vm20807_vm1, %v1459_v45  ;;  %v1167_v25 = vpop.f32.mrf.mxu1 }
 0x7ef   :  { %13945 = vmatprep.mubr.msk.f32.mxu1 %vm20807_vm1, %v1167_v25 }
 0x7f0   :  { %13946 = vmatmul.mubr.msk.f32.gmra.mxu1 %vm20807_vm1, %v13933_v44 }
 0x7f1   :  { %13969 = vmatpush3.xpose.msk.msra.mxu1 %vm20807_vm1, %v1459_v45  ;;  %13978 = vmatprep.mubr.msk.f32.mxu1 %vm20807_vm1, %v1435_v58  ;;  %v1996_v2 = vpop.permute.xlu1 %1995 }
 0x7f2   :  { %13970 = vmatprep.subr.msk.mxu1 %vm20807_vm1, %v1457_v29 }
 0x7f5   :  { %13971 = vmatpush3.xpose.msk.msra.mxu1 %vm20807_vm1, %v1457_v29 }
 0x7f6   :  { %13972 = vmatprep.subr.msk.mxu1 %vm20807_vm1, %v1455_v33 }
 0x7f9   :  { %13973 = vmatpush3.xpose.msk.msra.mxu1 %vm20807_vm1, %v1455_v33  ;;  %v15823_v33 = vld [vmem:[%s20827_s6 + $0x8] sm:$0xff] }
 0x7fa   :  { %13974 = vmatprep.subr.msk.mxu1 %vm20807_vm1, %v1453_v31 }
 0x7fd   :  { %13975 = vmatpush3.xpose.msk.msra.mxu1 %vm20807_vm1, %v1453_v31 }
 0x7fe   :  { %13976 = vmatprep.subr.msk.mxu1 %vm20807_vm1, %v1451_v41 }
 0x801   :  { %13977 = vmatpush3.xpose.msk.msra.mxu1 %vm20807_vm1, %v1451_v41 }
 0x802   :  { %14032 = vmatprep.subr.msk.mxu1 %vm20807_vm1, %v2012_v21 }
 0x804   :  { %13979 = vmatmul.mubr.msk.f32.vlgmr.msra.gmra.mxu1 %vm20807_vm1, %v1437_v27 }
 0x805   :  { %13981 = vmatprep.mubr.msk.f32.mxu1 %vm20807_vm1, %v1439_v50  ;;  %14033 = vmatpush3.xpose.msk.msra.mxu1 %vm20807_vm1, %v2012_v21  ;;  %v15829_v50 = vld [vmem:[%s20827_s6] sm:$0xff] }
 0x806   :  { %14034 = vmatprep.subr.msk.mxu1 %vm20807_vm1, %v2010_v55 }
 0x808   :  { %13982 = vmatmul.mubr.msk.f32.gmra.mxu1 %vm20807_vm1, %v1441_v28 }
 0x809   :  { %13984 = vmatprep.mubr.msk.f32.mxu1 %vm20807_vm1, %v1443_v1  ;;  %14035 = vmatpush3.xpose.msk.msra.mxu1 %vm20807_vm1, %v2010_v55  ;;  %v15852_v55 = vld [vmem:[%s20827_s6 + $0x20] sm:$0xff] }
 0x80a   :  { %14036 = vmatprep.subr.msk.mxu1 %vm20807_vm1, %v2008_v34 }
 0x80c   :  { %13985 = vmatmul.mubr.msk.f32.gmra.mxu1 %vm20807_vm1, %v1445_v32 }
 0x80d   :  { %13987 = vmatprep.mubr.msk.f32.mxu1 %vm20807_vm1, %v1447_v47  ;;  %14037 = vmatpush3.xpose.msk.msra.mxu1 %vm20807_vm1, %v2008_v34  ;;  %v15843_v47 = vld [vmem:[%s20827_s6 + $0x10] sm:$0xff] }
 0x80e   :  { %14038 = vmatprep.subr.msk.mxu1 %vm20807_vm1, %v2006_v39 }
 0x810   :  { %13988 = vmatmul.mubr.msk.f32.gmra.mxu1 %vm20807_vm1, %v1449_v22 }
 0x811   :  { %14039 = vmatpush3.xpose.msk.msra.mxu1 %vm20807_vm1, %v2006_v39  ;;  %14048 = vmatprep.mubr.msk.f32.mxu1 %vm20807_vm1, %v1982_v63 }
 0x812   :  { %14040 = vmatprep.subr.msk.mxu1 %vm20807_vm1, %v2004_v51 }
 0x815   :  { %14041 = vmatpush3.xpose.msk.msra.mxu1 %vm20807_vm1, %v2004_v51 }
 0x816   :  { %14042 = vmatprep.subr.msk.mxu1 %vm20807_vm1, %v2002_v0 }
 0x819   :  { %14043 = vmatpush3.xpose.msk.msra.mxu1 %vm20807_vm1, %v2002_v0 }
 0x81a   :  { %14044 = vmatprep.subr.msk.mxu1 %vm20807_vm1, %v2000_v53 }
 0x81d   :  { %14045 = vmatpush3.xpose.msk.msra.mxu1 %vm20807_vm1, %v2000_v53 }
 0x81e   :  { %14046 = vmatprep.subr.msk.mxu1 %vm20807_vm1, %v1998_v4 }
 0x821   :  { %14047 = vmatpush3.xpose.msk.msra.mxu1 %vm20807_vm1, %v1998_v4 }
 0x824   :  { %14049 = vmatmul.mubr.msk.f32.vlgmr.msra.gmra.mxu1 %vm20807_vm1, %v1984_v6 }
 0x825   :  { %14051 = vmatprep.mubr.msk.f32.mxu1 %vm20807_vm1, %v1986_v15 }
 0x828   :  { %14052 = vmatmul.mubr.msk.f32.gmra.mxu1 %vm20807_vm1, %v1988_v18 }
 0x829   :  { %14054 = vmatprep.mubr.msk.f32.mxu1 %vm20807_vm1, %v1990_v37 }
 0x82c   :  { %14055 = vmatmul.mubr.msk.f32.gmra.mxu1 %vm20807_vm1, %v1992_v40 }
 0x82d   :  { %14057 = vmatprep.mubr.msk.f32.mxu1 %vm20807_vm1, %v1994_v42 }
 0x830   :  { %14058 = vmatmul.mubr.msk.f32.gmra.mxu1 %vm20807_vm1, %v1996_v2 }
 0x8a4   :  { %v15804_v24 = vpop.f32.mrf.mxu1 }
 0x8a6   :  { %v15806_v30 = vpop.f32.mrf.mxu1 }
 0x8a8   :  { %v15808_v60 = vpop.f32.mrf.mxu1 }
 0x8aa   :  { %v15810_v29 = vpop.f32.mrf.mxu1 }
 0x8ac   :  { %v15812_v19 = vpop.f32.mrf.mxu1 }
 0x8ae   :  { %v15814_v31 = vpop.f32.mrf.mxu1 }
 0x8b0   :  { %v15816_v45 = vpop.f32.mrf.mxu1 }
 0x8b2   :  { %v15818_v58 = vpop.f32.mrf.mxu1 }
 0x8c4   :  { %v13980_v61 = vpop.f32.mrf.mxu1 }
 0x8c5   :  { %v1570_v26 = vadd.f32 %v15823_v33, %v13980_v61 }
 0x8c6   :  { %v1564_v35 = vpop.f32.mrf.mxu1 }
 0x8c7   :  { %v1565_v56 = vadd.f32 %v15829_v50, %v1564_v35  ;;  %v1606_v41 = vsel %vm524_vm2, %v1570_v26, -inf }
 0x8c8   :  { %1607 = vmax.xlane.f32.xlu1 %v1606_v41  ;;  %v13983_v43 = vpop.f32.mrf.mxu1 }
 0x8c9   :  { %v1580_v1 = vadd.f32 %v15836_v16, %v13983_v43  ;;  %v1603_v44 = vsel %vm524_vm2, %v1565_v56, -inf }
 0x8ca   :  { %1604 = vmax.xlane.f32.xlu0 %v1603_v44  ;;  %v1574_v27 = vpop.f32.mrf.mxu1 }
 0x8cb   :  { %v1575_v28 = vadd.f32 %v15843_v47, %v1574_v27  ;;  %v1612_v32 = vsel %vm524_vm2, %v1580_v1, -inf }
 0x8cc   :  { %v13986_v25 = vpop.f32.mrf.mxu1 }
 0x8cd   :  { %v1590_v21 = vadd.f32 %v13986_v25, %v15494_v38  ;;  %v1609_v63 = vsel %vm524_vm2, %v1575_v28, -inf }
 0x8ce   :  { %1613 = vmax.xlane.f32.xlu0 %v1612_v32  ;;  %v1584_v34 = vpop.f32.mrf.mxu1 }
 0x8cf   :  { %v1618_v22 = vsel %vm524_vm2, %v1590_v21, -inf  ;;  %v1585_v53 = vadd.f32 %v15852_v55, %v1584_v34 }
 0x8d0   :  { %1619 = vmax.xlane.f32.xlu1 %v1618_v22  ;;  %v13989_v51 = vpop.f32.mrf.mxu1 }
 0x8d1   :  { %v1600_v39 = vadd.f32 %v13989_v51, %v15507_v49  ;;  %v1615_v6 = vsel %vm524_vm2, %v1585_v53, -inf }
 0x8d2   :  { %1610 = vmax.xlane.f32.xlu0 %v1609_v63  ;;  %v1594_v38 = vpop.f32.mrf.mxu1 }
 0x8d3   :  { %v1624_v0 = vsel %vm524_vm2, %v1600_v39, -inf  ;;  %v1595_v4 = vadd.f32 %v1594_v38, %v15516_v14 }
 0x8d4   :  { %1625 = vmax.xlane.f32.xlu1 %v1624_v0 }
 0x8d5   :  { %v1621_v15 = vsel %vm524_vm2, %v1595_v4, -inf }
 0x8d6   :  { %1616 = vmax.xlane.f32.xlu0 %v1615_v6 }
 0x8da   :  { %1622 = vmax.xlane.f32.xlu0 %v1621_v15 }
 0x8e5   :  { %1703 = vrot.lane.b32.xlu1 %v15392_v7, %s15112_s9 }
 0x8e9   :  { %1701 = vrot.lane.b32.xlu1 %v15398_v9, %s15112_s9 }
 0x8ed   :  { %1699 = vrot.lane.b32.xlu1 %v15404_v12, %s15112_s9 }
 0x8f0   :  { %1705 = vrot.lane.b32.xlu0 %v15390_v5, %s15112_s9 }
 0x8f1   :  { %1695 = vrot.lane.b32.xlu1 %v15408_v13, %s15112_s9 }
 0x8f4   :  { %1697 = vrot.lane.b32.xlu0 %v15395_v8, %s15112_s9 }
 0x951   :  { %v1608_v49 = vpop.xlane.xlu1 %1607 }
 0x952   :  { %v1628_v14 = vsub.f32 %v1570_v26, %v1608_v49 }
 0x953   :  { %v1605_v18 = vpop.xlane.xlu0 %1604 }
 0x954   :  { %v1637_v37 = vmul.f32 1.442695, %v1628_v14  ;;  %v1627_v40 = vsub.f32 %v1565_v56, %v1605_v18 }
 0x956   :  { %14916 = vpow2.f32 %v1637_v37  ;;  %v1635_v42 = vmul.f32 1.442695, %v1627_v40 }
 0x957   :  { %v1614_v2 = vpop.xlane.xlu0 %1613 }
 0x958   :  { %14918 = vpow2.f32 %v1635_v42  ;;  %v1630_v61 = vsub.f32 %v1580_v1, %v1614_v2 }
 0x959   :  { %v1620_v35 = vpop.xlane.xlu1 %1619 }
 0x95a   :  { %v1641_v41 = vmul.f32 1.442695, %v1630_v61  ;;  %v1632_v43 = vsub.f32 %v1590_v21, %v1620_v35 }
 0x95b   :  { %v1611_v44 = vpop.xlane.xlu0 %1610 }
 0x95c   :  { %14920 = vpow2.f32 %v1641_v41  ;;  %v1645_v27 = vmul.f32 1.442695, %v1632_v43  ;;  %v1629_v25 = vsub.f32 %v1575_v28, %v1611_v44 }
 0x95d   :  { %v1626_v32 = vpop.xlane.xlu1 %1625 }
 0x95e   :  { %14922 = vpow2.f32 %v1645_v27  ;;  %v1639_v34 = vmul.f32 1.442695, %v1629_v25  ;;  %v1634_v22 = vsub.f32 %v1600_v39, %v1626_v32 }
 0x95f   :  { %v1617_v26 = vpop.xlane.xlu0 %1616 }
 0x960   :  { %14924 = vpow2.f32 %v1639_v34  ;;  %v1649_v51 = vmul.f32 1.442695, %v1634_v22  ;;  %v1631_v56 = vsub.f32 %v1585_v53, %v1617_v26  ;;  %v14050_v34 = vpop.f32.mrf.mxu1 }
 0x961   :  { %v1704_v63 = vpop.permute.xlu1 %1703 }
 0x962   :  { %v1643_v38 = vmul.f32 1.442695, %v1631_v56  ;;  %14926 = vpow2.f32 %v1649_v51  ;;  %v2111_v22 = vpop.f32.mrf.mxu1 }
 0x963   :  { %v15873_v0 = vpop.eup %14916  ;;  %v1623_v1 = vpop.xlane.xlu0 %1622 }
 0x964   :  { %14928 = vpow2.f32 %v1643_v38  ;;  %v1633_v21 = vsub.f32 %v1595_v4, %v1623_v1  ;;  %v1654_v6 = vsel %vm524_vm2, %v15873_v0, 0.0  ;;  %v14053_v26 = vpop.f32.mrf.mxu1  ;;  %v15913_v1 = vadd.f32 %v15829_v50, %v2111_v22  ;;  %v15066_v50 = vld [vmem:[%s20827_s6 + $0x38] sm:$0xff] }
 0x965   :  { %v15877_v28 = vpop.eup %14918  ;;  %1655 = vadd.xlane.f32.xlu1 %v1654_v6  ;;  %v1702_v39 = vpop.permute.xlu1 %1701 }
 0x966   :  { %v1647_v15 = vmul.f32 1.442695, %v1633_v21  ;;  %v1651_v49 = vsel %vm524_vm2, %v15877_v28, 0.0  ;;  %v2121_v51 = vpop.f32.mrf.mxu1  ;;  %v15065_v21 = vld [vmem:[%s20827_s6 + $0x28] sm:$0xff] }
 0x967   :  { %1652 = vadd.xlane.f32.xlu0 %v1651_v49  ;;  %v1706_v53 = vpop.permute.xlu0 %1705  ;;  %v15923_v49 = vadd.f32 %v15843_v47, %v2121_v51 }
 0x968   :  { %14930 = vpow2.f32 %v1647_v15  ;;  %13990 = vmatprep.subr.mxu0 %v1706_v53  ;;  %v14056_v56 = vpop.f32.mrf.mxu1 }
 0x969   :  { %v15881_v14 = vpop.eup %14920  ;;  %13991 = vmatpush3.msra.mxu0 %v1706_v53  ;;  %v1700_v37 = vpop.permute.xlu1 %1699  ;;  %v15918_v6 = vadd.f32 %v15065_v21, %v14056_v56  ;;  %v2156_v47 = vsel %vm524_vm2, %v15923_v49, -inf }
 0x96a   :  { %13992 = vmatprep.subr.mxu0 %v1704_v63  ;;  %v1660_v4 = vsel %vm524_vm2, %v15881_v14, 0.0  ;;  %v2131_v38 = vpop.f32.mrf.mxu1 }
 0x96b   :  { %v15885_v18 = vpop.eup %14922  ;;  %1661 = vadd.xlane.f32.xlu1 %v1660_v4  ;;  %13993 = vmatpush3.msra.mxu0 %v1704_v63  ;;  %v1698_v35 = vpop.permute.xlu0 %1697  ;;  %v15910_v63 = vadd.f32 %v15823_v33, %v14050_v34  ;;  %v2150_v33 = vsel %vm524_vm2, %v15913_v1, -inf  ;;  %v2165_v4 = vsel %vm524_vm2, %v15918_v6, -inf }
 0x96c   :  { %13994 = vmatprep.subr.mxu0 %v1702_v39  ;;  %v1666_v2 = vsel %vm524_vm2, %v15885_v18, 0.0 }
 0x96d   :  { %v15887_v40 = vpop.eup %14924  ;;  %13995 = vmatpush3.msra.mxu0 %v1702_v39  ;;  %v1696_v43 = vpop.permute.xlu1 %1695  ;;  %v2153_v15 = vsel %vm524_vm2, %v15910_v63, -inf }
 0x96e   :  { %13996 = vmatprep.subr.mxu0 %v1700_v37  ;;  %v1657_v42 = vsel %vm524_vm2, %v15887_v40, 0.0  ;;  %v14059_v39 = vpop.f32.mrf.mxu1 }
 0x96f   :  { %1658 = vadd.xlane.f32.xlu0 %v1657_v42  ;;  %1667 = vadd.xlane.f32.xlu1 %v1666_v2  ;;  %v15893_v61 = vpop.eup %14926  ;;  %v15930_v53 = vadd.f32 %v15066_v50, %v14059_v39  ;;  %v15942_v2 = vadd.f32 %v15852_v55, %v2131_v38 }
 0x970   :  { %13997 = vmatpush3.msra.mxu0 %v1700_v37  ;;  %v1672_v27 = vsel %vm524_vm2, %v15893_v61, 0.0  ;;  %v15935_v37 = vadd.f32 %v15836_v16, %v14053_v26  ;;  %v15067_v16 = vld [vmem:[%s20827_s6 + $0x30] sm:$0xff] }
 0x971   :  { %v15895_v41 = vpop.eup %14928  ;;  %13998 = vmatprep.subr.mxu0 %v1698_v35  ;;  %v2171_v42 = vsel %vm524_vm2, %v15930_v53, -inf }
 0x972   :  { %13999 = vmatpush3.msra.mxu0 %v1698_v35  ;;  %v1663_v44 = vsel %vm524_vm2, %v15895_v41, 0.0  ;;  %v2159_v35 = vsel %vm524_vm2, %v15935_v37, -inf }
 0x973   :  { %14000 = vmatprep.subr.mxu0 %v1696_v43  ;;  %1664 = vadd.xlane.f32.xlu0 %v1663_v44 }
 0x974   :  { %1673 = vadd.xlane.f32.xlu1 %v1672_v27  ;;  %14001 = vmatpush3.msra.mxu0 %v1696_v43  ;;  %v2141_v43 = vpop.f32.mrf.mxu1  ;;  %v2162_v27 = vsel %vm524_vm2, %v15942_v2, -inf }
 0x975   :  { %v15901_v25 = vpop.eup %14930  ;;  %v15949_v44 = vadd.f32 %v15067_v16, %v2141_v43 }
 0x976   :  { %v1669_v32 = vsel %vm524_vm2, %v15901_v25, 0.0 }
 0x977   :  { %1670 = vadd.xlane.f32.xlu0 %v1669_v32  ;;  %v2168_v32 = vsel %vm524_vm2, %v15949_v44, -inf }
 0x985   :  { %1691 = vrot.lane.b32.xlu1 %v15386_v62, %s15112_s9 }
 0x98d   :  { %1693 = vrot.lane.b32.xlu0 %v15401_v11, %s15112_s9 }
 0x9a9   :  { %2154 = vmax.xlane.f32.xlu1 %v2153_v15  ;;  %v360_v15 = vld [vmem:[%s20828_s7 + $0x10] sm:$0xff] }
 0x9ac   :  { %2151 = vmax.xlane.f32.xlu0 %v2150_v33 }
 0x9ad   :  { %2166 = vmax.xlane.f32.xlu1 %v2165_v4 }
 0x9b0   :  { %2157 = vmax.xlane.f32.xlu0 %v2156_v47 }
 0x9b1   :  { %2172 = vmax.xlane.f32.xlu1 %v2171_v42 }
 0x9b4   :  { %2160 = vmax.xlane.f32.xlu0 %v2159_v35 }
 0x9b8   :  { %2163 = vmax.xlane.f32.xlu0 %v2162_v27 }
 0x9bc   :  { %2169 = vmax.xlane.f32.xlu0 %v2168_v32 }
 0x9c2   :  { %2250 = vrot.lane.b32.xlu1 %v15392_v7, %s15113_s23 }
 0x9c6   :  { %2246 = vrot.lane.b32.xlu1 %v15404_v12, %s15113_s23 }
 0x9ca   :  { %2244 = vrot.lane.b32.xlu1 %v15395_v8, %s15113_s23 }
 0x9ce   :  { %2242 = vrot.lane.b32.xlu1 %v15408_v13, %s15113_s23 }
 0x9d2   :  { %2252 = vrot.lane.b32.xlu0 %v15390_v5, %s15113_s23 }
 0x9d6   :  { %2248 = vrot.lane.b32.xlu0 %v15398_v9, %s15113_s23 }
 0x9ee   :  { %v1656_v55 = vpop.xlane.xlu1 %1655 }
 0x9f0   :  { %v1653_v34 = vpop.xlane.xlu0 %1652 }
 0x9f1   :  { %14932 = vrcp.f32 %v1653_v34 }
 0x9f2   :  { %14934 = vrcp.f32 %v1656_v55 }
 0x9f4   :  { %v1662_v22 = vpop.xlane.xlu1 %1661 }
 0x9f8   :  { %v1659_v7 = vpop.xlane.xlu0 %1658  ;;  %v1668_v12 = vpop.xlane.xlu1 %1667 }
 0x9f9   :  { %14936 = vrcp.f32 %v1659_v7 }
 0x9fa   :  { %14938 = vrcp.f32 %v1662_v22 }
 0x9fc   :  { %v1665_v26 = vpop.xlane.xlu0 %1664 }
 0x9fd   :  { %14940 = vrcp.f32 %v1665_v26  ;;  %v1674_v51 = vpop.xlane.xlu1 %1673 }
 0x9fe   :  { %v14933_v8 = vpop.eup %14932  ;;  %14942 = vrcp.f32 %v1668_v12 }
 0x9ff   :  { %v1676_v13 = vmul.f32 %v14933_v8, %v15877_v28  ;;  %v14935_v9 = vpop.eup %14934 }
 0xa00   :  { %v1671_v5 = vpop.xlane.xlu0 %1670  ;;  %v1678_v39 = vmul.f32 %v14935_v9, %v15873_v0 }
 0xa01   :  { %14944 = vrcp.f32 %v1671_v5  ;;  %14006 = vmatprep.mubr.msk.f32.mxu0 %vm524_vm2, %v1676_v13  ;;  %v1692_v21 = vpop.permute.xlu1 %1691 }
 0xa02   :  { %14946 = vrcp.f32 %v1674_v51 }
 0xa04   :  { %v1694_v56 = vpop.permute.xlu0 %1693 }
 0xa05   :  { %14002 = vmatprep.subr.mxu0 %v1694_v56 }
 0xa06   :  { %v14937_v38 = vpop.eup %14936  ;;  %14003 = vmatpush3.msra.mxu0 %v1694_v56 }
 0xa07   :  { %14004 = vmatprep.subr.mxu0 %v1692_v21  ;;  %v1680_v28 = vmul.f32 %v14937_v38, %v15887_v40  ;;  %v14939_v33 = vpop.eup %14938 }
 0xa08   :  { %14005 = vmatpush3.msra.mxu0 %v1692_v21  ;;  %v1682_v4 = vmul.f32 %v14939_v33, %v15881_v14 }
 0xa09   :  { %14007 = vmatmul.mubr.msk.f32.vlgmr.msra.gmra.mxu0 %vm524_vm2, %v1678_v39  ;;  %14018 = vmatprep.subr.mxu0 %v360_v15 }
 0xa0a   :  { %v14941_v50 = vpop.eup %14940  ;;  %14009 = vmatprep.mubr.msk.f32.mxu0 %vm524_vm2, %v1680_v28  ;;  %14019 = vmatpush3.msra.mxu0 %v360_v15 }
 0xa0b   :  { %v1684_v47 = vmul.f32 %v14941_v50, %v15895_v41  ;;  %v14943_v42 = vpop.eup %14942 }
 0xa0c   :  { %v1686_v40 = vmul.f32 %v14943_v42, %v15885_v18 }
 0xa0d   :  { %14010 = vmatmul.mubr.msk.f32.gmra.mxu0 %vm524_vm2, %v1682_v4 }
 0xa0e   :  { %v14945_v0 = vpop.eup %14944  ;;  %14012 = vmatprep.mubr.msk.f32.mxu0 %vm524_vm2, %v1684_v47 }
 0xa0f   :  { %v1688_v35 = vmul.f32 %v14945_v0, %v15901_v25  ;;  %v14947_v43 = vpop.eup %14946 }
 0xa10   :  { %v1690_v16 = vmul.f32 %v14947_v43, %v15893_v61 }
 0xa11   :  { %14013 = vmatmul.mubr.msk.f32.gmra.mxu0 %vm524_vm2, %v1686_v40 }
 0xa12   :  { %14015 = vmatprep.mubr.msk.f32.mxu0 %vm524_vm2, %v1688_v35 }
 0xa15   :  { %14016 = vmatmul.mubr.msk.f32.gmra.mxu0 %vm524_vm2, %v1690_v16  ;;  %v16030_v16 = vpop.f32.mrf.mxu0 }
 0xa32   :  { %v2155_v14 = vpop.xlane.xlu1 %2154 }
 0xa33   :  { %v2175_v41 = vsub.f32 %v15910_v63, %v2155_v14  ;;  %v16032_v14 = vpop.f32.mrf.mxu0 }
 0xa35   :  { %v2184_v27 = vmul.f32 1.442695, %v2175_v41  ;;  %v2152_v32 = vpop.xlane.xlu0 %2151  ;;  %v16034_v41 = vpop.f32.mrf.mxu0 }
 0xa36   :  { %v2174_v55 = vsub.f32 %v15913_v1, %v2152_v32  ;;  %v2167_v34 = vpop.xlane.xlu1 %2166 }
 0xa37   :  { %14948 = vpow2.f32 %v2184_v27  ;;  %v2179_v25 = vsub.f32 %v15918_v6, %v2167_v34  ;;  %v16036_v27 = vpop.f32.mrf.mxu0 }
 0xa38   :  { %v2182_v18 = vmul.f32 1.442695, %v2174_v55 }
 0xa39   :  { %v2158_v22 = vpop.xlane.xlu0 %2157  ;;  %v2192_v12 = vmul.f32 1.442695, %v2179_v25  ;;  %v16038_v32 = vpop.f32.mrf.mxu0 }
 0xa3a   :  { %14950 = vpow2.f32 %v2182_v18  ;;  %v2176_v7 = vsub.f32 %v15923_v49, %v2158_v22  ;;  %v2173_v26 = vpop.xlane.xlu1 %2172 }
 0xa3b   :  { %v2181_v13 = vsub.f32 %v15930_v53, %v2173_v26  ;;  %v16040_v55 = vpop.f32.mrf.mxu0 }
 0xa3c   :  { %v2186_v61 = vmul.f32 1.442695, %v2176_v7 }
 0xa3d   :  { %v2161_v8 = vpop.xlane.xlu0 %2160  ;;  %v2196_v9 = vmul.f32 1.442695, %v2181_v13  ;;  %v16042_v18 = vpop.f32.mrf.mxu0 }
 0xa3e   :  { %14952 = vpow2.f32 %v2186_v61  ;;  %v2177_v63 = vsub.f32 %v15935_v37, %v2161_v8  ;;  %v2251_v34 = vpop.permute.xlu1 %2250 }
 0xa3f   :  { %14954 = vpow2.f32 %v2192_v12 }
 0xa40   :  { %v2188_v1 = vmul.f32 1.442695, %v2177_v63 }
 0xa41   :  { %v2164_v51 = vpop.xlane.xlu0 %2163 }
 0xa42   :  { %14956 = vpow2.f32 %v2188_v1  ;;  %v2178_v5 = vsub.f32 %v15942_v2, %v2164_v51  ;;  %v2247_v25 = vpop.permute.xlu1 %2246 }
 0xa44   :  { %v15993_v6 = vpop.eup %14948  ;;  %v2190_v56 = vmul.f32 1.442695, %v2178_v5 }
 0xa45   :  { %v2170_v49 = vpop.xlane.xlu0 %2169  ;;  %v2201_v38 = vsel %vm524_vm2, %v15993_v6, 0.0 }
 0xa46   :  { %14958 = vpow2.f32 %v2190_v56  ;;  %v2180_v21 = vsub.f32 %v15949_v44, %v2170_v49  ;;  %2202 = vadd.xlane.f32.xlu1 %v2201_v38  ;;  %v2245_v7 = vpop.permute.xlu1 %2244 }
 0xa47   :  { %v15998_v37 = vpop.eup %14950  ;;  %14960 = vpow2.f32 %v2196_v9 }
 0xa48   :  { %v2194_v53 = vmul.f32 1.442695, %v2180_v21  ;;  %v2198_v15 = vsel %vm524_vm2, %v15998_v37, 0.0 }
 0xa49   :  { %2199 = vadd.xlane.f32.xlu0 %v2198_v15  ;;  %v2253_v2 = vpop.permute.xlu0 %2252 }
 0xa4a   :  { %14962 = vpow2.f32 %v2194_v53  ;;  %14060 = vmatprep.subr.mxu0 %v2253_v2  ;;  %v2243_v63 = vpop.permute.xlu1 %2242 }
 0xa4b   :  { %v16002_v39 = vpop.eup %14952 }
 0xa4c   :  { %v2204_v28 = vsel %vm524_vm2, %v16002_v39, 0.0  ;;  %v16006_v33 = vpop.eup %14954 }
 0xa4d   :  { %2205 = vadd.xlane.f32.xlu0 %v2204_v28  ;;  %v2213_v4 = vsel %vm524_vm2, %v16006_v33, 0.0  ;;  %v2249_v61 = vpop.permute.xlu0 %2248 }
 0xa4f   :  { %v16008_v44 = vpop.eup %14956 }
 0xa50   :  { %v2207_v50 = vsel %vm524_vm2, %v16008_v44, 0.0 }
 0xa51   :  { %2208 = vadd.xlane.f32.xlu1 %v2207_v50  ;;  %2214 = vadd.xlane.f32.xlu0 %v2213_v4 }
 0xa53   :  { %v16014_v47 = vpop.eup %14958 }
 0xa54   :  { %v2210_v42 = vsel %vm524_vm2, %v16014_v47, 0.0  ;;  %v16018_v0 = vpop.eup %14960 }
 0xa55   :  { %2211 = vadd.xlane.f32.xlu1 %v2210_v42  ;;  %v2219_v43 = vsel %vm524_vm2, %v16018_v0, 0.0 }
 0xa57   :  { %v16020_v40 = vpop.eup %14962 }
 0xa58   :  { %v2216_v35 = vsel %vm524_vm2, %v16020_v40, 0.0 }
 0xa59   :  { %2217 = vadd.xlane.f32.xlu0 %v2216_v35  ;;  %2220 = vadd.xlane.f32.xlu1 %v2219_v43 }
 0xa6a   :  { %2238 = vrot.lane.b32.xlu1 %v15386_v62, %s15113_s23  ;;  %v16044_v62 = vpop.f32.mrf.mxu0 }
 0xa6f   :  { %2240 = vrot.lane.b32.xlu0 %v15401_v11, %s15113_s23 }
 0xac9   :  { %v14008_v22 = vpop.f32.mrf.mxu0 }
 0xacb   :  { %v1805_v11 = vpop.f32.mrf.mxu0 }
 0xacc   :  { %14020 = vmatprep.mubr.msk.f32.mxu0 %vm20807_vm1, %v1805_v11 }
 0xacd   :  { %v14011_v12 = vpop.f32.mrf.mxu0  ;;  %14021 = vmatmul.mubr.msk.f32.vlgmr.msra.gmra.mxu0 %vm20807_vm1, %v14008_v22 }
 0xace   :  { %14061 = vmatpush3.msra.mxu0 %v2253_v2 }
 0xacf   :  { %14062 = vmatprep.subr.mxu0 %v2251_v34  ;;  %v1815_v26 = vpop.f32.mrf.mxu0  ;;  %v2203_v5 = vpop.xlane.xlu1 %2202 }
 0xad0   :  { %14063 = vmatpush3.msra.mxu0 %v2251_v34  ;;  %14023 = vmatprep.mubr.msk.f32.mxu0 %vm20807_vm1, %v1815_v26 }
 0xad1   :  { %14064 = vmatprep.subr.mxu0 %v2249_v61  ;;  %v14014_v8 = vpop.f32.mrf.mxu0  ;;  %14024 = vmatmul.mubr.msk.f32.gmra.mxu0 %vm20807_vm1, %v14011_v12 }
 0xad2   :  { %14065 = vmatpush3.msra.mxu0 %v2249_v61  ;;  %v2200_v13 = vpop.xlane.xlu0 %2199 }
 0xad3   :  { %14964 = vrcp.f32 %v2200_v13  ;;  %14066 = vmatprep.subr.mxu0 %v2247_v25  ;;  %v1825_v1 = vpop.f32.mrf.mxu0 }
 0xad4   :  { %14067 = vmatpush3.msra.mxu0 %v2247_v25  ;;  %14026 = vmatprep.mubr.msk.f32.mxu0 %vm20807_vm1, %v1825_v1  ;;  %14966 = vrcp.f32 %v2203_v5 }
 0xad5   :  { %14068 = vmatprep.subr.mxu0 %v2245_v7  ;;  %v14017_v51 = vpop.f32.mrf.mxu0  ;;  %14027 = vmatmul.mubr.msk.f32.gmra.mxu0 %vm20807_vm1, %v14014_v8 }
 0xad6   :  { %14069 = vmatpush3.msra.mxu0 %v2245_v7  ;;  %v2206_v9 = vpop.xlane.xlu0 %2205 }
 0xad7   :  { %14070 = vmatprep.subr.mxu0 %v2243_v63  ;;  %v1835_v56 = vpop.f32.mrf.mxu0  ;;  %14968 = vrcp.f32 %v2206_v9 }
 0xad8   :  { %14071 = vmatpush3.msra.mxu0 %v2243_v63  ;;  %14029 = vmatprep.mubr.msk.f32.mxu0 %vm20807_vm1, %v1835_v56  ;;  %v1411_v63 = vadd.f32 %v16034_v41, %v15808_v60 }
 0xad9   :  { %14030 = vmatmul.mubr.msk.f32.gmra.mxu0 %vm20807_vm1, %v14017_v51  ;;  %v1421_v51 = vadd.f32 %v16038_v32, %v15812_v19 }
 0xada   :  { %v2209_v49 = vpop.xlane.xlu1 %2208  ;;  %v2215_v38 = vpop.xlane.xlu0 %2214 }
 0xadb   :  { %14970 = vrcp.f32 %v2209_v49  ;;  %v1431_v49 = vadd.f32 %v16042_v18, %v15816_v45 }
 0xade   :  { %v2212_v21 = vpop.xlane.xlu1 %2211 }
 0xadf   :  { %14972 = vrcp.f32 %v2212_v21 }
 0xae0   :  { %v14965_v53 = vpop.eup %14964  ;;  %14974 = vrcp.f32 %v2215_v38 }
 0xae1   :  { %v2223_v15 = vmul.f32 %v14965_v53, %v15998_v37  ;;  %v14967_v50 = vpop.eup %14966 }
 0xae2   :  { %v2218_v2 = vpop.xlane.xlu0 %2217  ;;  %v2221_v28 = vpop.xlane.xlu1 %2220  ;;  %v2225_v43 = vmul.f32 %v14967_v50, %v15993_v6 }
 0xae3   :  { %14976 = vrcp.f32 %v2218_v2  ;;  %14076 = vmatprep.mubr.msk.f32.mxu0 %vm524_vm2, %v2223_v15  ;;  %v1396_v15 = vadd.f32 %v16032_v14, %v15806_v30  ;;  %v1416_v14 = vadd.f32 %v16040_v55, %v15814_v31 }
 0xae4   :  { %14978 = vrcp.f32 %v2221_v28  ;;  %v14969_v42 = vpop.eup %14968  ;;  %v13058_v28 = vld [vmem:[%s20829_s27] ss:$0 sm:$0xff] }
 0xae5   :  { %v2227_v25 = vmul.f32 %v14969_v42, %v16002_v39 }
 0xae6   :  { %v2241_v4 = vpop.permute.xlu0 %2240  ;;  %v2239_v35 = vpop.permute.xlu1 %2238 }
 0xae7   :  { %14072 = vmatprep.subr.mxu0 %v2241_v4 }
 0xae8   :  { %14073 = vmatpush3.msra.mxu0 %v2241_v4  ;;  %v14971_v34 = vpop.eup %14970 }
 0xae9   :  { %14074 = vmatprep.subr.mxu0 %v2239_v35  ;;  %v2229_v22 = vmul.f32 %v14971_v34, %v16008_v44  ;;  %v361_v44 = vld [vmem:[%s20828_s7 + $0x18] sm:$0xff] }
 0xaea   :  { %14075 = vmatpush3.msra.mxu0 %v2239_v35  ;;  %v1406_v35 = vadd.f32 %v16036_v27, %v15810_v29 }
 0xaeb   :  { %14077 = vmatmul.mubr.msk.f32.vlgmr.msra.gmra.mxu0 %vm524_vm2, %v2225_v43  ;;  %14088 = vmatprep.subr.mxu0 %v361_v44 }
 0xaec   :  { %v14973_v37 = vpop.eup %14972  ;;  %14079 = vmatprep.mubr.msk.f32.mxu0 %vm524_vm2, %v2227_v25  ;;  %14089 = vmatpush3.msra.mxu0 %v361_v44 }
 0xaed   :  { %v2231_v11 = vmul.f32 %v14973_v37, %v16014_v47  ;;  %v14975_v7 = vpop.eup %14974 }
 0xaee   :  { %v2233_v6 = vmul.f32 %v14975_v7, %v16006_v33  ;;  %v1401_v33 = vadd.f32 %v16030_v16, %v15804_v24 }
 0xaef   :  { %14080 = vmatmul.mubr.msk.f32.gmra.mxu0 %vm524_vm2, %v2229_v22 }
 0xaf0   :  { %v14977_v12 = vpop.eup %14976  ;;  %14082 = vmatprep.mubr.msk.f32.mxu0 %vm524_vm2, %v2231_v11 }
 0xaf1   :  { %v2235_v61 = vmul.f32 %v14977_v12, %v16020_v40  ;;  %v14979_v39 = vpop.eup %14978 }
 0xaf2   :  { %v2237_v26 = vmul.f32 %v14979_v39, %v16018_v0 }
 0xaf3   :  { %14083 = vmatmul.mubr.msk.f32.gmra.mxu0 %vm524_vm2, %v2233_v6 }
 0xaf4   :  { %14085 = vmatprep.mubr.msk.f32.mxu0 %vm524_vm2, %v2235_v61 }
 0xaf7   :  { %14086 = vmatmul.mubr.msk.f32.gmra.mxu0 %vm524_vm2, %v2237_v26 }
 0xb8d   :  { %v14022_v47 = vpop.f32.mrf.mxu0 }
 0xb8e   :  { %v1974_v40 = vadd.f32 %v14022_v47, %v1401_v33 }
 0xb8f   :  { %v1934_v8 = vpop.f32.mrf.mxu0 }
 0xb90   :  { %v1973_v50 = vadd.f32 %v1934_v8, %v1396_v15 }
 0xb91   :  { %v14025_v13 = vpop.f32.mrf.mxu0 }
 0xb92   :  { %v1976_v1 = vadd.f32 %v14025_v13, %v1411_v63 }
 0xb93   :  { %v1944_v0 = vpop.f32.mrf.mxu0 }
 0xb94   :  { %v1975_v37 = vadd.f32 %v1944_v0, %v1406_v35 }
 0xb95   :  { %v14028_v5 = vpop.f32.mrf.mxu0 }
 0xb96   :  { %v1978_v9 = vadd.f32 %v14028_v5, %v1421_v51 }
 0xb97   :  { %v1954_v56 = vpop.f32.mrf.mxu0 }
 0xb98   :  { %v1977_v27 = vadd.f32 %v1954_v56, %v1416_v14 }
 0xb99   :  { %v14031_v38 = vpop.f32.mrf.mxu0 }
 0xb9a   :  { %v1980_v24 = vadd.f32 %v14031_v38, %v1431_v49 }
 0xb9b   :  { %v1964_v16 = vpop.f32.mrf.mxu0 }
 0xbab   :  { %v14078_v21 = vpop.f32.mrf.mxu0 }
 0xbad   :  { %v2352_v53 = vpop.f32.mrf.mxu0 }
 0xbae   :  { %14090 = vmatprep.mubr.msk.f32.mxu0 %vm20807_vm1, %v2352_v53 }
 0xbaf   :  { %v14081_v60 = vpop.f32.mrf.mxu0  ;;  %14091 = vmatmul.mubr.msk.f32.vlgmr.msra.gmra.mxu0 %vm20807_vm1, %v14078_v21 }
 0xbb1   :  { %v2362_v41 = vpop.f32.mrf.mxu0 }
 0xbb2   :  { %14093 = vmatprep.mubr.msk.f32.mxu0 %vm20807_vm1, %v2362_v41 }
 0xbb3   :  { %v14084_v19 = vpop.f32.mrf.mxu0  ;;  %14094 = vmatmul.mubr.msk.f32.gmra.mxu0 %vm20807_vm1, %v14081_v60 }
 0xbb5   :  { %v2372_v32 = vpop.f32.mrf.mxu0 }
 0xbb6   :  { %14096 = vmatprep.mubr.msk.f32.mxu0 %vm20807_vm1, %v2372_v32 }
 0xbb7   :  { %v14087_v45 = vpop.f32.mrf.mxu0  ;;  %14097 = vmatmul.mubr.msk.f32.gmra.mxu0 %vm20807_vm1, %v14084_v19 }
 0xbb9   :  { %v2382_v18 = vpop.f32.mrf.mxu0 }
 0xbba   :  { %14099 = vmatprep.mubr.msk.f32.mxu0 %vm20807_vm1, %v2382_v18 }
 0xbbb   :  { %14100 = vmatmul.mubr.msk.f32.gmra.mxu0 %vm20807_vm1, %v14087_v45 }
 0xc6f   :  { %v14092_v2 = vpop.f32.mrf.mxu0 }
 0xc70   :  { %v2521_v4 = vadd.f32 %v14092_v2, %v1974_v40 }
 0xc71   :  { %v2481_v42 = vpop.f32.mrf.mxu0 }
 0xc72   :  { %v2536_v43 = vadd.f32 %v13058_v28, %v2521_v4  ;;  %v2520_v34 = vadd.f32 %v2481_v42, %v1973_v50 }
 0xc73   :  { %v14095_v25 = vpop.f32.mrf.mxu0 }
 0xc74   :  { %v2535_v22 = vadd.f32 %v13058_v28, %v2520_v34  ;;  %v2523_v11 = vadd.f32 %v14095_v25, %v1976_v1  ;;  %v2544_v7 = vadd.f32 %v2536_v43, %v15350_v20  ;;  %v1426_v20 = vadd.f32 %v16044_v62, %v15818_v58 }
 0xc75   :  { %v2491_v30 = vpop.f32.mrf.mxu0 }
 0xc76   :  { %v2522_v12 = vadd.f32 %v2491_v30, %v1975_v37  ;;  %v2554_v6 = vsel %vm88_vm0, %v2544_v7, 0.0  ;;  %v2543_v61 = vadd.f32 %v2535_v22, %v15344_v36  ;;  %v2538_v39 = vadd.f32 %v13058_v28, %v2523_v11 }
 0xc77   :  { %2555 = vadd.xlane.f32.xlu1 %v2554_v6  ;;  %v14098_v29 = vpop.f32.mrf.mxu0  ;;  %v1979_v8 = vadd.f32 %v1964_v16, %v1426_v20 }
 0xc78   :  { %v2537_v26 = vadd.f32 %v13058_v28, %v2522_v12  ;;  %v2525_v44 = vadd.f32 %v14098_v29, %v1978_v9  ;;  %v2551_v33 = vsel %vm88_vm0, %v2543_v61, 0.0  ;;  %v2546_v36 = vadd.f32 %v2538_v39, %v15360_v52 }
 0xc79   :  { %2552 = vadd.xlane.f32.xlu0 %v2551_v33  ;;  %v2501_v47 = vpop.f32.mrf.mxu0 }
 0xc7a   :  { %v2540_v40 = vadd.f32 %v13058_v28, %v2525_v44  ;;  %v2524_v31 = vadd.f32 %v2501_v47, %v1977_v27  ;;  %v2545_v55 = vadd.f32 %v2537_v26, %v15353_v46  ;;  %v2560_v46 = vsel %vm88_vm0, %v2546_v36, 0.0 }
 0xc7b   :  { %v14101_v63 = vpop.f32.mrf.mxu0 }
 0xc7c   :  { %v2539_v13 = vadd.f32 %v13058_v28, %v2524_v31  ;;  %v2527_v1 = vadd.f32 %v14101_v63, %v1980_v24  ;;  %v2557_v0 = vsel %vm88_vm0, %v2545_v55, 0.0  ;;  %v2548_v51 = vadd.f32 %v2540_v40, %v15370_v57  ;;  %v2680_v63 = vld [vmem:[%s20634_s10 + $0x8] sm:$0xff] }
 0xc7d   :  { %2558 = vadd.xlane.f32.xlu0 %v2557_v0  ;;  %v2511_v5 = vpop.f32.mrf.mxu0 }
 0xc7e   :  { %v2542_v9 = vadd.f32 %v13058_v28, %v2527_v1  ;;  %v2526_v58 = vadd.f32 %v2511_v5, %v1979_v8  ;;  %v2566_v62 = vsel %vm88_vm0, %v2548_v51, 0.0  ;;  %v2547_v52 = vadd.f32 %v2539_v13, %v15363_v54  ;;  %v2681_v8 = vld [vmem:[%s20634_s10 + $0x10] sm:$0xff] }
 0xc7f   :  { %2567 = vadd.xlane.f32.xlu1 %v2566_v62 }
 0xc80   :  { %v2541_v56 = vadd.f32 %v13058_v28, %v2526_v58  ;;  %v2550_v49 = vadd.f32 %v2542_v9, %v15379_v48  ;;  %v2563_v57 = vsel %vm88_vm0, %v2547_v52, 0.0 }
 0xc81   :  { %2561 = vadd.xlane.f32.xlu0 %v2560_v46 }
 0xc82   :  { %v2572_v38 = vsel %vm88_vm0, %v2550_v49, 0.0  ;;  %v2549_v24 = vadd.f32 %v2541_v56, %v15373_v59 }
 0xc83   :  { %2573 = vadd.xlane.f32.xlu1 %v2572_v38  ;;  %v16169_v38 = vsub.s32 2, %v15330_v10 }
 0xc84   :  { %v2569_v16 = vsel %vm88_vm0, %v2549_v24, 0.0 }
 0xc85   :  { %2564 = vadd.xlane.f32.xlu0 %v2563_v57  ;;  %20830 = vst [vmem:[#allocation5_spill] sm:$0xff] %v16169_v38 }
 0xc89   :  { %2570 = vadd.xlane.f32.xlu0 %v2569_v16 }
 0xd00   :  { %v2556_v21 = vpop.xlane.xlu1 %2555 }
 0xd01   :  { %v2576_v53 = vmul.f32 0.03125, %v2556_v21 }
 0xd02   :  { %v2553_v60 = vpop.xlane.xlu0 %2552 }
 0xd03   :  { %v16116_v41 = vsub.f32 %v2544_v7, %v2576_v53  ;;  %v2575_v48 = vmul.f32 0.03125, %v2553_v60 }
 0xd05   :  { %v16118_v19 = vsub.f32 %v2543_v61, %v2575_v48  ;;  %v2592_v54 = vmul.f32 %v16116_v41, %v16116_v41 }
 0xd06   :  { %v2559_v32 = vpop.xlane.xlu0 %2558 }
 0xd07   :  { %v2577_v45 = vmul.f32 0.03125, %v2559_v32  ;;  %v2602_v18 = vsel %vm88_vm0, %v2592_v54, 0.0  ;;  %v2591_v59 = vmul.f32 %v16118_v19, %v16118_v19  ;;  %v16174_v54 = vld [vmem:[%s20824_s5] sm:$0xff] }
 0xd08   :  { %v2568_v15 = vpop.xlane.xlu1 %2567  ;;  %2603 = vadd.xlane.f32.xlu1 %v2602_v18  ;;  %v2658_v32 = vrot.slane %v16174_v54, %v16169_v38 }
 0xd09   :  { %v16125_v2 = vsub.f32 %v2545_v55, %v2577_v45  ;;  %v2580_v28 = vmul.f32 0.03125, %v2568_v15  ;;  %v2599_v50 = vsel %vm88_vm0, %v2591_v59, 0.0  ;;  %v2682_v55 = vld [vmem:[%s20634_s10 + $0x18] sm:$0xff]  ;;  %v16179_v59 = vsub.s32 3, %v15330_v10 }
 0xd0a   :  { %v2562_v4 = vpop.xlane.xlu0 %2561  ;;  %2600 = vadd.xlane.f32.xlu0 %v2599_v50  ;;  %14102 = vmatprep.subr.mxu1 %v2682_v55 }
 0xd0b   :  { %v2578_v42 = vmul.f32 0.03125, %v2562_v4  ;;  %v2593_v35 = vmul.f32 %v16125_v2, %v16125_v2  ;;  %v16130_v34 = vsub.f32 %v2548_v51, %v2580_v28  ;;  %14103 = vmatpush3.msra.mxu1 %v2682_v55  ;;  %20831 = vst [vmem:[#allocation6_spill] sm:$0xff] %v16179_v59 }
 0xd0c   :  { %v2574_v43 = vpop.xlane.xlu1 %2573  ;;  %14104 = vmatprep.subr.mxu1 %v2681_v8 }
 0xd0d   :  { %v16132_v25 = vsub.f32 %v2546_v36, %v2578_v42  ;;  %v2582_v37 = vmul.f32 0.03125, %v2574_v43  ;;  %v2605_v22 = vsel %vm88_vm0, %v2593_v35, 0.0  ;;  %v2596_v61 = vmul.f32 %v16130_v34, %v16130_v34  ;;  %14105 = vmatpush3.msra.mxu1 %v2681_v8  ;;  %v2679_v36 = vld [vmem:[%s20634_s10] sm:$0xff] }
 0xd0e   :  { %v2565_v11 = vpop.xlane.xlu0 %2564  ;;  %2606 = vadd.xlane.f32.xlu0 %v2605_v22  ;;  %14106 = vmatprep.subr.mxu1 %v2680_v63  ;;  %v2670_v22 = vrot.slane %v16174_v54, %v16179_v59 }
 0xd0f   :  { %v2579_v7 = vmul.f32 0.03125, %v2565_v11  ;;  %v2594_v30 = vmul.f32 %v16132_v25, %v16132_v25  ;;  %v16137_v14 = vsub.f32 %v2550_v49, %v2582_v37  ;;  %v2614_v44 = vsel %vm88_vm0, %v2596_v61, 0.0  ;;  %14107 = vmatpush3.msra.mxu1 %v2680_v63 }
 0xd10   :  { %14108 = vmatprep.subr.mxu1 %v2679_v36 }
 0xd11   :  { %v16139_v12 = vsub.f32 %v2547_v52, %v2579_v7  ;;  %v2608_v6 = vsel %vm88_vm0, %v2594_v30, 0.0  ;;  %v2598_v20 = vmul.f32 %v16137_v14, %v16137_v14  ;;  %14109 = vmatpush3.msra.mxu1 %v2679_v36 }
 0xd12   :  { %2609 = vadd.xlane.f32.xlu1 %v2608_v6  ;;  %v2571_v39 = vpop.xlane.xlu0 %2570 }
 0xd13   :  { %v2581_v29 = vmul.f32 0.03125, %v2571_v39  ;;  %v2595_v27 = vmul.f32 %v16139_v12, %v16139_v12  ;;  %v2620_v40 = vsel %vm88_vm0, %v2598_v20, 0.0 }
 0xd15   :  { %v16146_v26 = vsub.f32 %v2549_v24, %v2581_v29  ;;  %v2611_v33 = vsel %vm88_vm0, %v2595_v27, 0.0 }
 0xd16   :  { %2615 = vadd.xlane.f32.xlu1 %v2614_v44  ;;  %2612 = vadd.xlane.f32.xlu0 %v2611_v33 }
 0xd17   :  { %v2597_v47 = vmul.f32 %v16146_v26, %v16146_v26 }
 0xd19   :  { %v2617_v31 = vsel %vm88_vm0, %v2597_v47, 0.0 }
 0xd1a   :  { %2621 = vadd.xlane.f32.xlu1 %v2620_v40  ;;  %2618 = vadd.xlane.f32.xlu0 %v2617_v31 }
 0xd91   :  { %v2604_v13 = vpop.xlane.xlu1 %2603 }
 0xd92   :  { %v2624_v1 = vmul.f32 0.03125, %v2604_v13 }
 0xd93   :  { %v2601_v0 = vpop.xlane.xlu0 %2600 }
 0xd94   :  { %v2632_v51 = vadd.f32 1e-12, %v2624_v1  ;;  %v2623_v5 = vmul.f32 0.03125, %v2601_v0 }
 0xd96   :  { %14980 = vrsqrt.f32 %v2632_v51  ;;  %v2631_v9 = vadd.f32 1e-12, %v2623_v5  ;;  %v2896_v51 = vld [vmem:[%s20635_s12 + $0x28] sm:$0xff]  ;;  %v2895_v5 = vld [vmem:[%s20635_s12 + $0x20] sm:$0xff] }
 0xd97   :  { %v2607_v58 = vpop.xlane.xlu0 %2606 }
 0xd98   :  { %14982 = vrsqrt.f32 %v2631_v9  ;;  %v2625_v62 = vmul.f32 0.03125, %v2607_v58  ;;  %v2894_v9 = vld [vmem:[%s20635_s12 + $0x18] sm:$0xff]  ;;  %v2893_v58 = vld [vmem:[%s20635_s12 + $0x10] sm:$0xff] }
 0xd9a   :  { %v2633_v56 = vadd.f32 1e-12, %v2625_v62  ;;  %v2892_v62 = vld [vmem:[%s20635_s12 + $0x8] sm:$0xff] }
 0xd9b   :  { %v2610_v46 = vpop.xlane.xlu1 %2609 }
 0xd9c   :  { %14984 = vrsqrt.f32 %v2633_v56  ;;  %v2626_v49 = vmul.f32 0.03125, %v2610_v46  ;;  %v2891_v56 = vld [vmem:[%s20635_s12] sm:$0xff] }
 0xd9d   :  { %v13059_v46 = vld [vmem:[%s20636_s11] ss:$0 sm:$0xff] }
 0xd9e   :  { %v2634_v52 = vadd.f32 1e-12, %v2626_v49 }
 0xd9f   :  { %v2616_v57 = vpop.xlane.xlu1 %2615  ;;  %v2613_v24 = vpop.xlane.xlu0 %2612 }
 0xda0   :  { %14986 = vrsqrt.f32 %v2634_v52  ;;  %v2628_v16 = vmul.f32 0.03125, %v2616_v57  ;;  %v2627_v21 = vmul.f32 0.03125, %v2613_v24 }
 0xda2   :  { %v2636_v53 = vadd.f32 1e-12, %v2628_v16  ;;  %v2635_v60 = vadd.f32 1e-12, %v2627_v21 }
 0xda3   :  { %v14981_v48 = vpop.eup %14980  ;;  %v2622_v45 = vpop.xlane.xlu1 %2621 }
 0xda4   :  { %v2619_v18 = vpop.xlane.xlu0 %2618  ;;  %v2648_v15 = vmul.f32 %v14981_v48, %v16116_v41  ;;  %14988 = vrsqrt.f32 %v2636_v53  ;;  %v2630_v28 = vmul.f32 0.03125, %v2622_v45 }
 0xda5   :  { %v2629_v50 = vmul.f32 0.03125, %v2619_v18  ;;  %v14983_v4 = vpop.eup %14982  ;;  %14990 = vrsqrt.f32 %v2635_v60 }
 0xda6   :  { %v2638_v42 = vadd.f32 1e-12, %v2630_v28  ;;  %v2647_v43 = vmul.f32 %v14983_v4, %v16118_v19  ;;  %v2660_v37 = vmul.f32 %v2658_v32, %v2648_v15 }
 0xda7   :  { %v2637_v35 = vadd.f32 1e-12, %v2629_v50 }
 0xda8   :  { %14992 = vrsqrt.f32 %v2638_v42  ;;  %v2659_v11 = vmul.f32 %v2658_v32, %v2647_v43  ;;  %v16188_v6 = vadd.f32 %v2670_v22, %v2660_v37 }
 0xda9   :  { %v14985_v7 = vpop.eup %14984  ;;  %14994 = vrsqrt.f32 %v2637_v35 }
 0xdaa   :  { %v16185_v30 = vadd.f32 %v2670_v22, %v2659_v11  ;;  %v2649_v41 = vmul.f32 %v14985_v7, %v16125_v2 }
 0xdac   :  { %14110 = vmatprep.mubr.msk.f32.mxu1 %vm88_vm0, %v16185_v30  ;;  %v2661_v61 = vmul.f32 %v2658_v32, %v2649_v41 }
 0xdad   :  { %v14987_v39 = vpop.eup %14986  ;;  %14111 = vmatmul.mubr.msk.f32.vlgmr.msra.gmra.mxu1 %vm88_vm0, %v16188_v6 }
 0xdae   :  { %v16194_v19 = vadd.f32 %v2670_v22, %v2661_v61  ;;  %v2650_v29 = vmul.f32 %v14987_v39, %v16132_v25 }
 0xdb0   :  { %14113 = vmatprep.mubr.msk.f32.mxu1 %vm88_vm0, %v16194_v19  ;;  %v2662_v27 = vmul.f32 %v2658_v32, %v2650_v29 }
 0xdb1   :  { %v14989_v44 = vpop.eup %14988 }
 0xdb2   :  { %v14991_v2 = vpop.eup %14990  ;;  %v16199_v33 = vadd.f32 %v2670_v22, %v2662_v27  ;;  %v2652_v20 = vmul.f32 %v14989_v44, %v16130_v34 }
 0xdb3   :  { %v2651_v47 = vmul.f32 %v14991_v2, %v16139_v12 }
 0xdb4   :  { %14114 = vmatmul.mubr.msk.f32.gmra.mxu1 %vm88_vm0, %v16199_v33  ;;  %v2664_v40 = vmul.f32 %v2658_v32, %v2652_v20 }
 0xdb5   :  { %v14993_v31 = vpop.eup %14992  ;;  %v2663_v55 = vmul.f32 %v2658_v32, %v2651_v47 }
 0xdb6   :  { %v14995_v8 = vpop.eup %14994  ;;  %v16205_v25 = vadd.f32 %v2670_v22, %v2664_v40  ;;  %v2654_v63 = vmul.f32 %v14993_v31, %v16137_v14  ;;  %v2898_v14 = vld [vmem:[%s20635_s12 + $0x38] sm:$0xff] }
 0xdb7   :  { %v16208_v36 = vadd.f32 %v2670_v22, %v2663_v55  ;;  %v2653_v13 = vmul.f32 %v14995_v8, %v16146_v26  ;;  %14122 = vmatprep.subr.mxu0 %v2898_v14  ;;  %v2897_v26 = vld [vmem:[%s20635_s12 + $0x30] sm:$0xff]  ;;  %s15118_s12 = smov 16  }
 0xdb8   :  { %v2666_v1 = vmul.f32 %v2658_v32, %v2654_v63  ;;  %14123 = vmatpush3.msra.mxu0 %v2898_v14 }
 0xdb9   :  { %14116 = vmatprep.mubr.msk.f32.mxu1 %vm88_vm0, %v16208_v36  ;;  %v2665_v34 = vmul.f32 %v2658_v32, %v2653_v13  ;;  %14124 = vmatprep.subr.mxu0 %v2897_v26 }
 0xdba   :  { %14117 = vmatmul.mubr.msk.f32.gmra.mxu1 %vm88_vm0, %v16205_v25  ;;  %v16215_v12 = vadd.f32 %v2670_v22, %v2666_v1  ;;  %14125 = vmatpush3.msra.mxu0 %v2897_v26 }
 0xdbb   :  { %v16217_v0 = vadd.f32 %v2670_v22, %v2665_v34  ;;  %14126 = vmatprep.subr.mxu0 %v2896_v51 }
 0xdbc   :  { %14127 = vmatpush3.msra.mxu0 %v2896_v51 }
 0xdbd   :  { %14119 = vmatprep.mubr.msk.f32.mxu1 %vm88_vm0, %v16217_v0  ;;  %14128 = vmatprep.subr.mxu0 %v2895_v5 }
 0xdbe   :  { %14120 = vmatmul.mubr.msk.f32.gmra.mxu1 %vm88_vm0, %v16215_v12  ;;  %14129 = vmatpush3.msra.mxu0 %v2895_v5 }
 0xdbf   :  { %14130 = vmatprep.subr.mxu0 %v2894_v9 }
 0xdc0   :  { %14131 = vmatpush3.msra.mxu0 %v2894_v9 }
 0xdc1   :  { %14132 = vmatprep.subr.mxu0 %v2893_v58 }
 0xdc2   :  { %14133 = vmatpush3.msra.mxu0 %v2893_v58 }
 0xdc3   :  { %14134 = vmatprep.subr.mxu0 %v2892_v62 }
 0xdc4   :  { %14135 = vmatpush3.msra.mxu0 %v2892_v62 }
 0xdc5   :  { %14136 = vmatprep.subr.mxu0 %v2891_v56 }
 0xdc6   :  { %14137 = vmatpush3.msra.mxu0 %v2891_v56 }
 0xe6d   :  { %v14112_v49 = vpop.f32.mrf.mxu1 }
 0xe6e   :  { %v16250_v52 = vadd.f32 %v14112_v49, %v13059_v46 }
 0xe6f   :  { %v2780_v57 = vpop.f32.mrf.mxu1 }
 0xe70   :  { %v2820_v24 = vmul.f32 %v16250_v52, %v16250_v52  ;;  %v16254_v16 = vadd.f32 %v13059_v46, %v2780_v57 }
 0xe72   :  { %v2828_v21 = vmul.f32 %v2820_v24, %v16250_v52  ;;  %v2819_v53 = vmul.f32 %v16254_v16, %v16254_v16 }
 0xe74   :  { %v2836_v60 = vmul.f32 0.044715, %v2828_v21  ;;  %v2827_v48 = vmul.f32 %v2819_v53, %v16254_v16  ;;  %v14115_v32 = vpop.f32.mrf.mxu1 }
 0xe75   :  { %v16260_v45 = vadd.f32 %v14115_v32, %v13059_v46 }
 0xe76   :  { %v2844_v18 = vadd.f32 %v2836_v60, %v16250_v52  ;;  %v2835_v15 = vmul.f32 0.044715, %v2827_v48  ;;  %v2790_v28 = vpop.f32.mrf.mxu1 }
 0xe77   :  { %v2822_v50 = vmul.f32 %v16260_v45, %v16260_v45  ;;  %v16265_v4 = vadd.f32 %v13059_v46, %v2790_v28 }
 0xe78   :  { %v2852_v42 = vmul.f32 0.7978846, %v2844_v18  ;;  %v2843_v35 = vadd.f32 %v2835_v15, %v16254_v16 }
 0xe79   :  { %v2830_v43 = vmul.f32 %v2822_v50, %v16260_v45  ;;  %v2821_v37 = vmul.f32 %v16265_v4, %v16265_v4 }
 0xe7a   :  { %14996 = vtanh.f32 %v2852_v42  ;;  %v2851_v22 = vmul.f32 0.7978846, %v2843_v35  ;;  %v14118_v11 = vpop.f32.mrf.mxu1 }
 0xe7b   :  { %v2838_v7 = vmul.f32 0.044715, %v2830_v43  ;;  %v2829_v41 = vmul.f32 %v2821_v37, %v16265_v4  ;;  %v16272_v61 = vadd.f32 %v14118_v11, %v13059_v46 }
 0xe7c   :  { %14998 = vtanh.f32 %v2851_v22  ;;  %v2800_v39 = vpop.f32.mrf.mxu1 }
 0xe7d   :  { %v2846_v29 = vadd.f32 %v2838_v7, %v16260_v45  ;;  %v2837_v27 = vmul.f32 0.044715, %v2829_v41  ;;  %v2824_v44 = vmul.f32 %v16272_v61, %v16272_v61  ;;  %v2801_v2 = vadd.f32 %v13059_v46, %v2800_v39 }
 0xe7e   :  { %v14121_v20 = vpop.f32.mrf.mxu1 }
 0xe7f   :  { %v2854_v47 = vmul.f32 0.7978846, %v2846_v29  ;;  %v2845_v40 = vadd.f32 %v2837_v27, %v16265_v4  ;;  %v2832_v31 = vmul.f32 %v2824_v44, %v16272_v61  ;;  %v2823_v55 = vmul.f32 %v2801_v2, %v2801_v2 }
 0xe80   :  { %v16279_v8 = vadd.f32 %v14121_v20, %v13059_v46  ;;  %v2810_v63 = vpop.f32.mrf.mxu1 }
 0xe81   :  { %15000 = vtanh.f32 %v2854_v47  ;;  %v2853_v13 = vmul.f32 0.7978846, %v2845_v40  ;;  %v2840_v1 = vmul.f32 0.044715, %v2832_v31  ;;  %v2831_v34 = vmul.f32 %v2823_v55, %v2801_v2 }
 0xe82   :  { %v2826_v14 = vmul.f32 %v16279_v8, %v16279_v8  ;;  %v2811_v26 = vadd.f32 %v13059_v46, %v2810_v63 }
 0xe83   :  { %15002 = vtanh.f32 %v2853_v13  ;;  %v2848_v51 = vadd.f32 %v2840_v1, %v16272_v61  ;;  %v2839_v5 = vmul.f32 0.044715, %v2831_v34 }
 0xe84   :  { %v2834_v9 = vmul.f32 %v2826_v14, %v16279_v8  ;;  %v2825_v58 = vmul.f32 %v2811_v26, %v2811_v26 }
 0xe85   :  { %v2856_v62 = vmul.f32 0.7978846, %v2848_v51  ;;  %v2847_v56 = vadd.f32 %v2839_v5, %v2801_v2 }
 0xe86   :  { %v2842_v49 = vmul.f32 0.044715, %v2834_v9  ;;  %v2833_v57 = vmul.f32 %v2825_v58, %v2811_v26 }
 0xe87   :  { %v14997_v24 = vpop.eup %14996  ;;  %15004 = vtanh.f32 %v2856_v62  ;;  %v2855_v21 = vmul.f32 0.7978846, %v2847_v56 }
 0xe88   :  { %v2868_v53 = vadd.f32 1.0, %v14997_v24  ;;  %v2850_v60 = vadd.f32 %v2842_v49, %v16279_v8  ;;  %v2841_v48 = vmul.f32 0.044715, %v2833_v57 }
 0xe89   :  { %v14999_v32 = vpop.eup %14998  ;;  %15006 = vtanh.f32 %v2855_v21 }
 0xe8a   :  { %v2858_v46 = vmul.f32 0.7978846, %v2850_v60  ;;  %v2849_v18 = vadd.f32 %v2841_v48, %v2811_v26  ;;  %v2867_v15 = vadd.f32 1.0, %v14999_v32  ;;  %v2876_v28 = vmul.f32 0.5, %v2868_v53 }
 0xe8c   :  { %15008 = vtanh.f32 %v2858_v46  ;;  %v2857_v50 = vmul.f32 0.7978846, %v2849_v18  ;;  %v2875_v42 = vmul.f32 0.5, %v2867_v15  ;;  %v2884_v37 = vmul.f32 %v2876_v28, %v16250_v52 }
 0xe8e   :  { %v15001_v35 = vpop.eup %15000  ;;  %15010 = vtanh.f32 %v2857_v50  ;;  %v2883_v43 = vmul.f32 %v2875_v42, %v16254_v16 }
 0xe8f   :  { %v2870_v22 = vadd.f32 1.0, %v15001_v35 }
 0xe90   :  { %v15003_v11 = vpop.eup %15002  ;;  %14138 = vmatprep.mubr.msk.f32.mxu0 %vm524_vm2, %v2883_v43 }
 0xe91   :  { %14139 = vmatmul.mubr.msk.f32.vlgmr.msra.gmra.mxu0 %vm524_vm2, %v2884_v37  ;;  %v2869_v7 = vadd.f32 1.0, %v15003_v11  ;;  %v2878_v41 = vmul.f32 0.5, %v2870_v22 }
 0xe93   :  { %v2877_v39 = vmul.f32 0.5, %v2869_v7  ;;  %v2886_v47 = vmul.f32 %v2878_v41, %v16260_v45 }
 0xe94   :  { %v15005_v29 = vpop.eup %15004 }
 0xe95   :  { %v2885_v27 = vmul.f32 %v2877_v39, %v16265_v4  ;;  %v2872_v44 = vadd.f32 1.0, %v15005_v29 }
 0xe96   :  { %v15007_v20 = vpop.eup %15006 }
 0xe97   :  { %14141 = vmatprep.mubr.msk.f32.mxu0 %vm524_vm2, %v2885_v27  ;;  %v2871_v16 = vadd.f32 1.0, %v15007_v20  ;;  %v2880_v52 = vmul.f32 0.5, %v2872_v44 }
 0xe98   :  { %14142 = vmatmul.mubr.msk.f32.gmra.mxu0 %vm524_vm2, %v2886_v47 }
 0xe99   :  { %v15009_v40 = vpop.eup %15008  ;;  %v2879_v31 = vmul.f32 0.5, %v2871_v16  ;;  %v2888_v1 = vmul.f32 %v2880_v52, %v16272_v61 }
 0xe9a   :  { %v2874_v55 = vadd.f32 1.0, %v15009_v40 }
 0xe9b   :  { %v15011_v63 = vpop.eup %15010  ;;  %v2887_v13 = vmul.f32 %v2879_v31, %v2801_v2  ;;  %v13068_v2 = vld [vmem:[%s20637_s13] ss:$0 sm:$0xff]  ;;  %s15119_s13 = smov 24  }
 0xe9c   :  { %v2873_v34 = vadd.f32 1.0, %v15011_v63  ;;  %v2882_v4 = vmul.f32 0.5, %v2874_v55 }
 0xe9d   :  { %14144 = vmatprep.mubr.msk.f32.mxu0 %vm524_vm2, %v2887_v13 }
 0xe9e   :  { %14145 = vmatmul.mubr.msk.f32.gmra.mxu0 %vm524_vm2, %v2888_v1  ;;  %v2881_v45 = vmul.f32 0.5, %v2873_v34  ;;  %v2890_v51 = vmul.f32 %v2882_v4, %v16279_v8 }
 0xea0   :  { %v2889_v14 = vmul.f32 %v2881_v45, %v2811_v26 }
 0xea2   :  { %14147 = vmatprep.mubr.msk.f32.mxu0 %vm524_vm2, %v2889_v14 }
 0xea3   :  { %14148 = vmatmul.mubr.msk.f32.gmra.mxu0 %vm524_vm2, %v2890_v51 }
 0xf51   :  { %v14140_v5 = vpop.f32.mrf.mxu0 }
 0xf52   :  { %v3002_v61 = vadd.f32 %v14140_v5, %v13068_v2 }
 0xf53   :  { %v2996_v9 = vpop.f32.mrf.mxu0 }
 0xf54   :  { %v3036_v58 = vadd.f32 %v3002_v61, %v16188_v6  ;;  %v2997_v62 = vadd.f32 %v13068_v2, %v2996_v9 }
 0xf56   :  { %v3046_v56 = vsel %vm88_vm0, %v3036_v58, 0.0  ;;  %v3035_v26 = vadd.f32 %v2997_v62, %v16185_v30 }
 0xf57   :  { %3047 = vadd.xlane.f32.xlu1 %v3046_v56 }
 0xf58   :  { %v14143_v8 = vpop.f32.mrf.mxu0  ;;  %v3043_v49 = vsel %vm88_vm0, %v3035_v26, 0.0 }
 0xf59   :  { %v3012_v57 = vadd.f32 %v14143_v8, %v13068_v2  ;;  %3044 = vadd.xlane.f32.xlu0 %v3043_v49 }
 0xf5a   :  { %v3006_v24 = vpop.f32.mrf.mxu0 }
 0xf5b   :  { %v3038_v21 = vadd.f32 %v3012_v57, %v16199_v33  ;;  %v3007_v53 = vadd.f32 %v13068_v2, %v3006_v24 }
 0xf5d   :  { %v3052_v60 = vsel %vm88_vm0, %v3038_v21, 0.0  ;;  %v3037_v48 = vadd.f32 %v3007_v53, %v16194_v19 }
 0xf5e   :  { %v14146_v6 = vpop.f32.mrf.mxu0  ;;  %3053 = vadd.xlane.f32.xlu1 %v3052_v60 }
 0xf5f   :  { %v3022_v32 = vadd.f32 %v14146_v6, %v13068_v2  ;;  %v3049_v46 = vsel %vm88_vm0, %v3037_v48, 0.0  ;;  %v3226_v6 = vld [vmem:[%s20638_s14 + $0x1b8] sm:$0xff] }
 0xf60   :  { %v3016_v30 = vpop.f32.mrf.mxu0  ;;  %3050 = vadd.xlane.f32.xlu0 %v3049_v46  ;;  %3387 = vmatprep.subr.mxu1 %v3226_v6  ;;  %v3225_v46 = vld [vmem:[%s20638_s14 + $0x1b0] sm:$0xff] }
 0xf61   :  { %v3040_v18 = vadd.f32 %v3022_v32, %v16205_v25  ;;  %v3017_v15 = vadd.f32 %v13068_v2, %v3016_v30  ;;  %v3228_v32 = vld [vmem:[%s20638_s14 + $0x1c8] sm:$0xff]  ;;  %v3227_v30 = vld [vmem:[%s20638_s14 + $0x1c0] sm:$0xff]  ;;  %3388 = vmatpush1.msra.mxu1 %v3225_v46 }
 0xf62   :  { %3500 = vmatprep.subr.mxu0 %v3228_v32  ;;  %v16492_v32 = vsub.s32 4, %v15330_v10 }
 0xf63   :  { %v14149_v28 = vpop.f32.mrf.mxu0  ;;  %v3058_v50 = vsel %vm88_vm0, %v3040_v18, 0.0  ;;  %v3039_v33 = vadd.f32 %v3017_v15, %v16208_v36  ;;  %3501 = vmatpush1.msra.mxu0 %v3227_v30  ;;  %v3210_v15 = vld [vmem:[%s20638_s14 + $0x138] sm:$0xff] }
 0xf64   :  { %v3032_v42 = vadd.f32 %v14149_v28, %v13068_v2  ;;  %3059 = vadd.xlane.f32.xlu1 %v3058_v50  ;;  %3502 = vmatprep.subr.mxu0 %v3210_v15  ;;  %v3207_v28 = vld [vmem:[%s20638_s14 + $0x120] sm:$0xff]  ;;  %v3209_v50 = vld [vmem:[%s20638_s14 + $0x130] sm:$0xff]  ;;  %20832 = vst [vmem:[#allocation7_spill] sm:$0xff] %v16492_v32 }
 0xf65   :  { %v3026_v35 = vpop.f32.mrf.mxu0  ;;  %v3055_v19 = vsel %vm88_vm0, %v3039_v33, 0.0  ;;  %3503 = vmatpush1.msra.mxu0 %v3209_v50  ;;  %v16495_v50 = vsub.s32 5, %v15330_v10 }
 0xf66   :  { %v3042_v43 = vadd.f32 %v3032_v42, %v16215_v12  ;;  %v3027_v37 = vadd.f32 %v13068_v2, %v3026_v35  ;;  %3056 = vadd.xlane.f32.xlu0 %v3055_v19  ;;  %v3192_v42 = vld [vmem:[%s20638_s14 + $0xa8] sm:$0xff]  ;;  %v3189_v35 = vld [vmem:[%s20638_s14 + $0x90] sm:$0xff]  ;;  %v3191_v19 = vld [vmem:[%s20638_s14 + $0xa0] sm:$0xff] }
 0xf67   :  { %3504 = vmatprep.subr.mxu0 %v3192_v42  ;;  %20833 = vst [vmem:[#allocation8_spill] sm:$0xff] %v16495_v50  ;;  %v16499_v42 = vrot.slane %v16174_v54, %v16492_v32 }
 0xf68   :  { %v3064_v22 = vsel %vm88_vm0, %v3042_v43, 0.0  ;;  %v3041_v11 = vadd.f32 %v3027_v37, %v16217_v0  ;;  %3505 = vmatpush1.msra.mxu0 %v3191_v19  ;;  %v3174_v37 = vld [vmem:[%s20638_s14 + $0x18] sm:$0xff] }
 0xf69   :  { %3065 = vadd.xlane.f32.xlu1 %v3064_v22  ;;  %3506 = vmatprep.subr.mxu0 %v3174_v37  ;;  %v3171_v22 = vld [vmem:[%s20638_s14] sm:$0xff] }
 0xf6a   :  { %v3061_v25 = vsel %vm88_vm0, %v3041_v11, 0.0 }
 0xf6b   :  { %3062 = vadd.xlane.f32.xlu0 %v3061_v25  ;;  %v20656_v25 = vmov 0.0  }
 0xf6c   :  { %3427 = vmatprep.mubr.f32.mxu1 %v20656_v25  ;;  %3540 = vmatprep.mubr.f32.mxu0 %v20656_v25 }
 0xfe0   :  { %v3048_v7 = vpop.xlane.xlu1 %3047 }
 0xfe1   :  { %v3068_v41 = vmul.f32 0.03125, %v3048_v7  ;;  %v3230_v7 = vld [vmem:[%s20638_s14 + $0x1d8] sm:$0xff] }
 0xfe2   :  { %v3045_v36 = vpop.xlane.xlu0 %3044 }
 0xfe3   :  { %v16319_v39 = vsub.f32 %v3036_v58, %v3068_v41  ;;  %v3067_v29 = vmul.f32 0.03125, %v3045_v36  ;;  %v3232_v41 = vld [vmem:[%s20638_s14 + $0x1e8] sm:$0xff] }
 0xfe4   :  { %v16418_v36 = vld [vmem:[%s20639_s17 + $0x8] sm:$0xff] }
 0xfe5   :  { %v16321_v27 = vsub.f32 %v3035_v26, %v3067_v29  ;;  %v3084_v12 = vmul.f32 %v16319_v39, %v16319_v39  ;;  %v16425_v29 = vld [vmem:[%s20639_s17 + $0x10] sm:$0xff] }
 0xfe7   :  { %v3054_v44 = vpop.xlane.xlu1 %3053  ;;  %v3094_v20 = vsel %vm88_vm0, %v3084_v12, 0.0  ;;  %v3083_v0 = vmul.f32 %v16321_v27, %v16321_v27  ;;  %v16430_v12 = vld [vmem:[%s20639_s17] sm:$0xff] }
 0xfe8   :  { %v3070_v47 = vmul.f32 0.03125, %v3054_v44  ;;  %3095 = vadd.xlane.f32.xlu1 %v3094_v20  ;;  %v16439_v44 = vld [vmem:[%s20639_s17 + $0x18] sm:$0xff]  ;;  %v4392_v20 = vld [vmem:[%s20639_s17 + $0x20] sm:$0xff] }
 0xfe9   :  { %v3051_v16 = vpop.xlane.xlu0 %3050  ;;  %v3091_v52 = vsel %vm88_vm0, %v3083_v0, 0.0  ;;  %v4393_v0 = vld [vmem:[%s20639_s17 + $0x28] sm:$0xff] }
 0xfea   :  { %v16329_v40 = vsub.f32 %v3038_v21, %v3070_v47  ;;  %v3069_v31 = vmul.f32 0.03125, %v3051_v16  ;;  %3092 = vadd.xlane.f32.xlu0 %v3091_v52  ;;  %v4394_v47 = vld [vmem:[%s20639_s17 + $0x30] sm:$0xff]  ;;  %v4395_v16 = vld [vmem:[%s20639_s17 + $0x38] sm:$0xff]  ;;  %v4380_v52 = vld [vmem:[%s20640_s16] sm:$0xff] }
 0xfec   :  { %v16331_v55 = vsub.f32 %v3037_v48, %v3069_v31  ;;  %v3086_v63 = vmul.f32 %v16329_v40, %v16329_v40  ;;  %v4381_v31 = vld [vmem:[%s20640_s16 + $0x8] sm:$0xff] }
 0xfed   :  { %v3060_v13 = vpop.xlane.xlu1 %3059 }
 0xfee   :  { %v3072_v1 = vmul.f32 0.03125, %v3060_v13  ;;  %v3100_v34 = vsel %vm88_vm0, %v3086_v63, 0.0  ;;  %v3085_v4 = vmul.f32 %v16331_v55, %v16331_v55  ;;  %v4382_v63 = vld [vmem:[%s20640_s16 + $0x10] sm:$0xff]  ;;  %v4383_v13 = vld [vmem:[%s20640_s16 + $0x18] sm:$0xff] }
 0xfef   :  { %v3057_v45 = vpop.xlane.xlu0 %3056  ;;  %3101 = vadd.xlane.f32.xlu1 %v3100_v34  ;;  %v4385_v34 = vld [vmem:[%s20640_s16 + $0x28] sm:$0xff] }
 0xff0   :  { %v16338_v14 = vsub.f32 %v3040_v18, %v3072_v1  ;;  %v3071_v51 = vmul.f32 0.03125, %v3057_v45  ;;  %v3097_v2 = vsel %vm88_vm0, %v3085_v4, 0.0  ;;  %v3208_v18 = vld [vmem:[%s20638_s14 + $0x128] sm:$0xff]  ;;  %v4384_v1 = vld [vmem:[%s20640_s16 + $0x20] sm:$0xff]  ;;  %v4386_v45 = vld [vmem:[%s20640_s16 + $0x30] sm:$0xff] }
 0xff1   :  { %3098 = vadd.xlane.f32.xlu0 %v3097_v2  ;;  %3389 = vmatprep.subr.mxu1 %v3208_v18 }
 0xff2   :  { %v16341_v5 = vsub.f32 %v3039_v33, %v3071_v51  ;;  %v3066_v61 = vpop.xlane.xlu1 %3065  ;;  %v3088_v9 = vmul.f32 %v16338_v14, %v16338_v14  ;;  %3390 = vmatpush1.msra.mxu1 %v3207_v28  ;;  %v3190_v33 = vld [vmem:[%s20638_s14 + $0x98] sm:$0xff] }
 0xff3   :  { %v3074_v58 = vmul.f32 0.03125, %v3066_v61  ;;  %3391 = vmatprep.subr.mxu1 %v3190_v33 }
 0xff4   :  { %v3063_v62 = vpop.xlane.xlu0 %3062  ;;  %v3106_v56 = vsel %vm88_vm0, %v3088_v9, 0.0  ;;  %v3087_v26 = vmul.f32 %v16341_v5, %v16341_v5  ;;  %3392 = vmatpush1.msra.mxu1 %v3189_v35 }
 0xff5   :  { %v16348_v8 = vsub.f32 %v3042_v43, %v3074_v58  ;;  %v3073_v49 = vmul.f32 0.03125, %v3063_v62  ;;  %3107 = vadd.xlane.f32.xlu1 %v3106_v56  ;;  %v3172_v43 = vld [vmem:[%s20638_s14 + $0x8] sm:$0xff]  ;;  %v4387_v58 = vld [vmem:[%s20640_s16 + $0x38] sm:$0xff] }
 0xff6   :  { %v3103_v57 = vsel %vm88_vm0, %v3087_v26, 0.0  ;;  %3393 = vmatprep.subr.mxu1 %v3172_v43 }
 0xff7   :  { %v16351_v24 = vsub.f32 %v3041_v11, %v3073_v49  ;;  %3104 = vadd.xlane.f32.xlu0 %v3103_v57  ;;  %v3090_v21 = vmul.f32 %v16348_v8, %v16348_v8  ;;  %v3173_v11 = vld [vmem:[%s20638_s14 + $0x10] sm:$0xff]  ;;  %3394 = vmatpush1.msra.mxu1 %v3171_v22 }
 0xff8   :  { %3507 = vmatpush1.msra.mxu0 %v3173_v11  ;;  %3613 = vmatprep.subr.mxu1 %v3230_v7  ;;  %v16505_v11 = vrot.slane %v16174_v54, %v16495_v50 }
 0xff9   :  { %v3112_v53 = vsel %vm88_vm0, %v3090_v21, 0.0  ;;  %v3089_v60 = vmul.f32 %v16351_v24, %v16351_v24  ;;  %3726 = vmatprep.subr.mxu0 %v3232_v41 }
 0xffa   :  { %3113 = vadd.xlane.f32.xlu1 %v3112_v53 }
 0xffb   :  { %v3109_v48 = vsel %vm88_vm0, %v3089_v60, 0.0 }
 0xffc   :  { %3110 = vadd.xlane.f32.xlu0 %v3109_v48 }
0x100b   :  { %4414 = vrot.lane.b32.xlu1 %v16418_v36, %s15104_s30 }
0x100f   :  { %4416 = vrot.lane.b32.xlu1 %v16425_v29, %s15104_s30 }
0x1012   :  { %4412 = vrot.lane.b32.xlu0 %v16430_v12, %s15104_s30 }
0x1013   :  { %4418 = vrot.lane.b32.xlu1 %v16439_v44, %s15104_s30 }
0x1016   :  { %4420 = vrot.lane.b32.xlu0 %v4392_v20, %s15104_s30 }
0x1017   :  { %4422 = vrot.lane.b32.xlu1 %v4393_v0, %s15104_s30 }
0x101a   :  { %4424 = vrot.lane.b32.xlu0 %v4394_v47, %s15104_s30 }
0x101b   :  { %4426 = vrot.lane.b32.xlu1 %v4395_v16, %s15104_s30 }
0x101e   :  { %5156 = vrot.lane.b32.xlu0 %v4380_v52, %s15104_s30  ;;  %v3212_v52 = vld [vmem:[%s20638_s14 + $0x148] sm:$0xff] }
0x101f   :  { %5158 = vrot.lane.b32.xlu1 %v4381_v31, %s15104_s30  ;;  %v3214_v31 = vld [vmem:[%s20638_s14 + $0x158] sm:$0xff] }
0x1022   :  { %5160 = vrot.lane.b32.xlu0 %v4382_v63, %s15104_s30 }
0x1023   :  { %5162 = vrot.lane.b32.xlu1 %v4383_v13, %s15104_s30 }
0x1026   :  { %5164 = vrot.lane.b32.xlu0 %v4384_v1, %s15104_s30 }
0x1027   :  { %5166 = vrot.lane.b32.xlu1 %v4385_v34, %s15104_s30 }
0x102a   :  { %5168 = vrot.lane.b32.xlu0 %v4386_v45, %s15104_s30  ;;  %v3196_v45 = vld [vmem:[%s20638_s14 + $0xc8] sm:$0xff] }
0x102b   :  { %5170 = vrot.lane.b32.xlu1 %v4387_v58, %s15104_s30 }
0x1071   :  { %v3096_v4 = vpop.xlane.xlu1 %3095 }
0x1072   :  { %v3116_v51 = vmul.f32 0.03125, %v3096_v4  ;;  %v3213_v4 = vld [vmem:[%s20638_s14 + $0x150] sm:$0xff] }
0x1073   :  { %v3093_v2 = vpop.xlane.xlu0 %3092 }
0x1074   :  { %v3124_v61 = vadd.f32 1e-12, %v3116_v51  ;;  %v3115_v9 = vmul.f32 0.03125, %v3093_v2 }
0x1076   :  { %15012 = vrsqrt.f32 %v3124_v61  ;;  %v3123_v62 = vadd.f32 1e-12, %v3115_v9 }
0x1078   :  { %15014 = vrsqrt.f32 %v3123_v62  ;;  %v3102_v56 = vpop.xlane.xlu1 %3101  ;;  %v3193_v62 = vld [vmem:[%s20638_s14 + $0xb0] sm:$0xff] }
0x1079   :  { %v3118_v26 = vmul.f32 0.03125, %v3102_v56  ;;  %v3195_v56 = vld [vmem:[%s20638_s14 + $0xc0] sm:$0xff] }
0x107a   :  { %v3099_v49 = vpop.xlane.xlu0 %3098 }
0x107b   :  { %v3126_v57 = vadd.f32 1e-12, %v3118_v26  ;;  %v3117_v21 = vmul.f32 0.03125, %v3099_v49  ;;  %v3178_v26 = vld [vmem:[%s20638_s14 + $0x38] sm:$0xff] }
0x107d   :  { %v3125_v53 = vadd.f32 1e-12, %v3117_v21  ;;  %15016 = vrsqrt.f32 %v3126_v57 }
0x107e   :  { %v3108_v60 = vpop.xlane.xlu1 %3107 }
0x107f   :  { %15018 = vrsqrt.f32 %v3125_v53  ;;  %v3120_v48 = vmul.f32 0.03125, %v3108_v60  ;;  %v3175_v60 = vld [vmem:[%s20638_s14 + $0x20] sm:$0xff] }
0x1080   :  { %v3105_v6 = vpop.xlane.xlu0 %3104 }
0x1081   :  { %v3128_v46 = vadd.f32 1e-12, %v3120_v48  ;;  %v3119_v30 = vmul.f32 0.03125, %v3105_v6  ;;  %v3177_v48 = vld [vmem:[%s20638_s14 + $0x30] sm:$0xff]  ;;  %v3236_v6 = vld [vmem:[%s20638_s14 + $0x208] sm:$0xff] }
0x1083   :  { %v15013_v18 = vpop.eup %15012  ;;  %v3127_v15 = vadd.f32 1e-12, %v3119_v30  ;;  %v3114_v28 = vpop.xlane.xlu1 %3113  ;;  %15020 = vrsqrt.f32 %v3128_v46 }
0x1084   :  { %v3140_v19 = vmul.f32 %v15013_v18, %v16319_v39  ;;  %v3122_v37 = vmul.f32 0.03125, %v3114_v28  ;;  %v3229_v39 = vld [vmem:[%s20638_s14 + $0x1d0] sm:$0xff] }
0x1085   :  { %v15015_v33 = vpop.eup %15014  ;;  %15022 = vrsqrt.f32 %v3127_v15  ;;  %v3111_v35 = vpop.xlane.xlu0 %3110 }
0x1086   :  { %v3139_v43 = vmul.f32 %v15015_v33, %v16321_v27  ;;  %v3121_v22 = vmul.f32 0.03125, %v3111_v35  ;;  %v3152_v20 = vmul.f32 %v16499_v42, %v3140_v19  ;;  %v3130_v47 = vadd.f32 1e-12, %v3122_v37  ;;  %v3231_v27 = vld [vmem:[%s20638_s14 + $0x1e0] sm:$0xff]  ;;  %v3216_v37 = vld [vmem:[%s20638_s14 + $0x168] sm:$0xff] }
0x1088   :  { %v3151_v7 = vmul.f32 %v16499_v42, %v3139_v43  ;;  %v3129_v41 = vadd.f32 1e-12, %v3121_v22  ;;  %v16530_v13 = vadd.f32 %v16505_v11, %v3152_v20  ;;  %v3235_v43 = vld [vmem:[%s20638_s14 + $0x200] sm:$0xff]  ;;  %v3218_v22 = vld [vmem:[%s20638_s14 + $0x178] sm:$0xff]  ;;  %v3200_v20 = vld [vmem:[%s20638_s14 + $0xe8] sm:$0xff] }
0x108a   :  { %v16510_v0 = vadd.f32 %v16505_v11, %v3151_v7  ;;  %15024 = vrsqrt.f32 %v3129_v41  ;;  %v15017_v54 = vpop.eup %15016  ;;  %v3217_v7 = vld [vmem:[%s20638_s14 + $0x170] sm:$0xff]  ;;  %v3198_v41 = vld [vmem:[%s20638_s14 + $0xd8] sm:$0xff] }
0x108b   :  { %v3142_v1 = vmul.f32 %v15017_v54, %v16329_v40  ;;  %15026 = vrsqrt.f32 %v3130_v47  ;;  %v3194_v40 = vld [vmem:[%s20638_s14 + $0xb8] sm:$0xff]  ;;  %v3197_v47 = vld [vmem:[%s20638_s14 + $0xd0] sm:$0xff] }
0x108c   :  { %v15019_v16 = vpop.eup %15018  ;;  %13077 = vmatmul.mubr.msk.f32.vlgmr.msra.gmra.mxu1 %vm88_vm0, %v16510_v0  ;;  %13085 = vmatmul.mubr.msk.f32.vlgmr.msra.gmra.mxu0 %vm88_vm0, %v16510_v0  ;;  %v3182_v54 = vld [vmem:[%s20638_s14 + $0x58] sm:$0xff] }
0x108d   :  { %v3141_v63 = vmul.f32 %v15019_v16, %v16331_v55  ;;  %3614 = vmatpush1.msra.mxu1 %v3229_v39  ;;  %3727 = vmatpush1.msra.mxu0 %v3231_v27  ;;  %v3211_v55 = vld [vmem:[%s20638_s14 + $0x140] sm:$0xff]  ;;  %v3154_v9 = vmul.f32 %v16499_v42, %v3142_v1  ;;  %v3180_v27 = vld [vmem:[%s20638_s14 + $0x48] sm:$0xff]  ;;  %v3237_v1 = vld [vmem:[%s20638_s14 + $0x210] sm:$0xff] }
0x108e   :  { %3433 = vmatprep.mubr.f32.mxu1 %v20656_v25  ;;  %3546 = vmatprep.mubr.f32.mxu0 %v20656_v25  ;;  %v3199_v39 = vld [vmem:[%s20638_s14 + $0xe0] sm:$0xff] }
0x108f   :  { %v3153_v34 = vmul.f32 %v16499_v42, %v3141_v63  ;;  %3615 = vmatprep.subr.mxu1 %v3212_v52  ;;  %3728 = vmatprep.subr.mxu0 %v3214_v31  ;;  %v16578_v49 = vadd.f32 %v16505_v11, %v3154_v9  ;;  %v3179_v16 = vld [vmem:[%s20638_s14 + $0x40] sm:$0xff]  ;;  %v3181_v52 = vld [vmem:[%s20638_s14 + $0x50] sm:$0xff]  ;;  %v3238_v31 = vld [vmem:[%s20638_s14 + $0x218] sm:$0xff] }
0x1090   :  { %13078 = vmatmul.mubr.msk.f32.gmra.mxu1 %vm88_vm0, %v16530_v13  ;;  %13086 = vmatmul.mubr.msk.f32.gmra.mxu0 %vm88_vm0, %v16530_v13  ;;  %v15021_v51 = vpop.eup %15020  ;;  %v3240_v63 = vld [vmem:[%s20638_s14 + $0x228] sm:$0xff]  ;;  %v3201_v9 = vld [vmem:[%s20638_s14 + $0xf0] sm:$0xff] }
0x1091   :  { %v16553_v2 = vadd.f32 %v16505_v11, %v3153_v34  ;;  %3439 = vmatprep.mubr.f32.mxu1 %v20656_v25  ;;  %3552 = vmatprep.mubr.f32.mxu0 %v20656_v25  ;;  %v3144_v57 = vmul.f32 %v15021_v51, %v16338_v14  ;;  %v3234_v14 = vld [vmem:[%s20638_s14 + $0x1f8] sm:$0xff]  ;;  %v3239_v34 = vld [vmem:[%s20638_s14 + $0x220] sm:$0xff] }
0x1092   :  { %v15023_v61 = vpop.eup %15022  ;;  %3616 = vmatpush1.msra.mxu1 %v3211_v55  ;;  %3729 = vmatpush1.msra.mxu0 %v3213_v4  ;;  %v3220_v55 = vld [vmem:[%s20638_s14 + $0x188] sm:$0xff]  ;;  %v3222_v4 = vld [vmem:[%s20638_s14 + $0x198] sm:$0xff] }
0x1093   :  { %v3143_v58 = vmul.f32 %v15023_v61, %v16341_v5  ;;  %3617 = vmatprep.subr.mxu1 %v3194_v40  ;;  %3730 = vmatprep.subr.mxu0 %v3196_v45  ;;  %v3176_v5 = vld [vmem:[%s20638_s14 + $0x28] sm:$0xff]  ;;  %v3156_v46 = vmul.f32 %v16499_v42, %v3144_v57  ;;  %v3219_v40 = vld [vmem:[%s20638_s14 + $0x180] sm:$0xff]  ;;  %v3221_v45 = vld [vmem:[%s20638_s14 + $0x190] sm:$0xff] }
0x1094   :  { %13079 = vmatmul.mubr.msk.f32.gmra.mxu1 %vm88_vm0, %v16553_v2  ;;  %13087 = vmatmul.mubr.msk.f32.gmra.mxu0 %vm88_vm0, %v16553_v2  ;;  %v3202_v51 = vld [vmem:[%s20638_s14 + $0xf8] sm:$0xff]  ;;  %v3204_v61 = vld [vmem:[%s20638_s14 + $0x108] sm:$0xff] }
0x1095   :  { %3445 = vmatprep.mubr.f32.mxu1 %v20656_v25  ;;  %3558 = vmatprep.mubr.f32.mxu0 %v20656_v25  ;;  %v3155_v21 = vmul.f32 %v16499_v42, %v3143_v58  ;;  %v16612_v28 = vadd.f32 %v16505_v11, %v3156_v46  ;;  %v3203_v58 = vld [vmem:[%s20638_s14 + $0x100] sm:$0xff]  ;;  %v3242_v57 = vld [vmem:[%s20638_s14 + $0x238] sm:$0xff] }
0x1096   :  { %3618 = vmatpush1.msra.mxu1 %v3193_v62  ;;  %3731 = vmatpush1.msra.mxu0 %v3195_v56  ;;  %v3184_v62 = vld [vmem:[%s20638_s14 + $0x68] sm:$0xff]  ;;  %v3186_v56 = vld [vmem:[%s20638_s14 + $0x78] sm:$0xff]  ;;  %v3187_v46 = vld [vmem:[%s20638_s14 + $0x80] sm:$0xff] }
0x1097   :  { %v15025_v53 = vpop.eup %15024  ;;  %3619 = vmatprep.subr.mxu1 %v3176_v5  ;;  %3732 = vmatprep.subr.mxu0 %v3178_v26  ;;  %v16602_v30 = vadd.f32 %v16505_v11, %v3155_v21  ;;  %v3183_v5 = vld [vmem:[%s20638_s14 + $0x60] sm:$0xff]  ;;  %v3185_v26 = vld [vmem:[%s20638_s14 + $0x70] sm:$0xff] }
0x1098   :  { %13080 = vmatmul.mubr.msk.f32.gmra.mxu1 %vm88_vm0, %v16578_v49  ;;  %13088 = vmatmul.mubr.msk.f32.gmra.mxu0 %vm88_vm0, %v16578_v49  ;;  %v3145_v18 = vmul.f32 %v15025_v53, %v16351_v24  ;;  %v15027_v15 = vpop.eup %15026  ;;  %v3241_v21 = vld [vmem:[%s20638_s14 + $0x230] sm:$0xff]  ;;  %v3224_v53 = vld [vmem:[%s20638_s14 + $0x1a8] sm:$0xff] }
0x1099   :  { %3451 = vmatprep.mubr.f32.mxu1 %v20656_v25  ;;  %3564 = vmatprep.mubr.f32.mxu0 %v20656_v25  ;;  %v3146_v24 = vmul.f32 %v15027_v15, %v16348_v8 }
0x109a   :  { %3620 = vmatpush1.msra.mxu1 %v3175_v60  ;;  %3733 = vmatpush1.msra.mxu0 %v3177_v48  ;;  %v3157_v33 = vmul.f32 %v16499_v42, %v3145_v18  ;;  %v3223_v60 = vld [vmem:[%s20638_s14 + $0x1a0] sm:$0xff]  ;;  %v3206_v48 = vld [vmem:[%s20638_s14 + $0x118] sm:$0xff] }
0x109b   :  { %3839 = vmatprep.subr.mxu1 %v3234_v14  ;;  %3952 = vmatprep.subr.mxu0 %v3236_v6  ;;  %v3158_v35 = vmul.f32 %v16499_v42, %v3146_v24  ;;  %v3233_v42 = vld [vmem:[%s20638_s14 + $0x1f0] sm:$0xff]  ;;  %v3188_v6 = vld [vmem:[%s20638_s14 + $0x88] sm:$0xff] }
0x109c   :  { %13081 = vmatmul.mubr.msk.f32.gmra.mxu1 %vm88_vm0, %v16602_v30  ;;  %13089 = vmatmul.mubr.msk.f32.gmra.mxu0 %vm88_vm0, %v16602_v30  ;;  %v16624_v19 = vadd.f32 %v16505_v11, %v3157_v33  ;;  %v3205_v14 = vld [vmem:[%s20638_s14 + $0x110] sm:$0xff] }
0x109d   :  { %3457 = vmatprep.mubr.f32.mxu1 %v20656_v25  ;;  %3570 = vmatprep.mubr.f32.mxu0 %v20656_v25  ;;  %v16633_v8 = vadd.f32 %v16505_v11, %v3158_v35  ;;  %v3215_v11 = vld [vmem:[%s20638_s14 + $0x160] sm:$0xff] }
0x10a0   :  { %13082 = vmatmul.mubr.msk.f32.gmra.mxu1 %vm88_vm0, %v16612_v28  ;;  %13090 = vmatmul.mubr.msk.f32.gmra.mxu0 %vm88_vm0, %v16612_v28 }
0x10a1   :  { %3463 = vmatprep.mubr.f32.mxu1 %v20656_v25  ;;  %3576 = vmatprep.mubr.f32.mxu0 %v20656_v25 }
0x10a4   :  { %13083 = vmatmul.mubr.msk.f32.gmra.mxu1 %vm88_vm0, %v16624_v19  ;;  %13091 = vmatmul.mubr.msk.f32.gmra.mxu0 %vm88_vm0, %v16624_v19 }
0x10a5   :  { %3469 = vmatprep.mubr.f32.mxu1 %v20656_v25  ;;  %3582 = vmatprep.mubr.f32.mxu0 %v20656_v25 }
0x10a8   :  { %13084 = vmatmul.mubr.msk.f32.gmra.mxu1 %vm88_vm0, %v16633_v8  ;;  %13092 = vmatmul.mubr.msk.f32.gmra.mxu0 %vm88_vm0, %v16633_v8 }
0x10a9   :  { %3653 = vmatprep.mubr.f32.mxu1 %v20656_v25  ;;  %3766 = vmatprep.mubr.f32.mxu0 %v20656_v25 }
0x10ac   :  { %13093 = vmatmul.mubr.msk.f32.vlgmr.msra.gmra.mxu1 %vm88_vm0, %v16510_v0  ;;  %13101 = vmatmul.mubr.msk.f32.vlgmr.msra.gmra.mxu0 %vm88_vm0, %v16510_v0 }
0x10ad   :  { %3659 = vmatprep.mubr.f32.mxu1 %v20656_v25  ;;  %3772 = vmatprep.mubr.f32.mxu0 %v20656_v25 }
0x10ae   :  { %3840 = vmatpush1.msra.mxu1 %v3233_v42  ;;  %3953 = vmatpush1.msra.mxu0 %v3235_v43 }
0x10af   :  { %3841 = vmatprep.subr.mxu1 %v3216_v37  ;;  %3954 = vmatprep.subr.mxu0 %v3218_v22  ;;  %v16958_v22 = vld [vmem:[%s20641_s15] sm:$0xff] }
0x10b0   :  { %13094 = vmatmul.mubr.msk.f32.gmra.mxu1 %vm88_vm0, %v16530_v13  ;;  %13102 = vmatmul.mubr.msk.f32.gmra.mxu0 %vm88_vm0, %v16530_v13 }
0x10b1   :  { %3665 = vmatprep.mubr.f32.mxu1 %v20656_v25  ;;  %3778 = vmatprep.mubr.f32.mxu0 %v20656_v25 }
0x10b2   :  { %3842 = vmatpush1.msra.mxu1 %v3215_v11  ;;  %3955 = vmatpush1.msra.mxu0 %v3217_v7 }
0x10b3   :  { %3843 = vmatprep.subr.mxu1 %v3198_v41  ;;  %3956 = vmatprep.subr.mxu0 %v3200_v20 }
0x10b4   :  { %13095 = vmatmul.mubr.msk.f32.gmra.mxu1 %vm88_vm0, %v16553_v2  ;;  %13103 = vmatmul.mubr.msk.f32.gmra.mxu0 %vm88_vm0, %v16553_v2 }
0x10b5   :  { %3671 = vmatprep.mubr.f32.mxu1 %v20656_v25  ;;  %3784 = vmatprep.mubr.f32.mxu0 %v20656_v25 }
0x10b6   :  { %3844 = vmatpush1.msra.mxu1 %v3197_v47  ;;  %3957 = vmatpush1.msra.mxu0 %v3199_v39  ;;  %v16970_v47 = vrot.slane %v16958_v22, %v16169_v38 }
0x10b7   :  { %3845 = vmatprep.subr.mxu1 %v3180_v27  ;;  %3958 = vmatprep.subr.mxu0 %v3182_v54 }
0x10b8   :  { %13096 = vmatmul.mubr.msk.f32.gmra.mxu1 %vm88_vm0, %v16578_v49  ;;  %13104 = vmatmul.mubr.msk.f32.gmra.mxu0 %vm88_vm0, %v16578_v49 }
0x10b9   :  { %3677 = vmatprep.mubr.f32.mxu1 %v20656_v25  ;;  %3790 = vmatprep.mubr.f32.mxu0 %v20656_v25 }
0x10ba   :  { %3846 = vmatpush1.msra.mxu1 %v3179_v16  ;;  %3959 = vmatpush1.msra.mxu0 %v3181_v52 }
0x10bb   :  { %4065 = vmatprep.subr.mxu1 %v3238_v31  ;;  %4178 = vmatprep.subr.mxu0 %v3240_v63  ;;  %v16983_v31 = vrot.slane %v16958_v22, %v15333_v17 }
0x10bc   :  { %13097 = vmatmul.mubr.msk.f32.gmra.mxu1 %vm88_vm0, %v16602_v30  ;;  %13105 = vmatmul.mubr.msk.f32.gmra.mxu0 %vm88_vm0, %v16602_v30 }
0x10bd   :  { %3683 = vmatprep.mubr.f32.mxu1 %v20656_v25  ;;  %3796 = vmatprep.mubr.f32.mxu0 %v20656_v25 }
0x10c0   :  { %13098 = vmatmul.mubr.msk.f32.gmra.mxu1 %vm88_vm0, %v16612_v28  ;;  %13106 = vmatmul.mubr.msk.f32.gmra.mxu0 %vm88_vm0, %v16612_v28 }
0x10c1   :  { %3689 = vmatprep.mubr.f32.mxu1 %v20656_v25  ;;  %3802 = vmatprep.mubr.f32.mxu0 %v20656_v25 }
0x10c4   :  { %13099 = vmatmul.mubr.msk.f32.gmra.mxu1 %vm88_vm0, %v16624_v19  ;;  %13107 = vmatmul.mubr.msk.f32.gmra.mxu0 %vm88_vm0, %v16624_v19 }
0x10c5   :  { %3695 = vmatprep.mubr.f32.mxu1 %v20656_v25  ;;  %3808 = vmatprep.mubr.f32.mxu0 %v20656_v25 }
0x10c8   :  { %13100 = vmatmul.mubr.msk.f32.gmra.mxu1 %vm88_vm0, %v16633_v8  ;;  %13108 = vmatmul.mubr.msk.f32.gmra.mxu0 %vm88_vm0, %v16633_v8 }
0x10c9   :  { %3879 = vmatprep.mubr.f32.mxu1 %v20656_v25  ;;  %3992 = vmatprep.mubr.f32.mxu0 %v20656_v25 }
0x10cc   :  { %13109 = vmatmul.mubr.msk.f32.vlgmr.msra.gmra.mxu1 %vm88_vm0, %v16510_v0  ;;  %13117 = vmatmul.mubr.msk.f32.vlgmr.msra.gmra.mxu0 %vm88_vm0, %v16510_v0 }
0x10cd   :  { %3885 = vmatprep.mubr.f32.mxu1 %v20656_v25  ;;  %3998 = vmatprep.mubr.f32.mxu0 %v20656_v25 }
0x10ce   :  { %4066 = vmatpush1.msra.mxu1 %v3237_v1  ;;  %4179 = vmatpush1.msra.mxu0 %v3239_v34 }
0x10cf   :  { %4067 = vmatprep.subr.mxu1 %v3220_v55  ;;  %4180 = vmatprep.subr.mxu0 %v3222_v4  ;;  %v16992_v4 = vsub.s32 6, %v15330_v10 }
0x10d0   :  { %13110 = vmatmul.mubr.msk.f32.gmra.mxu1 %vm88_vm0, %v16530_v13  ;;  %13118 = vmatmul.mubr.msk.f32.gmra.mxu0 %vm88_vm0, %v16530_v13 }
0x10d1   :  { %3891 = vmatprep.mubr.f32.mxu1 %v20656_v25  ;;  %4004 = vmatprep.mubr.f32.mxu0 %v20656_v25  ;;  %20852 = vst [vmem:[#allocation27_spill] sm:$0xff] %v16992_v4 }
0x10d2   :  { %4068 = vmatpush1.msra.mxu1 %v3219_v40  ;;  %4181 = vmatpush1.msra.mxu0 %v3221_v45 }
0x10d3   :  { %4069 = vmatprep.subr.mxu1 %v3202_v51  ;;  %4182 = vmatprep.subr.mxu0 %v3204_v61 }
0x10d4   :  { %13111 = vmatmul.mubr.msk.f32.gmra.mxu1 %vm88_vm0, %v16553_v2  ;;  %13119 = vmatmul.mubr.msk.f32.gmra.mxu0 %vm88_vm0, %v16553_v2 }
0x10d5   :  { %3897 = vmatprep.mubr.f32.mxu1 %v20656_v25  ;;  %4010 = vmatprep.mubr.f32.mxu0 %v20656_v25 }
0x10d6   :  { %4070 = vmatpush1.msra.mxu1 %v3201_v9  ;;  %4183 = vmatpush1.msra.mxu0 %v3203_v58 }
0x10d7   :  { %4071 = vmatprep.subr.mxu1 %v3184_v62  ;;  %4184 = vmatprep.subr.mxu0 %v3186_v56  ;;  %v17006_v62 = vrot.slane %v16958_v22, %v16492_v32  ;;  %v17010_v56 = vrot.slane %v16958_v22, %v16992_v4 }
0x10d8   :  { %13112 = vmatmul.mubr.msk.f32.gmra.mxu1 %vm88_vm0, %v16578_v49  ;;  %13120 = vmatmul.mubr.msk.f32.gmra.mxu0 %vm88_vm0, %v16578_v49 }
0x10d9   :  { %3903 = vmatprep.mubr.f32.mxu1 %v20656_v25  ;;  %4016 = vmatprep.mubr.f32.mxu0 %v20656_v25 }
0x10da   :  { %4072 = vmatpush1.msra.mxu1 %v3183_v5  ;;  %4185 = vmatpush1.msra.mxu0 %v3185_v26 }
0x10db   :  { %4291 = vmatprep.subr.mxu1 %v3242_v57  ;;  %14150 = vmatprep.subr.mxu0 %v20656_v25  ;;  %v17017_v57 = vsub.s32 7, %v15330_v10 }
0x10dc   :  { %13113 = vmatmul.mubr.msk.f32.gmra.mxu1 %vm88_vm0, %v16602_v30  ;;  %13121 = vmatmul.mubr.msk.f32.gmra.mxu0 %vm88_vm0, %v16602_v30 }
0x10dd   :  { %3909 = vmatprep.mubr.f32.mxu1 %v20656_v25  ;;  %4022 = vmatprep.mubr.f32.mxu0 %v20656_v25  ;;  %20859 = vst [vmem:[#allocation34_spill] sm:$0xff] %v17017_v57 }
0x10e0   :  { %13114 = vmatmul.mubr.msk.f32.gmra.mxu1 %vm88_vm0, %v16612_v28  ;;  %13122 = vmatmul.mubr.msk.f32.gmra.mxu0 %vm88_vm0, %v16612_v28 }
0x10e1   :  { %3915 = vmatprep.mubr.f32.mxu1 %v20656_v25  ;;  %4028 = vmatprep.mubr.f32.mxu0 %v20656_v25 }
0x10e4   :  { %13115 = vmatmul.mubr.msk.f32.gmra.mxu1 %vm88_vm0, %v16624_v19  ;;  %13123 = vmatmul.mubr.msk.f32.gmra.mxu0 %vm88_vm0, %v16624_v19 }
0x10e5   :  { %3921 = vmatprep.mubr.f32.mxu1 %v20656_v25  ;;  %4034 = vmatprep.mubr.f32.mxu0 %v20656_v25 }
0x10e8   :  { %13116 = vmatmul.mubr.msk.f32.gmra.mxu1 %vm88_vm0, %v16633_v8  ;;  %13124 = vmatmul.mubr.msk.f32.gmra.mxu0 %vm88_vm0, %v16633_v8 }
0x10e9   :  { %4105 = vmatprep.mubr.f32.mxu1 %v20656_v25  ;;  %4218 = vmatprep.mubr.f32.mxu0 %v20656_v25 }
0x10ec   :  { %13125 = vmatmul.mubr.msk.f32.vlgmr.msra.gmra.mxu1 %vm88_vm0, %v16510_v0  ;;  %13133 = vmatmul.mubr.msk.f32.vlgmr.msra.gmra.mxu0 %vm88_vm0, %v16510_v0 }
0x10ed   :  { %4111 = vmatprep.mubr.f32.mxu1 %v20656_v25  ;;  %4224 = vmatprep.mubr.f32.mxu0 %v20656_v25 }
0x10ee   :  { %4292 = vmatpush1.msra.mxu1 %v3241_v21 }
0x10ef   :  { %4293 = vmatprep.subr.mxu1 %v3224_v53 }
0x10f0   :  { %13126 = vmatmul.mubr.msk.f32.gmra.mxu1 %vm88_vm0, %v16530_v13  ;;  %13134 = vmatmul.mubr.msk.f32.gmra.mxu0 %vm88_vm0, %v16530_v13 }
0x10f1   :  { %4117 = vmatprep.mubr.f32.mxu1 %v20656_v25  ;;  %4230 = vmatprep.mubr.f32.mxu0 %v20656_v25 }
0x10f2   :  { %4294 = vmatpush1.msra.mxu1 %v3223_v60  ;;  %v17021_v60 = vrot.slane %v16958_v22, %v16495_v50 }
0x10f3   :  { %4295 = vmatprep.subr.mxu1 %v3206_v48  ;;  %v17023_v48 = vpop.permute.xlu0 %4412 }
0x10f4   :  { %13127 = vmatmul.mubr.msk.f32.gmra.mxu1 %vm88_vm0, %v16553_v2  ;;  %13135 = vmatmul.mubr.msk.f32.gmra.mxu0 %vm88_vm0, %v16553_v2 }
0x10f5   :  { %4123 = vmatprep.mubr.f32.mxu1 %v20656_v25  ;;  %4236 = vmatprep.mubr.f32.mxu0 %v20656_v25 }
0x10f6   :  { %4296 = vmatpush1.msra.mxu1 %v3205_v14 }
0x10f7   :  { %4297 = vmatprep.subr.mxu1 %v3188_v6 }
0x10f8   :  { %13128 = vmatmul.mubr.msk.f32.gmra.mxu1 %vm88_vm0, %v16578_v49  ;;  %13136 = vmatmul.mubr.msk.f32.gmra.mxu0 %vm88_vm0, %v16578_v49 }
0x10f9   :  { %4129 = vmatprep.mubr.f32.mxu1 %v20656_v25  ;;  %4242 = vmatprep.mubr.f32.mxu0 %v20656_v25 }
0x10fa   :  { %4298 = vmatpush1.msra.mxu1 %v3187_v46 }
0x10fb   :  { %14185 = vmatprep.subr.mxu1 %v20656_v25 }
0x10fc   :  { %13129 = vmatmul.mubr.msk.f32.gmra.mxu1 %vm88_vm0, %v16602_v30  ;;  %13137 = vmatmul.mubr.msk.f32.gmra.mxu0 %vm88_vm0, %v16602_v30 }
0x10fd   :  { %4135 = vmatprep.mubr.f32.mxu1 %v20656_v25  ;;  %4248 = vmatprep.mubr.f32.mxu0 %v20656_v25 }
0x1100   :  { %13130 = vmatmul.mubr.msk.f32.gmra.mxu1 %vm88_vm0, %v16612_v28  ;;  %13138 = vmatmul.mubr.msk.f32.gmra.mxu0 %vm88_vm0, %v16612_v28 }
0x1101   :  { %4141 = vmatprep.mubr.f32.mxu1 %v20656_v25  ;;  %4254 = vmatprep.mubr.f32.mxu0 %v20656_v25 }
0x1104   :  { %13131 = vmatmul.mubr.msk.f32.gmra.mxu1 %vm88_vm0, %v16624_v19  ;;  %13139 = vmatmul.mubr.msk.f32.gmra.mxu0 %vm88_vm0, %v16624_v19 }
0x1105   :  { %4147 = vmatprep.mubr.f32.mxu1 %v20656_v25  ;;  %4260 = vmatprep.mubr.f32.mxu0 %v20656_v25 }
0x1108   :  { %13132 = vmatmul.mubr.msk.f32.gmra.mxu1 %vm88_vm0, %v16633_v8  ;;  %13140 = vmatmul.mubr.msk.f32.gmra.mxu0 %vm88_vm0, %v16633_v8 }
0x1109   :  { %4331 = vmatprep.mubr.f32.mxu1 %v20656_v25 }
0x110c   :  { %13141 = vmatmul.mubr.msk.f32.vlgmr.msra.gmra.mxu1 %vm88_vm0, %v16510_v0 }
0x110d   :  { %4337 = vmatprep.mubr.f32.mxu1 %v20656_v25 }
0x1110   :  { %13142 = vmatmul.mubr.msk.f32.gmra.mxu1 %vm88_vm0, %v16530_v13 }
0x1111   :  { %4343 = vmatprep.mubr.f32.mxu1 %v20656_v25 }
0x1114   :  { %13143 = vmatmul.mubr.msk.f32.gmra.mxu1 %vm88_vm0, %v16553_v2 }
0x1115   :  { %4349 = vmatprep.mubr.f32.mxu1 %v20656_v25 }
0x1118   :  { %13144 = vmatmul.mubr.msk.f32.gmra.mxu1 %vm88_vm0, %v16578_v49 }
0x1119   :  { %4355 = vmatprep.mubr.f32.mxu1 %v20656_v25 }
0x111c   :  { %13145 = vmatmul.mubr.msk.f32.gmra.mxu1 %vm88_vm0, %v16602_v30 }
0x111d   :  { %4361 = vmatprep.mubr.f32.mxu1 %v20656_v25 }
0x1120   :  { %13146 = vmatmul.mubr.msk.f32.gmra.mxu1 %vm88_vm0, %v16612_v28 }
0x1121   :  { %4367 = vmatprep.mubr.f32.mxu1 %v20656_v25 }
0x1124   :  { %13147 = vmatmul.mubr.msk.f32.gmra.mxu1 %vm88_vm0, %v16624_v19 }
0x1125   :  { %4373 = vmatprep.mubr.f32.mxu1 %v20656_v25 }
0x1128   :  { %13148 = vmatmul.mubr.msk.f32.gmra.mxu1 %vm88_vm0, %v16633_v8 }
0x114c   :  { %v16923_v0 = vpop.f32.mrf.mxu1  ;;  %v16925_v13 = vpop.f32.mrf.mxu0 }
0x114e   :  { %v16927_v2 = vpop.f32.mrf.mxu1  ;;  %v16929_v49 = vpop.f32.mrf.mxu0 }
0x114f   :  { %20834 = vst [vmem:[#allocation9_spill] sm:$0xff] %v16929_v49 }
0x1150   :  { %v16931_v30 = vpop.f32.mrf.mxu1  ;;  %v16933_v18 = vpop.f32.mrf.mxu0 }
0x1151   :  { %20835 = vst [vmem:[#allocation10_spill] sm:$0xff] %v16931_v30  ;;  %20836 = vst [vmem:[#allocation11_spill] sm:$0xff] %v16933_v18 }
0x1152   :  { %v16935_v15 = vpop.f32.mrf.mxu1  ;;  %v16937_v28 = vpop.f32.mrf.mxu0 }
0x1153   :  { %20837 = vst [vmem:[#allocation12_spill] sm:$0xff] %v16935_v15  ;;  %20838 = vst [vmem:[#allocation13_spill] sm:$0xff] %v16937_v28 }
0x1154   :  { %v16939_v24 = vpop.f32.mrf.mxu1  ;;  %v16941_v33 = vpop.f32.mrf.mxu0 }
0x1156   :  { %v16943_v35 = vpop.f32.mrf.mxu1  ;;  %v16945_v19 = vpop.f32.mrf.mxu0 }
0x1157   :  { %20839 = vst [vmem:[#allocation14_spill] sm:$0xff] %v16945_v19 }
0x1158   :  { %v16947_v8 = vpop.f32.mrf.mxu1  ;;  %v16949_v42 = vpop.f32.mrf.mxu0 }
0x1159   :  { %20840 = vst [vmem:[#allocation15_spill] sm:$0xff] %v16949_v42 }
0x115a   :  { %v16951_v43 = vpop.f32.mrf.mxu1  ;;  %v16953_v37 = vpop.f32.mrf.mxu0 }
0x115b   :  { %20841 = vst [vmem:[#allocation16_spill] sm:$0xff] %v16953_v37 }
0x115c   :  { %v16960_v11 = vpop.f32.mrf.mxu1  ;;  %v16962_v7 = vpop.f32.mrf.mxu0 }
0x115d   :  { %20842 = vst [vmem:[#allocation17_spill] sm:$0xff] %v16960_v11  ;;  %20843 = vst [vmem:[#allocation18_spill] sm:$0xff] %v16962_v7 }
0x115e   :  { %v16964_v41 = vpop.f32.mrf.mxu1  ;;  %v16966_v20 = vpop.f32.mrf.mxu0 }
0x115f   :  { %20844 = vst [vmem:[#allocation19_spill] sm:$0xff] %v16964_v41  ;;  %20845 = vst [vmem:[#allocation20_spill] sm:$0xff] %v16966_v20 }
0x1160   :  { %v16972_v39 = vpop.f32.mrf.mxu1  ;;  %v3572_v27 = vpop.f32.mrf.mxu0 }
0x1161   :  { %20846 = vst [vmem:[#allocation21_spill] sm:$0xff] %v16972_v39  ;;  %v16975_v54 = vadd.f32 %v3572_v27, %v16970_v47 }
0x1162   :  { %v16977_v16 = vpop.f32.mrf.mxu1  ;;  %v16979_v52 = vpop.f32.mrf.mxu0 }
0x1163   :  { %20847 = vst [vmem:[#allocation22_spill] sm:$0xff] %v16975_v54  ;;  %20848 = vst [vmem:[#allocation23_spill] sm:$0xff] %v16977_v16 }
0x1164   :  { %20849 = vst [vmem:[#allocation24_spill] sm:$0xff] %v16979_v52  ;;  %v3465_v63 = vpop.f32.mrf.mxu1  ;;  %v3578_v1 = vpop.f32.mrf.mxu0 }
0x1165   :  { %v16986_v34 = vadd.f32 %v3465_v63, %v16983_v31  ;;  %v16989_v55 = vadd.f32 %v3578_v1, %v16970_v47 }
0x1166   :  { %v16994_v40 = vpop.f32.mrf.mxu1  ;;  %v16996_v45 = vpop.f32.mrf.mxu0 }
0x1167   :  { %20850 = vst [vmem:[#allocation25_spill] sm:$0xff] %v16986_v34  ;;  %20851 = vst [vmem:[#allocation26_spill] sm:$0xff] %v16989_v55 }
0x1168   :  { %20853 = vst [vmem:[#allocation28_spill] sm:$0xff] %v16994_v40  ;;  %20854 = vst [vmem:[#allocation29_spill] sm:$0xff] %v16996_v45  ;;  %v3471_v51 = vpop.f32.mrf.mxu1  ;;  %v3584_v61 = vpop.f32.mrf.mxu0 }
0x1169   :  { %v16999_v9 = vadd.f32 %v3471_v51, %v16983_v31  ;;  %v17002_v58 = vadd.f32 %v3584_v61, %v16970_v47  ;;  %v17034_v51 = vrot.slane %v16958_v22, %v17017_v57 }
0x116a   :  { %v17012_v5 = vpop.f32.mrf.mxu1  ;;  %v17014_v26 = vpop.f32.mrf.mxu0 }
0x116b   :  { %20855 = vst [vmem:[#allocation30_spill] sm:$0xff] %v16999_v9  ;;  %20856 = vst [vmem:[#allocation31_spill] sm:$0xff] %v17002_v58 }
0x116c   :  { %20857 = vst [vmem:[#allocation32_spill] sm:$0xff] %v17012_v5  ;;  %20858 = vst [vmem:[#allocation33_spill] sm:$0xff] %v17014_v26  ;;  %v3655_v21 = vpop.f32.mrf.mxu1  ;;  %v3768_v53 = vpop.f32.mrf.mxu0 }
0x116d   :  { %v17026_v14 = vadd.f32 %v3655_v21, %v17006_v62  ;;  %v3769_v6 = vadd.f32 %v3768_v53, %v17010_v56 }
0x116e   :  { %v3657_v46 = vpop.f32.mrf.mxu1  ;;  %v3770_v27 = vpop.f32.mrf.mxu0 }
0x116f   :  { %20860 = vst [vmem:[#allocation35_spill] sm:$0xff] %v17026_v14  ;;  %v4436_v63 = vmul.f32 %v17023_v48, %v17026_v14  ;;  %v6660_v1 = vmul.f32 %v16430_v12, %v3769_v6  ;;  %v3658_v61 = vadd.f32 %v3657_v46, %v17021_v60  ;;  %v7412_v10 = vmul.f32 %v17023_v48, %v3769_v6 }
0x1170   :  { %v3661_v3 = vpop.f32.mrf.mxu1  ;;  %v3774_v25 = vpop.f32.mrf.mxu0  ;;  %v17042_v26 = vadd.f32 %v3770_v27, %v17034_v51 }
0x1171   :  { %6676 = vrot.lane.b32.xlu1 %v6660_v1, %s15104_s30  ;;  %4452 = vrot.lane.b32.xlu0 %v4436_v63, %s15104_s30  ;;  %v5188_v14 = vmul.f32 %v16430_v12, %v3658_v61  ;;  %v3775_v45 = vadd.f32 %v3774_v25, %v17010_v56  ;;  %v17050_v6 = vadd.f32 %v3661_v3, %v17006_v62  ;;  %v17055_v25 = vpop.permute.xlu1 %4414 }
0x1172   :  { %v3663_v21 = vpop.f32.mrf.mxu1  ;;  %v3776_v53 = vpop.f32.mrf.mxu0  ;;  %20861 = vst [vmem:[#allocation36_spill] sm:$0xff] %v17042_v26  ;;  %v8132_v63 = vmul.f32 %v16430_v12, %v17042_v26  ;;  %20863 = vst [vmem:[#allocation38_spill] sm:$0xff] %v17055_v25  ;;  %v5940_v12 = vmul.f32 %v17023_v48, %v3658_v61 }
0x1173   :  { %20862 = vst [vmem:[#allocation37_spill] sm:$0xff] %v17050_v6  ;;  %v6661_v37 = vmul.f32 %v16418_v36, %v3775_v45  ;;  %v4437_v3 = vmul.f32 %v17055_v25, %v17050_v6  ;;  %v17067_v28 = vadd.f32 %v3776_v53, %v17034_v51  ;;  %v7413_v61 = vmul.f32 %v17055_v25, %v3775_v45 }
0x1174   :  { %v3667_v52 = vpop.f32.mrf.mxu1  ;;  %v3780_v20 = vpop.f32.mrf.mxu0  ;;  %v3664_v58 = vadd.f32 %v3663_v21, %v17021_v60 }
0x1175   :  { %7428 = vrot.lane.b32.xlu1 %v7412_v10, %s15104_s30  ;;  %5204 = vrot.lane.b32.xlu0 %v5188_v14, %s15104_s30  ;;  %20864 = vst [vmem:[#allocation39_spill] sm:$0xff] %v17067_v28  ;;  %v8133_v53 = vmul.f32 %v16418_v36, %v17067_v28  ;;  %v17084_v6 = vadd.f32 %v3667_v52, %v17006_v62 }
0x1176   :  { %v3669_v46 = vpop.f32.mrf.mxu1  ;;  %v3782_v1 = vpop.f32.mrf.mxu0  ;;  %v5189_v21 = vmul.f32 %v16418_v36, %v3664_v58  ;;  %v3781_v28 = vadd.f32 %v3780_v20, %v17010_v56  ;;  %v17115_v36 = vld [vmem:[%s20641_s15 + $0x8] sm:$0xff] }
0x1177   :  { %20865 = vst [vmem:[#allocation40_spill] sm:$0xff] %v17084_v6  ;;  %v3670_v40 = vadd.f32 %v3669_v46, %v17021_v60  ;;  %v17137_v18 = vadd.f32 %v3782_v1, %v17034_v51 }
0x1178   :  { %v17053_v27 = vpop.f32.mrf.mxu1  ;;  %v3786_v19 = vpop.f32.mrf.mxu0 }
0x1179   :  { %8148 = vrot.lane.b32.xlu1 %v8132_v63, %s15104_s30  ;;  %6678 = vrot.lane.b32.xlu0 %v6661_v37, %s15104_s30  ;;  %v5190_v46 = vmul.f32 %v16425_v29, %v3670_v40  ;;  %20867 = vst [vmem:[#allocation42_spill] sm:$0xff] %v17137_v18  ;;  %v8134_v1 = vmul.f32 %v16425_v29, %v17137_v18 }
0x117a   :  { %v17059_v10 = vpop.f32.mrf.mxu1  ;;  %v17061_v14 = vpop.f32.mrf.mxu0  ;;  %v3787_v15 = vadd.f32 %v3786_v19, %v17010_v56 }
0x117c   :  { %v17069_v49 = vpop.f32.mrf.mxu1  ;;  %v17071_v26 = vpop.f32.mrf.mxu0  ;;  %v6663_v19 = vmul.f32 %v16439_v44, %v3787_v15 }
0x117d   :  { %5956 = vrot.lane.b32.xlu1 %v5940_v12, %s15104_s30  ;;  %4454 = vrot.lane.b32.xlu0 %v4437_v3, %s15104_s30  ;;  %v17090_v12 = vpop.permute.xlu1 %4416 }
0x117e   :  { %v17075_v37 = vpop.f32.mrf.mxu1  ;;  %v17077_v63 = vpop.f32.mrf.mxu0  ;;  %20866 = vst [vmem:[#allocation41_spill] sm:$0xff] %v17090_v12  ;;  %v4438_v52 = vmul.f32 %v17090_v12, %v17084_v6  ;;  %v5941_v6 = vmul.f32 %v17055_v25, %v3664_v58  ;;  %v7414_v20 = vmul.f32 %v17090_v12, %v3781_v28  ;;  %v6662_v58 = vmul.f32 %v16425_v29, %v3781_v28 }
0x117f   :  { %v5942_v28 = vmul.f32 %v17090_v12, %v3670_v40  ;;  %v17169_v29 = vadd.f32 %v17053_v27, %v17006_v62 }
0x1180   :  { %v17086_v55 = vpop.f32.mrf.mxu1  ;;  %v17088_v34 = vpop.f32.mrf.mxu0 }
0x1181   :  { %7430 = vrot.lane.b32.xlu1 %v7413_v61, %s15104_s30  ;;  %8150 = vrot.lane.b32.xlu0 %v8133_v53, %s15104_s30  ;;  %20874 = vst [vmem:[#allocation49_spill] sm:$0xff] %v17169_v29 }
0x1182   :  { %v17094_v3 = vpop.f32.mrf.mxu1  ;;  %v17096_v45 = vpop.f32.mrf.mxu0 }
0x1184   :  { %v17102_v9 = vpop.f32.mrf.mxu1  ;;  %v17104_v54 = vpop.f32.mrf.mxu0 }
0x1185   :  { %5206 = vrot.lane.b32.xlu1 %v5189_v21, %s15104_s30  ;;  %4456 = vrot.lane.b32.xlu0 %v4438_v52, %s15104_s30  ;;  %v17128_v52 = vrot.slane %v17115_v36, %v16169_v38 }
0x1186   :  { %v17108_v61 = vpop.f32.mrf.mxu1  ;;  %v17110_v53 = vpop.f32.mrf.mxu0 }
0x1188   :  { %v17120_v5 = vpop.f32.mrf.mxu1  ;;  %v17122_v21 = vpop.f32.mrf.mxu0 }
0x1189   :  { %5958 = vrot.lane.b32.xlu1 %v5941_v6, %s15104_s30  ;;  %7432 = vrot.lane.b32.xlu0 %v7414_v20, %s15104_s30 }
0x118a   :  { %v17130_v42 = vpop.f32.mrf.mxu1  ;;  %v17132_v39 = vpop.f32.mrf.mxu0 }
0x118c   :  { %v17139_v16 = vpop.f32.mrf.mxu1  ;;  %v3994_v6 = vpop.f32.mrf.mxu0 }
0x118d   :  { %v17142_v20 = vadd.f32 %v3994_v6, %v17128_v52  ;;  %6680 = vrot.lane.b32.xlu1 %v6662_v58, %s15104_s30  ;;  %5208 = vrot.lane.b32.xlu0 %v5190_v46, %s15104_s30  ;;  %v17156_v6 = vpop.permute.xlu1 %4418 }
0x118e   :  { %v17146_v38 = vpop.f32.mrf.mxu1  ;;  %v17148_v7 = vpop.f32.mrf.mxu0  ;;  %20870 = vst [vmem:[#allocation45_spill] sm:$0xff] %v17156_v6 }
0x118f   :  { %20868 = vst [vmem:[#allocation43_spill] sm:$0xff] %v17142_v20  ;;  %20869 = vst [vmem:[#allocation44_spill] sm:$0xff] %v17148_v7  ;;  %v7415_v7 = vmul.f32 %v17156_v6, %v3787_v15  ;;  %v4439_v15 = vmul.f32 %v17156_v6, %v17169_v29 }
0x1190   :  { %v17154_v11 = vpop.f32.mrf.mxu1  ;;  %v4000_v30 = vpop.f32.mrf.mxu0 }
0x1191   :  { %v17159_v58 = vadd.f32 %v4000_v30, %v17128_v52  ;;  %8152 = vrot.lane.b32.xlu1 %v8134_v1, %s15104_s30  ;;  %5960 = vrot.lane.b32.xlu0 %v5942_v28, %s15104_s30  ;;  %v3676_v30 = vadd.f32 %v17059_v10, %v17021_v60  ;;  %v17191_v10 = vadd.f32 %v17061_v14, %v17034_v51  ;;  %v17208_v14 = vld [vmem:[%s20639_s17 + $0x18] sm:$0xff] }
0x1192   :  { %v17163_v46 = vpop.f32.mrf.mxu1  ;;  %v17165_v40 = vpop.f32.mrf.mxu0 }
0x1193   :  { %20871 = vst [vmem:[#allocation46_spill] sm:$0xff] %v17159_v58  ;;  %20872 = vst [vmem:[#allocation47_spill] sm:$0xff] %v17163_v46  ;;  %v5191_v58 = vmul.f32 %v16439_v44, %v3676_v30  ;;  %v5943_v44 = vmul.f32 %v17156_v6, %v3676_v30  ;;  %v8135_v29 = vmul.f32 %v17208_v14, %v17191_v10 }
0x1194   :  { %20873 = vst [vmem:[#allocation48_spill] sm:$0xff] %v17165_v40  ;;  %v17175_v18 = vpop.f32.mrf.mxu1  ;;  %v4006_v1 = vpop.f32.mrf.mxu0  ;;  %20878 = vst [vmem:[#allocation53_spill] sm:$0xff] %v17191_v10  ;;  %v17229_v10 = vadd.f32 %v17069_v49, %v17006_v62  ;;  %v17249_v49 = vrot.slane %v17115_v36, %v15339_v23 }
0x1195   :  { %v17178_v28 = vadd.f32 %v4006_v1, %v17128_v52  ;;  %7434 = vrot.lane.b32.xlu1 %v7415_v7, %s15104_s30  ;;  %6682 = vrot.lane.b32.xlu0 %v6663_v19, %s15104_s30 }
0x1196   :  { %v17182_v40 = vpop.f32.mrf.mxu1  ;;  %v17184_v27 = vpop.f32.mrf.mxu0  ;;  %20886 = vst [vmem:[#allocation61_spill] sm:$0xff] %v17229_v10 }
0x1197   :  { %20875 = vst [vmem:[#allocation50_spill] sm:$0xff] %v17178_v28  ;;  %20876 = vst [vmem:[#allocation51_spill] sm:$0xff] %v17182_v40 }
0x1198   :  { %20877 = vst [vmem:[#allocation52_spill] sm:$0xff] %v17184_v27  ;;  %v17193_v20 = vpop.f32.mrf.mxu1  ;;  %v4012_v1 = vpop.f32.mrf.mxu0 }
0x1199   :  { %v17196_v7 = vadd.f32 %v4012_v1, %v17128_v52  ;;  %5210 = vrot.lane.b32.xlu1 %v5191_v58, %s15104_s30  ;;  %4458 = vrot.lane.b32.xlu0 %v4439_v15, %s15104_s30  ;;  %v3793_v1 = vadd.f32 %v17071_v26, %v17010_v56  ;;  %v17234_v26 = vld [vmem:[%s20639_s17 + $0x20] sm:$0xff] }
0x119a   :  { %v17200_v19 = vpop.f32.mrf.mxu1  ;;  %v17202_v27 = vpop.f32.mrf.mxu0 }
0x119b   :  { %20879 = vst [vmem:[#allocation54_spill] sm:$0xff] %v17196_v7  ;;  %20880 = vst [vmem:[#allocation55_spill] sm:$0xff] %v17200_v19  ;;  %v17216_v7 = vpop.permute.xlu0 %4420 }
0x119c   :  { %20881 = vst [vmem:[#allocation56_spill] sm:$0xff] %v17202_v27  ;;  %v17214_v58 = vpop.f32.mrf.mxu1  ;;  %v4018_v15 = vpop.f32.mrf.mxu0  ;;  %20882 = vst [vmem:[#allocation57_spill] sm:$0xff] %v17216_v7 }
0x119d   :  { %v17219_v27 = vadd.f32 %v4018_v15, %v17128_v52  ;;  %5962 = vrot.lane.b32.xlu1 %v5943_v44, %s15104_s30  ;;  %8154 = vrot.lane.b32.xlu0 %v8135_v29, %s15104_s30  ;;  %v6664_v15 = vmul.f32 %v17234_v26, %v3793_v1  ;;  %v3682_v29 = vadd.f32 %v17075_v37, %v17021_v60 }
0x119e   :  { %v17223_v30 = vpop.f32.mrf.mxu1  ;;  %v17225_v28 = vpop.f32.mrf.mxu0  ;;  %v4440_v37 = vmul.f32 %v17216_v7, %v17229_v10  ;;  %v17272_v10 = vrot.slane %v17115_v36, %v16179_v59 }
0x119f   :  { %20883 = vst [vmem:[#allocation58_spill] sm:$0xff] %v17219_v27  ;;  %20884 = vst [vmem:[#allocation59_spill] sm:$0xff] %v17223_v30  ;;  %v7416_v27 = vmul.f32 %v17216_v7, %v3793_v1  ;;  %v5192_v1 = vmul.f32 %v17234_v26, %v3682_v29  ;;  %v5944_v46 = vmul.f32 %v17216_v7, %v3682_v29  ;;  %v17291_v29 = vpop.permute.xlu1 %4422 }
0x11a0   :  { %20885 = vst [vmem:[#allocation60_spill] sm:$0xff] %v17225_v28  ;;  %v17240_v44 = vpop.f32.mrf.mxu1  ;;  %v4024_v30 = vpop.f32.mrf.mxu0  ;;  %20892 = vst [vmem:[#allocation67_spill] sm:$0xff] %v17272_v10 }
0x11a1   :  { %v17243_v28 = vadd.f32 %v4024_v30, %v17128_v52  ;;  %6684 = vrot.lane.b32.xlu1 %v6664_v15, %s15104_s30  ;;  %7436 = vrot.lane.b32.xlu0 %v7416_v27, %s15104_s30  ;;  %v17258_v30 = vadd.f32 %v17077_v63, %v17034_v51  ;;  %20896 = vst [vmem:[#allocation71_spill] sm:$0xff] %v17291_v29 }
0x11a2   :  { %v3913_v19 = vpop.f32.mrf.mxu1  ;;  %v17251_v40 = vpop.f32.mrf.mxu0 }
0x11a3   :  { %20887 = vst [vmem:[#allocation62_spill] sm:$0xff] %v17243_v28  ;;  %20888 = vst [vmem:[#allocation63_spill] sm:$0xff] %v17251_v40  ;;  %v17261_v15 = vadd.f32 %v3913_v19, %v17249_v49  ;;  %v8136_v19 = vmul.f32 %v17234_v26, %v17258_v30 }
0x11a4   :  { %20889 = vst [vmem:[#allocation64_spill] sm:$0xff] %v17258_v30  ;;  %v17263_v27 = vpop.f32.mrf.mxu1  ;;  %v4030_v28 = vpop.f32.mrf.mxu0 }
0x11a5   :  { %20890 = vst [vmem:[#allocation65_spill] sm:$0xff] %v17261_v15  ;;  %v17266_v41 = vadd.f32 %v4030_v28, %v17128_v52  ;;  %5212 = vrot.lane.b32.xlu0 %v5192_v1, %s15104_s30  ;;  %4460 = vrot.lane.b32.xlu1 %v4440_v37, %s15104_s30  ;;  %v17279_v15 = vadd.f32 %v17086_v55, %v17006_v62 }
0x11a6   :  { %v3919_v40 = vpop.f32.mrf.mxu1  ;;  %v4032_v63 = vpop.f32.mrf.mxu0  ;;  %v3799_v28 = vadd.f32 %v17088_v34, %v17010_v56  ;;  %v17300_v34 = vrot.slane %v17115_v36, %v16492_v32 }
0x11a7   :  { %20891 = vst [vmem:[#allocation66_spill] sm:$0xff] %v17266_v41  ;;  %20893 = vst [vmem:[#allocation68_spill] sm:$0xff] %v17279_v15  ;;  %v17284_v37 = vadd.f32 %v3919_v40, %v17249_v49  ;;  %v17287_v1 = vadd.f32 %v4032_v63, %v17272_v10  ;;  %v4441_v63 = vmul.f32 %v17291_v29, %v17279_v15 }
0x11a8   :  { %v17289_v59 = vpop.f32.mrf.mxu1  ;;  %v4036_v41 = vpop.f32.mrf.mxu0 }
0x11a9   :  { %20894 = vst [vmem:[#allocation69_spill] sm:$0xff] %v17284_v37  ;;  %20895 = vst [vmem:[#allocation70_spill] sm:$0xff] %v17287_v1  ;;  %v17294_v30 = vadd.f32 %v4036_v41, %v17128_v52  ;;  %5964 = vrot.lane.b32.xlu0 %v5944_v46, %s15104_s30  ;;  %8156 = vrot.lane.b32.xlu1 %v8136_v19, %s15104_s30  ;;  %v17307_v1 = vld [vmem:[%s20639_s17 + $0x28] sm:$0xff]  ;;  %v17312_v52 = vadd.f32 %v17102_v9, %v17006_v62 }
0x11aa   :  { %v3925_v55 = vpop.f32.mrf.mxu1  ;;  %v4038_v40 = vpop.f32.mrf.mxu0  ;;  %20898 = vst [vmem:[#allocation73_spill] sm:$0xff] %v17307_v1  ;;  %v6665_v41 = vmul.f32 %v17307_v1, %v3799_v28  ;;  %v7417_v9 = vmul.f32 %v17291_v29, %v3799_v28 }
0x11ab   :  { %20897 = vst [vmem:[#allocation72_spill] sm:$0xff] %v17294_v30  ;;  %20899 = vst [vmem:[#allocation74_spill] sm:$0xff] %v17312_v52  ;;  %v17315_v46 = vadd.f32 %v3925_v55, %v17249_v49  ;;  %v17318_v19 = vadd.f32 %v4038_v40, %v17272_v10  ;;  %v17325_v30 = vpop.permute.xlu0 %4424  ;;  %v3688_v55 = vadd.f32 %v17094_v3, %v17021_v60 }
0x11ac   :  { %v4107_v32 = vpop.f32.mrf.mxu1  ;;  %20903 = vst [vmem:[#allocation78_spill] sm:$0xff] %v17325_v30  ;;  %v4442_v40 = vmul.f32 %v17325_v30, %v17312_v52  ;;  %v17346_v3 = vadd.f32 %v17096_v45, %v17034_v51  ;;  %v17363_v45 = vld [vmem:[%s20639_s17 + $0x30] sm:$0xff] }
0x11ad   :  { %20900 = vst [vmem:[#allocation75_spill] sm:$0xff] %v17315_v46  ;;  %20901 = vst [vmem:[#allocation76_spill] sm:$0xff] %v17318_v19  ;;  %v17321_v15 = vadd.f32 %v4107_v32, %v17300_v34  ;;  %6686 = vrot.lane.b32.xlu0 %v6665_v41, %s15104_s30  ;;  %4462 = vrot.lane.b32.xlu1 %v4441_v63, %s15104_s30  ;;  %v3805_v32 = vadd.f32 %v17104_v54, %v17010_v56 }
0x11ae   :  { %v17327_v37 = vpop.f32.mrf.mxu1  ;;  %v5193_v28 = vmul.f32 %v17307_v1, %v3688_v55  ;;  %20905 = vst [vmem:[#allocation80_spill] sm:$0xff] %v17346_v3  ;;  %v3694_v54 = vadd.f32 %v17108_v61, %v17021_v60 }
0x11af   :  { %20902 = vst [vmem:[#allocation77_spill] sm:$0xff] %v17321_v15  ;;  %v7418_v52 = vmul.f32 %v17325_v30, %v3805_v32 }
0x11b0   :  { %v4113_v19 = vpop.f32.mrf.mxu1  ;;  %v5194_v61 = vmul.f32 %v17363_v45, %v3694_v54 }
0x11b1   :  { %v17337_v41 = vadd.f32 %v4113_v19, %v17300_v34  ;;  %7438 = vrot.lane.b32.xlu1 %v7417_v9, %s15104_s30  ;;  %4464 = vrot.lane.b32.xlu0 %v4442_v40, %s15104_s30  ;;  %v8137_v40 = vmul.f32 %v17307_v1, %v17346_v3 }
0x11b2   :  { %v17341_v63 = vpop.f32.mrf.mxu1 }
0x11b3   :  { %20904 = vst [vmem:[#allocation79_spill] sm:$0xff] %v17337_v41  ;;  %v5945_v41 = vmul.f32 %v17291_v29, %v3688_v55  ;;  %v17391_v55 = vadd.f32 %v17120_v5, %v17006_v62 }
0x11b4   :  { %v4119_v15 = vpop.f32.mrf.mxu1 }
0x11b5   :  { %v17352_v19 = vadd.f32 %v4119_v15, %v17300_v34  ;;  %5214 = vrot.lane.b32.xlu1 %v5193_v28, %s15104_s30  ;;  %7440 = vrot.lane.b32.xlu0 %v7418_v52, %s15104_s30  ;;  %v17368_v15 = vadd.f32 %v17110_v53, %v17034_v51  ;;  %20910 = vst [vmem:[#allocation85_spill] sm:$0xff] %v17391_v55 }
0x11b6   :  { %v17356_v9 = vpop.f32.mrf.mxu1 }
0x11b7   :  { %20906 = vst [vmem:[#allocation81_spill] sm:$0xff] %v17352_v19  ;;  %20907 = vst [vmem:[#allocation82_spill] sm:$0xff] %v17368_v15  ;;  %v8138_v10 = vmul.f32 %v17363_v45, %v17368_v15 }
0x11b8   :  { %v4125_v19 = vpop.f32.mrf.mxu1 }
0x11b9   :  { %v17371_v28 = vadd.f32 %v4125_v19, %v17300_v34  ;;  %8158 = vrot.lane.b32.xlu1 %v8137_v40, %s15104_s30  ;;  %5216 = vrot.lane.b32.xlu0 %v5194_v61, %s15104_s30  ;;  %v6666_v19 = vmul.f32 %v17363_v45, %v3805_v32  ;;  %v5946_v40 = vmul.f32 %v17325_v30, %v3694_v54  ;;  %v17404_v32 = vpop.permute.xlu1 %4426 }
0x11ba   :  { %v17375_v52 = vpop.f32.mrf.mxu1  ;;  %v3811_v61 = vadd.f32 %v17122_v21, %v17010_v56  ;;  %v4443_v62 = vmul.f32 %v17404_v32, %v17391_v55  ;;  %v17413_v56 = vld [vmem:[%s20639_s17 + $0x38] sm:$0xff]  ;;  %v3700_v55 = vadd.f32 %v17130_v42, %v17021_v60  ;;  %v17448_v42 = vrot.slane %v17115_v36, %v16992_v4  ;;  %v17482_v4 = vld [vmem:[%s20639_s17] sm:$0xff] }
0x11bb   :  { %20908 = vst [vmem:[#allocation83_spill] sm:$0xff] %v17371_v28 }
0x11bc   :  { %v4131_v3 = vpop.f32.mrf.mxu1  ;;  %v6667_v5 = vmul.f32 %v17413_v56, %v3811_v61  ;;  %v5195_v60 = vmul.f32 %v17413_v56, %v3700_v55 }
0x11bd   :  { %v17381_v46 = vadd.f32 %v4131_v3, %v17300_v34  ;;  %5966 = vrot.lane.b32.xlu1 %v5945_v41, %s15104_s30  ;;  %8160 = vrot.lane.b32.xlu0 %v8138_v10, %s15104_s30  ;;  %v17397_v3 = vrot.slane %v17115_v36, %v15333_v17 }
0x11be   :  { %v17385_v53 = vpop.f32.mrf.mxu1 }
0x11bf   :  { %20909 = vst [vmem:[#allocation84_spill] sm:$0xff] %v17381_v46  ;;  %v17418_v21 = vadd.f32 %v17154_v11, %v17397_v3  ;;  %v17433_v11 = vld [vmem:[%s20639_s17 + $0x8] sm:$0xff] }
0x11c0   :  { %v4137_v28 = vpop.f32.mrf.mxu1 }
0x11c1   :  { %v17400_v10 = vadd.f32 %v4137_v28, %v17300_v34  ;;  %6688 = vrot.lane.b32.xlu1 %v6666_v19, %s15104_s30  ;;  %5968 = vrot.lane.b32.xlu0 %v5946_v40, %s15104_s30  ;;  %20912 = vst [vmem:[#allocation87_spill] sm:$0xff] %v17418_v21  ;;  %v7419_v40 = vmul.f32 %v17404_v32, %v3811_v61 }
0x11c2   :  { %v17406_v41 = vpop.f32.mrf.mxu1  ;;  %v17453_v61 = vadd.f32 %v17132_v39, %v17034_v51  ;;  %v17470_v51 = vpop.permute.xlu0 %5156 }
0x11c3   :  { %20911 = vst [vmem:[#allocation86_spill] sm:$0xff] %v17400_v10 }
0x11c4   :  { %v4143_v54 = vpop.f32.mrf.mxu1  ;;  %20916 = vst [vmem:[#allocation91_spill] sm:$0xff] %v17453_v61 }
0x11c5   :  { %v17421_v28 = vadd.f32 %v4143_v54, %v17300_v34  ;;  %4466 = vrot.lane.b32.xlu1 %v4443_v62, %s15104_s30  ;;  %6690 = vrot.lane.b32.xlu0 %v6667_v5, %s15104_s30  ;;  %v9605_v54 = vmul.f32 %v17433_v11, %v17418_v21  ;;  %v17439_v62 = vadd.f32 %v17193_v20, %v17397_v3 }
0x11c6   :  { %v17425_v19 = vpop.f32.mrf.mxu1 }
0x11c7   :  { %20913 = vst [vmem:[#allocation88_spill] sm:$0xff] %v17421_v28  ;;  %20914 = vst [vmem:[#allocation89_spill] sm:$0xff] %v17439_v62  ;;  %v9607_v20 = vmul.f32 %v17208_v14, %v17439_v62 }
0x11c8   :  { %v4149_v5 = vpop.f32.mrf.mxu1 }
0x11c9   :  { %v17442_v28 = vadd.f32 %v4149_v5, %v17300_v34  ;;  %7442 = vrot.lane.b32.xlu1 %v7419_v40, %s15104_s30  ;;  %9622 = vrot.lane.b32.xlu0 %v9605_v54, %s15104_s30  ;;  %v17459_v34 = vadd.f32 %v17263_v27, %v17397_v3  ;;  %v4220_v40 = vpop.f32.mrf.mxu0  ;;  %v8139_v54 = vmul.f32 %v17413_v56, %v17453_v61  ;;  %v17472_v27 = vpop.permute.xlu1 %5158 }
0x11ca   :  { %v4221_v39 = vadd.f32 %v4220_v40, %v17448_v42  ;;  %20918 = vst [vmem:[#allocation93_spill] sm:$0xff] %v17472_v27 }
0x11cb   :  { %20915 = vst [vmem:[#allocation90_spill] sm:$0xff] %v17442_v28  ;;  %20917 = vst [vmem:[#allocation92_spill] sm:$0xff] %v17459_v34  ;;  %v9610_v5 = vmul.f32 %v17363_v45, %v17459_v34 }
0x11cc   :  { %v5244_v40 = vmul.f32 %v17482_v4, %v4221_v39 }
0x11cd   :  { %5218 = vrot.lane.b32.xlu1 %v5195_v60, %s15104_s30  ;;  %9626 = vrot.lane.b32.xlu0 %v9607_v20, %s15104_s30  ;;  %v5947_v60 = vmul.f32 %v17404_v32, %v3700_v55  ;;  %v17477_v20 = vadd.f32 %v17139_v16, %v17397_v3  ;;  %v17493_v55 = vrot.slane %v17115_v36, %v17017_v57  ;;  %v20920_v16 = vmov 0.0   ;;  %v17501_v34 = vpop.permute.xlu1 %5162 }
0x11ce   :  { %14152 = vmatprep.mubr.msk.f32.mxu0 %vm20808_vm3, %v20920_v16  ;;  %14187 = vmatprep.mubr.msk.f32.mxu1 %vm20808_vm3, %v20920_v16 }
0x11cf   :  { %20919 = vst [vmem:[#allocation94_spill] sm:$0xff] %v17477_v20 }
0x11d1   :  { %8162 = vrot.lane.b32.xlu1 %v8139_v54, %s15104_s30  ;;  %9632 = vrot.lane.b32.xlu0 %v9610_v5, %s15104_s30  ;;  %v17487_v54 = vrot.slane %v17115_v36, %v16495_v50  ;;  %v17499_v5 = vpop.permute.xlu0 %5160  ;;  %v5996_v36 = vmul.f32 %v17023_v48, %v4221_v39  ;;  %v4222_v50 = vpop.f32.mrf.mxu0 }
0x11d2   :  { %v17518_v28 = vpop.permute.xlu1 %5166 }
0x11d3   :  { %v17512_v57 = vadd.f32 %v17327_v37, %v17487_v54  ;;  %20923 = vst [vmem:[#allocation97_spill] sm:$0xff] %v17518_v28  ;;  %v17529_v37 = vadd.f32 %v17214_v58, %v17397_v3  ;;  %v17544_v58 = vadd.f32 %v17240_v44, %v17397_v3  ;;  %v17559_v44 = vadd.f32 %v17341_v63, %v17487_v54 }
0x11d5   :  { %5970 = vrot.lane.b32.xlu1 %v5947_v60, %s15104_s30  ;;  %5260 = vrot.lane.b32.xlu0 %v5244_v40, %s15104_s30  ;;  %v9604_v60 = vmul.f32 %v17482_v4, %v17477_v20  ;;  %v17507_v40 = vadd.f32 %v17175_v18, %v17397_v3  ;;  %20922 = vst [vmem:[#allocation96_spill] sm:$0xff] %v17512_v57  ;;  %v17516_v62 = vpop.permute.xlu0 %5164  ;;  %v17523_v18 = vld [vmem:[%s20639_s17 + $0x10] sm:$0xff]  ;;  %20924 = vst [vmem:[#allocation98_spill] sm:$0xff] %v17529_v37  ;;  %v4226_v20 = vpop.f32.mrf.mxu0 }
0x11d6   :  { %v17538_v10 = vpop.permute.xlu1 %5170  ;;  %20927 = vst [vmem:[#allocation101_spill] sm:$0xff] %v17544_v58  ;;  %20929 = vst [vmem:[#allocation103_spill] sm:$0xff] %v17559_v44 }
0x11d7   :  { %20921 = vst [vmem:[#allocation95_spill] sm:$0xff] %v17507_v40  ;;  %v9606_v39 = vmul.f32 %v17523_v18, %v17507_v40  ;;  %20926 = vst [vmem:[#allocation100_spill] sm:$0xff] %v17538_v10  ;;  %v9608_v40 = vmul.f32 %v17234_v26, %v17529_v37 }
0x11d9   :  { %9620 = vrot.lane.b32.xlu1 %v9604_v60, %s15104_s30  ;;  %6012 = vrot.lane.b32.xlu0 %v5996_v36, %s15104_s30  ;;  %v4492_v60 = vmul.f32 %v17023_v48, %v17512_v57  ;;  %v4223_v36 = vadd.f32 %v4222_v50, %v17493_v55  ;;  %v17536_v21 = vpop.permute.xlu0 %5168  ;;  %v4227_v50 = vadd.f32 %v4226_v20, %v17448_v42 }
0x11da   :  { %20925 = vst [vmem:[#allocation99_spill] sm:$0xff] %v17536_v21 }
0x11db   :  { %v7468_v57 = vmul.f32 %v17023_v48, %v4223_v36  ;;  %v5997_v37 = vmul.f32 %v17055_v25, %v4227_v50 }
0x11dd   :  { %9624 = vrot.lane.b32.xlu1 %v9606_v39, %s15104_s30  ;;  %4508 = vrot.lane.b32.xlu0 %v4492_v60, %s15104_s30  ;;  %v9609_v39 = vmul.f32 %v17307_v1, %v17544_v58  ;;  %v17554_v60 = vadd.f32 %v17289_v59, %v17397_v3  ;;  %v4493_v59 = vmul.f32 %v17055_v25, %v17559_v44 }
0x11df   :  { %20928 = vst [vmem:[#allocation102_spill] sm:$0xff] %v17554_v60 }
0x11e1   :  { %9628 = vrot.lane.b32.xlu1 %v9608_v40, %s15104_s30  ;;  %7484 = vrot.lane.b32.xlu0 %v7468_v57, %s15104_s30  ;;  %v4228_v40 = vpop.f32.mrf.mxu0  ;;  %v9611_v57 = vmul.f32 %v17413_v56, %v17554_v60 }
0x11e2   :  { %v4229_v3 = vadd.f32 %v4228_v40, %v17493_v55  ;;  %v5245_v40 = vmul.f32 %v17433_v11, %v4227_v50 }
0x11e3   :  { %v17561_v46 = vpop.permute.xlu1 %6676  ;;  %v17563_v20 = vpop.permute.xlu0 %4452 }
0x11e4   :  { %v4232_v61 = vpop.f32.mrf.mxu0 }
0x11e5   :  { %9630 = vrot.lane.b32.xlu1 %v9609_v39, %s15104_s30  ;;  %6014 = vrot.lane.b32.xlu0 %v5997_v37, %s15104_s30  ;;  %v6716_v39 = vmul.f32 %v17482_v4, %v4223_v36  ;;  %v7469_v37 = vmul.f32 %v17055_v25, %v4229_v3  ;;  %v4233_v60 = vadd.f32 %v4232_v61, %v17448_v42 }
0x11e6   :  { %v4234_v36 = vpop.f32.mrf.mxu0  ;;  %v6717_v61 = vmul.f32 %v17433_v11, %v4229_v3 }
0x11e7   :  { %v17572_v58 = vpop.permute.xlu1 %7428  ;;  %v17574_v63 = vpop.permute.xlu0 %5204  ;;  %v5998_v21 = vmul.f32 %v17090_v12, %v4233_v60  ;;  %v4235_v50 = vadd.f32 %v4234_v36, %v17493_v55 }
0x11e8   :  { %20930 = vst [vmem:[#allocation104_spill] sm:$0xff] %v17572_v58  ;;  %v4238_v10 = vpop.f32.mrf.mxu0 }
0x11e9   :  { %9634 = vrot.lane.b32.xlu1 %v9611_v57, %s15104_s30  ;;  %4510 = vrot.lane.b32.xlu0 %v4493_v59, %s15104_s30  ;;  %v5246_v57 = vmul.f32 %v17523_v18, %v4233_v60  ;;  %v6718_v60 = vmul.f32 %v17523_v18, %v4235_v50 }
0x11ea   :  { %v4240_v36 = vpop.f32.mrf.mxu0 }
0x11eb   :  { %v17581_v15 = vpop.permute.xlu1 %8148  ;;  %v17583_v44 = vpop.permute.xlu0 %6678 }
0x11ec   :  { %20931 = vst [vmem:[#allocation105_spill] sm:$0xff] %v17583_v44 }
0x11ed   :  { %6732 = vrot.lane.b32.xlu1 %v6716_v39, %s15104_s30  ;;  %7486 = vrot.lane.b32.xlu0 %v7469_v37, %s15104_s30  ;;  %v17599_v39 = vadd.f32 %v17356_v9, %v17487_v54 }
0x11ef   :  { %v17589_v58 = vpop.permute.xlu1 %5956  ;;  %v17591_v59 = vpop.permute.xlu0 %4454  ;;  %20934 = vst [vmem:[#allocation108_spill] sm:$0xff] %v17599_v39  ;;  %v4494_v3 = vmul.f32 %v17090_v12, %v17599_v39  ;;  %v17622_v39 = vadd.f32 %v17375_v52, %v17487_v54 }
0x11f0   :  { %20932 = vst [vmem:[#allocation106_spill] sm:$0xff] %v17589_v58  ;;  %20933 = vst [vmem:[#allocation107_spill] sm:$0xff] %v17591_v59 }
0x11f1   :  { %5262 = vrot.lane.b32.xlu1 %v5245_v40, %s15104_s30  ;;  %5264 = vrot.lane.b32.xlu0 %v5246_v57, %s15104_s30  ;;  %v4239_v40 = vadd.f32 %v4238_v10, %v17448_v42  ;;  %20939 = vst [vmem:[#allocation113_spill] sm:$0xff] %v17622_v39 }
0x11f3   :  { %v17602_v37 = vpop.permute.xlu1 %7430  ;;  %v17604_v58 = vpop.permute.xlu0 %8150 }
0x11f4   :  { %20935 = vst [vmem:[#allocation109_spill] sm:$0xff] %v17602_v37  ;;  %20936 = vst [vmem:[#allocation110_spill] sm:$0xff] %v17604_v58  ;;  %v4244_v58 = vpop.f32.mrf.mxu0 }
0x11f5   :  { %6734 = vrot.lane.b32.xlu1 %v6717_v61, %s15104_s30  ;;  %6016 = vrot.lane.b32.xlu0 %v5998_v21, %s15104_s30  ;;  %v7470_v61 = vmul.f32 %v17090_v12, %v4235_v50  ;;  %v5247_v21 = vmul.f32 %v17208_v14, %v4239_v40  ;;  %v4495_v50 = vmul.f32 %v17156_v6, %v17622_v39 }
0x11f6   :  { %v4245_v12 = vadd.f32 %v4244_v58, %v17448_v42 }
0x11f7   :  { %v17612_v9 = vpop.permute.xlu1 %5206  ;;  %v17614_v57 = vpop.permute.xlu0 %4456 }
0x11f8   :  { %20937 = vst [vmem:[#allocation111_spill] sm:$0xff] %v17612_v9  ;;  %20938 = vst [vmem:[#allocation112_spill] sm:$0xff] %v17614_v57 }
0x11f9   :  { %6736 = vrot.lane.b32.xlu1 %v6718_v60, %s15104_s30  ;;  %4512 = vrot.lane.b32.xlu0 %v4494_v3, %s15104_s30  ;;  %v5999_v60 = vmul.f32 %v17156_v6, %v4239_v40  ;;  %v4241_v3 = vadd.f32 %v4240_v36, %v17493_v55  ;;  %v5248_v40 = vmul.f32 %v17234_v26, %v4245_v12  ;;  %v4246_v36 = vpop.f32.mrf.mxu0 }
0x11fa   :  { %v4247_v9 = vadd.f32 %v4246_v36, %v17493_v55 }
0x11fb   :  { %v17624_v37 = vpop.permute.xlu1 %5958  ;;  %v17626_v10 = vpop.permute.xlu0 %7432 }
0x11fc   :  { %20940 = vst [vmem:[#allocation114_spill] sm:$0xff] %v17624_v37  ;;  %20941 = vst [vmem:[#allocation115_spill] sm:$0xff] %v17626_v10  ;;  %v17639_v37 = vpop.f32.mrf.mxu1  ;;  %v7471_v10 = vmul.f32 %v17156_v6, %v4241_v3  ;;  %v4250_v44 = vpop.f32.mrf.mxu0 }
0x11fd   :  { %5266 = vrot.lane.b32.xlu1 %v5247_v21, %s15104_s30  ;;  %7488 = vrot.lane.b32.xlu0 %v7470_v61, %s15104_s30  ;;  %v6719_v61 = vmul.f32 %v17208_v14, %v4241_v3  ;;  %v6720_v3 = vmul.f32 %v17234_v26, %v4247_v9 }
0x11fe   :  { %v17649_v58 = vpop.f32.mrf.mxu1  ;;  %v4252_v36 = vpop.f32.mrf.mxu0 }
0x11ff   :  { %v17635_v52 = vpop.permute.xlu1 %6680  ;;  %v17637_v57 = vpop.permute.xlu0 %5208 }
0x1200   :  { %v17664_v27 = vpop.f32.mrf.mxu1  ;;  %v4256_v59 = vpop.f32.mrf.mxu0 }
0x1201   :  { %6018 = vrot.lane.b32.xlu1 %v5999_v60, %s15104_s30  ;;  %4514 = vrot.lane.b32.xlu0 %v4495_v50, %s15104_s30  ;;  %v6000_v60 = vmul.f32 %v17216_v7, %v4245_v12  ;;  %v17657_v50 = vadd.f32 %v17385_v53, %v17487_v54  ;;  %v4251_v53 = vadd.f32 %v4250_v44, %v17448_v42 }
0x1203   :  { %v17645_v21 = vpop.permute.xlu1 %8152  ;;  %v17647_v39 = vpop.permute.xlu0 %5960  ;;  %20943 = vst [vmem:[#allocation117_spill] sm:$0xff] %v17657_v50  ;;  %v4496_v12 = vmul.f32 %v17216_v7, %v17657_v50  ;;  %v17682_v50 = vadd.f32 %v17406_v41, %v17487_v54  ;;  %v4257_v41 = vadd.f32 %v4256_v59, %v17448_v42 }
0x1204   :  { %20942 = vst [vmem:[#allocation116_spill] sm:$0xff] %v17647_v39 }
0x1205   :  { %6738 = vrot.lane.b32.xlu1 %v6719_v61, %s15104_s30  ;;  %5268 = vrot.lane.b32.xlu0 %v5248_v40, %s15104_s30  ;;  %20946 = vst [vmem:[#allocation120_spill] sm:$0xff] %v17682_v50 }
0x1207   :  { %v17660_v28 = vpop.permute.xlu1 %7434  ;;  %v17662_v39 = vpop.permute.xlu0 %6682 }
0x1208   :  { %20944 = vst [vmem:[#allocation118_spill] sm:$0xff] %v17660_v28  ;;  %v4339_v28 = vpop.f32.mrf.mxu1 }
0x1209   :  { %7490 = vrot.lane.b32.xlu1 %v7471_v10, %s15104_s30  ;;  %6020 = vrot.lane.b32.xlu0 %v6000_v60, %s15104_s30  ;;  %v7472_v10 = vmul.f32 %v17216_v7, %v4247_v9  ;;  %v5249_v60 = vmul.f32 %v17307_v1, %v4251_v53  ;;  %v4497_v9 = vmul.f32 %v17291_v29, %v17682_v50 }
0x120b   :  { %v17672_v61 = vpop.permute.xlu1 %5210  ;;  %v17674_v40 = vpop.permute.xlu0 %4458 }
0x120c   :  { %20945 = vst [vmem:[#allocation119_spill] sm:$0xff] %v17674_v40  ;;  %v17688_v40 = vpop.f32.mrf.mxu1 }
0x120d   :  { %6740 = vrot.lane.b32.xlu1 %v6720_v3, %s15104_s30  ;;  %4516 = vrot.lane.b32.xlu0 %v4496_v12, %s15104_s30  ;;  %v6001_v12 = vmul.f32 %v17291_v29, %v4251_v53  ;;  %v4253_v3 = vadd.f32 %v4252_v36, %v17493_v55  ;;  %v5250_v53 = vmul.f32 %v17363_v45, %v4257_v41  ;;  %v4258_v36 = vpop.f32.mrf.mxu0 }
0x120f   :  { %v17684_v6 = vpop.permute.xlu1 %5962  ;;  %v17686_v44 = vpop.permute.xlu0 %8154 }
0x1210   :  { %20947 = vst [vmem:[#allocation121_spill] sm:$0xff] %v17684_v6  ;;  %20948 = vst [vmem:[#allocation122_spill] sm:$0xff] %v17686_v44  ;;  %v17701_v44 = vpop.f32.mrf.mxu1 }
0x1211   :  { %5270 = vrot.lane.b32.xlu1 %v5249_v60, %s15104_s30  ;;  %7492 = vrot.lane.b32.xlu0 %v7472_v10, %s15104_s30  ;;  %v6721_v10 = vmul.f32 %v17307_v1, %v4253_v3  ;;  %v4262_v1 = vpop.f32.mrf.mxu0 }
0x1212   :  { %v17711_v59 = vpop.f32.mrf.mxu1 }
0x1213   :  { %v17697_v7 = vpop.permute.xlu1 %6684  ;;  %v17699_v6 = vpop.permute.xlu0 %7436 }
0x1214   :  { %20949 = vst [vmem:[#allocation123_spill] sm:$0xff] %v17697_v7  ;;  %20950 = vst [vmem:[#allocation124_spill] sm:$0xff] %v17699_v6  ;;  %v7473_v6 = vmul.f32 %v17291_v29, %v4253_v3  ;;  %v4259_v7 = vadd.f32 %v4258_v36, %v17493_v55 }
0x1215   :  { %6022 = vrot.lane.b32.xlu1 %v6001_v12, %s15104_s30  ;;  %4518 = vrot.lane.b32.xlu0 %v4497_v9, %s15104_s30  ;;  %v6002_v12 = vmul.f32 %v17325_v30, %v4257_v41  ;;  %v17719_v9 = vadd.f32 %v17425_v19, %v17487_v54  ;;  %v4263_v41 = vadd.f32 %v4262_v1, %v17448_v42 }
0x1216   :  { %v6722_v3 = vmul.f32 %v17363_v45, %v4259_v7 }
0x1217   :  { %v17707_v60 = vpop.permute.xlu1 %4460  ;;  %v17709_v50 = vpop.permute.xlu0 %5212  ;;  %20953 = vst [vmem:[#allocation127_spill] sm:$0xff] %v17719_v9  ;;  %v4498_v19 = vmul.f32 %v17325_v30, %v17719_v9 }
0x1218   :  { %20951 = vst [vmem:[#allocation125_spill] sm:$0xff] %v17707_v60  ;;  %20952 = vst [vmem:[#allocation126_spill] sm:$0xff] %v17709_v50  ;;  %v4264_v9 = vpop.f32.mrf.mxu0 }
0x1219   :  { %6742 = vrot.lane.b32.xlu1 %v6721_v10, %s15104_s30  ;;  %5272 = vrot.lane.b32.xlu0 %v5250_v53, %s15104_s30  ;;  %v3245_v10 = vld [vmem:[%s20641_s15 + $0x10] sm:$0x3]  ;;  %v17729_v53 = vpop.f32.mrf.mxu1 }
0x121a   :  { %v17738_v36 = vrot.slane %v3245_v10, %v15333_v17 }
0x121b   :  { %v17722_v60 = vpop.permute.xlu1 %8156  ;;  %v17724_v50 = vpop.permute.xlu0 %5964 }
0x121c   :  { %20954 = vst [vmem:[#allocation128_spill] sm:$0xff] %v17722_v60  ;;  %20955 = vst [vmem:[#allocation129_spill] sm:$0xff] %v17724_v50  ;;  %v17744_v60 = vpop.f32.mrf.mxu1  ;;  %v4334_v1 = vadd.f32 %v17649_v58, %v17738_v36 }
0x121d   :  { %7494 = vrot.lane.b32.xlu1 %v7473_v6, %s15104_s30  ;;  %6024 = vrot.lane.b32.xlu0 %v6002_v12, %s15104_s30  ;;  %v7474_v6 = vmul.f32 %v17325_v30, %v4259_v7  ;;  %v5251_v12 = vmul.f32 %v17413_v56, %v4263_v41  ;;  %v6003_v7 = vmul.f32 %v17404_v32, %v4263_v41 }
0x121e   :  { %v8940_v58 = vmul.f32 %v17023_v48, %v4334_v1 }
0x121f   :  { %v17740_v50 = vpop.permute.xlu1 %4462  ;;  %v17742_v29 = vpop.permute.xlu0 %6686 }
0x1220   :  { %20956 = vst [vmem:[#allocation130_spill] sm:$0xff] %v17740_v50  ;;  %20957 = vst [vmem:[#allocation131_spill] sm:$0xff] %v17742_v29  ;;  %v17756_v50 = vpop.f32.mrf.mxu1  ;;  %v17760_v29 = vrot.slane %v16958_v22, %v15339_v23 }
0x1221   :  { %6744 = vrot.lane.b32.xlu1 %v6722_v3, %s15104_s30  ;;  %4520 = vrot.lane.b32.xlu0 %v4498_v19, %s15104_s30  ;;  %v4265_v19 = vadd.f32 %v4264_v9, %v17493_v55  ;;  %v4340_v3 = vadd.f32 %v4339_v28, %v17738_v36  ;;  %v17782_v55 = vadd.f32 %v17639_v37, %v17487_v54 }
0x1222   :  { %v17776_v22 = vadd.f32 %v16927_v2, %v17760_v29  ;;  %v17794_v2 = vadd.f32 %v16923_v0, %v16983_v31  ;;  %v17811_v0 = vadd.f32 %v16925_v13, %v16970_v47 }
0x1223   :  { %v17752_v42 = vpop.permute.xlu1 %7438  ;;  %v17754_v17 = vpop.permute.xlu0 %4464  ;;  %20962 = vst [vmem:[#allocation136_spill] sm:$0xff] %v17782_v55  ;;  %v6723_v28 = vmul.f32 %v17413_v56, %v4265_v19  ;;  %v8941_v9 = vmul.f32 %v17055_v25, %v4340_v3  ;;  %v4499_v54 = vmul.f32 %v17404_v32, %v17782_v55 }
0x1224   :  { %20958 = vst [vmem:[#allocation132_spill] sm:$0xff] %v17752_v42  ;;  %20959 = vst [vmem:[#allocation133_spill] sm:$0xff] %v17754_v17  ;;  %v17772_v17 = vpop.f32.mrf.mxu1 }
0x1225   :  { %5274 = vrot.lane.b32.xlu1 %v5251_v12, %s15104_s30  ;;  %7496 = vrot.lane.b32.xlu0 %v7474_v6, %s15104_s30  ;;  %20961 = vst [vmem:[#allocation135_spill] sm:$0xff] %v17776_v22  ;;  %20964 = vst [vmem:[#allocation138_spill] sm:$0xff] %v17811_v0 }
0x1226   :  { %v17790_v12 = vpop.f32.mrf.mxu1 }
0x1227   :  { %v17768_v42 = vpop.permute.xlu1 %5214  ;;  %v17770_v30 = vpop.permute.xlu0 %7440 }
0x1228   :  { %20960 = vst [vmem:[#allocation134_spill] sm:$0xff] %v17770_v30  ;;  %v17807_v25 = vpop.f32.mrf.mxu1 }
0x1229   :  { %6026 = vrot.lane.b32.xlu1 %v6003_v7, %s15104_s30  ;;  %8956 = vrot.lane.b32.xlu0 %v8940_v58, %s15104_s30  ;;  %v6652_v7 = vmul.f32 %v17470_v51, %v17776_v22  ;;  %v8124_v22 = vmul.f32 %v17470_v51, %v17811_v0 }
0x122a   :  { %v4369_v13 = vpop.f32.mrf.mxu1 }
0x122b   :  { %v17786_v41 = vpop.permute.xlu1 %8158  ;;  %v17788_v6 = vpop.permute.xlu0 %5216  ;;  %v6700_v37 = vadd.f32 %v17561_v46, %v6652_v7  ;;  %v17819_v46 = vrot.slane %v3245_v10, %v15339_v23 }
0x122c   :  { %v4371_v23 = vpop.f32.mrf.mxu1 }
0x122d   :  { %6746 = vrot.lane.b32.xlu1 %v6723_v28, %s15104_s30  ;;  %8958 = vrot.lane.b32.xlu0 %v8941_v9, %s15104_s30  ;;  %v5180_v28 = vmul.f32 %v17470_v51, %v17794_v2  ;;  %v7475_v9 = vmul.f32 %v17404_v32, %v4265_v19  ;;  %v17833_v10 = vadd.f32 %v17664_v27, %v17819_v46 }
0x122e   :  { %v8172_v19 = vadd.f32 %v17581_v15, %v8124_v22  ;;  %v4375_v22 = vpop.f32.mrf.mxu1 }
0x122f   :  { %v17803_v58 = vpop.permute.xlu1 %5966  ;;  %v17805_v30 = vpop.permute.xlu0 %8160  ;;  %v5228_v7 = vadd.f32 %v17574_v63, %v5180_v28  ;;  %v17836_v63 = vadd.f32 %v4369_v13, %v17738_v36  ;;  %v8189_v13 = vmul.f32 %v17433_v11, %v4340_v3 }
0x1230   :  { %20963 = vst [vmem:[#allocation137_spill] sm:$0xff] %v17803_v58 }
0x1231   :  { %4522 = vrot.lane.b32.xlu1 %v4499_v54, %s15104_s30  ;;  %6765 = vrot.lane.b32.xlu0 %v6700_v37, %s15104_s30  ;;  %v8188_v54 = vmul.f32 %v17482_v4, %v4334_v1  ;;  %v9660_v1 = vmul.f32 %v17482_v4, %v17833_v10  ;;  %v8194_v27 = vmul.f32 %v17363_v45, %v17836_v63 }
0x1232   :  { %v17861_v4 = vadd.f32 %v17688_v40, %v17819_v46 }
0x1233   :  { %v17822_v55 = vpop.permute.xlu1 %6688  ;;  %v17824_v58 = vpop.permute.xlu0 %5968 }
0x1234   :  { %20965 = vst [vmem:[#allocation139_spill] sm:$0xff] %v17824_v58  ;;  %20968 = vst [vmem:[#allocation142_spill] sm:$0xff] %v17861_v4  ;;  %v9661_v40 = vmul.f32 %v17433_v11, %v17861_v4  ;;  %v21014_v4 = vld [vmem:[#allocation32_spill] sm:$0xff] }
0x1235   :  { %7498 = vrot.lane.b32.xlu1 %v7475_v9, %s15104_s30  ;;  %5293 = vrot.lane.b32.xlu0 %v5228_v7, %s15104_s30  ;;  %v17850_v9 = vadd.f32 %v4371_v23, %v17819_v46  ;;  %v17866_v23 = vadd.f32 %v4375_v22, %v17738_v36 }
0x1237   :  { %v17839_v37 = vpop.permute.xlu1 %4466  ;;  %v17841_v28 = vpop.permute.xlu0 %6690  ;;  %20966 = vst [vmem:[#allocation140_spill] sm:$0xff] %v17850_v9  ;;  %v8195_v3 = vmul.f32 %v17413_v56, %v17866_v23 }
0x1239   :  { %8204 = vrot.lane.b32.xlu1 %v8188_v54, %s15104_s30  ;;  %8237 = vrot.lane.b32.xlu0 %v8172_v19, %s15104_s30  ;;  %v9666_v54 = vmul.f32 %v17363_v45, %v17850_v9  ;;  %v17882_v45 = vadd.f32 %v17701_v44, %v17738_v36  ;;  %v17898_v44 = vadd.f32 %v17711_v59, %v17819_v46 }
0x123a   :  { %v17916_v59 = vadd.f32 %v17146_v38, %v17249_v49 }
0x123b   :  { %v17852_v7 = vpop.permute.xlu1 %7442  ;;  %v17854_v15 = vpop.permute.xlu0 %9622  ;;  %v8190_v11 = vmul.f32 %v17523_v18, %v17882_v45  ;;  %20970 = vst [vmem:[#allocation144_spill] sm:$0xff] %v17898_v44 }
0x123c   :  { %20967 = vst [vmem:[#allocation141_spill] sm:$0xff] %v17852_v7 }
0x123d   :  { %9676 = vrot.lane.b32.xlu1 %v9660_v1, %s15104_s30  ;;  %8216 = vrot.lane.b32.xlu0 %v8194_v27, %s15104_s30  ;;  %v17874_v1 = vadd.f32 %v16943_v35, %v17760_v29  ;;  %v4377_v35 = vpop.f32.mrf.mxu1 }
0x123f   :  { %v17868_v19 = vpop.permute.xlu1 %5218  ;;  %v17870_v7 = vpop.permute.xlu0 %9626  ;;  %20969 = vst [vmem:[#allocation143_spill] sm:$0xff] %v17874_v1 }
0x1241   :  { %8206 = vrot.lane.b32.xlu1 %v8189_v13, %s15104_s30  ;;  %9688 = vrot.lane.b32.xlu0 %v9666_v54, %s15104_s30  ;;  %v6654_v13 = vmul.f32 %v17499_v5, %v17874_v1  ;;  %v17901_v54 = vadd.f32 %v4377_v35, %v17819_v46  ;;  %v17956_v1 = vadd.f32 %v16951_v43, %v17760_v29 }
0x1243   :  { %v17886_v27 = vpop.permute.xlu1 %8162  ;;  %v17888_v22 = vpop.permute.xlu0 %9632  ;;  %20971 = vst [vmem:[#allocation145_spill] sm:$0xff] %v17901_v54  ;;  %v6702_v0 = vadd.f32 %v17635_v52, %v6654_v13  ;;  %v17922_v52 = vadd.f32 %v17729_v53, %v17738_v36  ;;  %v9667_v35 = vmul.f32 %v17413_v56, %v17901_v54  ;;  %20977 = vst [vmem:[#allocation151_spill] sm:$0xff] %v17956_v1  ;;  %v21003_v54 = vld [vmem:[#allocation128_spill] sm:$0xff] }
0x1245   :  { %9678 = vrot.lane.b32.xlu1 %v9661_v40, %s15104_s30  ;;  %8218 = vrot.lane.b32.xlu0 %v8195_v3, %s15104_s30  ;;  %v17910_v40 = vadd.f32 %v16939_v24, %v16983_v31  ;;  %v9662_v3 = vmul.f32 %v17523_v18, %v17898_v44  ;;  %v17941_v18 = vld [vmem:[%s20640_s16] sm:$0xff]  ;;  %v8191_v53 = vmul.f32 %v17208_v14, %v17922_v52 }
0x1246   :  { %20975 = vst [vmem:[#allocation149_spill] sm:$0xff] %v17941_v18  ;;  %v4484_v56 = vmul.f32 %v17941_v18, %v17916_v59 }
0x1247   :  { %v17904_v58 = vpop.permute.xlu1 %5970  ;;  %v17906_v9 = vpop.permute.xlu0 %5260  ;;  %v5182_v38 = vmul.f32 %v17499_v5, %v17910_v40 }
0x1248   :  { %20972 = vst [vmem:[#allocation146_spill] sm:$0xff] %v17904_v58 }
0x1249   :  { %8208 = vrot.lane.b32.xlu1 %v8190_v11, %s15104_s30  ;;  %6925 = vrot.lane.b32.xlu0 %v6702_v0, %s15104_s30  ;;  %v17932_v0 = vadd.f32 %v16941_v33, %v16970_v47  ;;  %v17949_v33 = vadd.f32 %v17744_v60, %v17819_v46  ;;  %v5230_v11 = vadd.f32 %v17637_v57, %v5182_v38 }
0x124a   :  { %v4396_v60 = vmul.f32 %v17941_v18, %v17794_v2  ;;  %v17969_v38 = vadd.f32 %v17756_v50, %v17738_v36  ;;  %v17980_v2 = vadd.f32 %v16947_v8, %v16983_v31  ;;  %v17995_v8 = vadd.f32 %v17772_v17, %v17819_v46  ;;  %v20984_v17 = vld [vmem:[#allocation10_spill] sm:$0xff] }
0x124b   :  { %v17926_v24 = vpop.permute.xlu1 %9620  ;;  %v17928_v13 = vpop.permute.xlu0 %6012  ;;  %20974 = vst [vmem:[#allocation148_spill] sm:$0xff] %v17932_v0  ;;  %20976 = vst [vmem:[#allocation150_spill] sm:$0xff] %v17949_v33  ;;  %v9663_v57 = vmul.f32 %v17208_v14, %v17949_v33  ;;  %v6655_v14 = vmul.f32 %v17501_v34, %v17956_v1 }
0x124c   :  { %20973 = vst [vmem:[#allocation147_spill] sm:$0xff] %v17928_v13  ;;  %v8126_v13 = vmul.f32 %v17499_v5, %v17932_v0 }
0x124d   :  { %9680 = vrot.lane.b32.xlu1 %v9662_v3, %s15104_s30  ;;  %9690 = vrot.lane.b32.xlu0 %v9667_v35, %s15104_s30 }
0x124e   :  { %v8174_v43 = vadd.f32 %v17645_v21, %v8126_v13  ;;  %v20979_v21 = vld [vmem:[#allocation47_spill] sm:$0xff] }
0x124f   :  { %v17952_v3 = vpop.permute.xlu1 %9624  ;;  %v4509_v35 = vpop.permute.xlu0 %4508  ;;  %v17988_v50 = vadd.f32 %v20979_v21, %v17249_v49  ;;  %20980 = vst [vmem:[#allocation47_spill] sm:$0xff] %v17995_v8  ;;  %v9664_v21 = vmul.f32 %v17234_v26, %v17995_v8 }
0x1250   :  { %v4532_v58 = vadd.f32 %v4509_v35, %v4484_v56 }
0x1251   :  { %8210 = vrot.lane.b32.xlu1 %v8191_v53, %s15104_s30  ;;  %5453 = vrot.lane.b32.xlu0 %v5230_v11, %s15104_s30  ;;  %v4476_v53 = vadd.f32 %v17563_v20, %v4396_v60  ;;  %v8192_v20 = vmul.f32 %v17234_v26, %v17969_v38  ;;  %v20982_v60 = vld [vmem:[#allocation19_spill] sm:$0xff] }
0x1252   :  { %14151 = vmatpush3.xpose.msk.msra.mxu0 %vm524_vm2, %v4532_v58  ;;  %v6703_v58 = vadd.f32 %v17662_v39, %v6655_v14  ;;  %v3436_v39 = vadd.f32 %v20984_v17, %v16983_v31 }
0x1253   :  { %v17972_v56 = vpop.permute.xlu1 %9628  ;;  %v17974_v35 = vpop.permute.xlu0 %7484  ;;  %14155 = vmatprep.subr.mxu0 %v20920_v16 }
0x1254   :  { %20978 = vst [vmem:[#allocation152_spill] sm:$0xff] %v17974_v35  ;;  %v20987_v35 = vld [vmem:[#allocation17_spill] sm:$0xff] }
0x1255   :  { %9682 = vrot.lane.b32.xlu1 %v9663_v57, %s15104_s30  ;;  %8397 = vrot.lane.b32.xlu0 %v8174_v43, %s15104_s30  ;;  %v18006_v57 = vadd.f32 %v20982_v60, %v17760_v29  ;;  %v5183_v43 = vmul.f32 %v17501_v34, %v17980_v2  ;;  %v18025_v60 = vadd.f32 %v17790_v12, %v17738_v36 }
0x1256   :  { %14153 = vmatmul.mubr.msk.f32.vlgmr.msra.gmra.mxu0 %vm524_vm2, %v4476_v53  ;;  %v18017_v53 = vld [vmem:[%s20640_s16 + $0x8] sm:$0xff]  ;;  %v18032_v1 = vadd.f32 %v20987_v35, %v16983_v31  ;;  %v18044_v12 = vadd.f32 %v17807_v25, %v17819_v46 }
0x1257   :  { %v17998_v13 = vpop.permute.xlu1 %9630  ;;  %v18000_v11 = vpop.permute.xlu0 %6014  ;;  %14157 = vmatprep.mubr.msk.f32.mxu0 %vm20808_vm3, %v20920_v16  ;;  %20983 = vst [vmem:[#allocation19_spill] sm:$0xff] %v18006_v57  ;;  %20985 = vst [vmem:[#allocation10_spill] sm:$0xff] %v18017_v53  ;;  %v4485_v14 = vmul.f32 %v18017_v53, %v17988_v50  ;;  %v4397_v26 = vmul.f32 %v18017_v53, %v3436_v39  ;;  %v20990_v35 = vld [vmem:[#allocation123_spill] sm:$0xff]  ;;  %v20995_v53 = vld [vmem:[#allocation18_spill] sm:$0xff] }
0x1258   :  { %20981 = vst [vmem:[#allocation153_spill] sm:$0xff] %v18000_v11  ;;  %v6656_v11 = vmul.f32 %v17516_v62, %v18006_v57  ;;  %20989 = vst [vmem:[#allocation17_spill] sm:$0xff] %v18044_v12  ;;  %v20993_v57 = vld [vmem:[#allocation12_spill] sm:$0xff]  ;;  %v18059_v18 = vadd.f32 %v20995_v53, %v16970_v47  ;;  %v5184_v25 = vmul.f32 %v17516_v62, %v18032_v1  ;;  %v20998_v53 = vld [vmem:[#allocation23_spill] sm:$0xff] }
0x1259   :  { %8212 = vrot.lane.b32.xlu1 %v8192_v20, %s15104_s30  ;;  %7005 = vrot.lane.b32.xlu0 %v6703_v58, %s15104_s30  ;;  %v5231_v20 = vadd.f32 %v17672_v61, %v5183_v43  ;;  %v20988_v61 = vld [vmem:[#allocation73_spill] sm:$0xff] }
0x125a   :  { %v8193_v36 = vmul.f32 %v20988_v61, %v18025_v60  ;;  %v6704_v43 = vadd.f32 %v20990_v35, %v6656_v11  ;;  %v9665_v46 = vmul.f32 %v20988_v61, %v18044_v12  ;;  %v20997_v11 = vld [vmem:[#allocation126_spill] sm:$0xff]  ;;  %v21001_v61 = vld [vmem:[#allocation51_spill] sm:$0xff] }
0x125b   :  { %v18028_v58 = vpop.permute.xlu1 %9634  ;;  %v4511_v17 = vpop.permute.xlu0 %4510 }
0x125c   :  { %20986 = vst [vmem:[#allocation154_spill] sm:$0xff] %v18028_v58  ;;  %v4533_v0 = vadd.f32 %v4511_v17, %v4485_v14  ;;  %v18127_v58 = vadd.f32 %v21014_v4, %v17760_v29 }
0x125d   :  { %9684 = vrot.lane.b32.xlu1 %v9664_v21, %s15104_s30  ;;  %5533 = vrot.lane.b32.xlu0 %v5231_v20, %s15104_s30  ;;  %v20992_v21 = vld [vmem:[#allocation107_spill] sm:$0xff] }
0x125e   :  { %14156 = vmatpush3.xpose.msk.msra.mxu0 %vm524_vm2, %v4533_v0  ;;  %v4477_v20 = vadd.f32 %v20992_v21, %v4397_v26  ;;  %v18055_v0 = vadd.f32 %v20993_v57, %v17760_v29  ;;  %20996 = vst [vmem:[#allocation107_spill] sm:$0xff] %v18059_v18  ;;  %v5232_v26 = vadd.f32 %v20997_v11, %v5184_v25  ;;  %v21002_v11 = vld [vmem:[#allocation105_spill] sm:$0xff]  ;;  %21015 = vst [vmem:[#allocation51_spill] sm:$0xff] %v18127_v58 }
0x125f   :  { %v18047_v14 = vpop.permute.xlu1 %6732  ;;  %v18049_v17 = vpop.permute.xlu0 %7486  ;;  %14160 = vmatprep.subr.mxu0 %v20920_v16  ;;  %v18077_v21 = vadd.f32 %v20998_v53, %v17760_v29  ;;  %v18087_v25 = vadd.f32 %v21001_v61, %v17249_v49  ;;  %v21008_v61 = vld [vmem:[#allocation97_spill] sm:$0xff] }
0x1260   :  { %20991 = vst [vmem:[#allocation73_spill] sm:$0xff] %v18049_v17  ;;  %20994 = vst [vmem:[#allocation123_spill] sm:$0xff] %v18055_v0 }
0x1261   :  { %8214 = vrot.lane.b32.xlu1 %v8193_v36, %s15104_s30  ;;  %7085 = vrot.lane.b32.xlu0 %v6704_v43, %s15104_s30  ;;  %20999 = vst [vmem:[#allocation12_spill] sm:$0xff] %v18077_v21  ;;  %v21000_v36 = vld [vmem:[#allocation93_spill] sm:$0xff]  ;;  %v6657_v33 = vmul.f32 %v21008_v61, %v18077_v21 }
0x1262   :  { %14158 = vmatmul.mubr.msk.f32.vlgmr.msra.gmra.mxu0 %vm524_vm2, %v4477_v20  ;;  %v6653_v43 = vmul.f32 %v21000_v36, %v18055_v0  ;;  %v8128_v20 = vmul.f32 %v17516_v62, %v18059_v18  ;;  %v21005_v0 = vld [vmem:[#allocation11_spill] sm:$0xff] }
0x1263   :  { %v18069_v57 = vpop.permute.xlu1 %5262  ;;  %v18071_v35 = vpop.permute.xlu0 %5264  ;;  %14162 = vmatprep.mubr.msk.f32.mxu0 %vm20808_vm3, %v20920_v16  ;;  %v18097_v44 = vadd.f32 %v21005_v0, %v16970_v47 }
0x1264   :  { %v6701_v17 = vadd.f32 %v21002_v11, %v6653_v43  ;;  %v8176_v12 = vadd.f32 %v21003_v54, %v8128_v20  ;;  %v18111_v54 = vld [vmem:[%s20640_s16 + $0x10] sm:$0xff]  ;;  %v21010_v43 = vld [vmem:[#allocation111_spill] sm:$0xff] }
0x1265   :  { %9686 = vrot.lane.b32.xlu1 %v9665_v46, %s15104_s30  ;;  %5613 = vrot.lane.b32.xlu0 %v5232_v26, %s15104_s30  ;;  %21006 = vst [vmem:[#allocation126_spill] sm:$0xff] %v18097_v44  ;;  %v21007_v46 = vld [vmem:[#allocation21_spill] sm:$0xff]  ;;  %v5181_v26 = vmul.f32 %v21000_v36, %v3436_v39  ;;  %21009 = vst [vmem:[#allocation23_spill] sm:$0xff] %v18111_v54  ;;  %v4486_v0 = vmul.f32 %v18111_v54, %v18087_v25  ;;  %v21011_v20 = vld [vmem:[#allocation131_spill] sm:$0xff] }
0x1266   :  { %v18101_v18 = vadd.f32 %v21007_v46, %v16983_v31  ;;  %v6705_v11 = vadd.f32 %v21011_v20, %v6657_v33  ;;  %v4398_v33 = vmul.f32 %v18111_v54, %v17910_v40 }
0x1267   :  { %v18091_v53 = vpop.permute.xlu1 %6734  ;;  %v18093_v8 = vpop.permute.xlu0 %6016  ;;  %v5229_v31 = vadd.f32 %v21010_v43, %v5181_v26 }
0x1268   :  { %21004 = vst [vmem:[#allocation18_spill] sm:$0xff] %v18093_v8  ;;  %v5185_v26 = vmul.f32 %v21008_v61, %v18101_v18 }
0x1269   :  { %6845 = vrot.lane.b32.xlu1 %v6701_v17, %s15104_s30  ;;  %8557 = vrot.lane.b32.xlu0 %v8176_v12, %s15104_s30  ;;  %v8125_v17 = vmul.f32 %v21000_v36, %v18097_v44  ;;  %v21012_v12 = vld [vmem:[#allocation15_spill] sm:$0xff] }
0x126a   :  { %v18123_v8 = vadd.f32 %v21012_v12, %v16970_v47  ;;  %v21017_v47 = vld [vmem:[#allocation110_spill] sm:$0xff]  ;;  %v5233_v4 = vadd.f32 %v17768_v42, %v5185_v26  ;;  %v18158_v42 = vld [vmem:[%s20640_s16 + $0x18] sm:$0xff] }
0x126b   :  { %v18117_v39 = vpop.permute.xlu1 %6736  ;;  %v4513_v46 = vpop.permute.xlu0 %4512  ;;  %v8173_v20 = vadd.f32 %v21017_v47, %v8125_v17  ;;  %v21021_v17 = vld [vmem:[#allocation122_spill] sm:$0xff] }
0x126c   :  { %v4534_v21 = vadd.f32 %v4513_v46, %v4486_v0  ;;  %21013 = vst [vmem:[#allocation93_spill] sm:$0xff] %v18123_v8  ;;  %v21016_v0 = vld [vmem:[#allocation55_spill] sm:$0xff]  ;;  %v8127_v40 = vmul.f32 %v17501_v34, %v18123_v8  ;;  %v21024_v8 = vld [vmem:[#allocation22_spill] sm:$0xff] }
0x126d   :  { %5373 = vrot.lane.b32.xlu1 %v5229_v31, %s15104_s30  ;;  %7165 = vrot.lane.b32.xlu0 %v6705_v11, %s15104_s30  ;;  %v18137_v43 = vadd.f32 %v21016_v0, %v17249_v49  ;;  %v21019_v31 = vld [vmem:[#allocation112_spill] sm:$0xff] }
0x126e   :  { %14161 = vmatpush3.xpose.msk.msra.mxu0 %vm524_vm2, %v4534_v21  ;;  %v4478_v11 = vadd.f32 %v21019_v31, %v4398_v33  ;;  %v21020_v0 = vld [vmem:[#allocation100_spill] sm:$0xff]  ;;  %v8175_v26 = vadd.f32 %v21021_v17, %v8127_v40  ;;  %v21026_v17 = vld [vmem:[#allocation119_spill] sm:$0xff] }
0x126f   :  { %v18142_v46 = vpop.permute.xlu1 %5266  ;;  %v18144_v12 = vpop.permute.xlu0 %7488  ;;  %14165 = vmatprep.subr.mxu0 %v20920_v16  ;;  %v6659_v44 = vmul.f32 %v21020_v0, %v18127_v58  ;;  %v4487_v21 = vmul.f32 %v18158_v42, %v18137_v43  ;;  %v21025_v58 = vld [vmem:[#allocation30_spill] sm:$0xff] }
0x1270   :  { %21018 = vst [vmem:[#allocation105_spill] sm:$0xff] %v18144_v12  ;;  %v8129_v12 = vmul.f32 %v21008_v61, %v21024_v8  ;;  %v5187_v54 = vmul.f32 %v21020_v0, %v21025_v58 }
0x1271   :  { %8317 = vrot.lane.b32.xlu1 %v8173_v20, %s15104_s30  ;;  %5693 = vrot.lane.b32.xlu0 %v5233_v4, %s15104_s30  ;;  %v6707_v33 = vadd.f32 %v17841_v28, %v6659_v44  ;;  %v21022_v4 = vld [vmem:[#allocation28_spill] sm:$0xff]  ;;  %v4399_v28 = vmul.f32 %v18158_v42, %v17980_v2  ;;  %v5236_v2 = vmul.f32 %v17470_v51, %v17916_v59  ;;  %v21030_v59 = vld [vmem:[#allocation43_spill] sm:$0xff] }
0x1272   :  { %14163 = vmatmul.mubr.msk.f32.vlgmr.msra.gmra.mxu0 %vm524_vm2, %v4478_v11  ;;  %v18170_v11 = vadd.f32 %v21022_v4, %v17760_v29  ;;  %v8177_v44 = vadd.f32 %v17786_v41, %v8129_v12  ;;  %v5235_v29 = vadd.f32 %v17868_v19, %v5187_v54  ;;  %v21028_v41 = vld [vmem:[#allocation59_spill] sm:$0xff] }
0x1273   :  { %v18164_v47 = vpop.permute.xlu1 %6018  ;;  %v4515_v31 = vpop.permute.xlu0 %4514  ;;  %14167 = vmatprep.mubr.msk.f32.mxu0 %vm20808_vm3, %v20920_v16  ;;  %v3908_v19 = vadd.f32 %v21028_v41, %v17249_v49  ;;  %v5284_v12 = vadd.f32 %v17906_v9, %v5236_v2  ;;  %v18215_v49 = vld [vmem:[%s20640_s16 + $0x20] sm:$0xff] }
0x1274   :  { %v4535_v20 = vadd.f32 %v4515_v31, %v4487_v21  ;;  %21023 = vst [vmem:[#allocation128_spill] sm:$0xff] %v18170_v11  ;;  %v4479_v31 = vadd.f32 %v21026_v17, %v4399_v28  ;;  %v6708_v28 = vmul.f32 %v17470_v51, %v21030_v59  ;;  %v21032_v41 = vld [vmem:[#allocation26_spill] sm:$0xff] }
0x1275   :  { %8477 = vrot.lane.b32.xlu1 %v8175_v26, %s15104_s30  ;;  %7325 = vrot.lane.b32.xlu0 %v6707_v33, %s15104_s30  ;;  %v21027_v26 = vld [vmem:[#allocation99_spill] sm:$0xff] }
0x1276   :  { %14166 = vmatpush3.xpose.msk.msra.mxu0 %vm524_vm2, %v4535_v20  ;;  %v6658_v33 = vmul.f32 %v21027_v26, %v18170_v11  ;;  %v6756_v17 = vadd.f32 %v18047_v14, %v6708_v28  ;;  %v8130_v8 = vmul.f32 %v21027_v26, %v21032_v41  ;;  %v21047_v41 = vld [vmem:[#allocation75_spill] sm:$0xff]  ;;  %v21079_v11 = vld [vmem:[#allocation44_spill] sm:$0xff] }
0x1277   :  { %v18183_v40 = vpop.permute.xlu1 %6738  ;;  %v18185_v21 = vpop.permute.xlu0 %5268  ;;  %14170 = vmatprep.subr.mxu0 %v20920_v16 }
0x1278   :  { %v6706_v54 = vadd.f32 %v17822_v55, %v6658_v33  ;;  %v4488_v55 = vmul.f32 %v18215_v49, %v3908_v19 }
0x1279   :  { %8637 = vrot.lane.b32.xlu1 %v8177_v44, %s15104_s30  ;;  %5853 = vrot.lane.b32.xlu0 %v5235_v29, %s15104_s30  ;;  %v21031_v44 = vld [vmem:[#allocation25_spill] sm:$0xff] }
0x127a   :  { %14168 = vmatmul.mubr.msk.f32.vlgmr.msra.gmra.mxu0 %vm524_vm2, %v4479_v31  ;;  %v5186_v29 = vmul.f32 %v21027_v26, %v21031_v44 }
0x127b   :  { %v18200_v20 = vpop.permute.xlu1 %7490  ;;  %v18202_v4 = vpop.permute.xlu0 %6020  ;;  %14172 = vmatprep.mubr.msk.f32.mxu0 %vm20808_vm3, %v20920_v16 }
0x127c   :  { %21029 = vst [vmem:[#allocation11_spill] sm:$0xff] %v18200_v20  ;;  %v5234_v9 = vadd.f32 %v17788_v6, %v5186_v29  ;;  %v8178_v6 = vadd.f32 %v17805_v30, %v8130_v8  ;;  %v18244_v30 = vld [vmem:[%s20640_s16 + $0x28] sm:$0xff] }
0x127d   :  { %7245 = vrot.lane.b32.xlu1 %v6706_v54, %s15104_s30  ;;  %5296 = vrot.lane.b32.xlu0 %v5284_v12, %s15104_s30  ;;  %v5238_v54 = vmul.f32 %v17499_v5, %v18087_v25  ;;  %v4400_v12 = vmul.f32 %v18215_v49, %v18032_v1  ;;  %v21036_v1 = vld [vmem:[#allocation65_spill] sm:$0xff] }
0x127e   :  { %v4489_v8 = vmul.f32 %v18244_v30, %v21036_v1 }
0x127f   :  { %v6741_v31 = vpop.permute.xlu1 %6740  ;;  %v4517_v33 = vpop.permute.xlu0 %4516  ;;  %v5286_v14 = vadd.f32 %v18071_v35, %v5238_v54 }
0x1280   :  { %v4536_v2 = vadd.f32 %v4517_v33, %v4488_v55  ;;  %v21034_v55 = vld [vmem:[#allocation125_spill] sm:$0xff]  ;;  %v21035_v33 = vld [vmem:[#allocation50_spill] sm:$0xff] }
0x1281   :  { %5773 = vrot.lane.b32.xlu1 %v5234_v9, %s15104_s30  ;;  %6768 = vrot.lane.b32.xlu0 %v6756_v17, %s15104_s30  ;;  %v4480_v25 = vadd.f32 %v21034_v55, %v4400_v12  ;;  %v6710_v9 = vmul.f32 %v17499_v5, %v21035_v33  ;;  %v5237_v17 = vmul.f32 %v21000_v36, %v17988_v50 }
0x1282   :  { %14171 = vmatpush3.xpose.msk.msra.mxu0 %vm524_vm2, %v4536_v2  ;;  %v5239_v55 = vmul.f32 %v17501_v34, %v18137_v43  ;;  %v21039_v43 = vld [vmem:[#allocation54_spill] sm:$0xff] }
0x1283   :  { %v5271_v28 = vpop.permute.xlu1 %5270  ;;  %v18231_v29 = vpop.permute.xlu0 %7492  ;;  %14175 = vmatprep.subr.mxu0 %v20920_v16  ;;  %v5285_v35 = vadd.f32 %v18069_v57, %v5237_v17  ;;  %v6758_v2 = vadd.f32 %v18117_v39, %v6710_v9  ;;  %v4401_v57 = vmul.f32 %v18244_v30, %v18101_v18 }
0x1284   :  { %21033 = vst [vmem:[#allocation21_spill] sm:$0xff] %v18231_v29  ;;  %v21071_v29 = vld [vmem:[#allocation9_spill] sm:$0xff] }
0x1285   :  { %8717 = vrot.lane.b32.xlu1 %v8178_v6, %s15104_s30  ;;  %5456 = vrot.lane.b32.xlu0 %v5286_v14, %s15104_s30  ;;  %v21037_v6 = vld [vmem:[#allocation46_spill] sm:$0xff] }
0x1286   :  { %14173 = vmatmul.mubr.msk.f32.vlgmr.msra.gmra.mxu0 %vm524_vm2, %v4480_v25  ;;  %v6709_v14 = vmul.f32 %v21000_v36, %v21037_v6  ;;  %v5287_v25 = vadd.f32 %v18142_v46, %v5239_v55  ;;  %v5241_v55 = vmul.f32 %v21008_v61, %v21036_v1 }
0x1287   :  { %v18251_v54 = vpop.permute.xlu1 %6022  ;;  %v4519_v50 = vpop.permute.xlu0 %4518  ;;  %14177 = vmatprep.mubr.msk.f32.mxu0 %vm20808_vm3, %v20920_v16 }
0x1288   :  { %v4537_v12 = vadd.f32 %v4519_v50, %v4489_v8  ;;  %v6757_v39 = vadd.f32 %v18091_v53, %v6709_v14  ;;  %v21038_v8 = vld [vmem:[#allocation130_spill] sm:$0xff] }
0x1289   :  { %5376 = vrot.lane.b32.xlu1 %v5285_v35, %s15104_s30  ;;  %6928 = vrot.lane.b32.xlu0 %v6758_v2, %s15104_s30  ;;  %v4481_v50 = vadd.f32 %v21038_v8, %v4401_v57  ;;  %v6711_v35 = vmul.f32 %v17501_v34, %v21039_v43  ;;  %v5240_v2 = vmul.f32 %v17516_v62, %v3908_v19  ;;  %v21042_v14 = vld [vmem:[#allocation58_spill] sm:$0xff] }
0x128a   :  { %14176 = vmatpush3.xpose.msk.msra.mxu0 %vm524_vm2, %v4537_v12  ;;  %v6712_v19 = vmul.f32 %v17516_v62, %v21042_v14 }
0x128b   :  { %v6743_v9 = vpop.permute.xlu1 %6742  ;;  %v5273_v17 = vpop.permute.xlu0 %5272  ;;  %14180 = vmatprep.subr.mxu0 %v20920_v16  ;;  %v6759_v18 = vadd.f32 %v18183_v40, %v6711_v35  ;;  %v5288_v53 = vadd.f32 %v18185_v21, %v5240_v2  ;;  %v18291_v40 = vld [vmem:[%s20640_s16 + $0x30] sm:$0xff]  ;;  %v21043_v21 = vld [vmem:[#allocation69_spill] sm:$0xff]  ;;  %v21044_v2 = vld [vmem:[#allocation62_spill] sm:$0xff] }
0x128c   :  { %v4490_v57 = vmul.f32 %v18291_v40, %v21043_v21  ;;  %v6713_v1 = vmul.f32 %v21008_v61, %v21044_v2 }
0x128d   :  { %6848 = vrot.lane.b32.xlu1 %v6757_v39, %s15104_s30  ;;  %5536 = vrot.lane.b32.xlu0 %v5287_v25, %s15104_s30  ;;  %v6760_v39 = vadd.f32 %v6741_v31, %v6712_v19  ;;  %v5289_v25 = vadd.f32 %v5271_v28, %v5241_v55 }
0x128e   :  { %14178 = vmatmul.mubr.msk.f32.vlgmr.msra.gmra.mxu0 %vm524_vm2, %v4481_v50  ;;  %v6761_v31 = vadd.f32 %v6743_v9, %v6713_v1  ;;  %v21051_v1 = vld [vmem:[#allocation66_spill] sm:$0xff] }
0x128f   :  { %v18276_v46 = vpop.permute.xlu1 %7494  ;;  %v18278_v12 = vpop.permute.xlu0 %6024  ;;  %14182 = vmatprep.mubr.msk.f32.mxu0 %vm20808_vm3, %v20920_v16 }
0x1290   :  { %21040 = vst [vmem:[#allocation97_spill] sm:$0xff] %v18276_v46  ;;  %21041 = vst [vmem:[#allocation111_spill] sm:$0xff] %v18278_v12 }
0x1291   :  { %7008 = vrot.lane.b32.xlu0 %v6759_v18, %s15104_s30  ;;  %5616 = vrot.lane.b32.xlu1 %v5288_v53, %s15104_s30  ;;  %v5242_v18 = vmul.f32 %v21027_v26, %v21043_v21  ;;  %v4402_v53 = vmul.f32 %v18291_v40, %v21031_v44  ;;  %v5243_v21 = vmul.f32 %v21020_v0, %v21047_v41 }
0x1293   :  { %v6745_v8 = vpop.permute.xlu1 %6744  ;;  %v4521_v50 = vpop.permute.xlu0 %4520  ;;  %v5290_v28 = vadd.f32 %v5273_v17, %v5242_v18  ;;  %v6714_v18 = vmul.f32 %v21027_v26, %v21051_v1 }
0x1294   :  { %v4538_v35 = vadd.f32 %v4521_v50, %v4490_v57  ;;  %v21046_v57 = vld [vmem:[#allocation133_spill] sm:$0xff] }
0x1295   :  { %5696 = vrot.lane.b32.xlu0 %v5289_v25, %s15104_s30  ;;  %7088 = vrot.lane.b32.xlu1 %v6760_v39, %s15104_s30  ;;  %v4482_v50 = vadd.f32 %v21046_v57, %v4402_v53  ;;  %v21048_v25 = vld [vmem:[#allocation31_spill] sm:$0xff]  ;;  %v21052_v53 = vld [vmem:[#allocation36_spill] sm:$0xff]  ;;  %v18335_v57 = vld [vmem:[%s20640_s16 + $0x38] sm:$0xff] }
0x1296   :  { %14181 = vmatpush3.xpose.msk.msra.mxu0 %vm524_vm2, %v4538_v35  ;;  %v8131_v39 = vmul.f32 %v21020_v0, %v21048_v25  ;;  %21054 = vst [vmem:[#allocation110_spill] sm:$0xff] %v18335_v57 }
0x1297   :  { %v5275_v19 = vpop.permute.xlu1 %5274  ;;  %v18304_v55 = vpop.permute.xlu0 %7496  ;;  %14190 = vmatprep.subr.mxu0 %v20920_v16 }
0x1298   :  { %21045 = vst [vmem:[#allocation131_spill] sm:$0xff] %v18304_v55  ;;  %v8179_v44 = vadd.f32 %v17886_v27, %v8131_v39  ;;  %v5291_v9 = vadd.f32 %v5275_v19, %v5243_v21  ;;  %v21055_v21 = vld [vmem:[#allocation39_spill] sm:$0xff]  ;;  %v21056_v39 = vld [vmem:[#allocation38_spill] sm:$0xff] }
0x1299   :  { %7168 = vrot.lane.b32.xlu0 %v6761_v31, %s15104_s30  ;;  %5776 = vrot.lane.b32.xlu1 %v5290_v28, %s15104_s30  ;;  %v8884_v31 = vmul.f32 %v17023_v48, %v21052_v53  ;;  %v6762_v28 = vadd.f32 %v6745_v8, %v6714_v18  ;;  %v21057_v8 = vld [vmem:[#allocation41_spill] sm:$0xff]  ;;  %v21069_v55 = vld [vmem:[#allocation6_spill] sm:$0xff] }
0x129a   :  { %14183 = vmatmul.mubr.msk.f32.vlgmr.msra.gmra.mxu0 %vm524_vm2, %v4482_v50  ;;  %v4491_v50 = vmul.f32 %v18335_v57, %v21047_v41  ;;  %v21059_v41 = vld [vmem:[#allocation42_spill] sm:$0xff] }
0x129b   :  { %v18316_v17 = vpop.permute.xlu1 %6026  ;;  %v18318_v35 = vpop.permute.xlu0 %8956  ;;  %14192 = vmatprep.mubr.msk.f32.mxu0 %vm20808_vm3, %v20920_v16 }
0x129c   :  { %21049 = vst [vmem:[#allocation15_spill] sm:$0xff] %v18316_v17  ;;  %21050 = vst [vmem:[#allocation32_spill] sm:$0xff] %v18318_v35 }
0x129d   :  { %5856 = vrot.lane.b32.xlu0 %v5291_v9, %s15104_s30  ;;  %8797 = vrot.lane.b32.xlu1 %v8179_v44, %s15104_s30  ;;  %v8885_v44 = vmul.f32 %v21056_v39, %v21055_v21  ;;  %v8942_v9 = vmul.f32 %v21057_v8, %v17882_v45 }
0x129f   :  { %v6747_v27 = vpop.permute.xlu1 %6746  ;;  %v18328_v19 = vpop.permute.xlu0 %8958 }
0x12a0   :  { %21053 = vst [vmem:[#allocation55_spill] sm:$0xff] %v18328_v19  ;;  %v8886_v19 = vmul.f32 %v21057_v8, %v21059_v41 }
0x12a1   :  { %8900 = vrot.lane.b32.xlu0 %v8884_v31, %s15104_s30  ;;  %7248 = vrot.lane.b32.xlu1 %v6762_v28, %s15104_s30  ;;  %v4403_v28 = vmul.f32 %v18335_v57, %v21025_v58 }
0x12a3   :  { %v4523_v18 = vpop.permute.xlu1 %4522  ;;  %v18343_v53 = vpop.permute.xlu0 %6765  ;;  %v4483_v21 = vadd.f32 %v17839_v37, %v4403_v28  ;;  %v21062_v37 = vld [vmem:[#allocation57_spill] sm:$0xff] }
0x12a4   :  { %21058 = vst [vmem:[#allocation112_spill] sm:$0xff] %v18343_v53  ;;  %v4539_v31 = vadd.f32 %v4523_v18, %v4491_v50  ;;  %v21061_v50 = vld [vmem:[#allocation45_spill] sm:$0xff]  ;;  %v21073_v53 = vld [vmem:[#allocation72_spill] sm:$0xff] }
0x12a5   :  { %8960 = vrot.lane.b32.xlu0 %v8942_v9, %s15104_s30  ;;  %8902 = vrot.lane.b32.xlu1 %v8885_v44, %s15104_s30  ;;  %v8943_v58 = vmul.f32 %v21061_v50, %v17922_v52  ;;  %v8944_v44 = vmul.f32 %v21062_v37, %v17969_v38  ;;  %v21065_v52 = vld [vmem:[#allocation64_spill] sm:$0xff]  ;;  %v21067_v38 = vld [vmem:[#allocation78_spill] sm:$0xff] }
0x12a6   :  { %14186 = vmatpush3.xpose.msk.msra.mxu1 %vm524_vm2, %v4539_v31  ;;  %v21064_v31 = vld [vmem:[#allocation53_spill] sm:$0xff] }
0x12a7   :  { %v18353_v35 = vpop.permute.xlu1 %7498  ;;  %v18355_v45 = vpop.permute.xlu0 %5293  ;;  %14195 = vmatprep.subr.mxu1 %v20920_v16  ;;  %v8887_v28 = vmul.f32 %v21061_v50, %v21064_v31  ;;  %v8946_v31 = vmul.f32 %v21067_v38, %v17836_v63 }
0x12a8   :  { %21060 = vst [vmem:[#allocation100_spill] sm:$0xff] %v18353_v35 }
0x12a9   :  { %14188 = vmatmul.mubr.msk.f32.vlgmr.msra.gmra.mxu1 %vm524_vm2, %v4483_v21  ;;  %8904 = vrot.lane.b32.xlu0 %v8886_v19, %s15104_s30  ;;  %v8888_v19 = vmul.f32 %v21062_v37, %v21065_v52  ;;  %v15085_v52 = vld [vmem:[%s20641_s15] sm:$0xff]  ;;  %s15120_s15 = smov 32  }
0x12aa   :  { %8962 = vrot.lane.b32.xlu1 %v8943_v58, %s15104_s30  ;;  %14197 = vmatprep.mubr.msk.f32.mxu1 %vm20808_vm3, %v20920_v16  ;;  %v21066_v58 = vld [vmem:[#allocation71_spill] sm:$0xff]  ;;  %v18391_v46 = vrot.slane %v15085_v52, %v21069_v55  ;;  %v6715_v52 = vmul.f32 %v21020_v0, %v21073_v53 }
0x12ab   :  { %v8205_v9 = vpop.permute.xlu1 %8204  ;;  %v18367_v18 = vpop.permute.xlu0 %8237  ;;  %v8945_v25 = vmul.f32 %v21066_v58, %v18025_v60  ;;  %v21070_v60 = vld [vmem:[#allocation82_spill] sm:$0xff] }
0x12ac   :  { %21063 = vst [vmem:[#allocation122_spill] sm:$0xff] %v18367_v18  ;;  %v8890_v63 = vmul.f32 %v21067_v38, %v21070_v60  ;;  %v18403_v20 = vadd.f32 %v21071_v29, %v18391_v46  ;;  %v6763_v60 = vadd.f32 %v6747_v27, %v6715_v52  ;;  %v21078_v29 = vld [vmem:[#allocation67_spill] sm:$0xff] }
0x12ad   :  { %8964 = vrot.lane.b32.xlu0 %v8944_v44, %s15104_s30  ;;  %v18419_v12 = vadd.f32 %v21079_v11, %v21078_v29 }
0x12ae   :  { %8906 = vrot.lane.b32.xlu1 %v8887_v28, %s15104_s30  ;;  %v21068_v28 = vld [vmem:[#allocation80_spill] sm:$0xff]  ;;  %21072 = vst [vmem:[#allocation28_spill] sm:$0xff] %v18403_v20 }
0x12af   :  { %v9677_v41 = vpop.permute.xlu1 %9676  ;;  %v18375_v21 = vpop.permute.xlu0 %8216  ;;  %v8889_v35 = vmul.f32 %v21066_v58, %v21068_v28  ;;  %v8947_v28 = vmul.f32 %v17404_v32, %v17866_v23  ;;  %v21077_v23 = vld [vmem:[#allocation91_spill] sm:$0xff]  ;;  %21080 = vst [vmem:[#allocation99_spill] sm:$0xff] %v18419_v12 }
0x12b0   :  { %v8891_v57 = vmul.f32 %v17404_v32, %v21077_v23 }
0x12b1   :  { %8908 = vrot.lane.b32.xlu0 %v8888_v19, %s15104_s30 }
0x12b2   :  { %8966 = vrot.lane.b32.xlu1 %v8945_v25, %s15104_s30 }
0x12b3   :  { %v8207_v18 = vpop.permute.xlu1 %8206  ;;  %v18383_v44 = vpop.permute.xlu0 %9688 }
0x12b5   :  { %8968 = vrot.lane.b32.xlu0 %v8946_v31, %s15104_s30 }
0x12b6   :  { %8910 = vrot.lane.b32.xlu1 %v8889_v35, %s15104_s30  ;;  %v21074_v35 = vld [vmem:[#allocation13_spill] sm:$0xff] }
0x12b7   :  { %v9679_v25 = vpop.permute.xlu1 %9678  ;;  %v18397_v19 = vpop.permute.xlu0 %8218  ;;  %v18410_v31 = vadd.f32 %v21074_v35, %v18391_v46  ;;  %v21081_v35 = vld [vmem:[#allocation48_spill] sm:$0xff] }
0x12b8   :  { %v18426_v53 = vadd.f32 %v21081_v35, %v21078_v29 }
0x12b9   :  { %8912 = vrot.lane.b32.xlu0 %v8890_v63, %s15104_s30  ;;  %21075 = vst [vmem:[#allocation30_spill] sm:$0xff] %v18410_v31  ;;  %v9596_v63 = vmul.f32 %v17470_v51, %v18403_v20  ;;  %v9597_v27 = vmul.f32 %v21000_v36, %v18410_v31  ;;  %v8180_v20 = vmul.f32 %v17470_v51, %v18419_v12 }
0x12ba   :  { %8970 = vrot.lane.b32.xlu1 %v8947_v28, %s15104_s30  ;;  %21082 = vst [vmem:[#allocation59_spill] sm:$0xff] %v18426_v53 }
0x12bb   :  { %v8209_v55 = vpop.permute.xlu1 %8208  ;;  %v18413_v17 = vpop.permute.xlu0 %6925  ;;  %v9644_v28 = vadd.f32 %v17926_v24, %v9596_v63  ;;  %v9645_v11 = vadd.f32 %v17854_v15, %v9597_v27  ;;  %v8228_v35 = vadd.f32 %v8205_v9, %v8180_v20  ;;  %v21083_v63 = vld [vmem:[#allocation52_spill] sm:$0xff]  ;;  %v21084_v15 = vld [vmem:[#allocation77_spill] sm:$0xff] }
0x12bc   :  { %21076 = vst [vmem:[#allocation119_spill] sm:$0xff] %v18413_v17  ;;  %v18445_v17 = vadd.f32 %v21083_v63, %v21078_v29  ;;  %v9652_v27 = vmul.f32 %v17470_v51, %v21084_v15  ;;  %v21091_v15 = vld [vmem:[#allocation83_spill] sm:$0xff] }
0x12bd   :  { %7328 = vrot.lane.b32.xlu0 %v6763_v60, %s15104_s30  ;;  %v8181_v60 = vmul.f32 %v21000_v36, %v18426_v53  ;;  %v21086_v53 = vld [vmem:[#allocation79_spill] sm:$0xff] }
0x12be   :  { %8914 = vrot.lane.b32.xlu1 %v8891_v57, %s15104_s30  ;;  %v9653_v20 = vmul.f32 %v21000_v36, %v21086_v53  ;;  %v9700_v9 = vadd.f32 %v9677_v41, %v9652_v27  ;;  %v8182_v63 = vmul.f32 %v17499_v5, %v18445_v17  ;;  %v21088_v41 = vld [vmem:[#allocation60_spill] sm:$0xff] }
0x12bf   :  { %v9681_v52 = vpop.permute.xlu1 %9680  ;;  %v18432_v23 = vpop.permute.xlu0 %9690  ;;  %v8229_v24 = vadd.f32 %v8207_v18, %v8181_v60  ;;  %v18469_v27 = vadd.f32 %v21088_v41, %v21078_v29 }
0x12c0   :  { %v9701_v60 = vadd.f32 %v9679_v25, %v9653_v20  ;;  %v21089_v25 = vld [vmem:[#allocation81_spill] sm:$0xff] }
0x12c1   :  { %9709 = vrot.lane.b32.xlu0 %v9644_v28, %s15104_s30  ;;  %v21085_v28 = vld [vmem:[#allocation56_spill] sm:$0xff]  ;;  %v9654_v20 = vmul.f32 %v17499_v5, %v21089_v25  ;;  %v8184_v41 = vmul.f32 %v17516_v62, %v18469_v27 }
0x12c2   :  { %9789 = vrot.lane.b32.xlu1 %v9645_v11, %s15104_s30  ;;  %v18452_v12 = vadd.f32 %v21085_v28, %v21078_v29  ;;  %v21096_v25 = vld [vmem:[#allocation76_spill] sm:$0xff] }
0x12c3   :  { %v8211_v31 = vpop.permute.xlu1 %8210  ;;  %v18441_v57 = vpop.permute.xlu0 %5453 }
0x12c4   :  { %v8183_v51 = vmul.f32 %v17501_v34, %v18452_v12 }
0x12c5   :  { %8240 = vrot.lane.b32.xlu0 %v8228_v35, %s15104_s30  ;;  %v8230_v35 = vadd.f32 %v8209_v55, %v8182_v63  ;;  %v9655_v55 = vmul.f32 %v17501_v34, %v21091_v15 }
0x12c6   :  { %8320 = vrot.lane.b32.xlu1 %v8229_v24, %s15104_s30  ;;  %v8231_v24 = vadd.f32 %v8211_v31, %v8183_v51 }
0x12c7   :  { %v9683_v18 = vpop.permute.xlu1 %9682  ;;  %v18457_v11 = vpop.permute.xlu0 %8397 }
0x12c8   :  { %21087 = vst [vmem:[#allocation43_spill] sm:$0xff] %v18457_v11  ;;  %v9703_v51 = vadd.f32 %v9683_v18, %v9655_v55  ;;  %v21093_v18 = vld [vmem:[#allocation70_spill] sm:$0xff] }
0x12c9   :  { %9712 = vrot.lane.b32.xlu0 %v9700_v9, %s15104_s30  ;;  %v21090_v9 = vld [vmem:[#allocation63_spill] sm:$0xff]  ;;  %v8186_v55 = vmul.f32 %v21027_v26, %v21093_v18 }
0x12ca   :  { %9792 = vrot.lane.b32.xlu1 %v9701_v60, %s15104_s30  ;;  %v18476_v53 = vadd.f32 %v21090_v9, %v21078_v29  ;;  %v9702_v60 = vadd.f32 %v9681_v52, %v9654_v20  ;;  %v21092_v52 = vld [vmem:[#allocation14_spill] sm:$0xff] }
0x12cb   :  { %v8213_v28 = vpop.permute.xlu1 %8212  ;;  %v18465_v36 = vpop.permute.xlu0 %7005  ;;  %v18493_v20 = vadd.f32 %v21092_v52, %v18391_v46 }
0x12cc   :  { %v8185_v29 = vmul.f32 %v21008_v61, %v18476_v53 }
0x12cd   :  { %8400 = vrot.lane.b32.xlu0 %v8230_v35, %s15104_s30  ;;  %v8232_v35 = vadd.f32 %v8213_v28, %v8184_v41  ;;  %v8187_v28 = vmul.f32 %v21020_v0, %v21096_v25  ;;  %v8234_v41 = vadd.f32 %v18375_v21, %v8186_v55  ;;  %v9598_v11 = vmul.f32 %v17499_v5, %v18493_v20  ;;  %v21098_v5 = vld [vmem:[#allocation84_spill] sm:$0xff] }
0x12ce   :  { %8480 = vrot.lane.b32.xlu1 %v8231_v24, %s15104_s30 }
0x12cf   :  { %v9685_v31 = vpop.permute.xlu1 %9684  ;;  %v18481_v63 = vpop.permute.xlu0 %5533  ;;  %v8235_v52 = vadd.f32 %v18397_v19, %v8187_v28  ;;  %v21097_v19 = vld [vmem:[#allocation20_spill] sm:$0xff] }
0x12d0   :  { %v18523_v28 = vadd.f32 %v21097_v19, %v18391_v46 }
0x12d1   :  { %9872 = vrot.lane.b32.xlu0 %v9702_v60, %s15104_s30  ;;  %v21094_v60 = vld [vmem:[#allocation16_spill] sm:$0xff] }
0x12d2   :  { %9952 = vrot.lane.b32.xlu1 %v9703_v51, %s15104_s30  ;;  %v18500_v51 = vadd.f32 %v21094_v60, %v18391_v46  ;;  %v9646_v60 = vadd.f32 %v17952_v3, %v9598_v11  ;;  %v21100_v3 = vld [vmem:[#allocation86_spill] sm:$0xff] }
0x12d3   :  { %v8215_v9 = vpop.permute.xlu1 %8214  ;;  %v18489_v15 = vpop.permute.xlu0 %7085  ;;  %v9657_v11 = vmul.f32 %v21008_v61, %v21100_v3 }
0x12d4   :  { %v8233_v24 = vadd.f32 %v8215_v9, %v8185_v29  ;;  %21095 = vst [vmem:[#allocation25_spill] sm:$0xff] %v18500_v51 }
0x12d5   :  { %8560 = vrot.lane.b32.xlu0 %v8232_v35, %s15104_s30  ;;  %v9599_v35 = vmul.f32 %v17501_v34, %v18500_v51  ;;  %v21099_v34 = vld [vmem:[#allocation24_spill] sm:$0xff] }
0x12d6   :  { %8640 = vrot.lane.b32.xlu1 %v8233_v24, %s15104_s30 }
0x12d7   :  { %v9687_v29 = vpop.permute.xlu1 %9686  ;;  %v18506_v9 = vpop.permute.xlu0 %5613  ;;  %v9647_v55 = vadd.f32 %v17870_v7, %v9599_v35 }
0x12d8   :  { %v9705_v19 = vadd.f32 %v9687_v29, %v9657_v11  ;;  %v21103_v11 = vld [vmem:[#allocation33_spill] sm:$0xff] }
0x12d9   :  { %8720 = vrot.lane.b32.xlu0 %v8234_v41, %s15104_s30  ;;  %v9656_v41 = vmul.f32 %v17516_v62, %v21098_v5  ;;  %v9600_v5 = vmul.f32 %v17516_v62, %v18523_v28  ;;  %v21102_v62 = vld [vmem:[#allocation88_spill] sm:$0xff] }
0x12da   :  { %8800 = vrot.lane.b32.xlu1 %v8235_v52, %s15104_s30  ;;  %v18530_v52 = vadd.f32 %v21099_v34, %v18391_v46 }
0x12db   :  { %v18516_v24 = vpop.permute.xlu1 %6845  ;;  %v18518_v21 = vpop.permute.xlu0 %8557  ;;  %v9704_v51 = vadd.f32 %v9685_v31, %v9656_v41  ;;  %v9648_v31 = vadd.f32 %v17972_v56, %v9600_v5 }
0x12dc   :  { %v9601_v3 = vmul.f32 %v21008_v61, %v18530_v52 }
0x12dd   :  { %9869 = vrot.lane.b32.xlu0 %v9646_v60, %s15104_s30  ;;  %v21101_v60 = vld [vmem:[#allocation29_spill] sm:$0xff] }
0x12de   :  { %9949 = vrot.lane.b32.xlu1 %v9647_v55, %s15104_s30  ;;  %v18544_v34 = vadd.f32 %v21101_v60, %v18391_v46  ;;  %v9649_v29 = vadd.f32 %v17998_v13, %v9601_v3  ;;  %v18560_v60 = vadd.f32 %v21103_v11, %v18391_v46 }
0x12df   :  { %v18535_v7 = vpop.permute.xlu1 %5373  ;;  %v18537_v35 = vpop.permute.xlu0 %7165 }
0x12e0   :  { %v9602_v61 = vmul.f32 %v21027_v26, %v18544_v34  ;;  %v9603_v3 = vmul.f32 %v21020_v0, %v18560_v60 }
0x12e1   :  { %10032 = vrot.lane.b32.xlu0 %v9704_v51, %s15104_s30  ;;  %v9658_v51 = vmul.f32 %v21027_v26, %v21102_v62  ;;  %v10412_v26 = vmul.f32 %v17023_v48, %v17833_v10  ;;  %v21107_v10 = vld [vmem:[#allocation94_spill] sm:$0xff] }
0x12e2   :  { %10112 = vrot.lane.b32.xlu1 %v9705_v19, %s15104_s30  ;;  %v9650_v13 = vadd.f32 %v17888_v22, %v9602_v61  ;;  %v21105_v22 = vld [vmem:[#allocation142_spill] sm:$0xff] }
0x12e3   :  { %v18550_v55 = vpop.permute.xlu1 %8317  ;;  %v18552_v41 = vpop.permute.xlu0 %5693  ;;  %v9706_v56 = vadd.f32 %v18383_v44, %v9658_v51  ;;  %v21104_v44 = vld [vmem:[#allocation154_spill] sm:$0xff]  ;;  %v10413_v51 = vmul.f32 %v21056_v39, %v21105_v22 }
0x12e4   :  { %v21109_v22 = vld [vmem:[#allocation90_spill] sm:$0xff] }
0x12e5   :  { %10029 = vrot.lane.b32.xlu0 %v9648_v31, %s15104_s30 }
0x12e6   :  { %10109 = vrot.lane.b32.xlu1 %v9649_v29, %s15104_s30  ;;  %v9651_v29 = vadd.f32 %v21104_v44, %v9603_v3  ;;  %v10356_v3 = vmul.f32 %v17023_v48, %v21107_v10  ;;  %v21110_v48 = vld [vmem:[#allocation144_spill] sm:$0xff]  ;;  %v21111_v10 = vld [vmem:[#allocation95_spill] sm:$0xff] }
0x12e7   :  { %v18566_v5 = vpop.permute.xlu1 %8477  ;;  %v18568_v19 = vpop.permute.xlu0 %7325 }
0x12e9   :  { %10192 = vrot.lane.b32.xlu0 %v9706_v56, %s15104_s30  ;;  %v21106_v56 = vld [vmem:[#allocation87_spill] sm:$0xff] }
0x12ea   :  { %10189 = vrot.lane.b32.xlu1 %v9650_v13, %s15104_s30  ;;  %v10357_v13 = vmul.f32 %v21056_v39, %v21106_v56 }
0x12eb   :  { %v18577_v46 = vpop.permute.xlu1 %8637  ;;  %v18579_v31 = vpop.permute.xlu0 %5853 }
0x12ed   :  { %10428 = vrot.lane.b32.xlu0 %v10412_v26, %s15104_s30 }
0x12ee   :  { %10269 = vrot.lane.b32.xlu1 %v9651_v29, %s15104_s30  ;;  %v21108_v29 = vld [vmem:[#allocation150_spill] sm:$0xff] }
0x12ef   :  { %v18586_v11 = vpop.permute.xlu1 %7245  ;;  %v5297_v61 = vpop.permute.xlu0 %5296  ;;  %v10415_v39 = vmul.f32 %v21061_v50, %v21108_v29 }
0x12f0   :  { %14191 = vmatpush3.xpose.msk.msra.mxu0 %vm524_vm2, %v5297_v61  ;;  %v10414_v61 = vmul.f32 %v21057_v8, %v21110_v48  ;;  %v21114_v48 = vld [vmem:[#allocation17_spill] sm:$0xff] }
0x12f1   :  { %10430 = vrot.lane.b32.xlu0 %v10413_v51, %s15104_s30  ;;  %14200 = vmatprep.subr.mxu0 %v20920_v16  ;;  %v9659_v51 = vmul.f32 %v21020_v0, %v21109_v22  ;;  %v10358_v0 = vmul.f32 %v21057_v8, %v21111_v10  ;;  %v21113_v8 = vld [vmem:[#allocation47_spill] sm:$0xff] }
0x12f2   :  { %10374 = vrot.lane.b32.xlu1 %v10357_v13, %s15104_s30 }
0x12f3   :  { %v18596_v26 = vpop.permute.xlu1 %5773  ;;  %14193 = vmatmul.mubr.msk.f32.vlgmr.msra.gmra.mxu0 %vm524_vm2, %v18355_v45  ;;  %v18600_v44 = vpop.permute.xlu0 %6768  ;;  %v9707_v13 = vadd.f32 %v18432_v23, %v9659_v51  ;;  %v10416_v51 = vmul.f32 %v21062_v37, %v21113_v8 }
0x12f4   :  { %14202 = vmatprep.mubr.msk.f32.mxu0 %vm20808_vm3, %v20920_v16 }
0x12f5   :  { %10372 = vrot.lane.b32.xlu0 %v10356_v3, %s15104_s30 }
0x12f6   :  { %10434 = vrot.lane.b32.xlu1 %v10415_v39, %s15104_s30  ;;  %v21112_v39 = vld [vmem:[#allocation89_spill] sm:$0xff] }
0x12f7   :  { %v18612_v56 = vpop.permute.xlu1 %8717  ;;  %v5457_v45 = vpop.permute.xlu0 %5456  ;;  %v10359_v23 = vmul.f32 %v21061_v50, %v21112_v39 }
0x12f8   :  { %14201 = vmatpush3.xpose.msk.msra.mxu0 %vm524_vm2, %v5457_v45  ;;  %v21115_v45 = vld [vmem:[#allocation98_spill] sm:$0xff] }
0x12f9   :  { %10432 = vrot.lane.b32.xlu0 %v10414_v61, %s15104_s30  ;;  %14210 = vmatprep.subr.mxu0 %v20920_v16  ;;  %v10417_v61 = vmul.f32 %v21066_v58, %v21114_v48 }
0x12fa   :  { %10272 = vrot.lane.b32.xlu1 %v9707_v13, %s15104_s30 }
0x12fb   :  { %v5377_v3 = vpop.permute.xlu1 %5376  ;;  %14203 = vmatmul.mubr.msk.f32.vlgmr.msra.gmra.mxu0 %vm524_vm2, %v18441_v57  ;;  %v18623_v29 = vpop.permute.xlu0 %6928 }
0x12fc   :  { %14196 = vmatpush3.xpose.msk.msra.mxu1 %vm524_vm2, %v5377_v3  ;;  %14212 = vmatprep.mubr.msk.f32.mxu0 %vm20808_vm3, %v20920_v16 }
0x12fd   :  { %10376 = vrot.lane.b32.xlu0 %v10358_v0, %s15104_s30  ;;  %14205 = vmatprep.subr.mxu1 %v20920_v16  ;;  %v21116_v0 = vld [vmem:[#allocation101_spill] sm:$0xff] }
0x12fe   :  { %10378 = vrot.lane.b32.xlu1 %v10359_v23, %s15104_s30  ;;  %v10361_v3 = vmul.f32 %v21066_v58, %v21116_v0  ;;  %v21118_v23 = vld [vmem:[#allocation145_spill] sm:$0xff] }
0x12ff   :  { %14198 = vmatmul.mubr.msk.f32.vlgmr.msra.gmra.mxu1 %vm524_vm2, %v18535_v7  ;;  %v18637_v57 = vpop.permute.xlu1 %6848  ;;  %v5537_v50 = vpop.permute.xlu0 %5536  ;;  %v10360_v7 = vmul.f32 %v21062_v37, %v21115_v45  ;;  %v21117_v37 = vld [vmem:[#allocation140_spill] sm:$0xff]  ;;  %v10419_v8 = vmul.f32 %v17404_v32, %v21118_v23 }
0x1300   :  { %14206 = vmatpush3.xpose.msk.msra.mxu1 %vm524_vm2, %v5537_v50  ;;  %14207 = vmatprep.mubr.msk.f32.mxu1 %vm20808_vm3, %v20920_v16  ;;  %v10418_v39 = vmul.f32 %v21067_v38, %v21117_v37  ;;  %v21124_v37 = vld [vmem:[#allocation10_spill] sm:$0xff] }
0x1301   :  { %10436 = vrot.lane.b32.xlu0 %v10416_v51, %s15104_s30  ;;  %14215 = vmatprep.subr.mxu1 %v20920_v16  ;;  %v21119_v51 = vld [vmem:[#allocation92_spill] sm:$0xff] }
0x1302   :  { %10438 = vrot.lane.b32.xlu1 %v10417_v61, %s15104_s30  ;;  %v10362_v50 = vmul.f32 %v21067_v38, %v21119_v51  ;;  %v21120_v61 = vld [vmem:[#allocation149_spill] sm:$0xff]  ;;  %v21122_v38 = vld [vmem:[#allocation147_spill] sm:$0xff] }
0x1303   :  { %v5617_v13 = vpop.permute.xlu1 %5616  ;;  %14208 = vmatmul.mubr.msk.f32.vlgmr.msra.gmra.mxu1 %vm524_vm2, %v18481_v63  ;;  %v18651_v10 = vpop.permute.xlu0 %7008  ;;  %v5988_v45 = vmul.f32 %v21120_v61, %v21030_v59 }
0x1304   :  { %14211 = vmatpush3.xpose.msk.msra.mxu0 %vm524_vm2, %v5617_v13  ;;  %14217 = vmatprep.mubr.msk.f32.mxu1 %vm20808_vm3, %v20920_v16 }
0x1305   :  { %10380 = vrot.lane.b32.xlu0 %v10360_v7, %s15104_s30  ;;  %14220 = vmatprep.subr.mxu0 %v20920_v16  ;;  %v21121_v7 = vld [vmem:[#allocation102_spill] sm:$0xff]  ;;  %v6036_v0 = vadd.f32 %v21122_v38, %v5988_v45  ;;  %v21130_v45 = vld [vmem:[#allocation143_spill] sm:$0xff] }
0x1306   :  { %10382 = vrot.lane.b32.xlu1 %v10361_v3, %s15104_s30  ;;  %v10363_v13 = vmul.f32 %v17404_v32, %v21121_v7 }
0x1307   :  { %v18663_v63 = vpop.permute.xlu1 %7088  ;;  %14213 = vmatmul.mubr.msk.f32.vlgmr.msra.gmra.mxu0 %vm524_vm2, %v18506_v9  ;;  %v5697_v58 = vpop.permute.xlu0 %5696 }
0x1308   :  { %14216 = vmatpush3.xpose.msk.msra.mxu1 %vm524_vm2, %v5697_v58  ;;  %14222 = vmatprep.mubr.msk.f32.mxu0 %vm20808_vm3, %v20920_v16  ;;  %v21125_v58 = vld [vmem:[#allocation23_spill] sm:$0xff] }
0x1309   :  { %10440 = vrot.lane.b32.xlu0 %v10418_v39, %s15104_s30  ;;  %14225 = vmatprep.subr.mxu1 %v20920_v16  ;;  %v5989_v39 = vmul.f32 %v21124_v37, %v21037_v6  ;;  %v5990_v23 = vmul.f32 %v21125_v58, %v21035_v33  ;;  %v21129_v6 = vld [vmem:[#allocation123_spill] sm:$0xff]  ;;  %v5934_v7 = vmul.f32 %v21125_v58, %v21130_v45  ;;  %v21136_v45 = vld [vmem:[#allocation129_spill] sm:$0xff] }
0x130a   :  { %10442 = vrot.lane.b32.xlu1 %v10419_v8, %s15104_s30  ;;  %v21126_v8 = vld [vmem:[#allocation106_spill] sm:$0xff]  ;;  %v5933_v33 = vmul.f32 %v21124_v37, %v21129_v6  ;;  %v21132_v37 = vld [vmem:[#allocation116_spill] sm:$0xff]  ;;  %v21135_v6 = vld [vmem:[#allocation121_spill] sm:$0xff] }
0x130b   :  { %v5777_v48 = vpop.permute.xlu1 %5776  ;;  %14218 = vmatmul.mubr.msk.f32.vlgmr.msra.gmra.mxu1 %vm524_vm2, %v18552_v41  ;;  %v18679_v9 = vpop.permute.xlu0 %7168  ;;  %v21123_v41 = vld [vmem:[#allocation135_spill] sm:$0xff] }
0x130c   :  { %14221 = vmatpush3.xpose.msk.msra.mxu0 %vm524_vm2, %v5777_v48  ;;  %14227 = vmatprep.mubr.msk.f32.mxu1 %vm20808_vm3, %v20920_v16  ;;  %v5932_v3 = vmul.f32 %v21120_v61, %v21123_v41  ;;  %v21128_v48 = vld [vmem:[#allocation18_spill] sm:$0xff]  ;;  %v5992_v41 = vmul.f32 %v18215_v49, %v21042_v14  ;;  %v21133_v14 = vld [vmem:[#allocation151_spill] sm:$0xff] }
0x130d   :  { %10384 = vrot.lane.b32.xlu0 %v10362_v50, %s15104_s30  ;;  %14230 = vmatprep.subr.mxu0 %v20920_v16  ;;  %v21127_v50 = vld [vmem:[#allocation153_spill] sm:$0xff]  ;;  %v6038_v61 = vadd.f32 %v21128_v48, %v5990_v23  ;;  %v5994_v48 = vmul.f32 %v18291_v40, %v21051_v1  ;;  %v21138_v1 = vld [vmem:[#allocation12_spill] sm:$0xff] }
0x130e   :  { %10386 = vrot.lane.b32.xlu1 %v10363_v13, %s15104_s30  ;;  %v5980_v51 = vadd.f32 %v21126_v8, %v5932_v3  ;;  %v21131_v3 = vld [vmem:[#allocation114_spill] sm:$0xff]  ;;  %v5935_v8 = vmul.f32 %v18158_v42, %v21133_v14 }
0x130f   :  { %v18694_v59 = vpop.permute.xlu1 %8797  ;;  %14223 = vmatmul.mubr.msk.f32.vlgmr.msra.gmra.mxu0 %vm524_vm2, %v18596_v26  ;;  %v5857_v32 = vpop.permute.xlu0 %5856  ;;  %v6037_v26 = vadd.f32 %v21127_v50, %v5989_v39  ;;  %v5982_v39 = vadd.f32 %v21132_v37, %v5934_v7 }
0x1310   :  { %14226 = vmatpush3.xpose.msk.msra.mxu1 %vm524_vm2, %v5857_v32  ;;  %14231 = vmatpush3.xpose.msk.msra.mxu0 %vm524_vm2, %v6036_v0  ;;  %v5991_v0 = vmul.f32 %v18158_v42, %v21039_v43  ;;  %v5981_v32 = vadd.f32 %v21131_v3, %v5933_v33  ;;  %v6040_v43 = vadd.f32 %v18202_v4, %v5992_v41 }
0x1311   :  { %14232 = vmatprep.mubr.msk.f32.mxu0 %vm20808_vm3, %v20920_v16  ;;  %14235 = vmatprep.subr.mxu1 %v20920_v16  ;;  %v5993_v4 = vmul.f32 %v18244_v30, %v21044_v2  ;;  %v5983_v33 = vadd.f32 %v21135_v6, %v5935_v8  ;;  %v5937_v3 = vmul.f32 %v18244_v30, %v21138_v1  ;;  %v21142_v8 = vld [vmem:[#allocation137_spill] sm:$0xff]  ;;  %v21145_v6 = vld [vmem:[#allocation51_spill] sm:$0xff]  ;;  %v21147_v1 = vld [vmem:[#allocation112_spill] sm:$0xff] }
0x1312   :  { %14240 = vmatprep.subr.mxu0 %v20920_v16 }
0x1313   :  { %v18715_v13 = vpop.permute.xlu1 %7248  ;;  %14228 = vmatmul.mubr.msk.f32.vlgmr.msra.gmra.mxu1 %vm524_vm2, %v18579_v31  ;;  %14233 = vmatmul.mubr.msk.f32.vlgmr.msra.gmra.mxu0 %vm524_vm2, %v5980_v51  ;;  %v18720_v38 = vpop.permute.xlu0 %8900  ;;  %v6039_v31 = vadd.f32 %v18164_v47, %v5991_v0  ;;  %v21134_v51 = vld [vmem:[#allocation19_spill] sm:$0xff]  ;;  %v6041_v2 = vadd.f32 %v18251_v54, %v5993_v4  ;;  %v21141_v54 = vld [vmem:[#allocation110_spill] sm:$0xff] }
0x1314   :  { %14236 = vmatpush3.xpose.msk.msra.mxu1 %vm524_vm2, %v6037_v26  ;;  %14241 = vmatpush3.xpose.msk.msra.mxu0 %vm524_vm2, %v6038_v61  ;;  %v5936_v50 = vmul.f32 %v18215_v49, %v21134_v51  ;;  %v21137_v0 = vld [vmem:[#allocation111_spill] sm:$0xff]  ;;  %v5985_v51 = vadd.f32 %v21142_v8, %v5937_v3  ;;  %v21151_v8 = vld [vmem:[#allocation138_spill] sm:$0xff] }
0x1315   :  { %14237 = vmatprep.mubr.msk.f32.mxu1 %vm20808_vm3, %v20920_v16  ;;  %14242 = vmatprep.mubr.msk.f32.mxu0 %vm20808_vm3, %v20920_v16  ;;  %v6042_v41 = vadd.f32 %v21137_v0, %v5994_v48  ;;  %v21144_v48 = vld [vmem:[#allocation15_spill] sm:$0xff] }
0x1316   :  { %v18736_v23 = vpop.f32.mrf.mxu0  ;;  %14245 = vmatprep.subr.mxu1 %v20920_v16  ;;  %14250 = vmatprep.subr.mxu0 %v20920_v16  ;;  %v5984_v7 = vadd.f32 %v21136_v45, %v5936_v50  ;;  %v21143_v50 = vld [vmem:[#allocation139_spill] sm:$0xff] }
0x1317   :  { %v18744_v26 = vpop.permute.xlu1 %8902  ;;  %14238 = vmatmul.mubr.msk.f32.vlgmr.msra.gmra.mxu1 %vm524_vm2, %v5981_v32  ;;  %14243 = vmatmul.mubr.msk.f32.vlgmr.msra.gmra.mxu0 %vm524_vm2, %v5982_v39  ;;  %v18748_v47 = vpop.permute.xlu0 %8960  ;;  %v21139_v32 = vld [vmem:[#allocation128_spill] sm:$0xff] }
0x1318   :  { %v14154_v61 = vpop.f32.mrf.mxu0  ;;  %14246 = vmatpush3.xpose.msk.msra.mxu1 %vm524_vm2, %v6039_v31  ;;  %14251 = vmatpush3.xpose.msk.msra.mxu0 %vm524_vm2, %v6040_v43  ;;  %v5938_v37 = vmul.f32 %v18291_v40, %v21139_v32  ;;  %v21140_v31 = vld [vmem:[#allocation72_spill] sm:$0xff] }
0x1319   :  { %14247 = vmatprep.mubr.msk.f32.mxu1 %vm20808_vm3, %v20920_v16  ;;  %14252 = vmatprep.mubr.msk.f32.mxu0 %vm20808_vm3, %v20920_v16  ;;  %v5995_v43 = vmul.f32 %v21141_v54, %v21140_v31 }
0x131a   :  { %14255 = vmatprep.subr.mxu1 %v20920_v16  ;;  %14260 = vmatprep.subr.mxu0 %v20920_v16  ;;  %v5986_v4 = vadd.f32 %v21143_v50, %v5938_v37  ;;  %v21148_v37 = vld [vmem:[#allocation119_spill] sm:$0xff] }
0x131b   :  { %14248 = vmatmul.mubr.msk.f32.vlgmr.msra.gmra.mxu1 %vm524_vm2, %v5983_v33  ;;  %14253 = vmatmul.mubr.msk.f32.vlgmr.msra.gmra.mxu0 %vm524_vm2, %v5984_v7  ;;  %v18772_v39 = vpop.permute.xlu0 %8904  ;;  %v6043_v61 = vadd.f32 %v21144_v48, %v5995_v43  ;;  %v5939_v33 = vmul.f32 %v21141_v54, %v21145_v6  ;;  %v21152_v50 = vld [vmem:[#allocation59_spill] sm:$0xff]  ;;  %v7462_v48 = vmul.f32 %v21125_v58, %v18445_v17  ;;  %v21154_v6 = vld [vmem:[#allocation73_spill] sm:$0xff]  ;;  %v21156_v17 = vld [vmem:[#allocation126_spill] sm:$0xff] }
0x131c   :  { %v18776_v14 = vpop.permute.xlu1 %8962  ;;  %14256 = vmatpush3.xpose.msk.msra.mxu1 %vm524_vm2, %v6041_v2  ;;  %14261 = vmatpush3.xpose.msk.msra.mxu0 %vm524_vm2, %v6042_v41  ;;  %v21146_v2 = vld [vmem:[#allocation146_spill] sm:$0xff] }
0x131d   :  { %14257 = vmatprep.mubr.msk.f32.mxu1 %vm20808_vm3, %v20920_v16  ;;  %14262 = vmatprep.mubr.msk.f32.mxu0 %vm20808_vm3, %v20920_v16  ;;  %v5987_v0 = vadd.f32 %v21146_v2, %v5939_v33  ;;  %v21155_v2 = vld [vmem:[#allocation105_spill] sm:$0xff] }
0x131e   :  { %14265 = vmatprep.subr.mxu1 %v20920_v16  ;;  %14270 = vmatprep.subr.mxu0 %v20920_v16 }
0x131f   :  { %14258 = vmatmul.mubr.msk.f32.vlgmr.msra.gmra.mxu1 %vm524_vm2, %v5985_v51  ;;  %14263 = vmatmul.mubr.msk.f32.vlgmr.msra.gmra.mxu0 %vm524_vm2, %v5986_v4  ;;  %v18793_v45 = vpop.permute.xlu0 %8964 }
0x1320   :  { %v18795_v7 = vpop.permute.xlu1 %8906  ;;  %14266 = vmatpush3.xpose.msk.msra.mxu1 %vm524_vm2, %v6043_v61  ;;  %14271 = vmatpush3.xpose.msk.msra.mxu0 %vm524_vm2, %v18600_v44 }
0x1321   :  { %14267 = vmatprep.mubr.msk.f32.mxu1 %vm20808_vm3, %v20920_v16  ;;  %14272 = vmatprep.mubr.msk.f32.mxu0 %vm20808_vm3, %v20920_v16 }
0x1322   :  { %v18805_v41 = vpop.f32.mrf.mxu0  ;;  %14275 = vmatprep.subr.mxu1 %v20920_v16  ;;  %14280 = vmatprep.subr.mxu0 %v20920_v16 }
0x1323   :  { %14268 = vmatmul.mubr.msk.f32.vlgmr.msra.gmra.mxu1 %vm524_vm2, %v5987_v0  ;;  %14273 = vmatmul.mubr.msk.f32.vlgmr.msra.gmra.mxu0 %vm524_vm2, %v21147_v1  ;;  %v18812_v44 = vpop.permute.xlu0 %8908  ;;  %v7510_v0 = vadd.f32 %v21155_v2, %v7462_v48 }
0x1324   :  { %v14159_v3 = vpop.f32.mrf.mxu0  ;;  %v18814_v32 = vpop.permute.xlu1 %8966  ;;  %14276 = vmatpush3.xpose.msk.msra.mxu1 %vm524_vm2, %v18637_v57  ;;  %14281 = vmatpush3.xpose.msk.msra.mxu0 %vm524_vm2, %v18623_v29  ;;  %v18853_v29 = vld [vmem:[%s20640_s16] sm:$0xff] }
0x1325   :  { %14277 = vmatprep.mubr.msk.f32.mxu1 %vm20808_vm3, %v20920_v16  ;;  %14282 = vmatprep.mubr.msk.f32.mxu0 %vm20808_vm3, %v20920_v16  ;;  %v7404_v51 = vmul.f32 %v18853_v29, %v21151_v8  ;;  %v18905_v3 = vld [vmem:[%s20640_s16 + $0x10] sm:$0xff] }
0x1326   :  { %14285 = vmatprep.subr.mxu1 %v20920_v16  ;;  %14290 = vmatprep.subr.mxu0 %v20920_v16 }
0x1327   :  { %14278 = vmatmul.mubr.msk.f32.vlgmr.msra.gmra.mxu1 %vm524_vm2, %v18516_v24  ;;  %14283 = vmatmul.mubr.msk.f32.vlgmr.msra.gmra.mxu0 %vm524_vm2, %v21148_v37  ;;  %v18830_v57 = vpop.permute.xlu0 %8968  ;;  %v21157_v37 = vld [vmem:[#allocation148_spill] sm:$0xff] }
0x1328   :  { %v18832_v31 = vpop.permute.xlu1 %8910  ;;  %14286 = vmatpush3.xpose.msk.msra.mxu1 %vm524_vm2, %v18651_v10  ;;  %14291 = vmatpush3.xpose.msk.msra.mxu0 %vm524_vm2, %v18663_v63  ;;  %v21149_v10 = vld [vmem:[#allocation99_spill] sm:$0xff] }
0x1329   :  { %14287 = vmatprep.mubr.msk.f32.mxu1 %vm20808_vm3, %v20920_v16  ;;  %14292 = vmatprep.mubr.msk.f32.mxu0 %vm20808_vm3, %v20920_v16  ;;  %v7460_v63 = vmul.f32 %v18853_v29, %v21149_v10  ;;  %v7406_v10 = vmul.f32 %v18905_v3, %v21157_v37 }
0x132a   :  { %14295 = vmatprep.subr.mxu1 %v20920_v16  ;;  %14300 = vmatprep.subr.mxu0 %v20920_v16 }
0x132b   :  { %14288 = vmatmul.mubr.msk.f32.vlgmr.msra.gmra.mxu1 %vm524_vm2, %v18465_v36  ;;  %14293 = vmatmul.mubr.msk.f32.vlgmr.msra.gmra.mxu0 %vm524_vm2, %v18489_v15  ;;  %v18848_v24 = vpop.permute.xlu0 %8912  ;;  %v21150_v15 = vld [vmem:[#allocation152_spill] sm:$0xff] }
0x132c   :  { %v18857_v43 = vpop.permute.xlu1 %8970  ;;  %14296 = vmatpush3.xpose.msk.msra.mxu1 %vm524_vm2, %v18679_v9  ;;  %14301 = vmatpush3.xpose.msk.msra.mxu0 %vm524_vm2, %v18715_v13  ;;  %v7508_v36 = vadd.f32 %v21150_v15, %v7460_v63  ;;  %v18879_v13 = vld [vmem:[%s20640_s16 + $0x8] sm:$0xff]  ;;  %v7463_v15 = vmul.f32 %v18158_v42, %v18452_v12 }
0x132d   :  { %14297 = vmatprep.mubr.msk.f32.mxu1 %vm20808_vm3, %v20920_v16  ;;  %14302 = vmatprep.mubr.msk.f32.mxu0 %vm20808_vm3, %v20920_v16  ;;  %v7461_v4 = vmul.f32 %v18879_v13, %v21152_v50  ;;  %v7405_v58 = vmul.f32 %v18879_v13, %v21156_v17  ;;  %v21160_v42 = vld [vmem:[#allocation11_spill] sm:$0xff]  ;;  %v7466_v17 = vmul.f32 %v18291_v40, %v21093_v18 }
0x132e   :  { %14305 = vmatprep.subr.mxu1 %v20920_v16  ;;  %14310 = vmatprep.subr.mxu0 %v20920_v16  ;;  %v7511_v12 = vadd.f32 %v21160_v42, %v7463_v15  ;;  %v21169_v42 = vld [vmem:[#allocation26_spill] sm:$0xff] }
0x132f   :  { %14298 = vmatmul.mubr.msk.f32.vlgmr.msra.gmra.mxu1 %vm524_vm2, %v18537_v35  ;;  %14303 = vmatmul.mubr.msk.f32.vlgmr.msra.gmra.mxu0 %vm524_vm2, %v18586_v11  ;;  %v7329_v9 = vpop.permute.xlu0 %7328  ;;  %v21153_v35 = vld [vmem:[#allocation104_spill] sm:$0xff]  ;;  %v7509_v33 = vadd.f32 %v21154_v6, %v7461_v4 }
0x1330   :  { %v18885_v61 = vpop.permute.xlu1 %8914  ;;  %14306 = vmatpush3.xpose.msk.msra.mxu1 %vm524_vm2, %v7329_v9  ;;  %14311 = vmatpush3.xpose.msk.msra.mxu0 %vm524_vm2, %v7508_v36  ;;  %v7452_v11 = vadd.f32 %v21153_v35, %v7404_v51  ;;  %v7464_v36 = vmul.f32 %v18215_v49, %v18469_v27  ;;  %v21158_v9 = vld [vmem:[#allocation109_spill] sm:$0xff] }
0x1331   :  { %14307 = vmatprep.mubr.msk.f32.mxu1 %vm20808_vm3, %v20920_v16  ;;  %14312 = vmatprep.mubr.msk.f32.mxu0 %vm20808_vm3, %v20920_v16  ;;  %v7453_v50 = vadd.f32 %v21158_v9, %v7405_v58  ;;  %v21161_v27 = vld [vmem:[#allocation21_spill] sm:$0xff]  ;;  %v7465_v58 = vmul.f32 %v18244_v30, %v18476_v53  ;;  %v21167_v9 = vld [vmem:[#allocation131_spill] sm:$0xff] }
0x1332   :  { %v18896_v1 = vpop.f32.mrf.mxu0  ;;  %14315 = vmatprep.subr.mxu1 %v20920_v16  ;;  %14320 = vmatprep.subr.mxu0 %v20920_v16  ;;  %v7512_v48 = vadd.f32 %v21161_v27, %v7464_v36  ;;  %v18935_v35 = vld [vmem:[%s20640_s16 + $0x18] sm:$0xff]  ;;  %v21165_v36 = vld [vmem:[#allocation124_spill] sm:$0xff] }
0x1333   :  { %14308 = vmatmul.mubr.msk.f32.vlgmr.msra.gmra.mxu1 %vm524_vm2, %v18568_v19  ;;  %14313 = vmatmul.mubr.msk.f32.vlgmr.msra.gmra.mxu0 %vm524_vm2, %v7452_v11  ;;  %v18912_v63 = vpop.permute.xlu0 %9709  ;;  %v21159_v19 = vld [vmem:[#allocation115_spill] sm:$0xff]  ;;  %v21162_v11 = vld [vmem:[#allocation93_spill] sm:$0xff] }
0x1334   :  { %v14164_v8 = vpop.f32.mrf.mxu0  ;;  %v18918_v51 = vpop.permute.xlu1 %9789  ;;  %14316 = vmatpush3.xpose.msk.msra.mxu1 %vm524_vm2, %v7509_v33  ;;  %14321 = vmatpush3.xpose.msk.msra.mxu0 %vm524_vm2, %v7510_v0  ;;  %v7454_v4 = vadd.f32 %v21159_v19, %v7406_v10  ;;  %v7407_v6 = vmul.f32 %v18935_v35, %v21162_v11  ;;  %v21163_v33 = vld [vmem:[#allocation107_spill] sm:$0xff]  ;;  %v21164_v10 = vld [vmem:[#allocation118_spill] sm:$0xff] }
0x1335   :  { %14317 = vmatprep.mubr.msk.f32.mxu1 %vm20808_vm3, %v20920_v16  ;;  %14322 = vmatprep.mubr.msk.f32.mxu0 %vm20808_vm3, %v20920_v16  ;;  %v7408_v2 = vmul.f32 %v18215_v49, %v21163_v33  ;;  %v21166_v8 = vld [vmem:[#allocation97_spill] sm:$0xff]  ;;  %v21168_v19 = vld [vmem:[#allocation22_spill] sm:$0xff] }
0x1336   :  { %14325 = vmatprep.subr.mxu1 %v20920_v16  ;;  %14330 = vmatprep.subr.mxu0 %v20920_v16  ;;  %v7455_v15 = vadd.f32 %v21164_v10, %v7407_v6  ;;  %v7513_v18 = vadd.f32 %v21166_v8, %v7465_v58 }
0x1337   :  { %14318 = vmatmul.mubr.msk.f32.vlgmr.msra.gmra.mxu1 %vm524_vm2, %v7453_v50  ;;  %14323 = vmatmul.mubr.msk.f32.vlgmr.msra.gmra.mxu0 %vm524_vm2, %v7454_v4  ;;  %v8241_v0 = vpop.permute.xlu0 %8240  ;;  %v7456_v49 = vadd.f32 %v21165_v36, %v7408_v2  ;;  %v7514_v50 = vadd.f32 %v21167_v9, %v7466_v17  ;;  %v7409_v4 = vmul.f32 %v18244_v30, %v21168_v19  ;;  %v21170_v30 = vld [vmem:[#allocation132_spill] sm:$0xff]  ;;  %v21171_v2 = vld [vmem:[#allocation134_spill] sm:$0xff] }
0x1338   :  { %v8321_v37 = vpop.permute.xlu1 %8320  ;;  %14326 = vmatpush3.xpose.msk.msra.mxu1 %vm524_vm2, %v7511_v12  ;;  %14331 = vmatpush3.xpose.msk.msra.mxu0 %vm524_vm2, %v7512_v48  ;;  %v7410_v12 = vmul.f32 %v18291_v40, %v21169_v42  ;;  %v7467_v48 = vmul.f32 %v21141_v54, %v21096_v25  ;;  %v21172_v17 = vld [vmem:[#allocation100_spill] sm:$0xff]  ;;  %v21173_v25 = vld [vmem:[#allocation31_spill] sm:$0xff]  ;;  %v21177_v42 = vld [vmem:[#allocation77_spill] sm:$0xff] }
0x1339   :  { %14327 = vmatprep.mubr.msk.f32.mxu1 %vm20808_vm3, %v20920_v16  ;;  %14332 = vmatprep.mubr.msk.f32.mxu0 %vm20808_vm3, %v20920_v16  ;;  %v7457_v33 = vadd.f32 %v21170_v30, %v7409_v4  ;;  %v7411_v10 = vmul.f32 %v21141_v54, %v21173_v25  ;;  %v21175_v54 = vld [vmem:[#allocation122_spill] sm:$0xff] }
0x133a   :  { %v18957_v53 = vpop.f32.mrf.mxu0  ;;  %14335 = vmatprep.subr.mxu1 %v20920_v16  ;;  %14340 = vmatprep.subr.mxu0 %v20920_v16  ;;  %v7458_v40 = vadd.f32 %v21171_v2, %v7410_v12  ;;  %v7515_v58 = vadd.f32 %v21172_v17, %v7467_v48  ;;  %v8932_v12 = vmul.f32 %v18853_v29, %v21177_v42 }
0x133b   :  { %14328 = vmatmul.mubr.msk.f32.vlgmr.msra.gmra.mxu1 %vm524_vm2, %v7455_v15  ;;  %14333 = vmatmul.mubr.msk.f32.vlgmr.msra.gmra.mxu0 %vm524_vm2, %v7456_v49  ;;  %v18967_v27 = vpop.permute.xlu0 %9712  ;;  %v21174_v49 = vld [vmem:[#allocation141_spill] sm:$0xff] }
0x133c   :  { %v14169_v11 = vpop.f32.mrf.mxu0  ;;  %v18971_v6 = vpop.permute.xlu1 %9792  ;;  %14336 = vmatpush3.xpose.msk.msra.mxu1 %vm524_vm2, %v7513_v18  ;;  %14341 = vmatpush3.xpose.msk.msra.mxu0 %vm524_vm2, %v7514_v50  ;;  %v7459_v8 = vadd.f32 %v21174_v49, %v7411_v10  ;;  %v21176_v50 = vld [vmem:[#allocation43_spill] sm:$0xff] }
0x133d   :  { %14337 = vmatprep.mubr.msk.f32.mxu1 %vm20808_vm3, %v20920_v16  ;;  %14342 = vmatprep.mubr.msk.f32.mxu0 %vm20808_vm3, %v20920_v16  ;;  %v21178_v11 = vld [vmem:[#allocation32_spill] sm:$0xff] }
0x133e   :  { %14345 = vmatprep.subr.mxu1 %v20920_v16  ;;  %14350 = vmatprep.subr.mxu0 %v20920_v16 }
0x133f   :  { %14338 = vmatmul.mubr.msk.f32.vlgmr.msra.gmra.mxu1 %vm524_vm2, %v7457_v33  ;;  %14343 = vmatmul.mubr.msk.f32.vlgmr.msra.gmra.mxu0 %vm524_vm2, %v7458_v40  ;;  %v8401_v15 = vpop.permute.xlu0 %8400  ;;  %v21180_v40 = vld [vmem:[#allocation79_spill] sm:$0xff] }
0x1340   :  { %v8481_v36 = vpop.permute.xlu1 %8480  ;;  %14346 = vmatpush3.xpose.msk.msra.mxu1 %vm524_vm2, %v7515_v58  ;;  %14351 = vmatpush3.xpose.msk.msra.mxu0 %vm524_vm2, %v8241_v0  ;;  %v8933_v17 = vmul.f32 %v18879_v13, %v21180_v40  ;;  %v21181_v58 = vld [vmem:[#allocation81_spill] sm:$0xff] }
0x1341   :  { %14347 = vmatprep.mubr.msk.f32.mxu1 %vm20808_vm3, %v20920_v16  ;;  %14352 = vmatprep.mubr.msk.f32.mxu0 %vm20808_vm3, %v20920_v16  ;;  %v8934_v25 = vmul.f32 %v18905_v3, %v21181_v58 }
0x1342   :  { %14355 = vmatprep.subr.mxu1 %v20920_v16  ;;  %14360 = vmatprep.subr.mxu0 %v20920_v16 }
0x1343   :  { %14348 = vmatmul.mubr.msk.f32.vlgmr.msra.gmra.mxu1 %vm524_vm2, %v7459_v8  ;;  %14353 = vmatmul.mubr.msk.f32.vlgmr.msra.gmra.mxu0 %vm524_vm2, %v21175_v54  ;;  %v19000_v18 = vpop.permute.xlu0 %9872  ;;  %v8982_v49 = vadd.f32 %v18748_v47, %v8934_v25  ;;  %v21183_v8 = vld [vmem:[#allocation30_spill] sm:$0xff] }
0x1344   :  { %v19002_v0 = vpop.permute.xlu1 %9952  ;;  %14356 = vmatpush3.xpose.msk.msra.mxu1 %vm524_vm2, %v8321_v37  ;;  %14361 = vmatpush3.xpose.msk.msra.mxu0 %vm524_vm2, %v8401_v15  ;;  %v8877_v54 = vmul.f32 %v18879_v13, %v21183_v8 }
0x1345   :  { %14357 = vmatprep.mubr.msk.f32.mxu1 %vm20808_vm3, %v20920_v16  ;;  %14362 = vmatprep.mubr.msk.f32.mxu0 %vm20808_vm3, %v20920_v16 }
0x1346   :  { %v19010_v9 = vpop.f32.mrf.mxu0  ;;  %14365 = vmatprep.subr.mxu1 %v20920_v16  ;;  %14370 = vmatprep.subr.mxu0 %v20920_v16 }
0x1347   :  { %14358 = vmatmul.mubr.msk.f32.vlgmr.msra.gmra.mxu1 %vm524_vm2, %v18550_v55  ;;  %14363 = vmatmul.mubr.msk.f32.vlgmr.msra.gmra.mxu0 %vm524_vm2, %v21176_v50  ;;  %v8561_v37 = vpop.permute.xlu0 %8560 }
0x1348   :  { %v14174_v19 = vpop.f32.mrf.mxu0  ;;  %v8641_v4 = vpop.permute.xlu1 %8640  ;;  %14366 = vmatpush3.xpose.msk.msra.mxu1 %vm524_vm2, %v8481_v36  ;;  %14371 = vmatpush3.xpose.msk.msra.mxu0 %vm524_vm2, %v8561_v37  ;;  %v21184_v37 = vld [vmem:[#allocation83_spill] sm:$0xff] }
0x1349   :  { %14367 = vmatprep.mubr.msk.f32.mxu1 %vm20808_vm3, %v20920_v16  ;;  %14372 = vmatprep.mubr.msk.f32.mxu0 %vm20808_vm3, %v20920_v16  ;;  %v8935_v47 = vmul.f32 %v18935_v35, %v21184_v37  ;;  %v19082_v19 = vld [vmem:[%s20640_s16 + $0x20] sm:$0xff]  ;;  %v21190_v37 = vld [vmem:[#allocation103_spill] sm:$0xff] }
0x134a   :  { %14375 = vmatprep.subr.mxu1 %v20920_v16  ;;  %14380 = vmatprep.subr.mxu0 %v20920_v16 }
0x134b   :  { %14368 = vmatmul.mubr.msk.f32.vlgmr.msra.gmra.mxu1 %vm524_vm2, %v18566_v5  ;;  %14373 = vmatmul.mubr.msk.f32.vlgmr.msra.gmra.mxu0 %vm524_vm2, %v18518_v21  ;;  %v8721_v55 = vpop.permute.xlu0 %8720  ;;  %v8980_v5 = vadd.f32 %v21178_v11, %v8932_v12  ;;  %v21179_v21 = vld [vmem:[#allocation28_spill] sm:$0xff]  ;;  %v8983_v12 = vadd.f32 %v18776_v14, %v8935_v47  ;;  %v21186_v11 = vld [vmem:[#allocation25_spill] sm:$0xff]  ;;  %v19111_v14 = vld [vmem:[%s20640_s16 + $0x28] sm:$0xff]  ;;  %v10405_v47 = vmul.f32 %v18879_v13, %v21190_v37 }
0x134c   :  { %v8801_v48 = vpop.permute.xlu1 %8800  ;;  %14376 = vmatpush3.xpose.msk.msra.mxu1 %vm524_vm2, %v8641_v4  ;;  %14381 = vmatpush3.xpose.msk.msra.mxu0 %vm524_vm2, %v8721_v55  ;;  %v8876_v33 = vmul.f32 %v18853_v29, %v21179_v21  ;;  %v21185_v4 = vld [vmem:[#allocation84_spill] sm:$0xff] }
0x134d   :  { %14377 = vmatprep.mubr.msk.f32.mxu1 %vm20808_vm3, %v20920_v16  ;;  %14382 = vmatprep.mubr.msk.f32.mxu0 %vm20808_vm3, %v20920_v16  ;;  %v8936_v55 = vmul.f32 %v19082_v19, %v21185_v4  ;;  %v21191_v4 = vld [vmem:[#allocation108_spill] sm:$0xff] }
0x134e   :  { %v19039_v30 = vpop.f32.mrf.mxu0  ;;  %14385 = vmatprep.subr.mxu1 %v20920_v16  ;;  %14390 = vmatprep.subr.mxu0 %v20920_v16 }
0x134f   :  { %14378 = vmatmul.mubr.msk.f32.vlgmr.msra.gmra.mxu1 %vm524_vm2, %v18577_v46  ;;  %14383 = vmatmul.mubr.msk.f32.vlgmr.msra.gmra.mxu0 %vm524_vm2, %v18612_v56  ;;  %v19049_v2 = vpop.permute.xlu0 %9869  ;;  %v8924_v46 = vadd.f32 %v18720_v38, %v8876_v33  ;;  %v21182_v56 = vld [vmem:[#allocation55_spill] sm:$0xff]  ;;  %v8878_v38 = vmul.f32 %v18905_v3, %v18493_v20  ;;  %v8925_v20 = vadd.f32 %v18744_v26, %v8877_v54  ;;  %v19118_v33 = vld [vmem:[%s20640_s16 + $0x30] sm:$0xff] }
0x1350   :  { %v14179_v10 = vpop.f32.mrf.mxu0  ;;  %v19055_v15 = vpop.permute.xlu1 %9949  ;;  %14386 = vmatpush3.xpose.msk.msra.mxu1 %vm524_vm2, %v8801_v48  ;;  %14391 = vmatpush3.xpose.msk.msra.mxu0 %vm524_vm2, %v8980_v5  ;;  %v8981_v36 = vadd.f32 %v21182_v56, %v8933_v17  ;;  %v8984_v48 = vadd.f32 %v18793_v45, %v8936_v55  ;;  %v8879_v5 = vmul.f32 %v18935_v35, %v21186_v11  ;;  %v21187_v45 = vld [vmem:[#allocation86_spill] sm:$0xff]  ;;  %v21189_v54 = vld [vmem:[#allocation35_spill] sm:$0xff]  ;;  %v21193_v11 = vld [vmem:[#allocation40_spill] sm:$0xff] }
0x1351   :  { %14387 = vmatprep.mubr.msk.f32.mxu1 %vm20808_vm3, %v20920_v16  ;;  %14392 = vmatprep.mubr.msk.f32.mxu0 %vm20808_vm3, %v20920_v16  ;;  %v8880_v26 = vmul.f32 %v19082_v19, %v18523_v28  ;;  %v8937_v21 = vmul.f32 %v19111_v14, %v21187_v45  ;;  %v8938_v28 = vmul.f32 %v19118_v33, %v21102_v62 }
0x1352   :  { %14395 = vmatprep.subr.mxu1 %v20920_v16  ;;  %14400 = vmatprep.subr.mxu0 %v20920_v16  ;;  %v8927_v17 = vadd.f32 %v18795_v7, %v8879_v5  ;;  %v8881_v7 = vmul.f32 %v19111_v14, %v18530_v52  ;;  %v10406_v55 = vmul.f32 %v18905_v3, %v21191_v4 }
0x1353   :  { %14388 = vmatmul.mubr.msk.f32.vlgmr.msra.gmra.mxu1 %vm524_vm2, %v18694_v59  ;;  %14393 = vmatmul.mubr.msk.f32.vlgmr.msra.gmra.mxu0 %vm524_vm2, %v8924_v46  ;;  %v19075_v50 = vpop.permute.xlu0 %10032  ;;  %v8926_v59 = vadd.f32 %v18772_v39, %v8878_v38  ;;  %v8928_v58 = vadd.f32 %v18812_v44, %v8880_v26  ;;  %v8985_v25 = vadd.f32 %v18814_v32, %v8937_v21  ;;  %v19147_v32 = vld [vmem:[%s20640_s16 + $0x38] sm:$0xff]  ;;  %s15116_s16 = smov 8  }
0x1354   :  { %v19086_v42 = vpop.permute.xlu1 %10112  ;;  %14396 = vmatpush3.xpose.msk.msra.mxu1 %vm524_vm2, %v8981_v36  ;;  %14401 = vmatpush3.xpose.msk.msra.mxu0 %vm524_vm2, %v8982_v49  ;;  %v8986_v62 = vadd.f32 %v18830_v57, %v8938_v28  ;;  %v8882_v44 = vmul.f32 %v19118_v33, %v18544_v34  ;;  %v8939_v57 = vmul.f32 %v19147_v32, %v21109_v22  ;;  %v21195_v21 = vld [vmem:[#allocation117_spill] sm:$0xff] }
0x1355   :  { %14397 = vmatprep.mubr.msk.f32.mxu1 %vm20808_vm3, %v20920_v16  ;;  %14402 = vmatprep.mubr.msk.f32.mxu0 %vm20808_vm3, %v20920_v16  ;;  %v8929_v52 = vadd.f32 %v18832_v31, %v8881_v7  ;;  %v8883_v22 = vmul.f32 %v19147_v32, %v18560_v60  ;;  %v10348_v38 = vmul.f32 %v18853_v29, %v21189_v54  ;;  %v21197_v7 = vld [vmem:[#allocation49_spill] sm:$0xff] }
0x1356   :  { %14405 = vmatprep.subr.mxu1 %v20920_v16  ;;  %14410 = vmatprep.subr.mxu0 %v20920_v16  ;;  %v8930_v34 = vadd.f32 %v18848_v24, %v8882_v44  ;;  %v8987_v49 = vadd.f32 %v18857_v43, %v8939_v57  ;;  %v10350_v5 = vmul.f32 %v18905_v3, %v21193_v11  ;;  %v21196_v3 = vld [vmem:[#allocation61_spill] sm:$0xff]  ;;  %v21198_v57 = vld [vmem:[#allocation120_spill] sm:$0xff] }
0x1357   :  { %14398 = vmatmul.mubr.msk.f32.vlgmr.msra.gmra.mxu1 %vm524_vm2, %v8925_v20  ;;  %14403 = vmatmul.mubr.msk.f32.vlgmr.msra.gmra.mxu0 %vm524_vm2, %v8926_v59  ;;  %v19106_v39 = vpop.permute.xlu0 %10029  ;;  %v8931_v43 = vadd.f32 %v18885_v61, %v8883_v22  ;;  %v10408_v28 = vmul.f32 %v19082_v19, %v21195_v21  ;;  %v10351_v44 = vmul.f32 %v18935_v35, %v21197_v7  ;;  %v21200_v22 = vld [vmem:[#allocation68_spill] sm:$0xff] }
0x1358   :  { %v19122_v40 = vpop.permute.xlu1 %10109  ;;  %14406 = vmatpush3.xpose.msk.msra.mxu1 %vm524_vm2, %v8983_v12  ;;  %14411 = vmatpush3.xpose.msk.msra.mxu0 %vm524_vm2, %v8984_v48  ;;  %v21192_v12 = vld [vmem:[#allocation37_spill] sm:$0xff] }
0x1359   :  { %14407 = vmatprep.mubr.msk.f32.mxu1 %vm20808_vm3, %v20920_v16  ;;  %14412 = vmatprep.mubr.msk.f32.mxu0 %vm20808_vm3, %v20920_v16  ;;  %v10349_v48 = vmul.f32 %v18879_v13, %v21192_v12 }
0x135a   :  { %v19134_v10 = vpop.f32.mrf.mxu0  ;;  %14415 = vmatprep.subr.mxu1 %v20920_v16  ;;  %14420 = vmatprep.subr.mxu0 %v20920_v16 }
0x135b   :  { %14408 = vmatmul.mubr.msk.f32.vlgmr.msra.gmra.mxu1 %vm524_vm2, %v8927_v17  ;;  %14413 = vmatmul.mubr.msk.f32.vlgmr.msra.gmra.mxu0 %vm524_vm2, %v8928_v58  ;;  %v10193_v46 = vpop.permute.xlu0 %10192  ;;  %v10352_v58 = vmul.f32 %v19082_v19, %v21196_v3 }
0x135c   :  { %v14184_v56 = vpop.f32.mrf.mxu0  ;;  %v10190_v36 = vpop.permute.xlu1 %10189  ;;  %14416 = vmatpush3.xpose.msk.msra.mxu1 %vm524_vm2, %v8985_v25  ;;  %14421 = vmatpush3.xpose.msk.msra.mxu0 %vm524_vm2, %v8986_v62 }
0x135d   :  { %14417 = vmatprep.mubr.msk.f32.mxu1 %vm20808_vm3, %v20920_v16  ;;  %14422 = vmatprep.mubr.msk.f32.mxu0 %vm20808_vm3, %v20920_v16  ;;  %v10409_v56 = vmul.f32 %v19111_v14, %v21198_v57 }
0x135e   :  { %14425 = vmatprep.subr.mxu1 %v20920_v16  ;;  %14430 = vmatprep.subr.mxu0 %v20920_v16 }
0x135f   :  { %14418 = vmatmul.mubr.msk.f32.vlgmr.msra.gmra.mxu1 %vm524_vm2, %v8929_v52  ;;  %14423 = vmatmul.mubr.msk.f32.vlgmr.msra.gmra.mxu0 %vm524_vm2, %v8930_v34  ;;  %v10429_v31 = vpop.permute.xlu0 %10428 }
0x1360   :  { %v10270_v24 = vpop.permute.xlu1 %10269  ;;  %14426 = vmatpush3.xpose.msk.msra.mxu1 %vm524_vm2, %v8987_v49  ;;  %14431 = vmatpush3.xpose.msk.msra.mxu0 %vm524_vm2, %v18967_v27 }
0x1361   :  { %14427 = vmatprep.mubr.msk.f32.mxu1 %vm20808_vm3, %v20920_v16  ;;  %14432 = vmatprep.mubr.msk.f32.mxu0 %vm20808_vm3, %v20920_v16 }
0x1362   :  { %14435 = vmatprep.subr.mxu1 %v20920_v16  ;;  %14440 = vmatprep.subr.mxu0 %v20920_v16 }
0x1363   :  { %14428 = vmatmul.mubr.msk.f32.vlgmr.msra.gmra.mxu1 %vm524_vm2, %v8931_v43  ;;  %14433 = vmatmul.mubr.msk.f32.vlgmr.msra.gmra.mxu0 %vm524_vm2, %v18912_v63  ;;  %v10431_v60 = vpop.permute.xlu0 %10430 }
0x1364   :  { %v10375_v8 = vpop.permute.xlu1 %10374  ;;  %14436 = vmatpush3.xpose.msk.msra.mxu1 %vm524_vm2, %v18971_v6  ;;  %14441 = vmatpush3.xpose.msk.msra.mxu0 %vm524_vm2, %v19000_v18  ;;  %v21188_v18 = vld [vmem:[#allocation96_spill] sm:$0xff] }
0x1365   :  { %14437 = vmatprep.mubr.msk.f32.mxu1 %vm20808_vm3, %v20920_v16  ;;  %14442 = vmatprep.mubr.msk.f32.mxu0 %vm20808_vm3, %v20920_v16  ;;  %v10397_v13 = vadd.f32 %v10375_v8, %v10349_v48 }
0x1366   :  { %14445 = vmatprep.subr.mxu1 %v20920_v16  ;;  %14450 = vmatprep.subr.mxu0 %v20920_v16 }
0x1367   :  { %14438 = vmatmul.mubr.msk.f32.vlgmr.msra.gmra.mxu1 %vm524_vm2, %v18918_v51  ;;  %14443 = vmatmul.mubr.msk.f32.vlgmr.msra.gmra.mxu0 %vm524_vm2, %v19049_v2  ;;  %v10373_v61 = vpop.permute.xlu0 %10372 }
0x1368   :  { %v10435_v63 = vpop.permute.xlu1 %10434  ;;  %14446 = vmatpush3.xpose.msk.msra.mxu1 %vm524_vm2, %v19002_v0  ;;  %14451 = vmatpush3.xpose.msk.msra.mxu0 %vm524_vm2, %v19075_v50  ;;  %v10404_v0 = vmul.f32 %v18853_v29, %v21188_v18  ;;  %v10396_v20 = vadd.f32 %v10373_v61, %v10348_v38  ;;  %v10453_v29 = vadd.f32 %v10431_v60, %v10405_v47  ;;  %v21203_v18 = vld [vmem:[#allocation85_spill] sm:$0xff] }
0x1369   :  { %v19197_v27 = vpop.f32.mrf.mxu1  ;;  %14447 = vmatprep.mubr.msk.f32.mxu1 %vm20808_vm3, %v20920_v16  ;;  %14452 = vmatprep.mubr.msk.f32.mxu0 %vm20808_vm3, %v20920_v16 }
0x136a   :  { %14455 = vmatprep.subr.mxu1 %v20920_v16  ;;  %14460 = vmatprep.subr.mxu0 %v20920_v16 }
0x136b   :  { %v14189_v51 = vpop.f32.mrf.mxu1  ;;  %14448 = vmatmul.mubr.msk.f32.vlgmr.msra.gmra.mxu1 %vm524_vm2, %v19055_v15  ;;  %14453 = vmatmul.mubr.msk.f32.vlgmr.msra.gmra.mxu0 %vm524_vm2, %v19106_v39  ;;  %v10433_v6 = vpop.permute.xlu0 %10432  ;;  %v10452_v15 = vadd.f32 %v10429_v31, %v10404_v0  ;;  %v21194_v39 = vld [vmem:[#allocation113_spill] sm:$0xff]  ;;  %v10353_v31 = vmul.f32 %v19111_v14, %v21200_v22  ;;  %v21202_v14 = vld [vmem:[#allocation74_spill] sm:$0xff]  ;;  %v10355_v0 = vmul.f32 %v19147_v32, %v21203_v18 }
0x136c   :  { %v10273_v2 = vpop.permute.xlu1 %10272  ;;  %14456 = vmatpush3.xpose.msk.msra.mxu1 %vm524_vm2, %v19086_v42  ;;  %14461 = vmatpush3.xpose.msk.msra.mxu0 %vm524_vm2, %v10193_v46  ;;  %v10454_v59 = vadd.f32 %v10433_v6, %v10406_v55  ;;  %v10407_v45 = vmul.f32 %v18935_v35, %v21194_v39  ;;  %v21199_v35 = vld [vmem:[#allocation127_spill] sm:$0xff]  ;;  %v10354_v6 = vmul.f32 %v19118_v33, %v21202_v14 }
0x136d   :  { %14457 = vmatprep.mubr.msk.f32.mxu1 %vm20808_vm3, %v20920_v16  ;;  %14462 = vmatprep.mubr.msk.f32.mxu0 %vm20808_vm3, %v20920_v16  ;;  %v10410_v34 = vmul.f32 %v19118_v33, %v21199_v35 }
0x136e   :  { %14465 = vmatprep.subr.mxu1 %v20920_v16  ;;  %14470 = vmatprep.subr.mxu0 %v20920_v16  ;;  %v10455_v25 = vadd.f32 %v10435_v63, %v10407_v45 }
0x136f   :  { %14458 = vmatmul.mubr.msk.f32.vlgmr.msra.gmra.mxu1 %vm524_vm2, %v19122_v40  ;;  %14463 = vmatmul.mubr.msk.f32.vlgmr.msra.gmra.mxu0 %vm524_vm2, %v10190_v36  ;;  %v10377_v50 = vpop.permute.xlu0 %10376 }
0x1370   :  { %v10379_v42 = vpop.permute.xlu1 %10378  ;;  %14466 = vmatpush3.xpose.msk.msra.mxu1 %vm524_vm2, %v10273_v2  ;;  %14471 = vmatpush3.xpose.msk.msra.mxu0 %vm524_vm2, %v10452_v15  ;;  %v10398_v17 = vadd.f32 %v10377_v50, %v10350_v5 }
0x1371   :  { %14467 = vmatprep.mubr.msk.f32.mxu1 %vm20808_vm3, %v20920_v16  ;;  %14472 = vmatprep.mubr.msk.f32.mxu0 %vm20808_vm3, %v20920_v16  ;;  %v10399_v19 = vadd.f32 %v10379_v42, %v10351_v44 }
0x1372   :  { %14475 = vmatprep.subr.mxu1 %v20920_v16  ;;  %14480 = vmatprep.subr.mxu0 %v20920_v16 }
0x1373   :  { %14468 = vmatmul.mubr.msk.f32.vlgmr.msra.gmra.mxu1 %vm524_vm2, %v10270_v24  ;;  %14473 = vmatmul.mubr.msk.f32.vlgmr.msra.gmra.mxu0 %vm524_vm2, %v10396_v20  ;;  %v10437_v26 = vpop.permute.xlu0 %10436  ;;  %v21201_v24 = vld [vmem:[#allocation136_spill] sm:$0xff] }
0x1374   :  { %v10439_v40 = vpop.permute.xlu1 %10438  ;;  %14476 = vmatpush3.xpose.msk.msra.mxu1 %vm524_vm2, %v10453_v29  ;;  %14481 = vmatpush3.xpose.msk.msra.mxu0 %vm524_vm2, %v10454_v59  ;;  %v10456_v62 = vadd.f32 %v10437_v26, %v10408_v28  ;;  %v10411_v43 = vmul.f32 %v19147_v32, %v21201_v24  ;;  %v15117_v59 = vmov 1  }
0x1375   :  { %14477 = vmatprep.mubr.msk.f32.mxu1 %vm20808_vm3, %v20920_v16  ;;  %14482 = vmatprep.mubr.msk.f32.mxu0 %vm20808_vm3, %v20920_v16  ;;  %v10457_v49 = vadd.f32 %v10439_v40, %v10409_v56 }
0x1376   :  { %14485 = vmatprep.subr.mxu1 %v20920_v16  ;;  %14490 = vmatprep.subr.mxu0 %v20920_v16 }
0x1377   :  { %14478 = vmatmul.mubr.msk.f32.vlgmr.msra.gmra.mxu1 %vm524_vm2, %v10397_v13  ;;  %14483 = vmatmul.mubr.msk.f32.vlgmr.msra.gmra.mxu0 %vm524_vm2, %v10398_v17  ;;  %v10381_v46 = vpop.permute.xlu0 %10380 }
0x1378   :  { %v10400_v36 = vadd.f32 %v10381_v46, %v10352_v58  ;;  %v10383_v52 = vpop.permute.xlu1 %10382  ;;  %14486 = vmatpush3.xpose.msk.msra.mxu1 %vm524_vm2, %v10455_v25  ;;  %14491 = vmatpush3.xpose.msk.msra.mxu0 %vm524_vm2, %v10456_v62 }
0x1379   :  { %14487 = vmatprep.mubr.msk.f32.mxu1 %vm20808_vm3, %v20920_v16  ;;  %14492 = vmatprep.mubr.msk.f32.mxu0 %vm20808_vm3, %v20920_v16  ;;  %v10401_v63 = vadd.f32 %v10383_v52, %v10353_v31 }
0x137a   :  { %14495 = vmatprep.subr.mxu1 %v20920_v16  ;;  %14500 = vmatprep.subr.mxu0 %v20920_v16 }
0x137b   :  { %14488 = vmatmul.mubr.msk.f32.vlgmr.msra.gmra.mxu1 %vm524_vm2, %v10399_v19  ;;  %14493 = vmatmul.mubr.msk.f32.vlgmr.msra.gmra.mxu0 %vm524_vm2, %v10400_v36  ;;  %v10441_v60 = vpop.permute.xlu0 %10440 }
0x137c   :  { %v10458_v8 = vadd.f32 %v10441_v60, %v10410_v34  ;;  %v10443_v61 = vpop.permute.xlu1 %10442  ;;  %14496 = vmatpush3.xpose.msk.msra.mxu1 %vm524_vm2, %v10457_v49  ;;  %14497 = vmatprep.mubr.msk.f32.mxu1 %vm20808_vm3, %v20920_v16 }
0x137d   :  { %v10459_v51 = vadd.f32 %v10443_v61, %v10411_v43  ;;  %14505 = vmatprep.subr.mxu1 %v20920_v16  ;;  %14502 = vmatprep.mubr.msk.f32.mxu0 %vm20808_vm3, %v20920_v16 }
0x137e   :  { %14501 = vmatpush3.xpose.msk.msra.mxu0 %vm524_vm2, %v10458_v8  ;;  %14826 = vset.pattern.permute.xlu1 %v15117_v59 }
0x137f   :  { %14498 = vmatmul.mubr.msk.f32.vlgmr.msra.gmra.mxu1 %vm524_vm2, %v10401_v63  ;;  %v10385_v2 = vpop.permute.xlu0 %10384 }
0x1380   :  { %v10402_v15 = vadd.f32 %v10385_v2, %v10354_v6  ;;  %v10387_v54 = vpop.permute.xlu1 %10386  ;;  %14506 = vmatpush3.xpose.msk.msra.mxu1 %vm524_vm2, %v10459_v51  ;;  %14507 = vmatprep.mubr.msk.f32.mxu1 %vm20808_vm3, %v20920_v16 }
0x1381   :  { %v10403_v38 = vadd.f32 %v10387_v54, %v10355_v0  ;;  %14554 = vmatprep.subr.mxu1 %v20920_v16 }
0x1382   :  { %14503 = vmatmul.mubr.msk.f32.vlgmr.msra.gmra.mxu0 %vm524_vm2, %v10402_v15 }
0x1383   :  { %14508 = vmatmul.mubr.msk.f32.vlgmr.msra.gmra.mxu1 %vm524_vm2, %v10403_v38 }
0x1384   :  { %14586 = vmatprep.mubr.msk.f32.mxu1 %vm20808_vm3, %v20920_v16  ;;  %vm11568_vm3 = vcmask 1044484  }
0x13b3   :  { %v5368_v33 = vpop.f32.mrf.mxu0 }
0x13b4   :  { %11076 = vrot.lane.b32.xlu1 %v5368_v33, %s15116_s16 }
0x13b5   :  { %v14194_v32 = vpop.f32.mrf.mxu0 }
0x13bb   :  { %v5528_v50 = vpop.f32.mrf.mxu0 }
0x13bc   :  { %11080 = vrot.lane.b32.xlu1 %v5528_v50, %s15116_s16 }
0x13bd   :  { %v14204_v37 = vpop.f32.mrf.mxu0 }
0x13bf   :  { %v5448_v47 = vpop.f32.mrf.mxu1 }
0x13c0   :  { %11078 = vrot.lane.b32.xlu0 %v5448_v47, %s15116_s16 }
0x13c1   :  { %v14199_v4 = vpop.f32.mrf.mxu1 }
0x13c3   :  { %v5608_v55 = vpop.f32.mrf.mxu1 }
0x13c4   :  { %11082 = vrot.lane.b32.xlu0 %v5608_v55, %s15116_s16 }
0x13c5   :  { %v14209_v42 = vpop.f32.mrf.mxu1 }
0x13c7   :  { %v5688_v20 = vpop.f32.mrf.mxu0 }
0x13c8   :  { %11084 = vrot.lane.b32.xlu1 %v5688_v20, %s15116_s16 }
0x13c9   :  { %v14214_v29 = vpop.f32.mrf.mxu0 }
0x13cb   :  { %v5768_v12 = vpop.f32.mrf.mxu1 }
0x13cc   :  { %11086 = vrot.lane.b32.xlu0 %v5768_v12, %s15116_s16 }
0x13cd   :  { %v14219_v48 = vpop.f32.mrf.mxu1 }
0x13cf   :  { %v5848_v11 = vpop.f32.mrf.mxu0 }
0x13d0   :  { %11088 = vrot.lane.b32.xlu0 %v5848_v11, %s15116_s16 }
0x13d1   :  { %v14224_v5 = vpop.f32.mrf.mxu0 }
0x13d3   :  { %v5928_v26 = vpop.f32.mrf.mxu1  ;;  %v6116_v39 = vpop.f32.mrf.mxu0 }
0x13d4   :  { %11108 = vrot.lane.b32.xlu0 %v6116_v39, %s15118_s12  ;;  %11090 = vrot.lane.b32.xlu1 %v5928_v26, %s15116_s16 }
0x13d5   :  { %v14229_v45 = vpop.f32.mrf.mxu1  ;;  %v14234_v21 = vpop.f32.mrf.mxu0 }
0x13d7   :  { %v6192_v28 = vpop.f32.mrf.mxu1  ;;  %v6268_v40 = vpop.f32.mrf.mxu0 }
0x13d8   :  { %11112 = vrot.lane.b32.xlu1 %v6268_v40, %s15118_s12  ;;  %11110 = vrot.lane.b32.xlu0 %v6192_v28, %s15118_s12 }
0x13d9   :  { %v14239_v13 = vpop.f32.mrf.mxu1  ;;  %v14244_v17 = vpop.f32.mrf.mxu0 }
0x13db   :  { %v6344_v3 = vpop.f32.mrf.mxu1  ;;  %v6420_v58 = vpop.f32.mrf.mxu0 }
0x13dc   :  { %11114 = vrot.lane.b32.xlu1 %v6344_v3, %s15118_s12 }
0x13dd   :  { %v14249_v25 = vpop.f32.mrf.mxu1  ;;  %v14254_v62 = vpop.f32.mrf.mxu0 }
0x13df   :  { %v6496_v7 = vpop.f32.mrf.mxu1  ;;  %v6572_v44 = vpop.f32.mrf.mxu0 }
0x13e0   :  { %11120 = vrot.lane.b32.xlu0 %v6572_v44, %s15118_s12  ;;  %11116 = vrot.lane.b32.xlu1 %v6420_v58, %s15118_s12 }
0x13e1   :  { %v14259_v46 = vpop.f32.mrf.mxu1  ;;  %v14264_v57 = vpop.f32.mrf.mxu0 }
0x13e3   :  { %v6648_v56 = vpop.f32.mrf.mxu1  ;;  %v6840_v36 = vpop.f32.mrf.mxu0 }
0x13e4   :  { %11140 = vrot.lane.b32.xlu0 %v6840_v36, %s15119_s13  ;;  %11118 = vrot.lane.b32.xlu1 %v6496_v7, %s15118_s12 }
0x13e5   :  { %v14269_v52 = vpop.f32.mrf.mxu1  ;;  %v14274_v19 = vpop.f32.mrf.mxu0 }
0x13e7   :  { %v6920_v35 = vpop.f32.mrf.mxu1  ;;  %v7000_v34 = vpop.f32.mrf.mxu0 }
0x13e8   :  { %11122 = vrot.lane.b32.xlu1 %v6648_v56, %s15118_s12  ;;  %11142 = vrot.lane.b32.xlu0 %v6920_v35, %s15119_s13 }
0x13e9   :  { %v14279_v49 = vpop.f32.mrf.mxu1  ;;  %v14284_v22 = vpop.f32.mrf.mxu0 }
0x13eb   :  { %v7080_v31 = vpop.f32.mrf.mxu1  ;;  %v7160_v24 = vpop.f32.mrf.mxu0 }
0x13ec   :  { %11144 = vrot.lane.b32.xlu0 %v7000_v34, %s15119_s13  ;;  %11146 = vrot.lane.b32.xlu1 %v7080_v31, %s15119_s13 }
0x13ed   :  { %v14289_v43 = vpop.f32.mrf.mxu1  ;;  %v14294_v60 = vpop.f32.mrf.mxu0 }
0x13ef   :  { %v7240_v8 = vpop.f32.mrf.mxu1  ;;  %v7320_v61 = vpop.f32.mrf.mxu0 }
0x13f0   :  { %11148 = vrot.lane.b32.xlu0 %v7160_v24, %s15119_s13  ;;  %11150 = vrot.lane.b32.xlu1 %v7240_v8, %s15119_s13 }
0x13f1   :  { %v14299_v63 = vpop.f32.mrf.mxu1  ;;  %v14304_v51 = vpop.f32.mrf.mxu0 }
0x13f3   :  { %v7400_v14 = vpop.f32.mrf.mxu1  ;;  %v7588_v6 = vpop.f32.mrf.mxu0 }
0x13f4   :  { %11152 = vrot.lane.b32.xlu0 %v7320_v61, %s15119_s13  ;;  %11172 = vrot.lane.b32.xlu1 %v7588_v6, %s15120_s15 }
0x13f5   :  { %v14309_v18 = vpop.f32.mrf.mxu1  ;;  %v14314_v0 = vpop.f32.mrf.mxu0 }
0x13f7   :  { %v7664_v2 = vpop.f32.mrf.mxu1  ;;  %v7740_v15 = vpop.f32.mrf.mxu0 }
0x13f8   :  { %11176 = vrot.lane.b32.xlu0 %v7740_v15, %s15120_s15  ;;  %11154 = vrot.lane.b32.xlu1 %v7400_v14, %s15119_s13 }
0x13f9   :  { %v14319_v54 = vpop.f32.mrf.mxu1  ;;  %v14324_v38 = vpop.f32.mrf.mxu0 }
0x13fb   :  { %v7816_v33 = vpop.f32.mrf.mxu1  ;;  %v7892_v32 = vpop.f32.mrf.mxu0 }
0x13fc   :  { %11174 = vrot.lane.b32.xlu1 %v7664_v2, %s15120_s15  ;;  %11178 = vrot.lane.b32.xlu0 %v7816_v33, %s15120_s15 }
0x13fd   :  { %v14329_v50 = vpop.f32.mrf.mxu1  ;;  %v14334_v37 = vpop.f32.mrf.mxu0 }
0x13ff   :  { %v7968_v47 = vpop.f32.mrf.mxu1  ;;  %v8044_v4 = vpop.f32.mrf.mxu0 }
0x1400   :  { %11180 = vrot.lane.b32.xlu0 %v7892_v32, %s15120_s15  ;;  %11182 = vrot.lane.b32.xlu1 %v7968_v47, %s15120_s15 }
0x1401   :  { %v14339_v55 = vpop.f32.mrf.mxu1  ;;  %v14344_v42 = vpop.f32.mrf.mxu0 }
0x1403   :  { %v8120_v20 = vpop.f32.mrf.mxu1  ;;  %v8312_v29 = vpop.f32.mrf.mxu0 }
0x1404   :  { %11184 = vrot.lane.b32.xlu0 %v8044_v4, %s15120_s15  ;;  %11204 = vrot.lane.b32.xlu1 %v8312_v29, %s15113_s23 }
0x1405   :  { %v14349_v59 = vpop.f32.mrf.mxu1  ;;  %v14354_v12 = vpop.f32.mrf.mxu0 }
0x1407   :  { %v8392_v48 = vpop.f32.mrf.mxu1  ;;  %v8472_v11 = vpop.f32.mrf.mxu0 }
0x1408   :  { %11186 = vrot.lane.b32.xlu0 %v8120_v20, %s15120_s15  ;;  %11206 = vrot.lane.b32.xlu1 %v8392_v48, %s15113_s23 }
0x1409   :  { %v14359_v5 = vpop.f32.mrf.mxu1  ;;  %v14364_v26 = vpop.f32.mrf.mxu0 }
0x140b   :  { %v8552_v39 = vpop.f32.mrf.mxu1  ;;  %v8632_v45 = vpop.f32.mrf.mxu0 }
0x140c   :  { %11210 = vrot.lane.b32.xlu0 %v8552_v39, %s15113_s23  ;;  %11208 = vrot.lane.b32.xlu1 %v8472_v11, %s15113_s23 }
0x140d   :  { %v14369_v21 = vpop.f32.mrf.mxu1  ;;  %v14374_v28 = vpop.f32.mrf.mxu0 }
0x140e   :  { %v11427_v28 = vld [vmem:[%s20642_s4] sm:$0xff] }
0x140f   :  { %v8712_v40 = vpop.f32.mrf.mxu1  ;;  %v8792_v13 = vpop.f32.mrf.mxu0  ;;  %vm12297_vm4 = vcmp.gt.f32.partialorder %v11427_v28, 0.5 }
0x1410   :  { %11214 = vrot.lane.b32.xlu1 %v8712_v40, %s15113_s23  ;;  %11212 = vrot.lane.b32.xlu0 %v8632_v45, %s15113_s23 }
0x1411   :  { %v14379_v17 = vpop.f32.mrf.mxu1  ;;  %v14384_v3 = vpop.f32.mrf.mxu0 }
0x1413   :  { %v8872_v58 = vpop.f32.mrf.mxu1  ;;  %v9060_v25 = vpop.f32.mrf.mxu0 }
0x1414   :  { %11218 = vrot.lane.b32.xlu0 %v8872_v58, %s15113_s23  ;;  %11216 = vrot.lane.b32.xlu1 %v8792_v13, %s15113_s23 }
0x1415   :  { %v14389_v62 = vpop.f32.mrf.mxu1  ;;  %v14394_v7 = vpop.f32.mrf.mxu0 }
0x1416   :  { %v20786_v7 = vmov 0  }
0x1417   :  { %v9136_v44 = vpop.f32.mrf.mxu1  ;;  %v9212_v46 = vpop.f32.mrf.mxu0 }
0x1418   :  { %11238 = vrot.lane.b32.xlu0 %v9136_v44, %s15112_s9  ;;  %11236 = vrot.lane.b32.xlu1 %v9060_v25, %s15112_s9  ;;  %v19365_v44 = vsel %vm12297_vm4, 1, %v20786_v7 }
0x1419   :  { %v14399_v57 = vpop.f32.mrf.mxu1  ;;  %v14404_v56 = vpop.f32.mrf.mxu0  ;;  %21204 = vst [vmem:[#allocation125_spill] sm:$0xff] %v19365_v44 }
0x141b   :  { %v9288_v36 = vpop.f32.mrf.mxu1  ;;  %v9364_v52 = vpop.f32.mrf.mxu0 }
0x141c   :  { %11242 = vrot.lane.b32.xlu0 %v9288_v36, %s15112_s9  ;;  %11240 = vrot.lane.b32.xlu1 %v9212_v46, %s15112_s9  ;;  %v19370_v46 = vld [vmem:[%s20643_s3] sm:$0xff]  ;;  %v21206_v36 = vld [vmem:[#allocation3_spill] sm:$0xff] }
0x141d   :  { %v14409_v19 = vpop.f32.mrf.mxu1  ;;  %v14414_v35 = vpop.f32.mrf.mxu0  ;;  %21205 = vst [vmem:[#allocation50_spill] sm:$0xff] %v19370_v46 }
0x141e   :  { %v21207_v35 = vld [vmem:[#allocation4_spill] sm:$0xff] }
0x141f   :  { %v9440_v34 = vpop.f32.mrf.mxu1  ;;  %v9516_v49 = vpop.f32.mrf.mxu0 }
0x1420   :  { %11244 = vrot.lane.b32.xlu0 %v9364_v52, %s15112_s9  ;;  %11248 = vrot.lane.b32.xlu1 %v9516_v49, %s15112_s9  ;;  %v11433_v52 = vrot.slane %v19370_v46, %v21206_v36 }
0x1421   :  { %v14419_v22 = vpop.f32.mrf.mxu1  ;;  %v14424_v31 = vpop.f32.mrf.mxu0 }
0x1423   :  { %v9592_v24 = vpop.f32.mrf.mxu1  ;;  %v9784_v43 = vpop.f32.mrf.mxu0 }
0x1424   :  { %11246 = vrot.lane.b32.xlu0 %v9440_v34, %s15112_s9  ;;  %11268 = vrot.lane.b32.xlu1 %v9784_v43, %s15107_s26  ;;  %v11440_v34 = vrot.slane %v19370_v46, %v21207_v35 }
0x1425   :  { %v14429_v60 = vpop.f32.mrf.mxu1  ;;  %v14434_v8 = vpop.f32.mrf.mxu0 }
0x1426   :  { %v19341_v20 = vpop.permute.xlu1 %11076 }
0x1427   :  { %v9864_v61 = vpop.f32.mrf.mxu1  ;;  %v9944_v63 = vpop.f32.mrf.mxu0 }
0x1428   :  { %11250 = vrot.lane.b32.xlu0 %v9592_v24, %s15112_s9  ;;  %11272 = vrot.lane.b32.xlu1 %v9944_v63, %s15107_s26 }
0x1429   :  { %v14439_v51 = vpop.f32.mrf.mxu1  ;;  %v14444_v14 = vpop.f32.mrf.mxu0 }
0x142b   :  { %v10024_v6 = vpop.f32.mrf.mxu1  ;;  %v10104_v18 = vpop.f32.mrf.mxu0 }
0x142c   :  { %11270 = vrot.lane.b32.xlu0 %v9864_v61, %s15107_s26  ;;  %11276 = vrot.lane.b32.xlu1 %v10104_v18, %s15107_s26 }
0x142d   :  { %v14449_v0 = vpop.f32.mrf.mxu1  ;;  %v14454_v2 = vpop.f32.mrf.mxu0 }
0x142e   :  { %v19347_v5 = vpop.permute.xlu1 %11080  ;;  %v19414_v2 = vld [vmem:[%s20644_s19 + $0x78] sm:$0xff] }
0x142f   :  { %v10184_v15 = vpop.f32.mrf.mxu1  ;;  %v10264_v54 = vpop.f32.mrf.mxu0  ;;  %21208 = vst [vmem:[#allocation65_spill] sm:$0xff] %v19414_v2  ;;  %14555 = vmatpush3.msra.mxu1 %v19414_v2 }
0x1430   :  { %11274 = vrot.lane.b32.xlu0 %v10024_v6, %s15107_s26  ;;  %11280 = vrot.lane.b32.xlu1 %v10264_v54, %s15107_s26  ;;  %v19426_v54 = vld [vmem:[%s20644_s19 + $0x68] sm:$0xff] }
0x1431   :  { %v14459_v38 = vpop.f32.mrf.mxu1  ;;  %v14464_v33 = vpop.f32.mrf.mxu0  ;;  %14556 = vmatprep.subr.mxu1 %v20920_v16  ;;  %21210 = vst [vmem:[#allocation130_spill] sm:$0xff] %v19426_v54 }
0x1432   :  { %v19337_v37 = vpop.permute.xlu0 %11078 }
0x1433   :  { %v10344_v32 = vpop.f32.mrf.mxu1  ;;  %v10532_v50 = vpop.f32.mrf.mxu0 }
0x1434   :  { %11278 = vrot.lane.b32.xlu0 %v10184_v15, %s15107_s26  ;;  %11282 = vrot.lane.b32.xlu1 %v10344_v32, %s15107_s26  ;;  %v19419_v15 = vld [vmem:[%s20644_s19 + $0x70] sm:$0xff]  ;;  %v19437_v32 = vld [vmem:[%s20644_s19 + $0x60] sm:$0xff] }
0x1435   :  { %v14469_v47 = vpop.f32.mrf.mxu1  ;;  %v14474_v4 = vpop.f32.mrf.mxu0  ;;  %21209 = vst [vmem:[#allocation46_spill] sm:$0xff] %v19419_v15  ;;  %14557 = vmatpush3.msra.mxu1 %v19419_v15  ;;  %21211 = vst [vmem:[#allocation54_spill] sm:$0xff] %v19437_v32  ;;  %v11324_v15 = vsel %vm20807_vm1, %v18736_v23, %v19341_v20  ;;  %v19525_v23 = vld [vmem:[%s20645_s2 + $0x10] sm:$0xff]  ;;  %v19530_v20 = vld [vmem:[%s20645_s2] sm:$0xff] }
0x1436   :  { %v19345_v12 = vpop.permute.xlu0 %11082  ;;  %14558 = vmatprep.subr.mxu1 %v20920_v16  ;;  %vm11412_vm11 = vcmp.gt.f32.partialorder %v19525_v23, 0.5  ;;  %vm11410_vm12 = vcmp.gt.f32.partialorder %v19530_v20, 0.5 }
0x1437   :  { %v10608_v55 = vpop.f32.mrf.mxu1  ;;  %v10684_v42 = vpop.f32.mrf.mxu0  ;;  %14559 = vmatpush3.msra.mxu1 %v19426_v54 }
0x1438   :  { %11300 = vrot.lane.b32.xlu0 %v10532_v50, %s15104_s30  ;;  %11304 = vrot.lane.b32.xlu1 %v10684_v42, %s15104_s30  ;;  %v19444_v50 = vld [vmem:[%s20644_s19 + $0x58] sm:$0xff]  ;;  %v19462_v42 = vld [vmem:[%s20644_s19 + $0x48] sm:$0xff] }
0x1439   :  { %v14479_v29 = vpop.f32.mrf.mxu1  ;;  %v14484_v59 = vpop.f32.mrf.mxu0  ;;  %14560 = vmatprep.subr.mxu1 %v20920_v16  ;;  %21212 = vst [vmem:[#allocation58_spill] sm:$0xff] %v19444_v50  ;;  %21214 = vst [vmem:[#allocation62_spill] sm:$0xff] %v19462_v42 }
0x143a   :  { %v19358_v40 = vpop.permute.xlu1 %11084  ;;  %14561 = vmatpush3.msra.mxu1 %v19437_v32 }
0x143b   :  { %v10760_v48 = vpop.f32.mrf.mxu1  ;;  %v10836_v11 = vpop.f32.mrf.mxu0  ;;  %14562 = vmatprep.subr.mxu1 %v20920_v16 }
0x143c   :  { %11302 = vrot.lane.b32.xlu0 %v10608_v55, %s15104_s30  ;;  %11306 = vrot.lane.b32.xlu1 %v10760_v48, %s15104_s30  ;;  %v19455_v55 = vld [vmem:[%s20644_s19 + $0x50] sm:$0xff] }
0x143d   :  { %v14489_v26 = vpop.f32.mrf.mxu1  ;;  %v14494_v39 = vpop.f32.mrf.mxu0  ;;  %21213 = vst [vmem:[#allocation69_spill] sm:$0xff] %v19455_v55  ;;  %14563 = vmatpush3.msra.mxu1 %v19444_v50 }
0x143e   :  { %v19351_v45 = vpop.permute.xlu0 %11086  ;;  %14564 = vmatprep.subr.mxu1 %v20920_v16 }
0x143f   :  { %v10912_v21 = vpop.f32.mrf.mxu1  ;;  %14565 = vmatpush3.msra.mxu1 %v19455_v55 }
0x1440   :  { %11310 = vrot.lane.b32.xlu0 %v10912_v21, %s15104_s30  ;;  %11308 = vrot.lane.b32.xlu1 %v10836_v11, %s15104_s30 }
0x1441   :  { %v14499_v13 = vpop.f32.mrf.mxu1  ;;  %14566 = vmatprep.subr.mxu1 %v20920_v16 }
0x1442   :  { %v10988_v17 = vpop.f32.mrf.mxu0  ;;  %v19360_v3 = vpop.permute.xlu0 %11088  ;;  %14567 = vmatpush3.msra.mxu1 %v19462_v42 }
0x1443   :  { %v11064_v58 = vpop.f32.mrf.mxu1  ;;  %14568 = vmatprep.subr.mxu1 %v20920_v16  ;;  %v11326_v16 = vsel %vm20807_vm1, %v18896_v1, %v19347_v5  ;;  %v11328_v1 = vsel %vm20807_vm1, %v19010_v9, %v19358_v40 }
0x1444   :  { %11314 = vrot.lane.b32.xlu1 %v11064_v58, %s15104_s30  ;;  %11312 = vrot.lane.b32.xlu0 %v10988_v17, %s15104_s30  ;;  %v14504_v25 = vpop.f32.mrf.mxu0 }
0x1445   :  { %v14509_v62 = vpop.f32.mrf.mxu1 }
0x1446   :  { %v19372_v57 = vpop.permute.xlu1 %11090  ;;  %v19374_v56 = vpop.permute.xlu0 %11108 }
0x1447   :  { %v11333_v9 = vsel %vm11332_vm5, %v11324_v15, %v19374_v56 }
0x1448   :  { %12300 = vperm.xlu1 %14826, %v19365_v44  }
0x144a   :  { %v19379_v19 = vpop.permute.xlu1 %11112  ;;  %v19383_v49 = vpop.permute.xlu0 %11110 }
0x144b   :  { %v11335_v5 = vsel %vm11332_vm5, %v11326_v16, %v19379_v19 }
0x144c   :  { %11435 = vbcast.lane.b32.xlu1 %v11433_v52, 256 }
0x144e   :  { %v19385_v22 = vpop.permute.xlu1 %11114 }
0x1450   :  { %11442 = vbcast.lane.b32.xlu1 %v11440_v34, 256 }
0x1452   :  { %v19387_v31 = vpop.permute.xlu1 %11116  ;;  %v19389_v24 = vpop.permute.xlu0 %11120 }
0x1456   :  { %v19391_v43 = vpop.permute.xlu1 %11118  ;;  %v19393_v60 = vpop.permute.xlu0 %11140 }
0x1457   :  { %v11342_v16 = vsel %vm11341_vm6, %v11333_v9, %v19393_v60 }
0x145a   :  { %v19395_v8 = vpop.permute.xlu1 %11122  ;;  %v19397_v61 = vpop.permute.xlu0 %11142 }
0x145e   :  { %v19399_v63 = vpop.permute.xlu1 %11146  ;;  %v19401_v51 = vpop.permute.xlu0 %11144 }
0x1462   :  { %v19403_v14 = vpop.permute.xlu1 %11150  ;;  %v19405_v6 = vpop.permute.xlu0 %11148 }
0x1466   :  { %v19407_v18 = vpop.permute.xlu1 %11172  ;;  %v19409_v0 = vpop.permute.xlu0 %11152 }
0x146a   :  { %v19428_v38 = vpop.permute.xlu1 %11154  ;;  %v19430_v33 = vpop.permute.xlu0 %11176 }
0x146e   :  { %v19446_v47 = vpop.permute.xlu1 %11174  ;;  %v19448_v4 = vpop.permute.xlu0 %11178 }
0x1472   :  { %v19464_v29 = vpop.permute.xlu1 %11182  ;;  %v19466_v59 = vpop.permute.xlu0 %11180 }
0x1476   :  { %v19472_v48 = vpop.permute.xlu1 %11204  ;;  %v19474_v11 = vpop.permute.xlu0 %11184 }
0x147a   :  { %v19476_v26 = vpop.permute.xlu1 %11206  ;;  %v19478_v39 = vpop.permute.xlu0 %11186 }
0x147e   :  { %v11209_v21 = vpop.permute.xlu1 %11208  ;;  %v19480_v28 = vpop.permute.xlu0 %11210 }
0x1482   :  { %v19482_v13 = vpop.permute.xlu1 %11214  ;;  %v19484_v17 = vpop.permute.xlu0 %11212 }
0x1486   :  { %v19486_v58 = vpop.permute.xlu1 %11216  ;;  %v19488_v25 = vpop.permute.xlu0 %11218 }
0x148a   :  { %v11237_v62 = vpop.permute.xlu1 %11236  ;;  %v19490_v52 = vpop.permute.xlu0 %11238 }
0x148e   :  { %v11241_v34 = vpop.permute.xlu1 %11240  ;;  %v19492_v7 = vpop.permute.xlu0 %11242 }
0x1492   :  { %v19494_v35 = vpop.permute.xlu1 %11248  ;;  %v19496_v36 = vpop.permute.xlu0 %11244 }
0x1496   :  { %v11269_v44 = vpop.permute.xlu1 %11268  ;;  %v19498_v42 = vpop.permute.xlu0 %11246 }
0x149a   :  { %v11273_v55 = vpop.permute.xlu1 %11272  ;;  %v19500_v50 = vpop.permute.xlu0 %11250 }
0x149b   :  { %21215 = vst [vmem:[#allocation133_spill] sm:$0xff] %v19500_v50  ;;  %v11327_v50 = vsel %vm20807_vm1, %v18957_v53, %v19345_v12  ;;  %v11330_v53 = vsel %vm20807_vm1, %v19134_v10, %v19360_v3  ;;  %v19547_v12 = vld [vmem:[%s20645_s2 + $0x8] sm:$0xff]  ;;  %v11344_v3 = vsel %vm11341_vm6, %v11335_v5, %v19401_v51 }
0x149c   :  { %v11336_v10 = vsel %vm11332_vm5, %v11327_v50, %v19385_v22  ;;  %v11339_v40 = vsel %vm11332_vm5, %v11330_v53, %v19389_v24  ;;  %v11350_v22 = vsel %vm88_vm0, %v11342_v16, %v19407_v18  ;;  %vm11411_vm13 = vcmp.gt.f32.partialorder %v19547_v12, 0.5  ;;  %v19601_v18 = vld [vmem:[%s20645_s2 + $0x28] sm:$0xff] }
0x149d   :  { %v11345_v60 = vsel %vm11341_vm6, %v11336_v10, %v19399_v63  ;;  %vm11415_vm4 = vcmp.gt.f32.partialorder %v19601_v18, 0.5 }
0x149e   :  { %v19502_v32 = vpop.permute.xlu1 %11276  ;;  %v19504_v54 = vpop.permute.xlu0 %11270 }
0x149f   :  { %21216 = vst [vmem:[#allocation75_spill] sm:$0xff] %v19502_v32  ;;  %v11325_v32 = vsel %vm20807_vm1, %v18805_v41, %v19337_v37  ;;  %v11329_v41 = vsel %vm20807_vm1, %v19039_v30, %v19351_v45  ;;  %v11331_v37 = vsel %vm20807_vm1, %v19197_v27, %v19372_v57  ;;  %v19560_v27 = vld [vmem:[%s20645_s2 + $0x18] sm:$0xff]  ;;  %v11337_v45 = vsel %vm11332_vm5, %v11328_v1, %v19387_v31 }
0x14a0   :  { %v11334_v30 = vsel %vm11332_vm5, %v11325_v32, %v19383_v49  ;;  %v11338_v19 = vsel %vm11332_vm5, %v11329_v41, %v19391_v43  ;;  %v11340_v49 = vsel %vm11332_vm5, %v11331_v37, %v19395_v8  ;;  %v11352_v31 = vsel %vm88_vm0, %v11344_v3, %v19430_v33  ;;  %v19596_v8 = vld [vmem:[%s20645_s2 + $0x20] sm:$0xff] }
0x14a1   :  { %v11343_v24 = vsel %vm11341_vm6, %v11334_v30, %v19397_v61  ;;  %v11359_v43 = vsel %vm11358_vm7, %v11350_v22, %v19472_v48  ;;  %v11361_v51 = vsel %vm11358_vm7, %v11352_v31, %v11209_v21  ;;  %vm11413_vm14 = vcmp.gt.f32.partialorder %v19560_v27, 0.5 }
0x14a2   :  { %v19509_v2 = vpop.permute.xlu1 %11280  ;;  %v19511_v46 = vpop.permute.xlu0 %11274  ;;  %v11347_v61 = vsel %vm11341_vm6, %v11338_v19, %v19403_v14  ;;  %v11346_v63 = vsel %vm11341_vm6, %v11337_v45, %v19405_v6  ;;  %v11368_v15 = vsel %vm11367_vm8, %v11359_v43, %v11237_v62  ;;  %v11370_v33 = vsel %vm11367_vm8, %v11361_v51, %v11241_v34 }
0x14a3   :  { %v11348_v32 = vsel %vm11341_vm6, %v11339_v40, %v19409_v0  ;;  %v11349_v50 = vsel %vm11341_vm6, %v11340_v49, %v19428_v38  ;;  %v11377_v48 = vsel %vm11376_vm9, %v11368_v15, %v11269_v44  ;;  %v11379_v21 = vsel %vm11376_vm9, %v11370_v33, %v11273_v55  ;;  %v19626_v44 = vld [vmem:[%s20645_s2 + $0x38] sm:$0xff]  ;;  %v19631_v0 = vld [vmem:[%s20645_s2 + $0x30] sm:$0xff] }
0x14a4   :  { %v11351_v14 = vsel %vm88_vm0, %v11343_v24, %v19446_v47  ;;  %v11353_v6 = vsel %vm88_vm0, %v11345_v60, %v19448_v4  ;;  %vm11414_vm15 = vcmp.gt.f32.partialorder %v19596_v8, 0.5  ;;  %vm20811_vm5 = vcmask 1041409   ;;  %v21217_v40 = vld [vmem:[#allocation133_spill] sm:$0xff] }
0x14a5   :  { %v11355_v38 = vsel %vm88_vm0, %v11347_v61, %v19464_v29  ;;  %v11354_v47 = vsel %vm88_vm0, %v11346_v63, %v19466_v59  ;;  %v11356_v4 = vsel %vm88_vm0, %v11348_v32, %v19474_v11  ;;  %v11360_v55 = vsel %vm11358_vm7, %v11351_v14, %v19476_v26 }
0x14a6   :  { %v19570_v57 = vpop.permute.xlu1 %11282  ;;  %v19572_v56 = vpop.permute.xlu0 %11278  ;;  %v11357_v53 = vsel %vm88_vm0, %v11349_v50, %v19478_v39  ;;  %v11362_v37 = vsel %vm11358_vm7, %v11353_v6, %v19480_v28  ;;  %v11364_v9 = vsel %vm11358_vm7, %v11355_v38, %v19482_v13  ;;  %v11363_v29 = vsel %vm11358_vm7, %v11354_v47, %v19484_v17  ;;  %v21218_v3 = vld [vmem:[#allocation75_spill] sm:$0xff] }
0x14a7   :  { %v11369_v59 = vsel %vm11367_vm8, %v11360_v55, %v19490_v52  ;;  %v11371_v11 = vsel %vm11367_vm8, %v11362_v37, %v19492_v7  ;;  %vm11417_vm0 = vcmp.gt.f32.partialorder %v19626_v44, 0.5  ;;  %v11365_v28 = vsel %vm11358_vm7, %v11356_v4, %v19486_v58  ;;  %v13301_v44 = vld [vmem:[%s20646_s20] ss:$0 sm:$0xff] }
0x14a8   :  { %v11366_v13 = vsel %vm11358_vm7, %v11357_v53, %v19488_v25  ;;  %v11378_v17 = vsel %vm11376_vm9, %v11369_v59, %v19504_v54  ;;  %v11380_v7 = vsel %vm11376_vm9, %v11371_v11, %v19511_v46  ;;  %vm11562_vm1 = vcmask 1042434  }
0x14a9   :  { %v11374_v52 = vsel %vm11367_vm8, %v11365_v28, %v19494_v35  ;;  %v11372_v10 = vsel %vm11367_vm8, %v11363_v29, %v19496_v36  ;;  %vm11565_vm6 = vcmask 1043459   ;;  %vm11571_vm7 = vcmask 1045509  }
0x14aa   :  { %v11305_v1 = vpop.permute.xlu1 %11304  ;;  %v11301_v41 = vpop.permute.xlu0 %11300  ;;  %v11373_v36 = vsel %vm11367_vm8, %v11364_v9, %v19498_v42  ;;  %v11375_v16 = vsel %vm11367_vm8, %v11366_v13, %v21217_v40  ;;  %v11381_v19 = vsel %vm11376_vm9, %v11372_v10, %v21218_v3  ;;  %v11383_v22 = vsel %vm11376_vm9, %v11374_v52, %v19509_v2  ;;  %v19790_v40 = vld [vmem:[%s20644_s19 + $0x38] sm:$0xff]  ;;  %v19798_v3 = vld [vmem:[%s20644_s19 + $0x30] sm:$0xff] }
0x14ab   :  { %v11387_v62 = vsel %vm524_vm2, %v11379_v21, %v11305_v1  ;;  %v11385_v34 = vsel %vm524_vm2, %v11377_v48, %v11301_v41  ;;  %v11384_v31 = vsel %vm11376_vm9, %v11375_v16, %v19570_v57  ;;  %v11382_v42 = vsel %vm11376_vm9, %v11373_v36, %v19572_v56  ;;  %v19784_v36 = vld [vmem:[%s20644_s19 + $0x40] sm:$0xff] }
0x14ac   :  { %v11396_v26 = vsel %vm11393_vm10, %v11387_v62, 0.0  ;;  %v11394_v5 = vsel %vm11393_vm10, %v11385_v34, 0.0  ;;  %vm21219_vm8 = vcmp.gt.f32.partialorder %v19631_v0, 0.5  ;;  %vm11574_vm9 = vcmask 1046534   ;;  %14569 = vmatpush3.msra.mxu1 %v19784_v36 }
0x14ad   :  { %v19673_v54 = vsel %vm11412_vm11, %v11396_v26, -1e+12  ;;  %v19677_v46 = vsel %vm11410_vm12, %v11394_v5, -1e+12  ;;  %v21221_v16 = vmov 0.0  }
0x14ae   :  { %v11307_v39 = vpop.permute.xlu1 %11306  ;;  %v11303_v30 = vpop.permute.xlu0 %11302  ;;  %v12281_v60 = vrot.slane %v19677_v46, 1  ;;  %v12188_v51 = vrot.slane %v19673_v54, 6  ;;  %v12383_v47 = vrot.slane %v19677_v46, 2  ;;  %v12483_v11 = vrot.slane %v19677_v46, 3  ;;  %14570 = vmatprep.subr.mxu1 %v21221_v16 }
0x14af   :  { %v11388_v45 = vsel %vm524_vm2, %v11380_v7, %v11307_v39  ;;  %v11386_v58 = vsel %vm524_vm2, %v11378_v17, %v11303_v30  ;;  %v12583_v39 = vrot.slane %v19677_v46, 4  ;;  %v12683_v17 = vrot.slane %v19677_v46, 5  ;;  %14571 = vmatpush3.msra.mxu1 %v19790_v40 }
0x14b0   :  { %v11397_v25 = vsel %vm11393_vm10, %v11388_v45, 0.0  ;;  %v11395_v35 = vsel %vm11393_vm10, %v11386_v58, 0.0  ;;  %v12783_v10 = vrot.slane %v19677_v46, 6  ;;  %14572 = vmatprep.subr.mxu1 %v21221_v16 }
0x14b1   :  { %v19689_v23 = vsel %vm11411_vm13, %v11395_v35, -1e+12  ;;  %v19699_v24 = vsel %vm11413_vm14, %v11397_v25, -1e+12  ;;  %v12883_v25 = vrot.slane %v19677_v46, 7  ;;  %14573 = vmatpush3.msra.mxu1 %v19798_v3  ;;  %vm21237_vm13 = vmmov 0  }
0x14b2   :  { %v11309_v20 = vpop.permute.xlu1 %11308  ;;  %v11311_v49 = vpop.permute.xlu0 %11310  ;;  %v12384_v2 = vrot.slane %v19689_v23, 1  ;;  %v12186_v56 = vrot.slane %v19689_v23, 7  ;;  %v12190_v32 = vrot.slane %v19699_v24, 5  ;;  %v19720_v50 = vsel %vm20811_vm5, %v19689_v23, %v12281_v60  ;;  %14574 = vmatprep.subr.mxu1 %v21221_v16  ;;  %v21224_v60 = vld [vmem:[#allocation7_spill] sm:$0xff] }
0x14b3   :  { %v11389_v12 = vsel %vm524_vm2, %v11381_v19, %v11309_v20  ;;  %v11390_v43 = vsel %vm524_vm2, %v11382_v42, %v11311_v49  ;;  %v12484_v37 = vrot.slane %v19689_v23, 2  ;;  %v12584_v26 = vrot.slane %v19689_v23, 3  ;;  %v21222_v19 = vld [vmem:[#allocation5_spill] sm:$0xff]  ;;  %v21223_v20 = vld [vmem:[#allocation50_spill] sm:$0xff] }
0x14b4   :  { %v11398_v61 = vsel %vm11393_vm10, %v11389_v12, 0.0  ;;  %v11399_v57 = vsel %vm11393_vm10, %v11390_v43, 0.0  ;;  %v12187_v8 = vsel %vm20811_vm5, %v12186_v56, %v19677_v46  ;;  %v19751_v29 = vsel %vm20811_vm5, %v12384_v2, %v12383_v47  ;;  %v19819_v42 = vld [vmem:[%s20644_s19 + $0x18] sm:$0xff]  ;;  %v19837_v2 = vld [vmem:[%s20644_s19 + $0x8] sm:$0xff] }
0x14b5   :  { %v19711_v27 = vsel %vm11414_vm15, %v11398_v61, -1e+12  ;;  %v19715_v63 = vsel %vm11415_vm4, %v11399_v57, -1e+12  ;;  %v12189_v14 = vsel %vm11562_vm1, %v12188_v51, %v12187_v8  ;;  %v19761_v30 = vsel %vm20811_vm5, %v12484_v37, %v12483_v11  ;;  %v19831_v51 = vld [vmem:[%s20644_s19 + $0x10] sm:$0xff]  ;;  %v11525_v8 = vld [vmem:[%s20647_s18 + $0x78] sm:$0xff] }
0x14b6   :  { %v11315_v15 = vpop.permute.xlu1 %11314  ;;  %v11313_v33 = vpop.permute.xlu0 %11312  ;;  %v12192_v1 = vrot.slane %v19711_v27, 4  ;;  %v12194_v6 = vrot.slane %v19715_v63, 3  ;;  %v12191_v38 = vsel %vm11565_vm6, %v12190_v32, %v12189_v14  ;;  %v12684_v28 = vrot.slane %v19689_v23, 4  ;;  %v21225_v61 = vld [vmem:[#allocation8_spill] sm:$0xff]  ;;  %14510 = vmatprep.subr.mxu0 %v11525_v8  ;;  %v11521_v47 = vld [vmem:[%s20647_s18 + $0x58] sm:$0xff]  ;;  %v11515_v37 = vld [vmem:[%s20647_s18 + $0x28] sm:$0xff] }
0x14b7   :  { %v11392_v48 = vsel %vm524_vm2, %v11384_v31, %v11315_v15  ;;  %v11391_v21 = vsel %vm524_vm2, %v11383_v22, %v11313_v33  ;;  %vm11577_vm2 = vcmask 1047559   ;;  %v19765_v13 = vsel %vm20811_vm5, %v12584_v26, %v12583_v39  ;;  %v19806_v22 = vld [vmem:[%s20644_s19 + $0x28] sm:$0xff]  ;;  %v19813_v31 = vld [vmem:[%s20644_s19 + $0x20] sm:$0xff]  ;;  %14511 = vmatpush3.msra.mxu0 %v11525_v8  ;;  %v11512_v11 = vld [vmem:[%s20647_s18 + $0x10] sm:$0xff] }
0x14b8   :  { %v11401_v18 = vsel %vm11393_vm10, %v11392_v48, 0.0  ;;  %v11400_v41 = vsel %vm11393_vm10, %v11391_v21, 0.0  ;;  %v12193_v4 = vsel %vm11568_vm3, %v12192_v1, %v12191_v38  ;;  %v12784_v7 = vrot.slane %v19689_v23, 5  ;;  %14575 = vmatpush3.msra.mxu1 %v19806_v22  ;;  %v19850_v33 = vld [vmem:[%s20644_s19] sm:$0xff]  ;;  %v21227_v48 = vld [vmem:[#allocation27_spill] sm:$0xff]  ;;  %v11524_v1 = vld [vmem:[%s20647_s18 + $0x70] sm:$0xff] }
0x14b9   :  { %v19733_v62 = vsel %vm11417_vm0, %v11401_v18, -1e+12  ;;  %v19737_v34 = vsel %vm21219_vm8, %v11400_v41, -1e+12  ;;  %v12195_v0 = vsel %vm11571_vm7, %v12194_v6, %v12193_v4  ;;  %v19770_v52 = vsel %vm20811_vm5, %v12684_v28, %v12683_v17  ;;  %14576 = vmatprep.subr.mxu1 %v21221_v16  ;;  %v21228_v41 = vld [vmem:[#allocation34_spill] sm:$0xff]  ;;  %v11523_v6 = vld [vmem:[%s20647_s18 + $0x68] sm:$0xff]  ;;  %14512 = vmatprep.subr.mxu0 %v11524_v1 }
0x14ba   :  { %v12196_v55 = vrot.slane %v19737_v34, 2  ;;  %v12198_v53 = vrot.slane %v19733_v62, 1  ;;  %v12884_v45 = vrot.slane %v19689_v23, 6  ;;  %v19775_v58 = vsel %vm20811_vm5, %v12784_v7, %v12783_v10  ;;  %14577 = vmatpush3.msra.mxu1 %v19813_v31  ;;  %14513 = vmatpush3.msra.mxu0 %v11524_v1  ;;  %v11522_v38 = vld [vmem:[%s20647_s18 + $0x60] sm:$0xff]  ;;  %v11520_v4 = vld [vmem:[%s20647_s18 + $0x50] sm:$0xff]  ;;  %v11511_v26 = vld [vmem:[%s20647_s18 + $0x8] sm:$0xff] }
0x14bb   :  { %v11447_v49 = vrot.slane %v21223_v20, %v21222_v19  ;;  %v11461_v12 = vrot.slane %v21223_v20, %v21224_v60  ;;  %14578 = vmatprep.subr.mxu1 %v21221_v16  ;;  %v11468_v57 = vrot.slane %v21223_v20, %v21225_v61  ;;  %v21226_v56 = vlaneseq  ;;  %14514 = vmatprep.subr.mxu0 %v11523_v6  ;;  %v11510_v39 = vld [vmem:[%s20647_s18] sm:$0xff]  ;;  %v21229_v17 = vld [vmem:[#allocation65_spill] sm:$0xff] }
0x14bc   :  { %v12197_v9 = vsel %vm11574_vm9, %v12196_v55, %v12195_v0  ;;  %v19779_v35 = vsel %vm20811_vm5, %v12884_v45, %v12883_v25  ;;  %14579 = vmatpush3.msra.mxu1 %v19819_v42  ;;  %v11475_v21 = vrot.slane %v21223_v20, %v21227_v48  ;;  %v15122_v18 = vmov 1.0   ;;  %14515 = vmatpush3.msra.mxu0 %v11523_v6  ;;  %v11519_v55 = vld [vmem:[%s20647_s18 + $0x48] sm:$0xff]  ;;  %v11516_v0 = vld [vmem:[%s20647_s18 + $0x30] sm:$0xff]  ;;  %v21230_v7 = vld [vmem:[#allocation46_spill] sm:$0xff] }
0x14bd   :  { %v12199_v59 = vsel %vm11577_vm2, %v12198_v53, %v12197_v9  ;;  %21220 = vst [vmem:[#allocation66_spill] sm:$0xff] %v19779_v35  ;;  %14580 = vmatprep.subr.mxu1 %v21221_v16  ;;  %v19844_v15 = vand.u32 127, %v21226_v56  ;;  %v11482_v14 = vrot.slane %v21223_v20, %v21228_v41  ;;  %14516 = vmatprep.subr.mxu0 %v11522_v38  ;;  %v11518_v53 = vld [vmem:[%s20647_s18 + $0x40] sm:$0xff]  ;;  %v12391_v35 = vrot.slane %v19715_v63, 5 }
0x14be   :  { %v19756_v5 = vadd.f32 %v13301_v44, %v12199_v59  ;;  %14581 = vmatpush3.msra.mxu1 %v19831_v51  ;;  %14517 = vmatpush3.msra.mxu0 %v11522_v38  ;;  %v11517_v44 = vld [vmem:[%s20647_s18 + $0x38] sm:$0xff]  ;;  %v11514_v9 = vld [vmem:[%s20647_s18 + $0x20] sm:$0xff] }
0x14bf   :  { %14582 = vmatprep.subr.mxu1 %v21221_v16  ;;  %14518 = vmatprep.subr.mxu0 %v11521_v47  ;;  %v11513_v59 = vld [vmem:[%s20647_s18 + $0x18] sm:$0xff]  ;;  %v21231_v10 = vld [vmem:[#allocation130_spill] sm:$0xff] }
0x14c0   :  { %12202 = vmax.xlane.f32.xlu0 %v19756_v5  ;;  %14583 = vmatpush3.msra.mxu1 %v19837_v2  ;;  %v21232_v45 = vld [vmem:[#allocation54_spill] sm:$0xff] }
0x14c1   :  { %14584 = vmatprep.subr.mxu1 %v21221_v16  ;;  %14519 = vmatpush3.msra.mxu0 %v11521_v47  ;;  %v21233_v25 = vld [vmem:[#allocation58_spill] sm:$0xff]  ;;  %v12283_v47 = vrot.slane %v19673_v54, 7 }
0x14c2   :  { %14585 = vmatpush3.msra.mxu1 %v19850_v33  ;;  %14520 = vmatprep.subr.mxu0 %v11520_v4 }
0x14c3   :  { %v19824_v43 = vpop.permute.xlu1 %12300  ;;  %14624 = vmatprep.subr.mxu1 %v21221_v16  ;;  %14521 = vmatpush3.msra.mxu0 %v11520_v4  ;;  %v12285_v4 = vrot.slane %v19699_v24, 6 }
0x14c4   :  { %14522 = vmatprep.subr.mxu0 %v11519_v55  ;;  %vm12302_vm14 = vcmp.eq.s32.totalorder %v19824_v43, 1 }
0x14c5   :  { %14523 = vmatpush3.msra.mxu0 %v11519_v55  ;;  %v12284_v55 = vsel %vm11562_vm1, %v12283_v47, %v19720_v50  ;;  %v15123_v47 = vmov 2  }
0x14c6   :  { %14524 = vmatprep.subr.mxu0 %v11518_v53  ;;  %14827 = vset.pattern.permute.xlu1 %v15123_v47  ;;  %v12386_v47 = vsel %vm11562_vm1, %v19673_v54, %v19751_v29 }
0x14c7   :  { %v19852_v32 = vpop.permute.xlu1 %11435  ;;  %14525 = vmatpush3.msra.mxu0 %v11518_v53  ;;  %v12287_v53 = vrot.slane %v19711_v27, 5 }
0x14c8   :  { %vm11486_vm10 = vcmp.eq.s32.totalorder %v19844_v15, %v19852_v32  ;;  %14526 = vmatprep.subr.mxu0 %v11517_v44 }
0x14c9   :  { %14542 = vmatprep.mubr.msk.f32.mxu0 %vm11486_vm10, %v15122_v18  ;;  %14527 = vmatpush3.msra.mxu0 %v11517_v44  ;;  %v12286_v44 = vsel %vm11565_vm6, %v12285_v4, %v12284_v55  ;;  %v21239_v4 = vld [vmem:[#allocation125_spill] sm:$0xff] }
0x14ca   :  { %14528 = vmatprep.subr.mxu0 %v11516_v0 }
0x14cb   :  { %14529 = vmatpush3.msra.mxu0 %v11516_v0  ;;  %v19915_v28 = vpop.permute.xlu1 %11442  ;;  %v12289_v0 = vrot.slane %v19715_v63, 4 }
0x14cc   :  { %14530 = vmatprep.subr.mxu0 %v11515_v37  ;;  %vm11487_vm11 = vcmp.eq.s32.totalorder %v19844_v15, %v19915_v28 }
0x14cd   :  { %14531 = vmatpush3.msra.mxu0 %v11515_v37  ;;  %v12288_v37 = vsel %vm11568_vm3, %v12287_v53, %v12286_v44 }
0x14ce   :  { %14532 = vmatprep.subr.mxu0 %v11514_v9 }
0x14cf   :  { %14533 = vmatpush3.msra.mxu0 %v11514_v9  ;;  %v12291_v9 = vrot.slane %v19737_v34, 3 }
0x14d0   :  { %14534 = vmatprep.subr.mxu0 %v11513_v59 }
0x14d1   :  { %14535 = vmatpush3.msra.mxu0 %v11513_v59 }
0x14d2   :  { %14536 = vmatprep.subr.mxu0 %v11512_v11 }
0x14d3   :  { %14537 = vmatpush3.msra.mxu0 %v11512_v11  ;;  %v12290_v11 = vsel %vm11571_vm7, %v12289_v0, %v12288_v37 }
0x14d4   :  { %14538 = vmatprep.subr.mxu0 %v11511_v26 }
0x14d5   :  { %14539 = vmatpush3.msra.mxu0 %v11511_v26  ;;  %v12293_v26 = vrot.slane %v19733_v62, 2 }
0x14d6   :  { %11449 = vbcast.lane.b32.xlu0 %v11447_v49, 256  ;;  %14540 = vmatprep.subr.mxu0 %v11510_v39  ;;  %v21234_v49 = vld [vmem:[#allocation69_spill] sm:$0xff] }
0x14d7   :  { %14541 = vmatpush3.msra.mxu0 %v11510_v39 }
0x14d8   :  { %14543 = vmatmul.mubr.msk.f32.vlgmr.msra.gmra.mxu0 %vm11487_vm11, %v15122_v18  ;;  %14589 = vmatprep.subr.mxu0 %v21221_v16 }
0x14d9   :  { %14590 = vmatpush3.msra.mxu0 %v21229_v17 }
0x14da   :  { %11463 = vbcast.lane.b32.xlu0 %v11461_v12, 256  ;;  %14591 = vmatprep.subr.mxu0 %v21221_v16  ;;  %v21235_v12 = vld [vmem:[#allocation62_spill] sm:$0xff] }
0x14db   :  { %14592 = vmatpush3.msra.mxu0 %v21230_v7 }
0x14dc   :  { %14593 = vmatprep.subr.mxu0 %v21221_v16 }
0x14dd   :  { %14594 = vmatpush3.msra.mxu0 %v21231_v10 }
0x14de   :  { %11470 = vbcast.lane.b32.xlu0 %v11468_v57, 256  ;;  %14595 = vmatprep.subr.mxu0 %v21221_v16 }
0x14df   :  { %14596 = vmatpush3.msra.mxu0 %v21232_v45 }
0x14e0   :  { %14597 = vmatprep.subr.mxu0 %v21221_v16 }
0x14e1   :  { %14598 = vmatpush3.msra.mxu0 %v21233_v25 }
0x14e2   :  { %11477 = vbcast.lane.b32.xlu0 %v11475_v21, 256  ;;  %14599 = vmatprep.subr.mxu0 %v21221_v16 }
0x14e3   :  { %14600 = vmatpush3.msra.mxu0 %v21234_v49 }
0x14e4   :  { %14601 = vmatprep.subr.mxu0 %v21221_v16 }
0x14e5   :  { %14602 = vmatpush3.msra.mxu0 %v21235_v12 }
0x14e6   :  { %11484 = vbcast.lane.b32.xlu0 %v11482_v14, 256  ;;  %14603 = vmatprep.subr.mxu0 %v21221_v16 }
0x14e7   :  { %14604 = vmatpush3.msra.mxu0 %v19784_v36 }
0x14e8   :  { %14605 = vmatprep.subr.mxu0 %v21221_v16 }
0x14e9   :  { %14606 = vmatpush3.msra.mxu0 %v19790_v40 }
0x14ea   :  { %14607 = vmatprep.subr.mxu0 %v21221_v16 }
0x14eb   :  { %14608 = vmatpush3.msra.mxu0 %v19798_v3 }
0x14ec   :  { %14609 = vmatprep.subr.mxu0 %v21221_v16 }
0x14ed   :  { %14610 = vmatpush3.msra.mxu0 %v19806_v22 }
0x14ee   :  { %14611 = vmatprep.subr.mxu0 %v21221_v16 }
0x14ef   :  { %14612 = vmatpush3.msra.mxu0 %v19813_v31 }
0x14f0   :  { %14613 = vmatprep.subr.mxu0 %v21221_v16 }
0x14f1   :  { %14614 = vmatpush3.msra.mxu0 %v19819_v42 }
0x14f2   :  { %14615 = vmatprep.subr.mxu0 %v21221_v16 }
0x14f3   :  { %14616 = vmatpush3.msra.mxu0 %v19831_v51 }
0x14f4   :  { %14617 = vmatprep.subr.mxu0 %v21221_v16 }
0x14f5   :  { %14618 = vmatpush3.msra.mxu0 %v19837_v2 }
0x14f6   :  { %14619 = vmatprep.subr.mxu0 %v21221_v16 }
0x14f7   :  { %14620 = vmatpush3.msra.mxu0 %v19850_v33 }
0x14f8   :  { %14659 = vmatprep.subr.mxu0 %v21221_v16 }
0x1549   :  { %v12203_v57 = vpop.xlane.xlu0 %12202 }
0x154a   :  { %v12204_v56 = vsub.f32 %v19756_v5, %v12203_v57 }
0x154c   :  { %v12205_v21 = vmul.f32 1.442695, %v12204_v56  ;;  %v12292_v56 = vsel %vm11574_vm9, %v12291_v9, %v12290_v11 }
0x154d   :  { %v19957_v8 = vpop.permute.xlu0 %11449  ;;  %v12294_v50 = vsel %vm11577_vm2, %v12293_v26, %v12292_v56 }
0x154e   :  { %21236 = vst [vmem:[#allocation36_spill] sm:$0xff] %v19957_v8  ;;  %15028 = vpow2.f32 %v12205_v21  ;;  %vm11488_vm12 = vcmp.eq.s32.totalorder %v19844_v15, %v19957_v8 }
0x154f   :  { %14545 = vmatprep.mubr.msk.f32.mxu0 %vm11488_vm12, %v15122_v18 }
0x1551   :  { %v20020_v55 = vpop.permute.xlu0 %11463 }
0x1552   :  { %21240 = vst [vmem:[#allocation39_spill] sm:$0xff] %v20020_v55  ;;  %vm11490_vm4 = vcmp.eq.s32.totalorder %v19844_v15, %v20020_v55 }
0x155b   :  { %v15029_v1 = vpop.eup %15028 }
0x155c   :  { %14587 = vmatmul.mubr.f32.vlgmr.msra.gmra.mxu1 %v15029_v1 }
0x155d   :  { %14625 = vmatpush3.msra.mxu1 %v21229_v17  ;;  %14656 = vmatprep.mubr.msk.f32.mxu1 %vm21237_vm13, %v21221_v16 }
0x155e   :  { %14626 = vmatprep.subr.mxu1 %v21221_v16 }
0x155f   :  { %14627 = vmatpush3.msra.mxu1 %v21230_v7 }
0x1560   :  { %14628 = vmatprep.subr.mxu1 %v21221_v16 }
0x1561   :  { %14629 = vmatpush3.msra.mxu1 %v21231_v10 }
0x1562   :  { %14630 = vmatprep.subr.mxu1 %v21221_v16 }
0x1563   :  { %14631 = vmatpush3.msra.mxu1 %v21232_v45 }
0x1564   :  { %14632 = vmatprep.subr.mxu1 %v21221_v16 }
0x1565   :  { %14633 = vmatpush3.msra.mxu1 %v21233_v25 }
0x1566   :  { %14634 = vmatprep.subr.mxu1 %v21221_v16 }
0x1567   :  { %14635 = vmatpush3.msra.mxu1 %v21234_v49 }
0x1568   :  { %14636 = vmatprep.subr.mxu1 %v21221_v16 }
0x1569   :  { %14637 = vmatpush3.msra.mxu1 %v21235_v12 }
0x156a   :  { %14638 = vmatprep.subr.mxu1 %v21221_v16 }
0x156b   :  { %14639 = vmatpush3.msra.mxu1 %v19784_v36 }
0x156c   :  { %14640 = vmatprep.subr.mxu1 %v21221_v16 }
0x156d   :  { %14641 = vmatpush3.msra.mxu1 %v19790_v40 }
0x156e   :  { %14642 = vmatprep.subr.mxu1 %v21221_v16 }
0x156f   :  { %14643 = vmatpush3.msra.mxu1 %v19798_v3 }
0x1570   :  { %14644 = vmatprep.subr.mxu1 %v21221_v16 }
0x1571   :  { %14645 = vmatpush3.msra.mxu1 %v19806_v22 }
0x1572   :  { %14646 = vmatprep.subr.mxu1 %v21221_v16 }
0x1573   :  { %14647 = vmatpush3.msra.mxu1 %v19813_v31 }
0x1574   :  { %14648 = vmatprep.subr.mxu1 %v21221_v16 }
0x1575   :  { %14649 = vmatpush3.msra.mxu1 %v19819_v42 }
0x1576   :  { %14650 = vmatprep.subr.mxu1 %v21221_v16 }
0x1577   :  { %14651 = vmatpush3.msra.mxu1 %v19831_v51 }
0x1578   :  { %14652 = vmatprep.subr.mxu1 %v21221_v16 }
0x1579   :  { %14653 = vmatpush3.msra.mxu1 %v19837_v2 }
0x157a   :  { %14654 = vmatprep.subr.mxu1 %v21221_v16 }
0x157b   :  { %14655 = vmatpush3.msra.mxu1 %v19850_v33 }
0x157c   :  { %14694 = vmatprep.subr.mxu1 %v21221_v16 }
0x161c   :  { %v12273_v14 = vpop.f32.mrf.mxu1 }
0x161d   :  { %v12277_v6 = vmax.f32 %v12273_v14, 1e-30 }
0x161e   :  { %v14588_v38 = vpop.f32.mrf.mxu1 }
0x161f   :  { %15030 = vlog2.f32 %v12277_v6  ;;  %v21238_v6 = vld [vmem:[#allocation6_spill] sm:$0xff] }
0x1620   :  { %v11454_v38 = vrot.slane %v21223_v20, %v21238_v6 }
0x162c   :  { %v15031_v59 = vpop.eup %15030 }
0x162d   :  { %v12279_v39 = vmul.f32 0.6931472, %v15031_v59 }
0x162f   :  { %v12280_v21 = vadd.f32 %v12279_v39, %v12203_v57  ;;  %v20022_v57 = vpop.permute.xlu0 %11470 }
0x1630   :  { %vm11491_vm0 = vcmp.eq.s32.totalorder %v19844_v15, %v20022_v57 }
0x1631   :  { %v12296_v1 = vadd.f32 %v12294_v50, %v12280_v21 }
0x1633   :  { %v20014_v14 = vsel %vm12302_vm14, %v12296_v1, %v19756_v5  ;;  %v20028_v44 = vpop.permute.xlu0 %11477 }
0x1634   :  { %12304 = vmax.xlane.f32.xlu1 %v20014_v14  ;;  %vm11492_vm8 = vcmp.eq.s32.totalorder %v19844_v15, %v20028_v44 }
0x1637   :  { %v20048_v20 = vpop.permute.xlu0 %11484 }
0x1638   :  { %vm11493_vm14 = vcmp.eq.s32.totalorder %v19844_v15, %v20048_v20 }
0x1645   :  { %11456 = vbcast.lane.b32.xlu1 %v11454_v38, 256 }
0x1649   :  { %12400 = vperm.xlu1 %14827, %v21239_v4  }
0x16bd   :  { %v20024_v43 = vpop.xlane.xlu1 %12304 }
0x16be   :  { %v12306_v5 = vsub.f32 %v20014_v14, %v20024_v43 }
0x16c0   :  { %v12307_v53 = vmul.f32 1.442695, %v12306_v5  ;;  %v12387_v5 = vrot.slane %v19699_v24, 7 }
0x16c1   :  { %v20030_v0 = vpop.permute.xlu1 %11456 }
0x16c2   :  { %15032 = vpow2.f32 %v12307_v53  ;;  %vm11489_vm15 = vcmp.eq.s32.totalorder %v19844_v15, %v20030_v0  ;;  %v12389_v53 = vrot.slane %v19711_v27, 6 }
0x16c3   :  { %14546 = vmatmul.mubr.msk.f32.gmra.mxu0 %vm11489_vm15, %v15122_v18 }
0x16c4   :  { %14548 = vmatprep.mubr.msk.f32.mxu0 %vm11490_vm4, %v15122_v18 }
0x16c7   :  { %14549 = vmatmul.mubr.msk.f32.gmra.mxu0 %vm11491_vm0, %v15122_v18 }
0x16c8   :  { %14551 = vmatprep.mubr.msk.f32.mxu0 %vm11492_vm8, %v15122_v18 }
0x16cb   :  { %14552 = vmatmul.mubr.msk.f32.gmra.mxu0 %vm11493_vm14, %v15122_v18  ;;  %v20100_v18 = vpop.f32.mrf.mxu0 }
0x16cc   :  { %14621 = vmatprep.mubr.msk.f32.mxu0 %vm21237_vm13, %v21221_v16  ;;  %21241 = vst [vmem:[#allocation38_spill] sm:$0xff] %v20100_v18  ;;  %v12401_v18 = vpop.permute.xlu1 %12400 }
0x16cd   :  { %v20102_v9 = vpop.f32.mrf.mxu0  ;;  %vm12402_vm5 = vcmp.eq.s32.totalorder %v12401_v18, 1  ;;  %v12493_v18 = vrot.slane %v19737_v34, 5 }
0x16ce   :  { %21242 = vst [vmem:[#allocation41_spill] sm:$0xff] %v20102_v9 }
0x16cf   :  { %v15033_v37 = vpop.eup %15032 }
0x16d0   :  { %14622 = vmatmul.mubr.f32.vlgmr.msra.gmra.mxu0 %v15033_v37  ;;  %v12388_v37 = vsel %vm11565_vm6, %v12387_v5, %v12386_v47 }
0x16d1   :  { %14660 = vmatpush3.msra.mxu0 %v21229_v17  ;;  %14691 = vmatprep.mubr.msk.f32.mxu0 %vm21237_vm13, %v21221_v16 }
0x16d2   :  { %14661 = vmatprep.subr.mxu0 %v21221_v16 }
0x16d3   :  { %14662 = vmatpush3.msra.mxu0 %v21230_v7 }
0x16d4   :  { %14663 = vmatprep.subr.mxu0 %v21221_v16 }
0x16d5   :  { %14664 = vmatpush3.msra.mxu0 %v21231_v10 }
0x16d6   :  { %14665 = vmatprep.subr.mxu0 %v21221_v16 }
0x16d7   :  { %14666 = vmatpush3.msra.mxu0 %v21232_v45 }
0x16d8   :  { %14667 = vmatprep.subr.mxu0 %v21221_v16 }
0x16d9   :  { %14668 = vmatpush3.msra.mxu0 %v21233_v25 }
0x16da   :  { %14669 = vmatprep.subr.mxu0 %v21221_v16 }
0x16db   :  { %14670 = vmatpush3.msra.mxu0 %v21234_v49 }
0x16dc   :  { %14671 = vmatprep.subr.mxu0 %v21221_v16 }
0x16dd   :  { %14672 = vmatpush3.msra.mxu0 %v21235_v12 }
0x16de   :  { %14673 = vmatprep.subr.mxu0 %v21221_v16 }
0x16df   :  { %14674 = vmatpush3.msra.mxu0 %v19784_v36 }
0x16e0   :  { %14675 = vmatprep.subr.mxu0 %v21221_v16 }
0x16e1   :  { %14676 = vmatpush3.msra.mxu0 %v19790_v40 }
0x16e2   :  { %14677 = vmatprep.subr.mxu0 %v21221_v16 }
0x16e3   :  { %14678 = vmatpush3.msra.mxu0 %v19798_v3 }
0x16e4   :  { %14679 = vmatprep.subr.mxu0 %v21221_v16 }
0x16e5   :  { %14680 = vmatpush3.msra.mxu0 %v19806_v22 }
0x16e6   :  { %14681 = vmatprep.subr.mxu0 %v21221_v16 }
0x16e7   :  { %14682 = vmatpush3.msra.mxu0 %v19813_v31 }
0x16e8   :  { %14683 = vmatprep.subr.mxu0 %v21221_v16 }
0x16e9   :  { %14684 = vmatpush3.msra.mxu0 %v19819_v42 }
0x16ea   :  { %14685 = vmatprep.subr.mxu0 %v21221_v16 }
0x16eb   :  { %14686 = vmatpush3.msra.mxu0 %v19831_v51 }
0x16ec   :  { %14687 = vmatprep.subr.mxu0 %v21221_v16 }
0x16ed   :  { %14688 = vmatpush3.msra.mxu0 %v19837_v2 }
0x16ee   :  { %14689 = vmatprep.subr.mxu0 %v21221_v16 }
0x16ef   :  { %14690 = vmatpush3.msra.mxu0 %v19850_v33 }
0x16f0   :  { %14729 = vmatprep.subr.mxu0 %v21221_v16 }
0x1783   :  { %v20104_v59 = vpop.f32.mrf.mxu0 }
0x1785   :  { %v20106_v11 = vpop.f32.mrf.mxu0 }
0x1786   :  { %21243 = vst [vmem:[#allocation42_spill] sm:$0xff] %v20106_v11  ;;  %v12393_v11 = vrot.slane %v19737_v34, 4 }
0x1787   :  { %v20108_v26 = vpop.f32.mrf.mxu0 }
0x1789   :  { %v20110_v39 = vpop.f32.mrf.mxu0 }
0x178a   :  { %21244 = vst [vmem:[#allocation45_spill] sm:$0xff] %v20110_v39  ;;  %v12390_v39 = vsel %vm11568_vm3, %v12389_v53, %v12388_v37  ;;  %v15124_v53 = vmov 3  }
0x178b   :  { %v20112_v56 = vpop.f32.mrf.mxu0  ;;  %14828 = vset.pattern.permute.xlu1 %v15124_v53 }
0x178c   :  { %12500 = vperm.xlu1 %14828, %v21239_v4  }
0x178d   :  { %v20114_v21 = vpop.f32.mrf.mxu0 }
0x1790   :  { %v12375_v50 = vpop.f32.mrf.mxu0 }
0x1791   :  { %v12379_v1 = vmax.f32 %v12375_v50, 1e-30  ;;  %v12392_v50 = vsel %vm11571_vm7, %v12391_v35, %v12390_v39 }
0x1792   :  { %v14623_v38 = vpop.f32.mrf.mxu0  ;;  %v12394_v29 = vsel %vm11574_vm9, %v12393_v11, %v12392_v50  ;;  %v12495_v50 = vrot.slane %v19733_v62, 4 }
0x1793   :  { %15034 = vlog2.f32 %v12379_v1  ;;  %v12395_v1 = vrot.slane %v19733_v62, 3 }
0x1795   :  { %v12396_v47 = vsel %vm11577_vm2, %v12395_v1, %v12394_v29 }
0x17a0   :  { %v15035_v55 = vpop.eup %15034 }
0x17a1   :  { %v12381_v38 = vmul.f32 0.6931472, %v15035_v55 }
0x17a3   :  { %v12382_v9 = vadd.f32 %v12381_v38, %v20024_v43 }
0x17a5   :  { %v12398_v5 = vadd.f32 %v12396_v47, %v12382_v9 }
0x17a7   :  { %v20131_v8 = vsel %vm12402_vm5, %v12398_v5, %v20014_v14  ;;  %v12491_v14 = vrot.slane %v19715_v63, 6 }
0x17a8   :  { %12404 = vmax.xlane.f32.xlu0 %v20131_v8 }
0x1807   :  { %v12501_v38 = vpop.permute.xlu1 %12500 }
0x1808   :  { %vm12502_vm5 = vcmp.eq.s32.totalorder %v12501_v38, 1  ;;  %v12591_v38 = vrot.slane %v19715_v63, 7 }
0x1831   :  { %v12405_v35 = vpop.xlane.xlu0 %12404 }
0x1832   :  { %v12406_v55 = vsub.f32 %v20131_v8, %v12405_v35 }
0x1834   :  { %v12407_v39 = vmul.f32 1.442695, %v12406_v55  ;;  %v15125_v55 = vmov 4  }
0x1835   :  { %14829 = vset.pattern.permute.xlu0 %v15125_v55  ;;  %v12595_v55 = vrot.slane %v19733_v62, 5 }
0x1836   :  { %15036 = vpow2.f32 %v12407_v39  ;;  %12600 = vperm.xlu0 %14829, %v21239_v4  }
0x1843   :  { %v15037_v11 = vpop.eup %15036 }
0x1844   :  { %14657 = vmatmul.mubr.f32.vlgmr.msra.gmra.mxu1 %v15037_v11 }
0x1845   :  { %14695 = vmatpush3.msra.mxu1 %v21229_v17  ;;  %14726 = vmatprep.mubr.msk.f32.mxu1 %vm21237_vm13, %v21221_v16 }
0x1846   :  { %14696 = vmatprep.subr.mxu1 %v21221_v16 }
0x1847   :  { %14697 = vmatpush3.msra.mxu1 %v21230_v7 }
0x1848   :  { %14698 = vmatprep.subr.mxu1 %v21221_v16 }
0x1849   :  { %14699 = vmatpush3.msra.mxu1 %v21231_v10 }
0x184a   :  { %14700 = vmatprep.subr.mxu1 %v21221_v16 }
0x184b   :  { %14701 = vmatpush3.msra.mxu1 %v21232_v45  ;;  %v12486_v45 = vrot.slane %v19673_v54, 1 }
0x184c   :  { %14702 = vmatprep.subr.mxu1 %v21221_v16 }
0x184d   :  { %14703 = vmatpush3.msra.mxu1 %v21233_v25  ;;  %v12487_v25 = vsel %vm11562_vm1, %v12486_v45, %v19761_v30  ;;  %v20218_v45 = vld [vmem:[%s20644_s19 + $0x60] sm:$0xff] }
0x184e   :  { %14704 = vmatprep.subr.mxu1 %v21221_v16 }
0x184f   :  { %14705 = vmatpush3.msra.mxu1 %v21234_v49  ;;  %v12489_v49 = vrot.slane %v19711_v27, 7 }
0x1850   :  { %14706 = vmatprep.subr.mxu1 %v21221_v16 }
0x1851   :  { %14707 = vmatpush3.msra.mxu1 %v21235_v12  ;;  %v12488_v12 = vsel %vm11565_vm6, %v19699_v24, %v12487_v25  ;;  %v20225_v25 = vld [vmem:[%s20644_s19 + $0x58] sm:$0xff] }
0x1852   :  { %14708 = vmatprep.subr.mxu1 %v21221_v16  ;;  %v12490_v43 = vsel %vm11568_vm3, %v12489_v49, %v12488_v12  ;;  %v20232_v49 = vld [vmem:[%s20644_s19 + $0x50] sm:$0xff]  ;;  %v20239_v12 = vld [vmem:[%s20644_s19 + $0x48] sm:$0xff] }
0x1853   :  { %14709 = vmatpush3.msra.mxu1 %v19784_v36  ;;  %v12492_v37 = vsel %vm11571_vm7, %v12491_v14, %v12490_v43 }
0x1854   :  { %14710 = vmatprep.subr.mxu1 %v21221_v16  ;;  %v12494_v30 = vsel %vm11574_vm9, %v12493_v18, %v12492_v37 }
0x1855   :  { %14711 = vmatpush3.msra.mxu1 %v19790_v40  ;;  %v12496_v47 = vsel %vm11577_vm2, %v12495_v50, %v12494_v30  ;;  %v12588_v50 = vrot.slane %v19699_v24, 1 }
0x1856   :  { %14712 = vmatprep.subr.mxu1 %v21221_v16 }
0x1857   :  { %14713 = vmatpush3.msra.mxu1 %v19798_v3 }
0x1858   :  { %14714 = vmatprep.subr.mxu1 %v21221_v16 }
0x1859   :  { %14715 = vmatpush3.msra.mxu1 %v19806_v22 }
0x185a   :  { %14716 = vmatprep.subr.mxu1 %v21221_v16 }
0x185b   :  { %14717 = vmatpush3.msra.mxu1 %v19813_v31 }
0x185c   :  { %14718 = vmatprep.subr.mxu1 %v21221_v16 }
0x185d   :  { %14719 = vmatpush3.msra.mxu1 %v19819_v42 }
0x185e   :  { %14720 = vmatprep.subr.mxu1 %v21221_v16 }
0x185f   :  { %14721 = vmatpush3.msra.mxu1 %v19831_v51 }
0x1860   :  { %14722 = vmatprep.subr.mxu1 %v21221_v16 }
0x1861   :  { %14723 = vmatpush3.msra.mxu1 %v19837_v2 }
0x1862   :  { %14724 = vmatprep.subr.mxu1 %v21221_v16 }
0x1863   :  { %14725 = vmatpush3.msra.mxu1 %v19850_v33 }
0x1864   :  { %14764 = vmatprep.subr.mxu1 %v21221_v16 }
0x1904   :  { %v12475_v17 = vpop.f32.mrf.mxu1 }
0x1905   :  { %v12479_v7 = vmax.f32 %v12475_v17, 1e-30 }
0x1906   :  { %v14658_v10 = vpop.f32.mrf.mxu1 }
0x1907   :  { %15038 = vlog2.f32 %v12479_v7  ;;  %v20204_v7 = vld [vmem:[%s20644_s19 + $0x70] sm:$0xff]  ;;  %v20211_v10 = vld [vmem:[%s20644_s19 + $0x68] sm:$0xff] }
0x1914   :  { %v15039_v9 = vpop.eup %15038 }
0x1915   :  { %v12481_v1 = vmul.f32 0.6931472, %v15039_v9  ;;  %v12586_v9 = vrot.slane %v19673_v54, 2 }
0x1917   :  { %v12482_v29 = vadd.f32 %v12481_v1, %v12405_v35  ;;  %v12587_v37 = vsel %vm11562_vm1, %v12586_v9, %v19765_v13  ;;  %v15126_v9 = vmov 5  }
0x1918   :  { %v12589_v1 = vsel %vm11565_vm6, %v12588_v50, %v12587_v37  ;;  %14830 = vset.pattern.permute.xlu1 %v15126_v9 }
0x1919   :  { %v12498_v5 = vadd.f32 %v12496_v47, %v12482_v29  ;;  %v12590_v30 = vsel %vm11568_vm3, %v19711_v27, %v12589_v1  ;;  %v12593_v29 = vrot.slane %v19737_v34, 6 }
0x191b   :  { %v20184_v53 = vsel %vm12502_vm5, %v12498_v5, %v20131_v8  ;;  %v20195_v8 = vld [vmem:[%s20644_s19 + $0x78] sm:$0xff]  ;;  %v12592_v5 = vsel %vm11571_vm7, %v12591_v38, %v12590_v30 }
0x191c   :  { %12504 = vmax.xlane.f32.xlu1 %v20184_v53  ;;  %v12594_v13 = vsel %vm11574_vm9, %v12593_v29, %v12592_v5  ;;  %v20337_v5 = vsel %vm11487_vm11, 1.0, %v21221_v16  ;;  %vm11883_vm11 = vcmask 1046528  }
0x19a5   :  { %v20188_v39 = vpop.xlane.xlu1 %12504 }
0x19a6   :  { %v12506_v11 = vsub.f32 %v20184_v53, %v20188_v39 }
0x19a8   :  { %v12507_v17 = vmul.f32 1.442695, %v12506_v11 }
0x19aa   :  { %15040 = vpow2.f32 %v12507_v17  ;;  %v12601_v17 = vpop.permute.xlu0 %12600 }
0x19ab   :  { %vm12602_vm5 = vcmp.eq.s32.totalorder %v12601_v17, 1  ;;  %v20351_v17 = vsel %vm11491_vm0, 1.0, %v21221_v16 }
0x19b7   :  { %v15041_v35 = vpop.eup %15040 }
0x19b8   :  { %14692 = vmatmul.mubr.f32.vlgmr.msra.gmra.mxu0 %v15041_v35 }
0x19b9   :  { %14730 = vmatpush3.msra.mxu0 %v20195_v8  ;;  %14761 = vmatprep.mubr.msk.f32.mxu0 %vm21237_vm13, %v21221_v16 }
0x19ba   :  { %14731 = vmatprep.subr.mxu0 %v21221_v16 }
0x19bb   :  { %14732 = vmatpush3.msra.mxu0 %v20204_v7 }
0x19bc   :  { %14733 = vmatprep.subr.mxu0 %v21221_v16 }
0x19bd   :  { %14734 = vmatpush3.msra.mxu0 %v20211_v10 }
0x19be   :  { %14735 = vmatprep.subr.mxu0 %v21221_v16 }
0x19bf   :  { %14736 = vmatpush3.msra.mxu0 %v20218_v45 }
0x19c0   :  { %14737 = vmatprep.subr.mxu0 %v21221_v16 }
0x19c1   :  { %14738 = vmatpush3.msra.mxu0 %v20225_v25 }
0x19c2   :  { %14739 = vmatprep.subr.mxu0 %v21221_v16 }
0x19c3   :  { %14740 = vmatpush3.msra.mxu0 %v20232_v49 }
0x19c4   :  { %14741 = vmatprep.subr.mxu0 %v21221_v16 }
0x19c5   :  { %14742 = vmatpush3.msra.mxu0 %v20239_v12 }
0x19c6   :  { %14743 = vmatprep.subr.mxu0 %v21221_v16 }
0x19c7   :  { %14744 = vmatpush3.msra.mxu0 %v19784_v36 }
0x19c8   :  { %14745 = vmatprep.subr.mxu0 %v21221_v16 }
0x19c9   :  { %14746 = vmatpush3.msra.mxu0 %v19790_v40 }
0x19ca   :  { %14747 = vmatprep.subr.mxu0 %v21221_v16 }
0x19cb   :  { %14748 = vmatpush3.msra.mxu0 %v19798_v3 }
0x19cc   :  { %14749 = vmatprep.subr.mxu0 %v21221_v16 }
0x19cd   :  { %14750 = vmatpush3.msra.mxu0 %v19806_v22 }
0x19ce   :  { %14751 = vmatprep.subr.mxu0 %v21221_v16 }
0x19cf   :  { %14752 = vmatpush3.msra.mxu0 %v19813_v31 }
0x19d0   :  { %14753 = vmatprep.subr.mxu0 %v21221_v16 }
0x19d1   :  { %14754 = vmatpush3.msra.mxu0 %v19819_v42 }
0x19d2   :  { %14755 = vmatprep.subr.mxu0 %v21221_v16 }
0x19d3   :  { %14756 = vmatpush3.msra.mxu0 %v19831_v51 }
0x19d4   :  { %14757 = vmatprep.subr.mxu0 %v21221_v16 }
0x19d5   :  { %14758 = vmatpush3.msra.mxu0 %v19837_v2 }
0x19d6   :  { %14759 = vmatprep.subr.mxu0 %v21221_v16 }
0x19d7   :  { %14760 = vmatpush3.msra.mxu0 %v19850_v33 }
0x1a78   :  { %v12575_v14 = vpop.f32.mrf.mxu0 }
0x1a79   :  { %v12579_v43 = vmax.f32 %v12575_v14, 1e-30  ;;  %v12596_v14 = vsel %vm11577_vm2, %v12595_v55, %v12594_v13  ;;  %v20343_v55 = vsel %vm11489_vm15, 1.0, %v21221_v16  ;;  %v11588_v13 = vmul.f32 %v20351_v17, %v19715_v63 }
0x1a7a   :  { %v14693_v18 = vpop.f32.mrf.mxu0  ;;  %v11863_v28 = vrot.slane %v20343_v55, 1 }
0x1a7b   :  { %15042 = vlog2.f32 %v12579_v43 }
0x1a88   :  { %v15043_v47 = vpop.eup %15042 }
0x1a89   :  { %v12581_v11 = vmul.f32 0.6931472, %v15043_v47  ;;  %v21245_v47 = vmov 0  }
0x1a8b   :  { %v12582_v35 = vadd.f32 %v12581_v11, %v20188_v39  ;;  %v12693_v39 = vrot.slane %v19737_v34, 7  ;;  %v11584_v11 = vmul.f32 %v20337_v5, %v19689_v23  ;;  %v20361_v23 = vsel %vm11492_vm8, 1.0, %v21221_v16 }
0x1a8c   :  { %v11589_v0 = vmul.f32 %v20361_v23, %v19737_v34 }
0x1a8d   :  { %v12598_v43 = vadd.f32 %v12596_v14, %v12582_v35  ;;  %v11878_v35 = vmul.f32 %v20104_v59, %v11863_v28  ;;  %v20370_v14 = vsel %vm11493_vm14, 1.0, %v21221_v16  ;;  %v11865_v59 = vrot.slane %v20351_v17, 1 }
0x1a8e   :  { %v11590_v44 = vmul.f32 %v20370_v14, %v19733_v62  ;;  %v11576_v20 = vrot.slane %v20370_v14, 1 }
0x1a8f   :  { %v20275_v18 = vsel %vm12602_vm5, %v12598_v43, %v20184_v53  ;;  %v11893_v57 = vsel %vm11883_vm11, %v11878_v35, 0.0  ;;  %v11880_v43 = vmul.f32 %v20108_v26, %v11865_v59  ;;  %v20388_v26 = vld [vmem:[%s20642_s4] sm:$0xff]  ;;  %s15129_s4 = smov 127  }
0x1a90   :  { %12604 = vmax.xlane.f32.xlu1 %v20275_v18 }
0x1aa1   :  { %12700 = vperm.xlu1 %14830, %v21239_v4  }
0x1b19   :  { %v12605_v37 = vpop.xlane.xlu1 %12604 }
0x1b1a   :  { %v12606_v50 = vsub.f32 %v20275_v18, %v12605_v37 }
0x1b1c   :  { %v12607_v1 = vmul.f32 1.442695, %v12606_v50  ;;  %v11882_v50 = vmul.f32 %v20112_v56, %v11576_v20  ;;  %v20399_v56 = vrot.slane %v20388_v26, %v21238_v6 }
0x1b1e   :  { %15044 = vpow2.f32 %v12607_v1 }
0x1b2b   :  { %v15045_v38 = vpop.eup %15044 }
0x1b2c   :  { %14727 = vmatmul.mubr.f32.vlgmr.msra.gmra.mxu1 %v15045_v38  ;;  %v11905_v38 = vsel %vm11883_vm11, %v11882_v50, 0.0 }
0x1b2d   :  { %14765 = vmatpush3.msra.mxu1 %v20195_v8  ;;  %14796 = vmatprep.mubr.msk.f32.mxu1 %vm21237_vm13, %v21221_v16 }
0x1b2e   :  { %14766 = vmatprep.subr.mxu1 %v21221_v16 }
0x1b2f   :  { %14767 = vmatpush3.msra.mxu1 %v20204_v7 }
0x1b30   :  { %14768 = vmatprep.subr.mxu1 %v21221_v16 }
0x1b31   :  { %14769 = vmatpush3.msra.mxu1 %v20211_v10  ;;  %v12695_v10 = vrot.slane %v19733_v62, 6 }
0x1b32   :  { %14770 = vmatprep.subr.mxu1 %v21221_v16 }
0x1b33   :  { %14771 = vmatpush3.msra.mxu1 %v20218_v45 }
0x1b34   :  { %14772 = vmatprep.subr.mxu1 %v21221_v16 }
0x1b35   :  { %14773 = vmatpush3.msra.mxu1 %v20225_v25  ;;  %v12701_v25 = vpop.permute.xlu1 %12700 }
0x1b36   :  { %14774 = vmatprep.subr.mxu1 %v21221_v16  ;;  %vm12702_vm13 = vcmp.eq.s32.totalorder %v12701_v25, 1 }
0x1b37   :  { %14775 = vmatpush3.msra.mxu1 %v20232_v49 }
0x1b38   :  { %14776 = vmatprep.subr.mxu1 %v21221_v16 }
0x1b39   :  { %14777 = vmatpush3.msra.mxu1 %v20239_v12 }
0x1b3a   :  { %14778 = vmatprep.subr.mxu1 %v21221_v16 }
0x1b3b   :  { %14779 = vmatpush3.msra.mxu1 %v19784_v36  ;;  %v15127_v36 = vmov 7  }
0x1b3c   :  { %14780 = vmatprep.subr.mxu1 %v21221_v16  ;;  %14832 = vset.pattern.permute.xlu1 %v15127_v36 }
0x1b3d   :  { %14781 = vmatpush3.msra.mxu1 %v19790_v40 }
0x1b3e   :  { %14782 = vmatprep.subr.mxu1 %v21221_v16 }
0x1b3f   :  { %14783 = vmatpush3.msra.mxu1 %v19798_v3 }
0x1b40   :  { %14784 = vmatprep.subr.mxu1 %v21221_v16 }
0x1b41   :  { %14785 = vmatpush3.msra.mxu1 %v19806_v22 }
0x1b42   :  { %14786 = vmatprep.subr.mxu1 %v21221_v16 }
0x1b43   :  { %14787 = vmatpush3.msra.mxu1 %v19813_v31  ;;  %v12686_v31 = vrot.slane %v19673_v54, 3 }
0x1b44   :  { %14788 = vmatprep.subr.mxu1 %v21221_v16 }
0x1b45   :  { %14789 = vmatpush3.msra.mxu1 %v19819_v42  ;;  %v12687_v42 = vsel %vm11562_vm1, %v12686_v31, %v19770_v52 }
0x1b46   :  { %14790 = vmatprep.subr.mxu1 %v21221_v16 }
0x1b47   :  { %14791 = vmatpush3.msra.mxu1 %v19831_v51  ;;  %v12688_v51 = vrot.slane %v19699_v24, 2 }
0x1b48   :  { %14792 = vmatprep.subr.mxu1 %v21221_v16 }
0x1b49   :  { %14793 = vmatpush3.msra.mxu1 %v19837_v2  ;;  %v12690_v2 = vrot.slane %v19711_v27, 1  ;;  %v12689_v53 = vsel %vm11565_vm6, %v12688_v51, %v12687_v42  ;;  %v20409_v42 = vrot.slane %v20388_v26, %v21224_v60  ;;  %v15128_v51 = vmov 6  }
0x1b4a   :  { %14794 = vmatprep.subr.mxu1 %v21221_v16  ;;  %14831 = vset.pattern.permute.xlu0 %v15128_v51  ;;  %v11861_v51 = vrot.slane %v20337_v5, 1 }
0x1b4b   :  { %14795 = vmatpush3.msra.mxu1 %v19850_v33  ;;  %v12691_v33 = vsel %vm11568_vm3, %v12690_v2, %v12689_v53  ;;  %12800 = vperm.xlu0 %14831, %v21239_v4   ;;  %v20415_v2 = vrot.slane %v20388_v26, %v21225_v61  ;;  %v11653_v53 = vrot.slane %v20388_v26, %v21227_v48 }
0x1b4c   :  { %v12692_v7 = vsel %vm11571_vm7, %v19715_v63, %v12691_v33  ;;  %v20423_v33 = vrot.slane %v20388_v26, %v21228_v41 }
0x1b4d   :  { %v12694_v52 = vsel %vm11574_vm9, %v12693_v39, %v12692_v7 }
0x1b4e   :  { %v12696_v12 = vsel %vm11577_vm2, %v12695_v10, %v12694_v52  ;;  %v12786_v52 = vrot.slane %v19673_v54, 4 }
0x1b4f   :  { %14833 = vset.pattern.permute.xlu0 %v21245_v47 }
0x1bc6   :  { %v12801_v59 = vpop.permute.xlu0 %12800 }
0x1bc7   :  { %vm12802_vm15 = vcmp.eq.s32.totalorder %v12801_v59, 1 }
0x1bec   :  { %v12675_v40 = vpop.f32.mrf.mxu1 }
0x1bed   :  { %v12679_v3 = vmax.f32 %v12675_v40, 1e-30 }
0x1bee   :  { %v14728_v22 = vpop.f32.mrf.mxu1 }
0x1bef   :  { %15046 = vlog2.f32 %v12679_v3  ;;  %v20394_v3 = vrot.slane %v20388_v26, %v21222_v19  ;;  %v21247_v22 = vld [vmem:[#allocation4_spill] sm:$0xff] }
0x1bf0   :  { %v20404_v31 = vrot.slane %v20388_v26, %v21247_v22 }
0x1bfc   :  { %v15047_v8 = vpop.eup %15046 }
0x1bfd   :  { %v12681_v45 = vmul.f32 0.6931472, %v15047_v8 }
0x1bff   :  { %v12682_v49 = vadd.f32 %v12681_v45, %v12605_v37  ;;  %v11899_v37 = vsel %vm11883_vm11, %v11880_v43, 0.0 }
0x1c01   :  { %v12698_v30 = vadd.f32 %v12696_v12, %v12682_v49  ;;  %v12787_v49 = vsel %vm11562_vm1, %v12786_v52, %v19775_v58  ;;  %v12788_v12 = vrot.slane %v19699_v24, 3 }
0x1c03   :  { %v20328_v29 = vsel %vm12702_vm13, %v12698_v30, %v20275_v18  ;;  %v11866_v18 = vrot.slane %v20361_v23, 1  ;;  %v12790_v30 = vrot.slane %v19711_v27, 2 }
0x1c04   :  { %12704 = vmax.xlane.f32.xlu1 %v20328_v29 }
0x1c05   :  { %v11881_v9 = vmul.f32 %v11866_v18, %v20114_v21  ;;  %v21246_v21 = vld [vmem:[#allocation3_spill] sm:$0xff] }
0x1c06   :  { %v11611_v40 = vrot.slane %v20388_v26, %v21246_v21 }
0x1c07   :  { %v11902_v1 = vsel %vm11883_vm11, %v11881_v9, 0.0  ;;  %v20444_v9 = vsel %vm11486_vm10, 1.0, %v21221_v16  ;;  %vm12028_vm10 = vcmask 56320  }
0x1c08   :  { %v11583_v50 = vmul.f32 %v20444_v9, %v19677_v46 }
0x1c15   :  { %12900 = vperm.xlu1 %14832, %v21239_v4  }
0x1c19   :  { %14834 = vset.pattern.permute.xlu1 %v21245_v47  ;;  %v12789_v47 = vsel %vm11565_vm6, %v12788_v12, %v12787_v49  ;;  %v21252_v49 = vld [vmem:[#allocation42_spill] sm:$0xff] }
0x1c1a   :  { %v12791_v28 = vsel %vm11568_vm3, %v12790_v30, %v12789_v47  ;;  %v21253_v47 = vld [vmem:[#allocation45_spill] sm:$0xff] }
0x1c39   :  { %11593 = vadd.xlane.f32.xlu1 %v11584_v11  ;;  %v12792_v11 = vrot.slane %v19715_v63, 1 }
0x1c3d   :  { %11601 = vadd.xlane.f32.xlu1 %v11588_v13  ;;  %v12793_v13 = vsel %vm11571_vm7, %v12792_v11, %v12791_v28 }
0x1c3e   :  { %v12794_v58 = vsel %vm11574_vm9, %v19737_v34, %v12793_v13 }
0x1c41   :  { %11894 = vadd.xlane.f32.xlu1 %v11893_v57  ;;  %v12795_v57 = vrot.slane %v19733_v62, 7 }
0x1c43   :  { %v12796_v43 = vsel %vm11577_vm2, %v12795_v57, %v12794_v58 }
0x1c45   :  { %11603 = vadd.xlane.f32.xlu1 %v11589_v0 }
0x1c49   :  { %11605 = vadd.xlane.f32.xlu1 %v11590_v44 }
0x1c4d   :  { %11900 = vadd.xlane.f32.xlu1 %v11899_v37 }
0x1c51   :  { %11903 = vadd.xlane.f32.xlu1 %v11902_v1 }
0x1c55   :  { %11906 = vadd.xlane.f32.xlu1 %v11905_v38  ;;  %v20456_v38 = vsel %vm11488_vm12, 1.0, %v21221_v16  ;;  %vm21255_vm12 = vcmask 1041409  }
0x1c56   :  { %v11585_v32 = vmul.f32 %v20456_v38, %v19673_v54  ;;  %vm21257_vm0 = vmmov %vm21255_vm12 }
0x1c57   :  { %vm21258_vm8 = vmmov %vm21257_vm0 }
0x1c58   :  { %vm21259_vm14 = vmmov %vm21257_vm0 }
0x1c66   :  { %11613 = vbcast.lane.b32.xlu1 %v11611_v40, 256 }
0x1c6a   :  { %11627 = vbcast.lane.b32.xlu1 %v20394_v3, 256 }
0x1c6e   :  { %11634 = vbcast.lane.b32.xlu1 %v20399_v56, 256 }
0x1c72   :  { %11910 = vbcast.lane.b32.xlu1 %v11611_v40, 257  ;;  %v11860_v40 = vrot.slane %v20444_v9, 1 }
0x1c76   :  { %11914 = vbcast.lane.b32.xlu1 %v20404_v31, 257 }
0x1c7a   :  { %11641 = vbcast.lane.b32.xlu1 %v20409_v42, 256 }
0x1c7e   :  { %11648 = vbcast.lane.b32.xlu1 %v20415_v2, 256 }
0x1c82   :  { %11655 = vbcast.lane.b32.xlu1 %v11653_v53, 256 }
0x1c86   :  { %11662 = vbcast.lane.b32.xlu1 %v20423_v33, 256 }
0x1c8a   :  { %11934 = vbcast.lane.b32.xlu1 %v11653_v53, 257  ;;  %v21249_v53 = vld [vmem:[#allocation41_spill] sm:$0xff] }
0x1c8b   :  { %v11875_v46 = vmul.f32 %v11860_v40, %v21249_v53 }
0x1c8d   :  { %v12705_v4 = vpop.xlane.xlu1 %12704 }
0x1c8e   :  { %v12706_v39 = vsub.f32 %v20328_v29, %v12705_v4 }
0x1c90   :  { %v12707_v8 = vmul.f32 1.442695, %v12706_v39 }
0x1c91   :  { %v20483_v13 = vpop.permute.xlu1 %12900 }
0x1c92   :  { %15048 = vpow2.f32 %v12707_v8  ;;  %v11884_v8 = vsel %vm11883_vm11, %v11875_v46, 0.0 }
0x1c9f   :  { %v15049_v7 = vpop.eup %15048 }
0x1ca0   :  { %14762 = vmatmul.mubr.f32.vlgmr.msra.gmra.mxu0 %v15049_v7 }
0x1d60   :  { %v12775_v10 = vpop.f32.mrf.mxu0 }
0x1d61   :  { %v12779_v45 = vmax.f32 %v12775_v10, 1e-30  ;;  %v20471_v10 = vsel %vm11490_vm4, 1.0, %v21221_v16  ;;  %vm12902_vm4 = vcmp.eq.s32.totalorder %v20483_v13, 1 }
0x1d62   :  { %v14763_v25 = vpop.f32.mrf.mxu0  ;;  %v11587_v52 = vmul.f32 %v20471_v10, %v19711_v27  ;;  %v11864_v16 = vrot.slane %v20471_v10, 1 }
0x1d63   :  { %15050 = vlog2.f32 %v12779_v45  ;;  %v11862_v25 = vrot.slane %v20456_v38, 1 }
0x1d64   :  { %v11879_v11 = vmul.f32 %v11864_v16, %v21253_v47 }
0x1d65   :  { %v11877_v12 = vmul.f32 %v11862_v25, %v21252_v49 }
0x1d66   :  { %v11896_v28 = vsel %vm11883_vm11, %v11879_v11, 0.0 }
0x1d67   :  { %v11890_v30 = vsel %vm11883_vm11, %v11877_v12, 0.0 }
0x1d70   :  { %v15051_v35 = vpop.eup %15050 }
0x1d71   :  { %v12781_v0 = vmul.f32 0.6931472, %v15051_v35  ;;  %v11594_v35 = vpop.xlane.xlu1 %11593 }
0x1d73   :  { %v12782_v44 = vadd.f32 %v12781_v0, %v12705_v4  ;;  %v21250_v4 = vld [vmem:[#allocation38_spill] sm:$0xff] }
0x1d74   :  { %v11876_v39 = vmul.f32 %v21250_v4, %v11861_v51 }
0x1d75   :  { %v12798_v18 = vadd.f32 %v12796_v43, %v12782_v44  ;;  %v20485_v57 = vpop.xlane.xlu1 %11601 }
0x1d76   :  { %v11887_v45 = vsel %vm11883_vm11, %v11876_v39, 0.0 }
0x1d77   :  { %v20447_v37 = vsel %vm12802_vm15, %v12798_v18, %v20328_v29  ;;  %v11586_v29 = vmul.f32 %v20343_v55, %v19699_v24 }
0x1d78   :  { %12804 = vmax.xlane.f32.xlu0 %v20447_v37 }
0x1d79   :  { %v11895_v0 = vpop.xlane.xlu1 %11894 }
0x1d7c   :  { %11591 = vadd.xlane.f32.xlu0 %v11583_v50 }
0x1d7d   :  { %v20489_v59 = vpop.xlane.xlu1 %11603 }
0x1d80   :  { %11595 = vadd.xlane.f32.xlu0 %v11585_v32 }
0x1d81   :  { %v20492_v58 = vpop.xlane.xlu1 %11605 }
0x1d84   :  { %11597 = vadd.xlane.f32.xlu0 %v11586_v29 }
0x1d85   :  { %v20496_v44 = vpop.xlane.xlu1 %11900 }
0x1d88   :  { %11885 = vadd.xlane.f32.xlu0 %v11884_v8 }
0x1d89   :  { %v20499_v43 = vpop.xlane.xlu1 %11903 }
0x1d8c   :  { %11888 = vadd.xlane.f32.xlu0 %v11887_v45 }
0x1d8d   :  { %v20501_v18 = vpop.xlane.xlu1 %11906 }
0x1d90   :  { %11599 = vadd.xlane.f32.xlu0 %v11587_v52 }
0x1d94   :  { %11891 = vadd.xlane.f32.xlu0 %v11890_v30 }
0x1daa   :  { %12032 = vrot.lane.b32.xlu0 %v20388_v26, %s15129_s4 }
0x1dc9   :  { %11897 = vadd.xlane.f32.xlu0 %v11896_v28 }
0x1ddf   :  { %11620 = vbcast.lane.b32.xlu0 %v20404_v31, 256 }
0x1de3   :  { %11918 = vbcast.lane.b32.xlu0 %v20394_v3, 257 }
0x1de7   :  { %11922 = vbcast.lane.b32.xlu0 %v20399_v56, 257  ;;  %v11614_v56 = vpop.permute.xlu1 %11613 }
0x1deb   :  { %11926 = vbcast.lane.b32.xlu0 %v20409_v42, 257  ;;  %v11628_v42 = vpop.permute.xlu1 %11627 }
0x1def   :  { %11930 = vbcast.lane.b32.xlu0 %v20415_v2, 257 }
0x1df3   :  { %11938 = vbcast.lane.b32.xlu0 %v20423_v33, 257 }
0x1e01   :  { %v20503_v31 = vpop.xlane.xlu0 %12804 }
0x1e02   :  { %v12806_v3 = vsub.f32 %v20447_v37, %v20503_v31 }
0x1e04   :  { %v12807_v50 = vmul.f32 1.442695, %v12806_v3 }
0x1e05   :  { %v11592_v1 = vpop.xlane.xlu0 %11591 }
0x1e06   :  { %15052 = vpow2.f32 %v12807_v50  ;;  %v11672_v16 = vmul.f32 %v11614_v56, %v11592_v1 }
0x1e09   :  { %v11596_v32 = vpop.xlane.xlu0 %11595 }
0x1e0a   :  { %v11674_v2 = vmul.f32 %v11628_v42, %v11596_v32 }
0x1e0c   :  { %11695 = vperm.xlu1 %14834, %v11674_v2  }
0x1e0d   :  { %v11598_v40 = vpop.xlane.xlu0 %11597 }
0x1e11   :  { %v11886_v29 = vpop.xlane.xlu0 %11885 }
0x1e13   :  { %v15053_v33 = vpop.eup %15052 }
0x1e14   :  { %14797 = vmatmul.mubr.f32.vlgmr.msra.gmra.mxu1 %v15053_v33 }
0x1e15   :  { %v11889_v51 = vpop.xlane.xlu0 %11888 }
0x1e19   :  { %v11600_v53 = vpop.xlane.xlu0 %11599 }
0x1e1d   :  { %v11892_v46 = vpop.xlane.xlu0 %11891 }
0x1e21   :  { %v12033_v4 = vpop.permute.xlu0 %12032 }
0x1e22   :  { %v12035_v39 = vsel %vm12028_vm10, %v12033_v4, 0.0 }
0x1e23   :  { %v12036_v8 = vsub.f32 1.0, %v12035_v39 }
0x1e25   :  { %v12037_v7 = vmul.f32 %v20388_v26, %v12036_v8  ;;  %v11635_v26 = vpop.permute.xlu1 %11634 }
0x1e26   :  { %v11675_v1 = vmul.f32 %v11635_v26, %v11598_v40 }
0x1e27   :  { %v12041_v45 = vrot.slane %v12037_v7, %v21246_v21  ;;  %v12090_v25 = vrot.slane %v12037_v7, %v21228_v41  ;;  %v12048_v52 = vrot.slane %v12037_v7, %v21247_v22  ;;  %v12055_v49 = vrot.slane %v12037_v7, %v21222_v19 }
0x1e28   :  { %v12062_v12 = vrot.slane %v12037_v7, %v21238_v6  ;;  %v12069_v30 = vrot.slane %v12037_v7, %v21224_v60  ;;  %v12076_v22 = vrot.slane %v12037_v7, %v21225_v61  ;;  %v12083_v19 = vrot.slane %v12037_v7, %v21227_v48 }
0x1e29   :  { %12043 = vbcast.lane.b32.xlu0 %v12041_v45, 256  ;;  %12092 = vbcast.lane.b32.xlu1 %v12090_v25, 256  ;;  %v11911_v11 = vpop.permute.xlu1 %11910 }
0x1e2a   :  { %v11948_v2 = vmul.f32 %v11911_v11, %v11886_v29  ;;  %v21256_v11 = vld [vmem:[#allocation66_spill] sm:$0xff] }
0x1e2d   :  { %12050 = vbcast.lane.b32.xlu0 %v12048_v52, 256  ;;  %v11915_v6 = vpop.permute.xlu1 %11914 }
0x1e31   :  { %12057 = vbcast.lane.b32.xlu0 %v12055_v49, 256  ;;  %v11642_v32 = vpop.permute.xlu1 %11641  ;;  %v21254_v49 = vld [vmem:[#allocation2_spill] sm:$0xff] }
0x1e32   :  { %v11676_v48 = vmul.f32 %v11642_v32, %v11600_v53 }
0x1e35   :  { %12064 = vbcast.lane.b32.xlu0 %v12062_v12, 256  ;;  %v11649_v33 = vpop.permute.xlu1 %11648 }
0x1e39   :  { %12071 = vbcast.lane.b32.xlu0 %v12069_v30, 256  ;;  %v11656_v4 = vpop.permute.xlu1 %11655 }
0x1e3a   :  { %v11678_v39 = vmul.f32 %v11656_v4, %v20489_v59  ;;  %v20525_v59 = vsub.s32 %v19844_v15, %v21254_v49  ;;  %v12886_v15 = vrot.slane %v19673_v54, 5 }
0x1e3d   :  { %11689 = vperm.xlu0 %14833, %v11672_v16   ;;  %v11663_v40 = vpop.permute.xlu1 %11662 }
0x1e3e   :  { %v11679_v8 = vmul.f32 %v11663_v40, %v20492_v58 }
0x1e41   :  { %v11935_v29 = vpop.permute.xlu1 %11934 }
0x1e52   :  { %v11898_v21 = vpop.xlane.xlu0 %11897 }
0x1e56   :  { %v11621_v47 = vpop.permute.xlu0 %11620 }
0x1e57   :  { %v11673_v41 = vmul.f32 %v11621_v47, %v11594_v35 }
0x1e59   :  { %11692 = vperm.xlu0 %14833, %v11673_v41  }
0x1e5a   :  { %v11919_v28 = vpop.permute.xlu0 %11918 }
0x1e5b   :  { %v11950_v3 = vmul.f32 %v11919_v28, %v11892_v46  ;;  %v11949_v46 = vmul.f32 %v11915_v6, %v11889_v51  ;;  %v12888_v28 = vrot.slane %v19699_v24, 4  ;;  %v12892_v6 = vrot.slane %v19715_v63, 2  ;;  %v20551_v63 = vld [vmem:[%s20648_s21] ss:$0 sm:$0xff] }
0x1e5d   :  { %12078 = vbcast.lane.b32.xlu0 %v12076_v22, 256  ;;  %11971 = vperm.xlu1 %14834, %v11950_v3   ;;  %v12887_v22 = vsel %vm11562_vm1, %v12886_v15, %v21256_v11  ;;  %v12890_v3 = vrot.slane %v19711_v27, 3  ;;  %v11564_v11 = vrot.slane %v20343_v55, 5 }
0x1e5e   :  { %v11923_v50 = vpop.permute.xlu0 %11922 }
0x1e5f   :  { %v11951_v60 = vmul.f32 %v11923_v50, %v11895_v0  ;;  %v11677_v0 = vmul.f32 %v11649_v33, %v20485_v57 }
0x1e61   :  { %12085 = vbcast.lane.b32.xlu0 %v12083_v19, 256  ;;  %11974 = vperm.xlu1 %14834, %v11951_v60   ;;  %v12889_v19 = vsel %vm11565_vm6, %v12888_v28, %v12887_v22  ;;  %v12894_v60 = vrot.slane %v19737_v34, 1 }
0x1e62   :  { %v11927_v56 = vpop.permute.xlu0 %11926  ;;  %v12891_v50 = vsel %vm11568_vm3, %v12890_v3, %v12889_v19 }
0x1e63   :  { %v11952_v42 = vmul.f32 %v11927_v56, %v11898_v21 }
0x1e65   :  { %11977 = vperm.xlu1 %14834, %v11952_v42   ;;  %11698 = vperm.xlu0 %14833, %v11675_v1   ;;  %v12893_v1 = vsel %vm11571_vm7, %v12892_v6, %v12891_v50 }
0x1e66   :  { %v11931_v35 = vpop.permute.xlu0 %11930  ;;  %v12895_v54 = vsel %vm11574_vm9, %v12894_v60, %v12893_v1 }
0x1e67   :  { %v11953_v61 = vmul.f32 %v11931_v35, %v20496_v44  ;;  %v11954_v44 = vmul.f32 %v11935_v29, %v20499_v43  ;;  %v12896_v24 = vsel %vm11577_vm2, %v19733_v62, %v12895_v54  ;;  %v11567_v54 = vrot.slane %v20471_v10, 4 }
0x1e69   :  { %11980 = vperm.xlu1 %14834, %v11953_v61   ;;  %11965 = vperm.xlu0 %14833, %v11948_v2  }
0x1e6a   :  { %v11939_v51 = vpop.permute.xlu0 %11938 }
0x1e6d   :  { %11968 = vperm.xlu0 %14833, %v11949_v46  }
0x1e71   :  { %11701 = vperm.xlu0 %14833, %v11676_v48  }
0x1e75   :  { %11704 = vperm.xlu0 %14833, %v11677_v0  }
0x1e79   :  { %11707 = vperm.xlu0 %14833, %v11678_v39  }
0x1e7d   :  { %11710 = vperm.xlu0 %14833, %v11679_v8  }
0x1e81   :  { %11983 = vperm.xlu0 %14833, %v11954_v44  }
0x1e85   :  { %14835 = vset.pattern.permute.xlu0 %v15127_v36 }
0x1e87   :  { %v11696_v12 = vpop.permute.xlu1 %11695 }
0x1e88   :  { %v11723_v36 = vrot.slane %v11696_v12, %v20525_v59 }
0x1e9b   :  { %v12044_v53 = vpop.permute.xlu0 %12043  ;;  %v12093_v8 = vpop.permute.xlu1 %12092 }
0x1e9c   :  { %v12094_v33 = vmul.f32 %v20444_v9, %v12044_v53 }
0x1e9e   :  { %v12102_v39 = vrot.slane %v12094_v33, 4 }
0x1e9f   :  { %v12051_v7 = vpop.permute.xlu0 %12050 }
0x1ea0   :  { %v12095_v62 = vmul.f32 %v20337_v5, %v12051_v7  ;;  %v12103_v53 = vadd.f32 %v12102_v39, %v12094_v33  ;;  %v11573_v33 = vrot.slane %v20361_v23, 2 }
0x1ea2   :  { %v12108_v48 = vrot.slane %v12095_v62, 4 }
0x1ea3   :  { %v12058_v45 = vpop.permute.xlu0 %12057 }
0x1ea4   :  { %v12096_v61 = vmul.f32 %v20456_v38, %v12058_v45  ;;  %v12109_v44 = vadd.f32 %v12108_v48, %v12095_v62 }
0x1ea6   :  { %v12114_v0 = vrot.slane %v12096_v61, 4  ;;  %v12110_v12 = vrot.slane %v12109_v44, 2 }
0x1ea7   :  { %v12065_v25 = vpop.permute.xlu0 %12064 }
0x1ea8   :  { %v12097_v46 = vmul.f32 %v20343_v55, %v12065_v25  ;;  %v12115_v7 = vadd.f32 %v12114_v0, %v12096_v61  ;;  %v12101_v25 = vmul.f32 %v20370_v14, %v12093_v8  ;;  %v12111_v22 = vadd.f32 %v12110_v12, %v12109_v44 }
0x1ea9   :  { %v11570_v55 = vrot.slane %v20351_v17, 3 }
0x1eab   :  { %v12072_v57 = vpop.permute.xlu0 %12071 }
0x1eb8   :  { %v11690_v52 = vpop.permute.xlu0 %11689 }
0x1eb9   :  { %v11715_v16 = vrot.slane %v11690_v52, %v20525_v59 }
0x1ed4   :  { %v12875_v58 = vpop.f32.mrf.mxu1  ;;  %v11693_v30 = vpop.permute.xlu0 %11692 }
0x1ed5   :  { %v12879_v43 = vmax.f32 %v12875_v58, 1e-30  ;;  %v11719_v26 = vrot.slane %v11693_v30, %v20525_v59  ;;  %v12116_v30 = vrot.slane %v12115_v7, 2 }
0x1ed6   :  { %v14798_v21 = vpop.f32.mrf.mxu1 }
0x1ed7   :  { %15054 = vlog2.f32 %v12879_v43  ;;  %v11744_v47 = vsel %vm21255_vm12, %v11719_v26, %v11715_v16  ;;  %v12104_v43 = vrot.slane %v12103_v53, 2  ;;  %v12144_v26 = vrot.slane %v12101_v25, 4 }
0x1ed8   :  { %v20532_v41 = vsel %vm11562_vm1, %v11723_v36, %v11744_v47  ;;  %v12079_v2 = vpop.permute.xlu0 %12078  ;;  %v11561_v21 = vrot.slane %v20456_v38, 6  ;;  %v12117_v3 = vadd.f32 %v12116_v30, %v12115_v7  ;;  %v11972_v14 = vpop.permute.xlu1 %11971 }
0x1ed9   :  { %v12099_v4 = vmul.f32 %v20351_v17, %v12079_v2  ;;  %v12145_v6 = vadd.f32 %v12144_v26, %v12101_v25  ;;  %v15102_v25 = vld [vmem:[%s20646_s20] ss:$0 sm:$0xff] }
0x1edc   :  { %v12086_v13 = vpop.permute.xlu0 %12085 }
0x1edd   :  { %v12100_v40 = vmul.f32 %v20361_v23, %v12086_v13 }
0x1edf   :  { %v12138_v45 = vrot.slane %v12100_v40, 4 }
0x1ee0   :  { %v11699_v12 = vpop.permute.xlu0 %11698 }
0x1ee1   :  { %v12139_v16 = vadd.f32 %v12138_v45, %v12100_v40 }
0x1ee3   :  { %v12140_v19 = vrot.slane %v12139_v16, 2 }
0x1ee4   :  { %v15055_v56 = vpop.eup %15054 }
0x1ee5   :  { %v12881_v42 = vmul.f32 0.6931472, %v15055_v56 }
0x1ee7   :  { %v12882_v32 = vadd.f32 %v12881_v42, %v20503_v31  ;;  %v11955_v31 = vmul.f32 %v11939_v51, %v20501_v18  ;;  %v12120_v18 = vrot.slane %v12097_v46, 4  ;;  %v12132_v51 = vrot.slane %v12099_v4, 4 }
0x1ee8   :  { %v12112_v42 = vrot.slane %v12111_v22, 1 }
0x1ee9   :  { %v12898_v27 = vadd.f32 %v12896_v24, %v12882_v32  ;;  %v12121_v52 = vadd.f32 %v12120_v18, %v12097_v46  ;;  %v12133_v58 = vadd.f32 %v12132_v51, %v12099_v4  ;;  %v12118_v32 = vrot.slane %v12117_v3, 1 }
0x1eea   :  { %v12113_v62 = vadd.f32 %v12112_v42, %v12111_v22 }
0x1eeb   :  { %v12903_v34 = vsel %vm12902_vm4, %v12898_v27, %v20447_v37  ;;  %v12098_v37 = vmul.f32 %v20471_v10, %v12072_v57  ;;  %v11558_v57 = vrot.slane %v20337_v5, 7  ;;  %v12122_v36 = vrot.slane %v12121_v52, 2 }
0x1eec   :  { %v20556_v35 = vadd.f32 %v20551_v63, %v12903_v34  ;;  %v12134_v28 = vrot.slane %v12133_v58, 2  ;;  %v12105_v5 = vadd.f32 %v12104_v43, %v12103_v53  ;;  %v12146_v27 = vrot.slane %v12145_v6, 2 }
0x1eed   :  { %v12126_v29 = vrot.slane %v12098_v37, 4  ;;  %v11560_v15 = vsel %vm21257_vm0, %v11558_v57, %v20444_v9  ;;  %v12123_v50 = vadd.f32 %v12122_v36, %v12121_v52  ;;  %v12141_v9 = vadd.f32 %v12140_v19, %v12139_v16 }
0x1eee   :  { %12905 = vmax.xlane.f32.xlu1 %v20556_v35  ;;  %v11563_v60 = vsel %vm11562_vm1, %v11561_v21, %v11560_v15  ;;  %v12135_v38 = vadd.f32 %v12134_v28, %v12133_v58  ;;  %v12106_v24 = vrot.slane %v12105_v5, 1  ;;  %v12119_v46 = vadd.f32 %v12118_v32, %v12117_v3  ;;  %v11966_v58 = vpop.permute.xlu0 %11965 }
0x1eef   :  { %v12127_v49 = vadd.f32 %v12126_v29, %v12098_v37  ;;  %v11566_v1 = vsel %vm11565_vm6, %v11564_v11, %v11563_v60  ;;  %v12124_v34 = vrot.slane %v12123_v50, 1  ;;  %v12142_v13 = vrot.slane %v12141_v9, 1 }
0x1ef0   :  { %v12136_v61 = vrot.slane %v12135_v38, 1  ;;  %v12107_v37 = vadd.f32 %v12106_v24, %v12105_v5  ;;  %v12147_v48 = vadd.f32 %v12146_v27, %v12145_v6  ;;  %v11999_v19 = vrot.slane %v11972_v14, %v20525_v59 }
0x1ef1   :  { %v12128_v47 = vrot.slane %v12127_v49, 2  ;;  %v12125_v4 = vadd.f32 %v12124_v34, %v12123_v50  ;;  %v12143_v18 = vadd.f32 %v12142_v13, %v12141_v9  ;;  %v11727_v5 = vrot.slane %v11699_v12, %v20525_v59 }
0x1ef2   :  { %v12164_v17 = vsel %vm21258_vm8, %v12113_v62, %v12107_v37  ;;  %v12137_v40 = vadd.f32 %v12136_v61, %v12135_v38  ;;  %v12148_v29 = vrot.slane %v12147_v48, 1  ;;  %v11969_v30 = vpop.permute.xlu0 %11968 }
0x1ef3   :  { %v12129_v56 = vadd.f32 %v12128_v47, %v12127_v49  ;;  %v12165_v39 = vsel %vm11562_vm1, %v12119_v46, %v12164_v17  ;;  %v11995_v22 = vrot.slane %v11969_v30, %v20525_v59 }
0x1ef4   :  { %v12166_v44 = vsel %vm11565_vm6, %v12125_v4, %v12165_v39  ;;  %v12149_v53 = vadd.f32 %v12148_v29, %v12147_v48 }
0x1ef5   :  { %v12130_v2 = vrot.slane %v12129_v56, 1 }
0x1ef6   :  { %v11702_v43 = vpop.permute.xlu0 %11701 }
0x1ef7   :  { %v12131_v0 = vadd.f32 %v12130_v2, %v12129_v56  ;;  %v11731_v50 = vrot.slane %v11702_v43, %v20525_v59 }
0x1ef9   :  { %v12167_v23 = vsel %vm11568_vm3, %v12131_v0, %v12166_v44 }
0x1efa   :  { %v12168_v7 = vsel %vm11571_vm7, %v12137_v40, %v12167_v23  ;;  %v11705_v36 = vpop.permute.xlu0 %11704 }
0x1efb   :  { %v12169_v45 = vsel %vm11574_vm9, %v12143_v18, %v12168_v7  ;;  %v11735_v60 = vrot.slane %v11705_v36, %v20525_v59 }
0x1efc   :  { %v12170_v49 = vsel %vm11577_vm2, %v12149_v53, %v12169_v45 }
0x1efd   :  { %v12172_v57 = vmul.f32 %v20551_v63, %v12170_v49  ;;  %v11991_v63 = vrot.slane %v11966_v58, %v20525_v59 }
0x1efe   :  { %v11708_v15 = vpop.permute.xlu0 %11707 }
0x1eff   :  { %11986 = vperm.xlu1 %14834, %v11955_v31   ;;  %v11569_v31 = vsel %vm11568_vm3, %v11567_v54, %v11566_v1  ;;  %v12020_v28 = vsel %vm21259_vm14, %v11995_v22, %v11991_v63  ;;  %v11739_v56 = vrot.slane %v11708_v15, %v20525_v59  ;;  %v11746_v1 = vsel %vm11565_vm6, %v11727_v5, %v20532_v41 }
0x1f00   :  { %v11572_v10 = vsel %vm11571_vm7, %v11570_v55, %v11569_v31  ;;  %v12021_v6 = vsel %vm11562_vm1, %v11999_v19, %v12020_v28  ;;  %v11747_v9 = vsel %vm11568_vm3, %v11731_v50, %v11746_v1  ;;  %vm21260_vm1 = vcmask 64512  }
0x1f01   :  { %v11575_v8 = vsel %vm11574_vm9, %v11573_v33, %v11572_v10  ;;  %v11748_v24 = vsel %vm11571_vm7, %v11735_v60, %v11747_v9 }
0x1f02   :  { %v11578_v51 = vsel %vm11577_vm2, %v11576_v20, %v11575_v8  ;;  %v11975_v20 = vpop.permute.xlu1 %11974  ;;  %v11711_v3 = vpop.permute.xlu0 %11710  ;;  %v11749_v2 = vsel %vm11574_vm9, %v11739_v56, %v11748_v24 }
0x1f03   :  { %v11580_v52 = vmul.f32 %v15102_v25, %v11578_v51  ;;  %v11743_v38 = vrot.slane %v11711_v3, %v20525_v59 }
0x1f05   :  { %v11750_v61 = vsel %vm11577_vm2, %v11743_v38, %v11749_v2 }
0x1f06   :  { %v11978_v16 = vpop.permute.xlu1 %11977  ;;  %v11984_v54 = vpop.permute.xlu0 %11983  ;;  %v11752_v46 = vsel %vm21260_vm1, %v11750_v61, 0.0 }
0x1f07   :  { %v12007_v32 = vrot.slane %v11978_v16, %v20525_v59  ;;  %v12015_v34 = vrot.slane %v11984_v54, %v20525_v59 }
0x1f0a   :  { %v11981_v26 = vpop.permute.xlu1 %11980 }
0x1f0b   :  { %v12011_v41 = vrot.slane %v11981_v26, %v20525_v59 }
0x1f23   :  { %11581 = vadd.xlane.f32.xlu1 %v11580_v52 }
0x1f27   :  { %12173 = vadd.xlane.f32.xlu1 %v12172_v57 }
0x1f77   :  { %v12906_v21 = vpop.xlane.xlu1 %12905 }
0x1f78   :  { %v12907_v47 = vsub.f32 %v20556_v35, %v12906_v21  ;;  %v12003_v35 = vrot.slane %v11975_v20, %v20525_v59 }
0x1f7a   :  { %v12908_v11 = vmul.f32 1.442695, %v12907_v47  ;;  %v12022_v42 = vsel %vm11565_vm6, %v12003_v35, %v12021_v6 }
0x1f7b   :  { %v11987_v55 = vpop.permute.xlu1 %11986  ;;  %v12023_v31 = vsel %vm11568_vm3, %v12007_v32, %v12022_v42 }
0x1f7c   :  { %15056 = vpow2.f32 %v12908_v11  ;;  %v12019_v62 = vrot.slane %v11987_v55, %v20525_v59  ;;  %v12024_v33 = vsel %vm11571_vm7, %v12011_v41, %v12023_v31 }
0x1f7d   :  { %v12025_v13 = vsel %vm11574_vm9, %v12015_v34, %v12024_v33 }
0x1f7e   :  { %v12026_v37 = vsel %vm11577_vm2, %v12019_v62, %v12025_v13 }
0x1f7f   :  { %v12029_v48 = vsel %vm12028_vm10, %v12026_v37, 0.0 }
0x1f89   :  { %v15057_v27 = vpop.eup %15056 }
0x1f8a   :  { %12910 = vadd.xlane.f32.xlu0 %v15057_v27 }
0x1f8e   :  { %11753 = vadd.xlane.f32.xlu0 %v11752_v46 }
0x1f92   :  { %12030 = vadd.xlane.f32.xlu0 %v12029_v48 }
0x1fac   :  { %v11582_v0 = vpop.xlane.xlu1 %11581 }
0x1fb0   :  { %v12174_v8 = vpop.xlane.xlu1 %12173 }
0x2013   :  { %v12911_v4 = vpop.xlane.xlu0 %12910 }
0x2014   :  { %15058 = vlog2.f32 %v12911_v4 }
0x2017   :  { %v11754_v10 = vpop.xlane.xlu0 %11753 }
0x2018   :  { %v12175_v17 = vadd.f32 %v11754_v10, %v11582_v0 }
0x201b   :  { %v12031_v59 = vpop.xlane.xlu0 %12030 }
0x201c   :  { %v12176_v40 = vadd.f32 %v12175_v17, %v12031_v59 }
0x201e   :  { %v12177_v44 = vadd.f32 %v12176_v40, %v12174_v8 }
0x2021   :  { %v15059_v39 = vpop.eup %15058 }
0x2022   :  { %v12913_v18 = vmul.f32 0.6931472, %v15059_v39 }
0x2024   :  { %v12914_v29 = vadd.f32 %v12913_v18, %v12906_v21 }
0x2026   :  { %v12915_v23 = vsub.f32 %v12177_v44, %v12914_v29 }
0x2028   :  { %12916 = vst [vmem:[%s20649_s22] sm:$0xff] %v12915_v23 }

</bundles_post_ra>
